<compile_context>
chip_gen: v7x
topology: tpu7x:2x2x1
jax: 0.10.0
libtpu: 0.0.40
codegen_flags: <defaults>
</compile_context>

<pallas_src>
import math
import re

import jax
import jax.numpy as jnp
from jax.experimental import pallas as pl
from jax.experimental.pallas import tpu as pltpu


NUM_LAYERS = 9        # 5 (mapping) + 4 (embedder)
HIDDEN_CHUNK = 256    # blocking of the 1024-wide hidden dim (layers 5 & 6)


def _tpu_generation():
    """Best-effort TPU generation (5, 6, 7, ...). 0 if unknown."""
    try:
        kind = jax.devices()[0].device_kind.lower()
    except Exception:
        return 0
    m = re.search(r"(\d+)", kind)
    return int(m.group(1)) if m else 0


def make_mapnet_kernel(bf16_epilogue, block_hidden):
    """Build the fused forward kernel.

    refs = (w0..w8, b0..b8, out_ref).  ReLU after layers 0..7 (incl. the F.relu on the
    mapping output); the final embedder layer (index 8) has no activation.
    """

    def epilogue(acc_f32, bias, *, last):
        if last:
            # Final layer: f32 bias-add, f32 output (numerics anchor).
            return acc_f32 + bias.astype(jnp.float32)
        if bf16_epilogue:
            # bf16 VPU path (v6e/v7x): bias stored bf16, ReLU in bf16, bf16 activation
            # feeds the next MXU matmul directly.
            h = acc_f32.astype(jnp.bfloat16) + bias
            return jnp.maximum(h, 0.0)
        # f32 VPU path (v5e): bias-add / ReLU in f32, cast once for the next matmul.
        h = jnp.maximum(acc_f32 + bias, 0.0)
        return h.astype(jnp.bfloat16)

    def kernel(x_ref, *refs):
        ws = refs[:NUM_LAYERS]
        bs = refs[NUM_LAYERS:2 * NUM_LAYERS]
        o_ref = refs[2 * NUM_LAYERS]

        h = x_ref[...]                      # bf16 activations straight into the MXU
        i = 0
        while i < NUM_LAYERS:
            if block_hidden and i == 5:
                # Fuse layers 5 (Fin->1024) and 6 (1024->512), blocked over the 1024
                # hidden dim so the (TB,1024) intermediate never materializes in VMEM.
                w5, b5, w6, b6 = ws[5], bs[5], ws[6], bs[6]
                k_hidden = w5.shape[1]      # 1024
                acc = jnp.zeros((h.shape[0], w6.shape[1]), jnp.float32)
                for c in range(0, k_hidden, HIDDEN_CHUNK):
                    s5 = jnp.dot(h, w5[:, c:c + HIDDEN_CHUNK],
                                 preferred_element_type=jnp.float32)
                    h5 = epilogue(s5, b5[:, c:c + HIDDEN_CHUNK], last=False)
                    acc = acc + jnp.dot(h5, w6[c:c + HIDDEN_CHUNK, :],
                                        preferred_element_type=jnp.float32)
                h = epilogue(acc, b6[...], last=False)
                i = 7
            else:
                acc = jnp.dot(h, ws[i][...], preferred_element_type=jnp.float32)
                h = epilogue(acc, bs[i][...], last=(i == NUM_LAYERS - 1))
                i += 1
        o_ref[...] = h.astype(o_ref.dtype)

    return kernel


def init_mapnet_params(key, feature_dim, output_dim):
    """Deterministic f32 init mimicking PyTorch nn.Linear (U(-1/sqrt(in), 1/sqrt(in))).

    Weights stored transposed, i.e. (in_features, out_features), so each layer is
    y = x @ W + b.
    """
    layer_dims = (
        [(feature_dim, feature_dim)] * 5                    # mapping
        + [(feature_dim, 1024), (1024, 512), (512, 128),    # embedder
           (128, output_dim)]
    )
    weights, biases = [], []
    for (fan_in, fan_out) in layer_dims:
        key, kw, kb = jax.random.split(key, 3)
        bound = 1.0 / math.sqrt(fan_in)
        weights.append(jax.random.uniform(kw, (fan_in, fan_out), jnp.float32, -bound, bound))
        biases.append(jax.random.uniform(kb, (1, fan_out), jnp.float32, -bound, bound))
    return weights, biases


def pack_params(weights, biases, output_dim, *, bf16_epilogue):
    """One-time conversion: bf16 weights; biases 0..7 bf16 iff bf16_epilogue, layer 8
    always f32.  Final layer zero-padded to a multiple of 128 output lanes so the
    kernel's output store is lane-dense."""
    out_pad = max(128, ((output_dim + 127) // 128) * 128)
    w_last, b_last = weights[-1], biases[-1]
    if out_pad != output_dim:
        w_last = jnp.pad(w_last, ((0, 0), (0, out_pad - output_dim)))
        b_last = jnp.pad(b_last, ((0, 0), (0, out_pad - output_dim)))
    w_packed = [w.astype(jnp.bfloat16) for w in weights[:-1]] + [w_last.astype(jnp.bfloat16)]
    hid_dtype = jnp.bfloat16 if bf16_epilogue else jnp.float32
    b_packed = [b.astype(hid_dtype) for b in biases[:-1]] + [b_last.astype(jnp.float32)]
    return w_packed, b_packed, out_pad


def _choose_tb(batch, gen, block_b):
    if block_b is not None:
        return max(8, block_b)
    tiles = pl.cdiv(batch, 128)              # number of 128-row tiles
    if gen >= 7:
        # v7x: 2 TCs/chip -> cap TB so the grid keeps >= 2 steps when batch allows.
        tb = min(512, 128 * max(1, pl.cdiv(tiles, 2)))
    elif gen == 6:
        tb = min(512, 128 * tiles)
    else:
        # v5e (and unknown): MXU-bound, TB=128-256 already amortizes step overhead.
        tb = min(256, 128 * tiles)
    return max(128, tb)


def mapnet_forward(x, weights_bf16, biases, output_dim, *, block_b=None):
    """Run MapNet on a (B, feature_dim) batch. Returns (B, output_dim) f32."""
    B, Fin = x.shape
    out_pad = biases[-1].shape[1]
    bf16_epilogue = biases[0].dtype == jnp.bfloat16
    block_hidden = bf16_epilogue            # hidden-dim blocking only on v6e/v7x path
    gen = _tpu_generation()

    TB = _choose_tb(B, gen, block_b)
    nb = pl.cdiv(B, TB)
    B_pad = nb * TB

    x = x.astype(jnp.bfloat16)              # halve activation DMA; MXU wants bf16 anyway
    if B_pad != B:
        x = jnp.pad(x, ((0, B_pad - B), (0, 0)))

    x_spec = pl.BlockSpec((TB, Fin), lambda i: (i, 0))
    # Constant index_map -> weights/biases stay resident in VMEM across grid steps.
    w_specs = [pl.BlockSpec(w.shape, lambda i: (0, 0)) for w in weights_bf16]
    b_specs = [pl.BlockSpec(b.shape, lambda i: (0, 0)) for b in biases]
    out_spec = pl.BlockSpec((TB, out_pad), lambda i: (i, 0))
    out_shape = jax.ShapeDtypeStruct((B_pad, out_pad), jnp.float32)

    flops = 2 * B_pad * sum(w.shape[0] * w.shape[1] for w in weights_bf16)
    bytes_weights = sum(w.size * w.dtype.itemsize for w in weights_bf16) \
        + sum(b.size * b.dtype.itemsize for b in biases)
    bytes_io = B_pad * (Fin * 2 + out_pad * 4)
    cost = pl.CostEstimate(flops=flops, transcendentals=0,
                           bytes_accessed=bytes_weights + bytes_io)

    fn = pl.pallas_call(
        make_mapnet_kernel(bf16_epilogue, block_hidden),
        out_shape=out_shape,
        grid=(nb,),
        in_specs=[x_spec] + w_specs + b_specs,
        out_specs=out_spec,
        compiler_params=pltpu.CompilerParams(
            dimension_semantics=("parallel",),   # megacore-shard batch tiles on v7x
            vmem_limit_bytes=32 << 20,           # footprint < 10 MiB; fits all gens
        ),
        cost_estimate=cost,
    )
    out = fn(x, *weights_bf16, *biases)
    return out[:B, :output_dim]


def mapnet_reference(x, weights_bf16, biases, output_dim):
    """Plain-JAX reference mirroring the kernel's dtype path (bf16 matmul inputs,
    f32 accumulation, bf16 or f32 epilogue matching the packed bias dtype)."""
    bf16_epilogue = biases[0].dtype == jnp.bfloat16
    h = x.astype(jnp.bfloat16)
    for i, (w, b) in enumerate(zip(weights_bf16, biases)):
        acc = jnp.dot(h, w, preferred_element_type=jnp.float32)
        if i == NUM_LAYERS - 1:
            h = acc + b.astype(jnp.float32)
        elif bf16_epilogue:
            h = jnp.maximum(acc.astype(jnp.bfloat16) + b, 0.0)
        else:
            h = jnp.maximum(acc + b, 0.0).astype(jnp.bfloat16)
    return h[:, :output_dim].astype(jnp.float32)


if __name__ == "__main__":
    feature_dim = 256
    output_dim = 64
    batch = 256

    key = jax.random.PRNGKey(0)
    key, kx = jax.random.split(key)
    x = jax.random.normal(kx, (batch, feature_dim), jnp.float32)

    bf16_epilogue = _tpu_generation() >= 6   # bf16 VPU on v6e/v7x; f32 epilogue on v5e
    weights_f32, biases_raw = init_mapnet_params(key, feature_dim, output_dim)
    weights_bf16, biases_packed, _ = pack_params(
        weights_f32, biases_raw, output_dim, bf16_epilogue=bf16_epilogue)

    out = mapnet_forward(x, weights_bf16, biases_packed, output_dim)
    out = jax.block_until_ready(out)

    ref = mapnet_reference(x, weights_bf16, biases_packed, output_dim)
    assert out.shape == (batch, output_dim), out.shape
    assert jnp.allclose(out, ref, atol=2e-2, rtol=2e-2), "mismatch vs reference"

    print("KERNEL_OK")
</pallas_src>

<mosaic_0001>
module attributes {stable_mosaic.version = 11 : i64} {
  func.func @kernel(%arg0: i32, %arg1: memref<256x256xbf16, #tpu.memory_space<vmem>>, %arg2: memref<256x256xbf16, #tpu.memory_space<vmem>>, %arg3: memref<256x256xbf16, #tpu.memory_space<vmem>>, %arg4: memref<256x256xbf16, #tpu.memory_space<vmem>>, %arg5: memref<256x256xbf16, #tpu.memory_space<vmem>>, %arg6: memref<256x256xbf16, #tpu.memory_space<vmem>>, %arg7: memref<256x1024xbf16, #tpu.memory_space<vmem>>, %arg8: memref<1024x512xbf16, #tpu.memory_space<vmem>>, %arg9: memref<512x128xbf16, #tpu.memory_space<vmem>>, %arg10: memref<128x128xbf16, #tpu.memory_space<vmem>>, %arg11: memref<1x256xf32, #tpu.memory_space<vmem>>, %arg12: memref<1x256xf32, #tpu.memory_space<vmem>>, %arg13: memref<1x256xf32, #tpu.memory_space<vmem>>, %arg14: memref<1x256xf32, #tpu.memory_space<vmem>>, %arg15: memref<1x256xf32, #tpu.memory_space<vmem>>, %arg16: memref<1x1024xf32, #tpu.memory_space<vmem>>, %arg17: memref<1x512xf32, #tpu.memory_space<vmem>>, %arg18: memref<1x128xf32, #tpu.memory_space<vmem>>, %arg19: memref<1x128xf32, #tpu.memory_space<vmem>>, %arg20: memref<256x128xf32, #tpu.memory_space<vmem>>) attributes {dimension_semantics = [#tpu.dimension_semantics<parallel>], iteration_bounds = array<i64: 1>, scalar_prefetch = 0 : i64, scratch_operands = 0 : i64, tpu.core_type = #tpu.core_type<tc>, window_params = [{transform_indices = @transform_0, window_bounds = array<i64: 256, 256>}, {pipeline_mode = #tpu.pipeline_mode<synchronous>, transform_indices = @transform_1, window_bounds = array<i64: 256, 256>}, {pipeline_mode = #tpu.pipeline_mode<synchronous>, transform_indices = @transform_2, window_bounds = array<i64: 256, 256>}, {pipeline_mode = #tpu.pipeline_mode<synchronous>, transform_indices = @transform_3, window_bounds = array<i64: 256, 256>}, {pipeline_mode = #tpu.pipeline_mode<synchronous>, transform_indices = @transform_4, window_bounds = array<i64: 256, 256>}, {pipeline_mode = #tpu.pipeline_mode<synchronous>, transform_indices = @transform_5, window_bounds = array<i64: 256, 256>}, {pipeline_mode = #tpu.pipeline_mode<synchronous>, transform_indices = @transform_6, window_bounds = array<i64: 256, 1024>}, {pipeline_mode = #tpu.pipeline_mode<synchronous>, transform_indices = @transform_7, window_bounds = array<i64: 1024, 512>}, {pipeline_mode = #tpu.pipeline_mode<synchronous>, transform_indices = @transform_8, window_bounds = array<i64: 512, 128>}, {pipeline_mode = #tpu.pipeline_mode<synchronous>, transform_indices = @transform_9, window_bounds = array<i64: 128, 128>}, {pipeline_mode = #tpu.pipeline_mode<synchronous>, transform_indices = @transform_10, window_bounds = array<i64: 1, 256>}, {pipeline_mode = #tpu.pipeline_mode<synchronous>, transform_indices = @transform_11, window_bounds = array<i64: 1, 256>}, {pipeline_mode = #tpu.pipeline_mode<synchronous>, transform_indices = @transform_12, window_bounds = array<i64: 1, 256>}, {pipeline_mode = #tpu.pipeline_mode<synchronous>, transform_indices = @transform_13, window_bounds = array<i64: 1, 256>}, {pipeline_mode = #tpu.pipeline_mode<synchronous>, transform_indices = @transform_14, window_bounds = array<i64: 1, 256>}, {pipeline_mode = #tpu.pipeline_mode<synchronous>, transform_indices = @transform_15, window_bounds = array<i64: 1, 1024>}, {pipeline_mode = #tpu.pipeline_mode<synchronous>, transform_indices = @transform_16, window_bounds = array<i64: 1, 512>}, {pipeline_mode = #tpu.pipeline_mode<synchronous>, transform_indices = @transform_17, window_bounds = array<i64: 1, 128>}, {pipeline_mode = #tpu.pipeline_mode<synchronous>, transform_indices = @transform_18, window_bounds = array<i64: 1, 128>}, {transform_indices = @transform_19, window_bounds = array<i64: 256, 128>}]} {
    %c0 = arith.constant 0 : index
    %c0_0 = arith.constant 0 : index
    %0 = vector.load %arg1[%c0, %c0_0] : memref<256x256xbf16, #tpu.memory_space<vmem>>, vector<256x256xbf16>
    %c0_1 = arith.constant 0 : index
    %c0_2 = arith.constant 0 : index
    %1 = vector.load %arg2[%c0_1, %c0_2] : memref<256x256xbf16, #tpu.memory_space<vmem>>, vector<256x256xbf16>
    %cst = arith.constant dense<0.000000e+00> : vector<256x256xf32>
    %2 = tpu.matmul %0, %1, %cst {dimension_numbers = #tpu.dot_dimension_numbers<[1], [0], [0], [1], [0, 0, 1, 1], [], []>} : vector<256x256xbf16>, vector<256x256xbf16>, vector<256x256xf32> -> vector<256x256xf32>
    %c0_3 = arith.constant 0 : index
    %c0_4 = arith.constant 0 : index
    %3 = vector.load %arg11[%c0_3, %c0_4] : memref<1x256xf32, #tpu.memory_space<vmem>>, vector<1x256xf32>
    %4 = vector.broadcast %3 : vector<1x256xf32> to vector<256x256xf32>
    %5 = arith.addf %2, %4 : vector<256x256xf32>
    %cst_5 = arith.constant 0.000000e+00 : f32
    %6 = vector.broadcast %cst_5 : f32 to vector<256x256xf32>
    %7 = arith.maximumf %5, %6 : vector<256x256xf32>
    %8 = arith.truncf %7 : vector<256x256xf32> to vector<256x256xbf16>
    %c0_6 = arith.constant 0 : index
    %c0_7 = arith.constant 0 : index
    %9 = vector.load %arg3[%c0_6, %c0_7] : memref<256x256xbf16, #tpu.memory_space<vmem>>, vector<256x256xbf16>
    %cst_8 = arith.constant dense<0.000000e+00> : vector<256x256xf32>
    %10 = tpu.matmul %8, %9, %cst_8 {dimension_numbers = #tpu.dot_dimension_numbers<[1], [0], [0], [1], [0, 0, 1, 1], [], []>} : vector<256x256xbf16>, vector<256x256xbf16>, vector<256x256xf32> -> vector<256x256xf32>
    %c0_9 = arith.constant 0 : index
    %c0_10 = arith.constant 0 : index
    %11 = vector.load %arg12[%c0_9, %c0_10] : memref<1x256xf32, #tpu.memory_space<vmem>>, vector<1x256xf32>
    %12 = vector.broadcast %11 : vector<1x256xf32> to vector<256x256xf32>
    %13 = arith.addf %10, %12 : vector<256x256xf32>
    %cst_11 = arith.constant 0.000000e+00 : f32
    %14 = vector.broadcast %cst_11 : f32 to vector<256x256xf32>
    %15 = arith.maximumf %13, %14 : vector<256x256xf32>
    %16 = arith.truncf %15 : vector<256x256xf32> to vector<256x256xbf16>
    %c0_12 = arith.constant 0 : index
    %c0_13 = arith.constant 0 : index
    %17 = vector.load %arg4[%c0_12, %c0_13] : memref<256x256xbf16, #tpu.memory_space<vmem>>, vector<256x256xbf16>
    %cst_14 = arith.constant dense<0.000000e+00> : vector<256x256xf32>
    %18 = tpu.matmul %16, %17, %cst_14 {dimension_numbers = #tpu.dot_dimension_numbers<[1], [0], [0], [1], [0, 0, 1, 1], [], []>} : vector<256x256xbf16>, vector<256x256xbf16>, vector<256x256xf32> -> vector<256x256xf32>
    %c0_15 = arith.constant 0 : index
    %c0_16 = arith.constant 0 : index
    %19 = vector.load %arg13[%c0_15, %c0_16] : memref<1x256xf32, #tpu.memory_space<vmem>>, vector<1x256xf32>
    %20 = vector.broadcast %19 : vector<1x256xf32> to vector<256x256xf32>
    %21 = arith.addf %18, %20 : vector<256x256xf32>
    %cst_17 = arith.constant 0.000000e+00 : f32
    %22 = vector.broadcast %cst_17 : f32 to vector<256x256xf32>
    %23 = arith.maximumf %21, %22 : vector<256x256xf32>
    %24 = arith.truncf %23 : vector<256x256xf32> to vector<256x256xbf16>
    %c0_18 = arith.constant 0 : index
    %c0_19 = arith.constant 0 : index
    %25 = vector.load %arg5[%c0_18, %c0_19] : memref<256x256xbf16, #tpu.memory_space<vmem>>, vector<256x256xbf16>
    %cst_20 = arith.constant dense<0.000000e+00> : vector<256x256xf32>
    %26 = tpu.matmul %24, %25, %cst_20 {dimension_numbers = #tpu.dot_dimension_numbers<[1], [0], [0], [1], [0, 0, 1, 1], [], []>} : vector<256x256xbf16>, vector<256x256xbf16>, vector<256x256xf32> -> vector<256x256xf32>
    %c0_21 = arith.constant 0 : index
    %c0_22 = arith.constant 0 : index
    %27 = vector.load %arg14[%c0_21, %c0_22] : memref<1x256xf32, #tpu.memory_space<vmem>>, vector<1x256xf32>
    %28 = vector.broadcast %27 : vector<1x256xf32> to vector<256x256xf32>
    %29 = arith.addf %26, %28 : vector<256x256xf32>
    %cst_23 = arith.constant 0.000000e+00 : f32
    %30 = vector.broadcast %cst_23 : f32 to vector<256x256xf32>
    %31 = arith.maximumf %29, %30 : vector<256x256xf32>
    %32 = arith.truncf %31 : vector<256x256xf32> to vector<256x256xbf16>
    %c0_24 = arith.constant 0 : index
    %c0_25 = arith.constant 0 : index
    %33 = vector.load %arg6[%c0_24, %c0_25] : memref<256x256xbf16, #tpu.memory_space<vmem>>, vector<256x256xbf16>
    %cst_26 = arith.constant dense<0.000000e+00> : vector<256x256xf32>
    %34 = tpu.matmul %32, %33, %cst_26 {dimension_numbers = #tpu.dot_dimension_numbers<[1], [0], [0], [1], [0, 0, 1, 1], [], []>} : vector<256x256xbf16>, vector<256x256xbf16>, vector<256x256xf32> -> vector<256x256xf32>
    %c0_27 = arith.constant 0 : index
    %c0_28 = arith.constant 0 : index
    %35 = vector.load %arg15[%c0_27, %c0_28] : memref<1x256xf32, #tpu.memory_space<vmem>>, vector<1x256xf32>
    %36 = vector.broadcast %35 : vector<1x256xf32> to vector<256x256xf32>
    %37 = arith.addf %34, %36 : vector<256x256xf32>
    %cst_29 = arith.constant 0.000000e+00 : f32
    %38 = vector.broadcast %cst_29 : f32 to vector<256x256xf32>
    %39 = arith.maximumf %37, %38 : vector<256x256xf32>
    %40 = arith.truncf %39 : vector<256x256xf32> to vector<256x256xbf16>
    %c0_30 = arith.constant 0 : index
    %c0_31 = arith.constant 0 : index
    %41 = vector.load %arg7[%c0_30, %c0_31] : memref<256x1024xbf16, #tpu.memory_space<vmem>>, vector<256x1024xbf16>
    %cst_32 = arith.constant dense<0.000000e+00> : vector<256x1024xf32>
    %42 = tpu.matmul %40, %41, %cst_32 {dimension_numbers = #tpu.dot_dimension_numbers<[1], [0], [0], [1], [0, 0, 1, 1], [], []>} : vector<256x256xbf16>, vector<256x1024xbf16>, vector<256x1024xf32> -> vector<256x1024xf32>
    %c0_33 = arith.constant 0 : index
    %c0_34 = arith.constant 0 : index
    %43 = vector.load %arg16[%c0_33, %c0_34] : memref<1x1024xf32, #tpu.memory_space<vmem>>, vector<1x1024xf32>
    %44 = vector.broadcast %43 : vector<1x1024xf32> to vector<256x1024xf32>
    %45 = arith.addf %42, %44 : vector<256x1024xf32>
    %cst_35 = arith.constant 0.000000e+00 : f32
    %46 = vector.broadcast %cst_35 : f32 to vector<256x1024xf32>
    %47 = arith.maximumf %45, %46 : vector<256x1024xf32>
    %48 = arith.truncf %47 : vector<256x1024xf32> to vector<256x1024xbf16>
    %c0_36 = arith.constant 0 : index
    %c0_37 = arith.constant 0 : index
    %49 = vector.load %arg8[%c0_36, %c0_37] : memref<1024x512xbf16, #tpu.memory_space<vmem>>, vector<1024x512xbf16>
    %cst_38 = arith.constant dense<0.000000e+00> : vector<256x512xf32>
    %50 = tpu.matmul %48, %49, %cst_38 {dimension_numbers = #tpu.dot_dimension_numbers<[1], [0], [0], [1], [0, 0, 1, 1], [], []>} : vector<256x1024xbf16>, vector<1024x512xbf16>, vector<256x512xf32> -> vector<256x512xf32>
    %c0_39 = arith.constant 0 : index
    %c0_40 = arith.constant 0 : index
    %51 = vector.load %arg17[%c0_39, %c0_40] : memref<1x512xf32, #tpu.memory_space<vmem>>, vector<1x512xf32>
    %52 = vector.broadcast %51 : vector<1x512xf32> to vector<256x512xf32>
    %53 = arith.addf %50, %52 : vector<256x512xf32>
    %cst_41 = arith.constant 0.000000e+00 : f32
    %54 = vector.broadcast %cst_41 : f32 to vector<256x512xf32>
    %55 = arith.maximumf %53, %54 : vector<256x512xf32>
    %56 = arith.truncf %55 : vector<256x512xf32> to vector<256x512xbf16>
    %c0_42 = arith.constant 0 : index
    %c0_43 = arith.constant 0 : index
    %57 = vector.load %arg9[%c0_42, %c0_43] : memref<512x128xbf16, #tpu.memory_space<vmem>>, vector<512x128xbf16>
    %cst_44 = arith.constant dense<0.000000e+00> : vector<256x128xf32>
    %58 = tpu.matmul %56, %57, %cst_44 {dimension_numbers = #tpu.dot_dimension_numbers<[1], [0], [0], [1], [0, 0, 1, 1], [], []>} : vector<256x512xbf16>, vector<512x128xbf16>, vector<256x128xf32> -> vector<256x128xf32>
    %c0_45 = arith.constant 0 : index
    %c0_46 = arith.constant 0 : index
    %59 = vector.load %arg18[%c0_45, %c0_46] : memref<1x128xf32, #tpu.memory_space<vmem>>, vector<1x128xf32>
    %60 = vector.broadcast %59 : vector<1x128xf32> to vector<256x128xf32>
    %61 = arith.addf %58, %60 : vector<256x128xf32>
    %cst_47 = arith.constant 0.000000e+00 : f32
    %62 = vector.broadcast %cst_47 : f32 to vector<256x128xf32>
    %63 = arith.maximumf %61, %62 : vector<256x128xf32>
    %64 = arith.truncf %63 : vector<256x128xf32> to vector<256x128xbf16>
    %c0_48 = arith.constant 0 : index
    %c0_49 = arith.constant 0 : index
    %65 = vector.load %arg10[%c0_48, %c0_49] : memref<128x128xbf16, #tpu.memory_space<vmem>>, vector<128x128xbf16>
    %cst_50 = arith.constant dense<0.000000e+00> : vector<256x128xf32>
    %66 = tpu.matmul %64, %65, %cst_50 {dimension_numbers = #tpu.dot_dimension_numbers<[1], [0], [0], [1], [0, 0, 1, 1], [], []>} : vector<256x128xbf16>, vector<128x128xbf16>, vector<256x128xf32> -> vector<256x128xf32>
    %c0_51 = arith.constant 0 : index
    %c0_52 = arith.constant 0 : index
    %67 = vector.load %arg19[%c0_51, %c0_52] : memref<1x128xf32, #tpu.memory_space<vmem>>, vector<1x128xf32>
    %68 = vector.broadcast %67 : vector<1x128xf32> to vector<256x128xf32>
    %69 = arith.addf %66, %68 : vector<256x128xf32>
    %c0_53 = arith.constant 0 : index
    %c0_54 = arith.constant 0 : index
    %70 = vector.load %arg20[%c0_53, %c0_54] : memref<256x128xf32, #tpu.memory_space<vmem>>, vector<256x128xf32>
    tpu.vector_store %arg20[%c0_53, %c0_54], %69 {strides = array<i32>} : memref<256x128xf32, #tpu.memory_space<vmem>>, vector<256x128xf32>,
    return
  }
  func.func @transform_0(%arg0: i32) -> (i32, i32) {
    %c0_i32 = arith.constant 0 : i32
    %c0_i32_0 = arith.constant 0 : i32
    return %arg0, %c0_i32 : i32, i32
  }
  func.func @transform_1(%arg0: i32) -> (i32, i32) {
    %c0_i32 = arith.constant 0 : i32
    %c0_i32_0 = arith.constant 0 : i32
    %c0_i32_1 = arith.constant 0 : i32
    return %c0_i32, %c0_i32_0 : i32, i32
  }
  func.func @transform_2(%arg0: i32) -> (i32, i32) {
    %c0_i32 = arith.constant 0 : i32
    %c0_i32_0 = arith.constant 0 : i32
    %c0_i32_1 = arith.constant 0 : i32
    return %c0_i32, %c0_i32_0 : i32, i32
  }
  func.func @transform_3(%arg0: i32) -> (i32, i32) {
    %c0_i32 = arith.constant 0 : i32
    %c0_i32_0 = arith.constant 0 : i32
    %c0_i32_1 = arith.constant 0 : i32
    return %c0_i32, %c0_i32_0 : i32, i32
  }
  func.func @transform_4(%arg0: i32) -> (i32, i32) {
    %c0_i32 = arith.constant 0 : i32
    %c0_i32_0 = arith.constant 0 : i32
    %c0_i32_1 = arith.constant 0 : i32
    return %c0_i32, %c0_i32_0 : i32, i32
  }
  func.func @transform_5(%arg0: i32) -> (i32, i32) {
    %c0_i32 = arith.constant 0 : i32
    %c0_i32_0 = arith.constant 0 : i32
    %c0_i32_1 = arith.constant 0 : i32
    return %c0_i32, %c0_i32_0 : i32, i32
  }
  func.func @transform_6(%arg0: i32) -> (i32, i32) {
    %c0_i32 = arith.constant 0 : i32
    %c0_i32_0 = arith.constant 0 : i32
    %c0_i32_1 = arith.constant 0 : i32
    return %c0_i32, %c0_i32_0 : i32, i32
  }
  func.func @transform_7(%arg0: i32) -> (i32, i32) {
    %c0_i32 = arith.constant 0 : i32
    %c0_i32_0 = arith.constant 0 : i32
    %c0_i32_1 = arith.constant 0 : i32
    return %c0_i32, %c0_i32_0 : i32, i32
  }
  func.func @transform_8(%arg0: i32) -> (i32, i32) {
    %c0_i32 = arith.constant 0 : i32
    %c0_i32_0 = arith.constant 0 : i32
    %c0_i32_1 = arith.constant 0 : i32
    return %c0_i32, %c0_i32_0 : i32, i32
  }
  func.func @transform_9(%arg0: i32) -> (i32, i32) {
    %c0_i32 = arith.constant 0 : i32
    %c0_i32_0 = arith.constant 0 : i32
    %c0_i32_1 = arith.constant 0 : i32
    return %c0_i32, %c0_i32_0 : i32, i32
  }
  func.func @transform_10(%arg0: i32) -> (i32, i32) {
    %c0_i32 = arith.constant 0 : i32
    %c0_i32_0 = arith.constant 0 : i32
    %c0_i32_1 = arith.constant 0 : i32
    return %c0_i32, %c0_i32_0 : i32, i32
  }
  func.func @transform_11(%arg0: i32) -> (i32, i32) {
    %c0_i32 = arith.constant 0 : i32
    %c0_i32_0 = arith.constant 0 : i32
    %c0_i32_1 = arith.constant 0 : i32
    return %c0_i32, %c0_i32_0 : i32, i32
  }
  func.func @transform_12(%arg0: i32) -> (i32, i32) {
    %c0_i32 = arith.constant 0 : i32
    %c0_i32_0 = arith.constant 0 : i32
    %c0_i32_1 = arith.constant 0 : i32
    return %c0_i32, %c0_i32_0 : i32, i32
  }
  func.func @transform_13(%arg0: i32) -> (i32, i32) {
    %c0_i32 = arith.constant 0 : i32
    %c0_i32_0 = arith.constant 0 : i32
    %c0_i32_1 = arith.constant 0 : i32
    return %c0_i32, %c0_i32_0 : i32, i32
  }
  func.func @transform_14(%arg0: i32) -> (i32, i32) {
    %c0_i32 = arith.constant 0 : i32
    %c0_i32_0 = arith.constant 0 : i32
    %c0_i32_1 = arith.constant 0 : i32
    return %c0_i32, %c0_i32_0 : i32, i32
  }
  func.func @transform_15(%arg0: i32) -> (i32, i32) {
    %c0_i32 = arith.constant 0 : i32
    %c0_i32_0 = arith.constant 0 : i32
    %c0_i32_1 = arith.constant 0 : i32
    return %c0_i32, %c0_i32_0 : i32, i32
  }
  func.func @transform_16(%arg0: i32) -> (i32, i32) {
    %c0_i32 = arith.constant 0 : i32
    %c0_i32_0 = arith.constant 0 : i32
    %c0_i32_1 = arith.constant 0 : i32
    return %c0_i32, %c0_i32_0 : i32, i32
  }
  func.func @transform_17(%arg0: i32) -> (i32, i32) {
    %c0_i32 = arith.constant 0 : i32
    %c0_i32_0 = arith.constant 0 : i32
    %c0_i32_1 = arith.constant 0 : i32
    return %c0_i32, %c0_i32_0 : i32, i32
  }
  func.func @transform_18(%arg0: i32) -> (i32, i32) {
    %c0_i32 = arith.constant 0 : i32
    %c0_i32_0 = arith.constant 0 : i32
    %c0_i32_1 = arith.constant 0 : i32
    return %c0_i32, %c0_i32_0 : i32, i32
  }
  func.func @transform_19(%arg0: i32) -> (i32, i32) {
    %c0_i32 = arith.constant 0 : i32
    %c0_i32_0 = arith.constant 0 : i32
    return %arg0, %c0_i32 : i32, i32
  }
}

</mosaic_0001>

<bundles_post_ra>
// kernel: tpu_custom_call.1
= control target key start
LH: loop header
LB: loop body
LE: loop exit
PB: predicated region body
PF: predicated region fallthrough
CT: control target
= control target key end

     0   :  { %s13522_s0 = inlined_call_operand.hbm [shape: bf16[256,256], index: 0, kind: input, shape index: {}]   ;;  %s13523_s1 = inlined_call_operand.hbm [shape: bf16[256,256], index: 1, kind: input, shape index: {}]   ;;  %s13524_s2 = inlined_call_operand.hbm [shape: bf16[256,256], index: 2, kind: input, shape index: {}]   ;;  %s13525_s3 = inlined_call_operand.hbm [shape: bf16[256,256], index: 3, kind: input, shape index: {}]   ;;  %s13526_s4 = inlined_call_operand.hbm [shape: bf16[256,256], index: 4, kind: input, shape index: {}]   ;;  %s13527_s5 = inlined_call_operand.hbm [shape: bf16[256,256], index: 5, kind: input, shape index: {}]   ;;  %s13528_s6 = inlined_call_operand.hbm [shape: bf16[256,1024], index: 6, kind: input, shape index: {}]   ;;  %s13529_s7 = inlined_call_operand.hbm [shape: bf16[1024,512], index: 7, kind: input, shape index: {}]   ;;  %s13530_s8 = inlined_call_operand.hbm [shape: bf16[512,128], index: 8, kind: input, shape index: {}]   ;;  %s13531_s9 = inlined_call_operand.hbm [shape: bf16[128,128], index: 9, kind: input, shape index: {}]   ;;  %s13532_s10 = inlined_call_operand.vmem [shape: f32[1,256], index: 10, kind: input, shape index: {}]   ;;  %s13533_s11 = inlined_call_operand.vmem [shape: f32[1,256], index: 11, kind: input, shape index: {}]   ;;  %s13534_s12 = inlined_call_operand.vmem [shape: f32[1,256], index: 12, kind: input, shape index: {}]   ;;  %s13535_s13 = inlined_call_operand.vmem [shape: f32[1,256], index: 13, kind: input, shape index: {}]   ;;  %s13536_s14 = inlined_call_operand.vmem [shape: f32[1,256], index: 14, kind: input, shape index: {}]   ;;  %s13537_s15 = inlined_call_operand.vmem [shape: f32[1,1024], index: 15, kind: input, shape index: {}]   ;;  %s13538_s16 = inlined_call_operand.vmem [shape: f32[1,512], index: 16, kind: input, shape index: {}]   ;;  %s13539_s17 = inlined_call_operand.vmem [shape: f32[1,128], index: 17, kind: input, shape index: {}]   ;;  %s13540_s18 = inlined_call_operand.vmem [shape: f32[1,128], index: 18, kind: input, shape index: {}]   ;;  %s13541_s19 = inlined_call_operand.hbm [shape: f32[256,128], index: 19, kind: output, shape index: {}]  }
   0x1   :  { %13595 = sst [smem:[#allocation69_spill]] %s13522_s0 }
   0x2   :  { %13596 = sst [smem:[#allocation70_spill]] %s13523_s1 }
   0x3   :  { %13597 = sst [smem:[#allocation71_spill]] %s13524_s2 }
   0x4   :  { %13598 = sst [smem:[#allocation72_spill]] %s13525_s3 }
   0x5   :  { %13599 = sst [smem:[#allocation73_spill]] %s13540_s18 }
   0x6   :  { %13600 = sst [smem:[#allocation74_spill]] %s13541_s19 }
   0x7   :  { %24 = vsyncpa [#allocation3], 0 }
   0x8   :  { %25 = vsyncpa [#allocation6], 0 }
   0x9   :  { %26 = vsyncpa [#allocation9], 0 }
   0xa   :  { %27 = vsyncpa [#allocation12], 0 }
   0xb   :  { %28 = vsyncpa [#allocation15], 0 }
   0xc   :  { %29 = vsyncpa [#allocation18], 0 }
   0xd   :  { %30 = vsyncpa [#allocation4], 0  ;;  %s11514_s0 = smov [#allocation5]   ;;  %s11515_s20 = smov [#allocation8]  }
   0xe   :  { %s48_s30 = sshll.u32 %s11514_s0, 4  ;;  %s72_s21 = sshll.u32 %s11515_s20, 4  ;;  %s49_s30 = int_to_ptr.vmem [resolvable:$true] %s48_s30  ;;  %s11633_s21 = int_to_ptr.vmem [resolvable:$true] %s72_s21 }
   0xf   :  { %s13601_s2 = sld [smem:[#allocation70_spill]] }
  0x15   :  { %s11258_s23 = scalar_lea.hbm %s13601_s2, 4096 }
  0x16   :  { %p11259_p0 = scmp.ne.s32.totalorder %s13601_s2, %s11258_s23  ;;  %p11262_p1 = scmp.lt.u32.totalorder %s11258_s23, %s13601_s2 }
  0x18   :  { %p11264_p2 = pnand %p11262_p1, %p11259_p0 }
  0x1a   :  { %11267 = shalt.err (!%p11264_p2)
}
  0x1b   :  { %s11268_s27 = scalar_lea.vmem %s49_s30, 4096  ;;  %p11273_p4 = scmp.lt.s32.totalorder %s49_s30, %s49_s30 }
  0x1c   :  { %p11269_p3 = scmp.ne.s32.totalorder %s49_s30, %s11268_s27  ;;  %p11274_p5 = scmp.lt.s32.totalorder %s11268_s27, %s11268_s27 }
  0x1e   :  { %p11275_p6 = por %p11274_p5, %p11273_p4 }
  0x20   :  { %p11276_p7 = pnand %p11275_p6, %p11269_p3 }
  0x22   :  { %11279 = shalt.err (!%p11276_p7)
}
  0x23   :  { %s13547_s28 = smov 128   ;;  %s11517_s29 = smov 8  }
  0x24   :  { %54 = dma.hbm_to_vmem [thread:$0]  %s13601_s2, 4096, %s49_s30, [#allocation6], %s13547_s28, %s13547_s28, %s11517_s29  }
  0x25   :  { %s13602_s23 = sld [smem:[#allocation72_spill]] }
  0x2b   :  { %s11280_s24 = scalar_lea.hbm %s13602_s23, 4096 }
  0x2c   :  { %p11281_p8 = scmp.ne.s32.totalorder %s13602_s23, %s11280_s24  ;;  %p11284_p9 = scmp.lt.u32.totalorder %s11280_s24, %s13602_s23 }
  0x2e   :  { %p11286_p10 = pnand %p11284_p9, %p11281_p8 }
  0x30   :  { %11289 = shalt.err (!%p11286_p10)
}
  0x31   :  { %s11290_s19 = scalar_lea.vmem %s11633_s21, 4096  ;;  %p11295_p12 = scmp.lt.s32.totalorder %s11633_s21, %s11633_s21 }
  0x32   :  { %p11291_p11 = scmp.ne.s32.totalorder %s11633_s21, %s11290_s19  ;;  %p11296_p13 = scmp.lt.s32.totalorder %s11290_s19, %s11290_s19 }
  0x34   :  { %p11297_p0 = por %p11296_p13, %p11295_p12 }
  0x36   :  { %p11298_p1 = pnand %p11297_p0, %p11291_p11 }
  0x38   :  { %11301 = shalt.err (!%p11298_p1)
}
  0x39   :  { %78 = dma.hbm_to_vmem [thread:$0]  %s13602_s23, 4096, %s11633_s21, [#allocation9], %s13547_s28, %s13547_s28, %s11517_s29  }
  0x3a   :  { %s11518_s0 = smov [#allocation11]   ;;  %s11519_s1 = smov [#allocation14]  }
  0x3b   :  { %s96_s20 = sshll.u32 %s11518_s0, 4  ;;  %s120_s22 = sshll.u32 %s11519_s1, 4  ;;  %s97_s20 = int_to_ptr.vmem [resolvable:$true] %s96_s20  ;;  %s11670_s22 = int_to_ptr.vmem [resolvable:$true] %s120_s22 }
  0x3c   :  { %s11302_s25 = scalar_lea.hbm %s13527_s5, 4096 }
  0x3d   :  { %p11303_p2 = scmp.ne.s32.totalorder %s13527_s5, %s11302_s25  ;;  %p11306_p3 = scmp.lt.u32.totalorder %s11302_s25, %s13527_s5 }
  0x3f   :  { %p11308_p4 = pnand %p11306_p3, %p11303_p2 }
  0x41   :  { %11311 = shalt.err (!%p11308_p4)
}
  0x42   :  { %s11312_s21 = scalar_lea.vmem %s97_s20, 4096  ;;  %p11317_p6 = scmp.lt.s32.totalorder %s97_s20, %s97_s20 }
  0x43   :  { %p11313_p5 = scmp.ne.s32.totalorder %s97_s20, %s11312_s21  ;;  %p11318_p7 = scmp.lt.s32.totalorder %s11312_s21, %s11312_s21 }
  0x45   :  { %p11319_p8 = por %p11318_p7, %p11317_p6 }
  0x47   :  { %p11320_p9 = pnand %p11319_p8, %p11313_p5 }
  0x49   :  { %11323 = shalt.err (!%p11320_p9)
}
  0x4a   :  { %102 = dma.hbm_to_vmem [thread:$0]  %s13527_s5, 4096, %s97_s20, [#allocation12], %s13547_s28, %s13547_s28, %s11517_s29  }
  0x4b   :  { %s11324_s18 = scalar_lea.hbm %s13529_s7, 32768 }
  0x4c   :  { %p11325_p10 = scmp.ne.s32.totalorder %s13529_s7, %s11324_s18  ;;  %p11328_p11 = scmp.lt.u32.totalorder %s11324_s18, %s13529_s7 }
  0x4e   :  { %p11330_p12 = pnand %p11328_p11, %p11325_p10 }
  0x50   :  { %11333 = shalt.err (!%p11330_p12)
}
  0x51   :  { %s11334_s3 = scalar_lea.vmem %s11670_s22, 32768  ;;  %p11339_p0 = scmp.lt.s32.totalorder %s11670_s22, %s11670_s22 }
  0x52   :  { %p11335_p13 = scmp.ne.s32.totalorder %s11670_s22, %s11334_s3  ;;  %p11340_p1 = scmp.lt.s32.totalorder %s11334_s3, %s11334_s3 }
  0x54   :  { %p11341_p2 = por %p11340_p1, %p11339_p0 }
  0x56   :  { %p11342_p3 = pnand %p11341_p2, %p11335_p13 }
  0x58   :  { %11345 = shalt.err (!%p11342_p3)
}
  0x59   :  { %s11520_s5 = smov 256   ;;  %s11521_s20 = smov 16  }
  0x5a   :  { %126 = dma.hbm_to_vmem [thread:$0]  %s13529_s7, 32768, %s11670_s22, [#allocation15], %s11520_s5, %s11520_s5, %s11521_s20  }
  0x5b   :  { %s11522_s21 = smov [#allocation2]   ;;  %s11523_s30 = smov [#allocation7]  }
  0x5c   :  { %s36_s23 = sshll.u32 %s11522_s21, 4  ;;  %s60_s2 = sshll.u32 %s11523_s30, 4  ;;  %s37_s23 = int_to_ptr.vmem [resolvable:$true] %s36_s23  ;;  %s11704_s2 = int_to_ptr.vmem [resolvable:$true] %s60_s2 }
  0x5d   :  { %s13603_s1 = sld [smem:[#allocation69_spill]] }
  0x63   :  { %s11346_s24 = scalar_lea.hbm %s13603_s1, 4096 }
  0x64   :  { %p11347_p4 = scmp.ne.s32.totalorder %s13603_s1, %s11346_s24  ;;  %p11350_p5 = scmp.lt.u32.totalorder %s11346_s24, %s13603_s1 }
  0x66   :  { %p11352_p6 = pnand %p11350_p5, %p11347_p4 }
  0x68   :  { %11355 = shalt.err (!%p11352_p6)
}
  0x69   :  { %s11356_s7 = scalar_lea.vmem %s37_s23, 4096  ;;  %p11361_p8 = scmp.lt.s32.totalorder %s37_s23, %s37_s23 }
  0x6a   :  { %p11357_p7 = scmp.ne.s32.totalorder %s37_s23, %s11356_s7  ;;  %p11362_p9 = scmp.lt.s32.totalorder %s11356_s7, %s11356_s7 }
  0x6c   :  { %p11363_p10 = por %p11362_p9, %p11361_p8 }
  0x6e   :  { %p11364_p11 = pnand %p11363_p10, %p11357_p7 }
  0x70   :  { %11367 = shalt.err (!%p11364_p11)
}
  0x71   :  { %s13604_s22 = smov 128   ;;  %s13605_s28 = sld [smem:[#allocation71_spill]] }
  0x72   :  { %42 = dma.hbm_to_vmem [thread:$0]  %s13603_s1, 4096, %s37_s23, [#allocation3], %s13604_s22, %s13604_s22, %s11517_s29  }
  0x77   :  { %s11368_s21 = scalar_lea.hbm %s13605_s28, 4096 }
  0x78   :  { %p11369_p12 = scmp.ne.s32.totalorder %s13605_s28, %s11368_s21  ;;  %p11372_p13 = scmp.lt.u32.totalorder %s11368_s21, %s13605_s28 }
  0x7a   :  { %p11374_p0 = pnand %p11372_p13, %p11369_p12 }
  0x7c   :  { %11377 = shalt.err (!%p11374_p0)
}
  0x7d   :  { %s11378_s19 = scalar_lea.vmem %s11704_s2, 4096  ;;  %p11383_p2 = scmp.lt.s32.totalorder %s11704_s2, %s11704_s2 }
  0x7e   :  { %p11379_p1 = scmp.ne.s32.totalorder %s11704_s2, %s11378_s19  ;;  %p11384_p3 = scmp.lt.s32.totalorder %s11378_s19, %s11378_s19 }
  0x80   :  { %p11385_p4 = por %p11384_p3, %p11383_p2 }
  0x82   :  { %p11386_p5 = pnand %p11385_p4, %p11379_p1 }
  0x84   :  { %11389 = shalt.err (!%p11386_p5)
}
  0x85   :  { %66 = dma.hbm_to_vmem [thread:$0]  %s13605_s28, 4096, %s11704_s2, [#allocation6], %s13604_s22, %s13604_s22, %s11517_s29  }
  0x86   :  { %s11524_s25 = smov [#allocation10]   ;;  %s11525_s7 = smov [#allocation13]  }
  0x87   :  { %s84_s3 = sshll.u32 %s11524_s25, 4  ;;  %s108_s5 = sshll.u32 %s11525_s7, 4  ;;  %s85_s3 = int_to_ptr.vmem [resolvable:$true] %s84_s3  ;;  %s11741_s5 = int_to_ptr.vmem [resolvable:$true] %s108_s5 }
  0x88   :  { %s11390_s27 = scalar_lea.hbm %s13526_s4, 4096 }
  0x89   :  { %p11391_p6 = scmp.ne.s32.totalorder %s13526_s4, %s11390_s27  ;;  %p11394_p7 = scmp.lt.u32.totalorder %s11390_s27, %s13526_s4 }
  0x8b   :  { %p11396_p8 = pnand %p11394_p7, %p11391_p6 }
  0x8d   :  { %11399 = shalt.err (!%p11396_p8)
}
  0x8e   :  { %s11400_s2 = scalar_lea.vmem %s85_s3, 4096  ;;  %p11405_p10 = scmp.lt.s32.totalorder %s85_s3, %s85_s3 }
  0x8f   :  { %p11401_p9 = scmp.ne.s32.totalorder %s85_s3, %s11400_s2  ;;  %p11406_p11 = scmp.lt.s32.totalorder %s11400_s2, %s11400_s2 }
  0x91   :  { %p11407_p12 = por %p11406_p11, %p11405_p10 }
  0x93   :  { %p11408_p13 = pnand %p11407_p12, %p11401_p9 }
  0x95   :  { %11411 = shalt.err (!%p11408_p13)
}
  0x96   :  { %90 = dma.hbm_to_vmem [thread:$0]  %s13526_s4, 4096, %s85_s3, [#allocation9], %s13604_s22, %s13604_s22, %s11517_s29  }
  0x97   :  { %s11412_s1 = scalar_lea.hbm %s13528_s6, 16384 }
  0x98   :  { %p11413_p0 = scmp.ne.s32.totalorder %s13528_s6, %s11412_s1  ;;  %p11416_p1 = scmp.lt.u32.totalorder %s11412_s1, %s13528_s6 }
  0x9a   :  { %p11418_p2 = pnand %p11416_p1, %p11413_p0 }
  0x9c   :  { %11421 = shalt.err (!%p11418_p2)
}
  0x9d   :  { %s11422_s27 = scalar_lea.vmem %s11741_s5, 16384  ;;  %p11427_p4 = scmp.lt.s32.totalorder %s11741_s5, %s11741_s5 }
  0x9e   :  { %p11423_p3 = scmp.ne.s32.totalorder %s11741_s5, %s11422_s27  ;;  %p11428_p5 = scmp.lt.s32.totalorder %s11422_s27, %s11422_s27 }
  0xa0   :  { %p11429_p6 = por %p11428_p5, %p11427_p4 }
  0xa2   :  { %p11430_p7 = pnand %p11429_p6, %p11423_p3 }
  0xa4   :  { %11433 = shalt.err (!%p11430_p7)
}
  0xa5   :  { %s11526_s4 = smov 512   ;;  %s11527_s3 = smov 32  }
  0xa6   :  { %114 = dma.hbm_to_vmem [thread:$0]  %s13528_s6, 16384, %s11741_s5, [#allocation12], %s11526_s4, %s11526_s4, %s11527_s3  }
  0xa7   :  { %s11528_s0 = smov [#allocation16]   ;;  %s11434_s24 = scalar_lea.hbm %s13530_s8, 4096 }
  0xa8   :  { %s132_s18 = sshll.u32 %s11528_s0, 4  ;;  %p11435_p8 = scmp.ne.s32.totalorder %s13530_s8, %s11434_s24  ;;  %s133_s18 = int_to_ptr.vmem [resolvable:$true] %s132_s18 }
  0xa9   :  { %p11438_p9 = scmp.lt.u32.totalorder %s11434_s24, %s13530_s8 }
  0xab   :  { %p11440_p10 = pnand %p11438_p9, %p11435_p8 }
  0xad   :  { %11443 = shalt.err (!%p11440_p10)
}
  0xae   :  { %s11444_s7 = scalar_lea.vmem %s133_s18, 4096  ;;  %p11449_p12 = scmp.lt.s32.totalorder %s133_s18, %s133_s18 }
  0xaf   :  { %p11445_p11 = scmp.ne.s32.totalorder %s133_s18, %s11444_s7  ;;  %p11450_p13 = scmp.lt.s32.totalorder %s11444_s7, %s11444_s7 }
  0xb1   :  { %p11451_p0 = por %p11450_p13, %p11449_p12 }
  0xb3   :  { %p11452_p1 = pnand %p11451_p0, %p11445_p11 }
  0xb5   :  { %11455 = shalt.err (!%p11452_p1)
}
  0xb6   :  { %s11529_s6 = smov 64   ;;  %s11530_s5 = smov 4  }
  0xb7   :  { %138 = dma.hbm_to_vmem [thread:$0]  %s13530_s8, 4096, %s133_s18, [#allocation15], %s11529_s6, %s11529_s6, %s11530_s5  }
  0xb8   :  { %s11531_s27 = smov [#allocation17]   ;;  %s11456_s30 = scalar_lea.hbm %s13531_s9, 1024 }
  0xb9   :  { %s144_s4 = sshll.u32 %s11531_s27, 4  ;;  %p11457_p2 = scmp.ne.s32.totalorder %s13531_s9, %s11456_s30  ;;  %s145_s4 = int_to_ptr.vmem [resolvable:$true] %s144_s4 }
  0xba   :  { %p11460_p3 = scmp.lt.u32.totalorder %s11456_s30, %s13531_s9 }
  0xbc   :  { %p11462_p4 = pnand %p11460_p3, %p11457_p2 }
  0xbe   :  { %11465 = shalt.err (!%p11462_p4)
}
  0xbf   :  { %s11466_s19 = scalar_lea.vmem %s145_s4, 1024  ;;  %p11471_p6 = scmp.lt.s32.totalorder %s145_s4, %s145_s4 }
  0xc0   :  { %p11467_p5 = scmp.ne.s32.totalorder %s145_s4, %s11466_s19  ;;  %p11472_p7 = scmp.lt.s32.totalorder %s11466_s19, %s11466_s19 }
  0xc2   :  { %p11473_p8 = por %p11472_p7, %p11471_p6 }
  0xc4   :  { %p11474_p9 = pnand %p11473_p8, %p11467_p5 }
  0xc6   :  { %11477 = shalt.err (!%p11474_p9)
}
  0xc7   :  { %150 = dma.hbm_to_vmem [thread:$0]  %s13531_s9, 1024, %s145_s4, [#allocation18], %s11529_s6, %s11529_s6, %s11530_s5  }
  0xc8   :  { %11500 = dma.done.wait [#allocation3], 4096  }
  0xc9   :  { %11501 = vsyncadd [#allocation3], 4294963200 }
  0xca   :  { %11502 = dma.done.wait [#allocation6], 8192  }
  0xcb   :  { %11503 = vsyncadd [#allocation6], 4294959104 }
  0xcc   :  { %11504 = dma.done.wait [#allocation9], 8192  }
  0xcd   :  { %11505 = vsyncadd [#allocation9], 4294959104 }
  0xce   :  { %11506 = dma.done.wait [#allocation12], 20480  }
  0xcf   :  { %11507 = vsyncadd [#allocation12], 4294946816 }
  0xd0   :  { %11508 = dma.done.wait [#allocation15], 36864  }
  0xd1   :  { %11509 = vsyncadd [#allocation15], 4294930432 }
  0xd2   :  { %11510 = dma.done.wait [#allocation18], 1024  }
  0xd3   :  { %11511 = vsyncadd [#allocation18], 4294966272  ;;  %v10513_v0 = vld [vmem:[#allocation5 + $0x4] ss:$8 sps:$4 sm:$0xff]   ;;  %v10515_v1 = vld [vmem:[#allocation5] ss:$8 sps:$4 sm:$0xff]  }
  0xd4   :  { %596 = vmatprep.subr.bf16.mxu0 %v10513_v0  ;;  %v10516_v2 = vld [vmem:[#allocation5 + $0x14] ss:$8 sps:$4 sm:$0xff]   ;;  %v10518_v3 = vld [vmem:[#allocation5 + $0x10] ss:$8 sps:$4 sm:$0xff]   ;;  %v10519_v4 = vld [vmem:[#allocation5 + $0x24] ss:$8 sps:$4 sm:$0xff]  }
  0xd5   :  { %597 = vmatpush1.bf16.msra.mxu0 %v10515_v1  ;;  %v10521_v5 = vld [vmem:[#allocation5 + $0x20] ss:$8 sps:$4 sm:$0xff]   ;;  %v10522_v6 = vld [vmem:[#allocation5 + $0x34] ss:$8 sps:$4 sm:$0xff]   ;;  %v10524_v7 = vld [vmem:[#allocation5 + $0x30] ss:$8 sps:$4 sm:$0xff]  }
  0xd6   :  { %598 = vmatprep.subr.bf16.mxu0 %v10516_v2  ;;  %v10525_v8 = vld [vmem:[#allocation5 + $0x44] ss:$8 sps:$4 sm:$0xff]   ;;  %v10527_v9 = vld [vmem:[#allocation5 + $0x40] ss:$8 sps:$4 sm:$0xff]   ;;  %v10528_v10 = vld [vmem:[#allocation5 + $0x54] ss:$8 sps:$4 sm:$0xff]  }
  0xd7   :  { %v10530_v11 = vld [vmem:[#allocation5 + $0x50] ss:$8 sps:$4 sm:$0xff]   ;;  %v10531_v12 = vld [vmem:[#allocation5 + $0x64] ss:$8 sps:$4 sm:$0xff]   ;;  %v10533_v14 = vld [vmem:[#allocation5 + $0x60] ss:$8 sps:$4 sm:$0xff]  }
  0xd8   :  { %v10563_v13 = vld [vmem:[#allocation2 + $0x4] ss:$8 sps:$4 sm:$0xff]   ;;  %v10534_v15 = vld [vmem:[#allocation5 + $0x74] ss:$8 sps:$4 sm:$0xff]   ;;  %v10536_v16 = vld [vmem:[#allocation5 + $0x70] ss:$8 sps:$4 sm:$0xff]  }
  0xd9   :  { %599 = vmatpush1.bf16.msra.mxu0 %v10518_v3  ;;  %628 = vmatprep.mubr.bf16.mxu0 %v10563_v13  ;;  %v10537_v17 = vld [vmem:[#allocation5 + $0x84] ss:$8 sps:$4 sm:$0xff]   ;;  %v10539_v18 = vld [vmem:[#allocation5 + $0x80] ss:$8 sps:$4 sm:$0xff]   ;;  %v10540_v19 = vld [vmem:[#allocation5 + $0x94] ss:$8 sps:$4 sm:$0xff]  }
  0xda   :  { %600 = vmatprep.subr.bf16.mxu0 %v10519_v4  ;;  %v10542_v20 = vld [vmem:[#allocation5 + $0x90] ss:$8 sps:$4 sm:$0xff]   ;;  %v10543_v21 = vld [vmem:[#allocation5 + $0xa4] ss:$8 sps:$4 sm:$0xff]   ;;  %v10545_v22 = vld [vmem:[#allocation5 + $0xa0] ss:$8 sps:$4 sm:$0xff]  }
  0xdb   :  { %v10546_v23 = vld [vmem:[#allocation5 + $0xb4] ss:$8 sps:$4 sm:$0xff]   ;;  %v10548_v24 = vld [vmem:[#allocation5 + $0xb0] ss:$8 sps:$4 sm:$0xff]   ;;  %v10549_v25 = vld [vmem:[#allocation5 + $0xc4] ss:$8 sps:$4 sm:$0xff]  }
  0xdc   :  { %v10551_v26 = vld [vmem:[#allocation5 + $0xc0] ss:$8 sps:$4 sm:$0xff]   ;;  %v10552_v27 = vld [vmem:[#allocation5 + $0xd4] ss:$8 sps:$4 sm:$0xff]   ;;  %v10554_v28 = vld [vmem:[#allocation5 + $0xd0] ss:$8 sps:$4 sm:$0xff]  }
  0xdd   :  { %601 = vmatpush1.bf16.msra.mxu0 %v10521_v5  ;;  %v10555_v29 = vld [vmem:[#allocation5 + $0xe4] ss:$8 sps:$4 sm:$0xff]   ;;  %v10557_v30 = vld [vmem:[#allocation5 + $0xe0] ss:$8 sps:$4 sm:$0xff]   ;;  %v10558_v31 = vld [vmem:[#allocation5 + $0xf4] ss:$8 sps:$4 sm:$0xff]  }
  0xde   :  { %602 = vmatprep.subr.bf16.mxu0 %v10522_v6  ;;  %v10609_v32 = vld [vmem:[#allocation7 + $0x4] ss:$8 sps:$4 sm:$0xff]   ;;  %v10611_v33 = vld [vmem:[#allocation7] ss:$8 sps:$4 sm:$0xff]   ;;  %v10612_v34 = vld [vmem:[#allocation7 + $0x14] ss:$8 sps:$4 sm:$0xff]  }
  0xdf   :  { %v10560_v35 = vld [vmem:[#allocation5 + $0xf0] ss:$8 sps:$4 sm:$0xff]   ;;  %1089 = vmatprep.subr.bf16.mxu1 %v10609_v32  ;;  %v10561_v37 = vld [vmem:[#allocation2] ss:$8 sps:$4 sm:$0xff]   ;;  %v10615_v38 = vld [vmem:[#allocation7 + $0x24] ss:$8 sps:$4 sm:$0xff]  }
  0xe0   :  { %1090 = vmatpush1.bf16.msra.mxu1 %v10611_v33  ;;  %v10614_v36 = vld [vmem:[#allocation7 + $0x10] ss:$8 sps:$4 sm:$0xff]   ;;  %v10564_v39 = vld [vmem:[#allocation2 + $0x14] ss:$8 sps:$4 sm:$0xff]   ;;  %v10617_v40 = vld [vmem:[#allocation7 + $0x20] ss:$8 sps:$4 sm:$0xff]  }
  0xe1   :  { %603 = vmatpush1.bf16.msra.mxu0 %v10524_v7  ;;  %1091 = vmatprep.subr.bf16.mxu1 %v10612_v34  ;;  %v10618_v41 = vld [vmem:[#allocation7 + $0x34] ss:$8 sps:$4 sm:$0xff]   ;;  %v10620_v42 = vld [vmem:[#allocation7 + $0x30] ss:$8 sps:$4 sm:$0xff]   ;;  %v10621_v44 = vld [vmem:[#allocation7 + $0x44] ss:$8 sps:$4 sm:$0xff]   ;;  %v266_v34 = vlaneseq }
  0xe2   :  { %604 = vmatprep.subr.bf16.mxu0 %v10525_v8  ;;  %v10566_v43 = vld [vmem:[#allocation2 + $0x10] ss:$8 sps:$4 sm:$0xff]   ;;  %v10567_v45 = vld [vmem:[#allocation2 + $0x24] ss:$8 sps:$4 sm:$0xff]   ;;  %v10623_v46 = vld [vmem:[#allocation7 + $0x40] ss:$8 sps:$4 sm:$0xff]  }
  0xe3   :  { %v10624_v47 = vld [vmem:[#allocation7 + $0x54] ss:$8 sps:$4 sm:$0xff]   ;;  %v10626_v48 = vld [vmem:[#allocation7 + $0x50] ss:$8 sps:$4 sm:$0xff]   ;;  %v10569_v49 = vld [vmem:[#allocation2 + $0x20] ss:$8 sps:$4 sm:$0xff]  }
  0xe4   :  { %1092 = vmatpush1.bf16.msra.mxu1 %v10614_v36  ;;  %v10627_v50 = vld [vmem:[#allocation7 + $0x64] ss:$8 sps:$4 sm:$0xff]   ;;  %v10570_v51 = vld [vmem:[#allocation2 + $0x34] ss:$8 sps:$4 sm:$0xff]   ;;  %v10629_v52 = vld [vmem:[#allocation7 + $0x60] ss:$8 sps:$4 sm:$0xff]  }
  0xe5   :  { %605 = vmatpush1.bf16.msra.mxu0 %v10527_v9  ;;  %1093 = vmatprep.subr.bf16.mxu1 %v10615_v38  ;;  %v10630_v53 = vld [vmem:[#allocation7 + $0x74] ss:$8 sps:$4 sm:$0xff]   ;;  %v10632_v54 = vld [vmem:[#allocation7 + $0x70] ss:$8 sps:$4 sm:$0xff]   ;;  %v10633_v56 = vld [vmem:[#allocation7 + $0x84] ss:$8 sps:$4 sm:$0xff]  }
  0xe6   :  { %606 = vmatprep.subr.bf16.mxu0 %v10528_v10  ;;  %v10572_v55 = vld [vmem:[#allocation2 + $0x30] ss:$8 sps:$4 sm:$0xff]   ;;  %v10573_v57 = vld [vmem:[#allocation2 + $0x44] ss:$8 sps:$4 sm:$0xff]   ;;  %v10635_v58 = vld [vmem:[#allocation7 + $0x80] ss:$8 sps:$4 sm:$0xff]  }
  0xe7   :  { %v10636_v59 = vld [vmem:[#allocation7 + $0x94] ss:$8 sps:$4 sm:$0xff]   ;;  %v10638_v60 = vld [vmem:[#allocation7 + $0x90] ss:$8 sps:$4 sm:$0xff]   ;;  %v10575_v61 = vld [vmem:[#allocation2 + $0x40] ss:$8 sps:$4 sm:$0xff]  }
  0xe8   :  { %1094 = vmatpush1.bf16.msra.mxu1 %v10617_v40  ;;  %v10639_v62 = vld [vmem:[#allocation7 + $0xa4] ss:$8 sps:$4 sm:$0xff]   ;;  %v10576_v63 = vld [vmem:[#allocation2 + $0x54] ss:$8 sps:$4 sm:$0xff]   ;;  %v10641_v0 = vld [vmem:[#allocation7 + $0xa0] ss:$8 sps:$4 sm:$0xff]  }
  0xe9   :  { %607 = vmatpush1.bf16.msra.mxu0 %v10530_v11  ;;  %1095 = vmatprep.subr.bf16.mxu1 %v10618_v41  ;;  %v10642_v1 = vld [vmem:[#allocation7 + $0xb4] ss:$8 sps:$4 sm:$0xff]   ;;  %v10644_v2 = vld [vmem:[#allocation7 + $0xb0] ss:$8 sps:$4 sm:$0xff]   ;;  %v10645_v4 = vld [vmem:[#allocation7 + $0xc4] ss:$8 sps:$4 sm:$0xff]  }
  0xea   :  { %608 = vmatprep.subr.bf16.mxu0 %v10531_v12  ;;  %v10578_v3 = vld [vmem:[#allocation2 + $0x50] ss:$8 sps:$4 sm:$0xff]   ;;  %v10579_v5 = vld [vmem:[#allocation2 + $0x64] ss:$8 sps:$4 sm:$0xff]   ;;  %v10647_v6 = vld [vmem:[#allocation7 + $0xc0] ss:$8 sps:$4 sm:$0xff]  }
  0xeb   :  { %v10648_v7 = vld [vmem:[#allocation7 + $0xd4] ss:$8 sps:$4 sm:$0xff]   ;;  %v10581_v8 = vld [vmem:[#allocation2 + $0x60] ss:$8 sps:$4 sm:$0xff]   ;;  %v10584_v10 = vld [vmem:[#allocation2 + $0x70] ss:$8 sps:$4 sm:$0xff]  }
  0xec   :  { %1096 = vmatpush1.bf16.msra.mxu1 %v10620_v42  ;;  %v10582_v9 = vld [vmem:[#allocation2 + $0x74] ss:$8 sps:$4 sm:$0xff]   ;;  %v10585_v11 = vld [vmem:[#allocation2 + $0x84] ss:$8 sps:$4 sm:$0xff]   ;;  %v10587_v12 = vld [vmem:[#allocation2 + $0x80] ss:$8 sps:$4 sm:$0xff]  }
  0xed   :  { %609 = vmatpush1.bf16.msra.mxu0 %v10533_v14  ;;  %1097 = vmatprep.subr.bf16.mxu1 %v10621_v44  ;;  %v10588_v13 = vld [vmem:[#allocation2 + $0x94] ss:$8 sps:$4 sm:$0xff]   ;;  %v10590_v14 = vld [vmem:[#allocation2 + $0x90] ss:$8 sps:$4 sm:$0xff]   ;;  %v10657_v32 = vld [vmem:[#allocation8] ss:$8 sps:$4 sm:$0xff]  }
  0xee   :  { %610 = vmatprep.subr.bf16.mxu0 %v10534_v15  ;;  %v10591_v15 = vld [vmem:[#allocation2 + $0xa4] ss:$8 sps:$4 sm:$0xff]   ;;  %v10662_v36 = vld [vmem:[#allocation8 + $0x14] ss:$8 sps:$4 sm:$0xff]   ;;  %v10663_v41 = vld [vmem:[#allocation8 + $0x20] ss:$8 sps:$4 sm:$0xff]  }
  0xef   :  { %v10659_v33 = vld [vmem:[#allocation8 + $0x4] ss:$8 sps:$4 sm:$0xff]   ;;  %s13694_s21 = sld [smem:[#allocation73_spill]]  ;;  %s11532_s30 = smov [#allocation19]  }
  0xf0   :  { %1098 = vmatpush1.bf16.msra.mxu1 %v10623_v46  ;;  %v10665_v42 = vld [vmem:[#allocation8 + $0x24] ss:$8 sps:$4 sm:$0xff]   ;;  %v10668_v46 = vld [vmem:[#allocation8 + $0x34] ss:$8 sps:$4 sm:$0xff]   ;;  %s9019_s0 = sshll.u32 %s11532_s30, 4  ;;  %s9020_s0 = int_to_ptr.vmem [resolvable:$true] %s9019_s0 }
  0xf1   :  { %611 = vmatpush1.bf16.msra.mxu0 %v10536_v16  ;;  %1099 = vmatprep.subr.bf16.mxu1 %v10624_v47  ;;  %v10593_v16 = vld [vmem:[#allocation2 + $0xa0] ss:$8 sps:$4 sm:$0xff]   ;;  %s11478_s2 = scalar_lea.vmem %s9020_s0, 4096  ;;  %p11483_p11 = scmp.lt.s32.totalorder %s9020_s0, %s9020_s0 }
  0xf2   :  { %612 = vmatprep.subr.bf16.mxu0 %v10537_v17  ;;  %v10594_v17 = vld [vmem:[#allocation2 + $0xb4] ss:$8 sps:$4 sm:$0xff]   ;;  %p11479_p10 = scmp.ne.s32.totalorder %s9020_s0, %s11478_s2  ;;  %p11484_p12 = scmp.lt.s32.totalorder %s11478_s2, %s11478_s2 }
  0xf4   :  { %1100 = vmatpush1.bf16.msra.mxu1 %v10626_v48  ;;  %p11485_p13 = por %p11484_p12, %p11483_p11 }
  0xf5   :  { %613 = vmatpush1.bf16.msra.mxu0 %v10539_v18  ;;  %1101 = vmatprep.subr.bf16.mxu1 %v10627_v50  ;;  %v10650_v18 = vld [vmem:[#allocation7 + $0xd0] ss:$8 sps:$4 sm:$0xff]  }
  0xf6   :  { %614 = vmatprep.subr.bf16.mxu0 %v10540_v19  ;;  %v10596_v19 = vld [vmem:[#allocation2 + $0xb0] ss:$8 sps:$4 sm:$0xff]   ;;  %p11486_p0 = pnand %p11485_p13, %p11479_p10 }
  0xf8   :  { %1102 = vmatpush1.bf16.msra.mxu1 %v10629_v52 }
  0xf9   :  { %615 = vmatpush1.bf16.msra.mxu0 %v10542_v20  ;;  %1103 = vmatprep.subr.bf16.mxu1 %v10630_v53  ;;  %v10597_v20 = vld [vmem:[#allocation2 + $0xc4] ss:$8 sps:$4 sm:$0xff]  }
  0xfa   :  { %616 = vmatprep.subr.bf16.mxu0 %v10543_v21  ;;  %v10651_v21 = vld [vmem:[#allocation7 + $0xe4] ss:$8 sps:$4 sm:$0xff]  }
  0xfc   :  { %1104 = vmatpush1.bf16.msra.mxu1 %v10632_v54  ;;  %v10669_v54 = vld [vmem:[#allocation8 + $0x40] ss:$8 sps:$4 sm:$0xff]  }
  0xfd   :  { %617 = vmatpush1.bf16.msra.mxu0 %v10545_v22  ;;  %1105 = vmatprep.subr.bf16.mxu1 %v10633_v56  ;;  %v10653_v22 = vld [vmem:[#allocation7 + $0xe0] ss:$8 sps:$4 sm:$0xff]  }
  0xfe   :  { %618 = vmatprep.subr.bf16.mxu0 %v10546_v23  ;;  %v10654_v23 = vld [vmem:[#allocation7 + $0xf4] ss:$8 sps:$4 sm:$0xff]  }
 0x100   :  { %1106 = vmatpush1.bf16.msra.mxu1 %v10635_v58 }
 0x101   :  { %619 = vmatpush1.bf16.msra.mxu0 %v10548_v24  ;;  %1107 = vmatprep.subr.bf16.mxu1 %v10636_v59  ;;  %v10656_v24 = vld [vmem:[#allocation7 + $0xf0] ss:$8 sps:$4 sm:$0xff]  }
 0x102   :  { %620 = vmatprep.subr.bf16.mxu0 %v10549_v25  ;;  %v10599_v25 = vld [vmem:[#allocation2 + $0xc0] ss:$8 sps:$4 sm:$0xff]  }
 0x104   :  { %1108 = vmatpush1.bf16.msra.mxu1 %v10638_v60 }
 0x105   :  { %621 = vmatpush1.bf16.msra.mxu0 %v10551_v26  ;;  %1109 = vmatprep.subr.bf16.mxu1 %v10639_v62  ;;  %v10600_v26 = vld [vmem:[#allocation2 + $0xd4] ss:$8 sps:$4 sm:$0xff]   ;;  %v10672_v62 = vld [vmem:[#allocation8 + $0x50] ss:$8 sps:$4 sm:$0xff]  }
 0x106   :  { %622 = vmatprep.subr.bf16.mxu0 %v10552_v27  ;;  %v10602_v27 = vld [vmem:[#allocation2 + $0xd0] ss:$8 sps:$4 sm:$0xff]  }
 0x108   :  { %1110 = vmatpush1.bf16.msra.mxu1 %v10641_v0  ;;  %v10677_v0 = vld [vmem:[#allocation8 + $0x64] ss:$8 sps:$4 sm:$0xff]  }
 0x109   :  { %623 = vmatpush1.bf16.msra.mxu0 %v10554_v28  ;;  %1111 = vmatprep.subr.bf16.mxu1 %v10642_v1  ;;  %v10603_v28 = vld [vmem:[#allocation2 + $0xe4] ss:$8 sps:$4 sm:$0xff]  }
 0x10a   :  { %624 = vmatprep.subr.bf16.mxu0 %v10555_v29  ;;  %v10605_v29 = vld [vmem:[#allocation2 + $0xe0] ss:$8 sps:$4 sm:$0xff]  }
 0x10c   :  { %1112 = vmatpush1.bf16.msra.mxu1 %v10644_v2 }
 0x10d   :  { %625 = vmatpush1.bf16.msra.mxu0 %v10557_v30  ;;  %1113 = vmatprep.subr.bf16.mxu1 %v10645_v4  ;;  %v10606_v30 = vld [vmem:[#allocation2 + $0xf4] ss:$8 sps:$4 sm:$0xff]  }
 0x10e   :  { %626 = vmatprep.subr.bf16.mxu0 %v10558_v31  ;;  %v10608_v31 = vld [vmem:[#allocation2 + $0xf0] ss:$8 sps:$4 sm:$0xff]  }
 0x110   :  { %1114 = vmatpush1.bf16.msra.mxu1 %v10647_v6 }
 0x111   :  { %627 = vmatpush1.bf16.msra.mxu0 %v10560_v35  ;;  %1115 = vmatprep.subr.bf16.mxu1 %v10648_v7  ;;  %v10660_v35 = vld [vmem:[#allocation8 + $0x10] ss:$8 sps:$4 sm:$0xff]   ;;  %v10675_v7 = vld [vmem:[#allocation8 + $0x60] ss:$8 sps:$4 sm:$0xff]  }
 0x112   :  { %1582 = vmatprep.subr.bf16.mxu0 %v10659_v33 }
 0x114   :  { %629 = vmatmul.mubr.bf16.vlgmr.msra.gmra.mrb[0].mxu0 %v10561_v37  ;;  %1116 = vmatpush1.bf16.msra.mxu1 %v10650_v18  ;;  %v11799_v37 = vshrl.u32 %v266_v34, 7  ;;  %v10683_v18 = vld [vmem:[#allocation8 + $0x84] ss:$8 sps:$4 sm:$0xff]   ;;  %v10684_v34 = vld [vmem:[#allocation8 + $0x90] ss:$8 sps:$4 sm:$0xff]  }
 0x115   :  { %638 = vmatprep.mubr.bf16.mxu0 %v10564_v39  ;;  %1117 = vmatprep.subr.bf16.mxu1 %v10651_v21  ;;  %v264_v39 = vld [vmem:[%s13532_s10] sm:$0x3] }
 0x116   :  { %1583 = vmatpush1.bf16.msra.mxu0 %v10657_v32  ;;  %13606 = vst [vmem:[#allocation27_spill] sm:$0xff] %v11799_v37  ;;  %v11802_v38 = vsub.s32 0, %v11799_v37  ;;  %v11808_v40 = vsub.s32 1, %v11799_v37 }
 0x117   :  { %1584 = vmatprep.subr.bf16.mxu0 %v10662_v36  ;;  %v10689_v36 = vld [vmem:[#allocation8 + $0xa4] ss:$8 sps:$4 sm:$0xff]  }
 0x118   :  { %1118 = vmatpush1.bf16.msra.mxu1 %v10653_v22  ;;  %13607 = vst [vmem:[#allocation28_spill] sm:$0xff] %v11802_v38  ;;  %13608 = vst [vmem:[#allocation29_spill] sm:$0xff] %v11808_v40  ;;  %v11814_v44 = vrot.slane %v264_v39, %v11808_v40 }
 0x119   :  { %1119 = vmatprep.subr.bf16.mxu1 %v10654_v23 }
 0x11a   :  { %1585 = vmatpush1.bf16.msra.mxu0 %v10660_v35 }
 0x11b   :  { %1586 = vmatprep.subr.bf16.mxu0 %v10665_v42 }
 0x11c   :  { %639 = vmatmul.mubr.bf16.gmra.mrb[4].mxu0 %v10566_v43  ;;  %1120 = vmatpush1.bf16.msra.mxu1 %v10656_v24  ;;  %v11811_v43 = vrot.slane %v264_v39, %v11802_v38 }
 0x11d   :  { %648 = vmatprep.mubr.bf16.mxu0 %v10567_v45  ;;  %v10666_v45 = vld [vmem:[#allocation8 + $0x30] ss:$8 sps:$4 sm:$0xff]  }
 0x11e   :  { %1587 = vmatpush1.bf16.msra.mxu0 %v10663_v41 }
 0x11f   :  { %1588 = vmatprep.subr.bf16.mxu0 %v10668_v46 }
 0x122   :  { %1589 = vmatpush1.bf16.msra.mxu0 %v10666_v45 }
 0x124   :  { %649 = vmatmul.mubr.bf16.gmra.mrb[8].mxu0 %v10569_v49 }
 0x125   :  { %658 = vmatprep.mubr.bf16.mxu0 %v10570_v51 }
 0x12c   :  { %659 = vmatmul.mubr.bf16.gmra.mrb[12].mxu0 %v10572_v55  ;;  %v10671_v55 = vld [vmem:[#allocation8 + $0x44] ss:$8 sps:$4 sm:$0xff]  }
 0x12d   :  { %668 = vmatprep.mubr.bf16.mxu0 %v10573_v57  ;;  %v10674_v57 = vld [vmem:[#allocation8 + $0x54] ss:$8 sps:$4 sm:$0xff]   ;;  %1590 = vmatprep.subr.bf16.mxu0 %v10671_v55 }
 0x12e   :  { %1591 = vmatpush1.bf16.msra.mxu0 %v10669_v54 }
 0x12f   :  { %1592 = vmatprep.subr.bf16.mxu0 %v10674_v57  ;;  %v10690_v57 = vld [vmem:[#allocation8 + $0xb0] ss:$8 sps:$4 sm:$0xff]  }
 0x132   :  { %1593 = vmatpush1.bf16.msra.mxu0 %v10672_v62 }
 0x133   :  { %1594 = vmatprep.subr.bf16.mxu0 %v10677_v0 }
 0x134   :  { %669 = vmatmul.mubr.bf16.gmra.mrb[16].mxu0 %v10575_v61 }
 0x135   :  { %678 = vmatprep.mubr.bf16.mxu0 %v10576_v63 }
 0x136   :  { %1595 = vmatpush1.bf16.msra.mxu0 %v10675_v7 }
 0x13c   :  { %679 = vmatmul.mubr.bf16.gmra.mrb[20].mxu0 %v10578_v3 }
 0x13d   :  { %688 = vmatprep.mubr.bf16.mxu0 %v10579_v5 }
 0x144   :  { %689 = vmatmul.mubr.bf16.gmra.mrb[24].mxu0 %v10581_v8 }
 0x145   :  { %698 = vmatprep.mubr.bf16.mxu0 %v10582_v9 }
 0x14c   :  { %699 = vmatmul.mubr.bf16.gmra.mrb[28].mxu0 %v10584_v10  ;;  %v10680_v10 = vld [vmem:[#allocation8 + $0x74] ss:$8 sps:$4 sm:$0xff]  }
 0x14d   :  { %708 = vmatprep.mubr.bf16.mxu0 %v10585_v11  ;;  %1596 = vmatprep.subr.bf16.mxu0 %v10680_v10 }
 0x154   :  { %709 = vmatmul.mubr.bf16.gmra.mrb[32].mxu0 %v10587_v12 }
 0x155   :  { %718 = vmatprep.mubr.bf16.mxu0 %v10588_v13 }
 0x15c   :  { %719 = vmatmul.mubr.bf16.gmra.mrb[36].mxu0 %v10590_v14 }
 0x15d   :  { %728 = vmatprep.mubr.bf16.mxu0 %v10591_v15 }
 0x164   :  { %729 = vmatmul.mubr.bf16.gmra.mrb[40].mxu0 %v10593_v16  ;;  %v10678_v16 = vld [vmem:[#allocation8 + $0x70] ss:$8 sps:$4 sm:$0xff]  }
 0x165   :  { %738 = vmatprep.mubr.bf16.mxu0 %v10594_v17  ;;  %1597 = vmatpush1.bf16.msra.mxu0 %v10678_v16 }
 0x166   :  { %1598 = vmatprep.subr.bf16.mxu0 %v10683_v18 }
 0x16c   :  { %739 = vmatmul.mubr.bf16.gmra.mrb[44].mxu0 %v10596_v19 }
 0x16d   :  { %748 = vmatprep.mubr.bf16.mxu0 %v10597_v20 }
 0x174   :  { %749 = vmatmul.mubr.bf16.gmra.mrb[48].mxu0 %v10599_v25  ;;  %v10681_v25 = vld [vmem:[#allocation8 + $0x80] ss:$8 sps:$4 sm:$0xff]  }
 0x175   :  { %758 = vmatprep.mubr.bf16.mxu0 %v10600_v26  ;;  %1599 = vmatpush1.bf16.msra.mxu0 %v10681_v25 }
 0x17c   :  { %759 = vmatmul.mubr.bf16.gmra.mrb[52].mxu0 %v10602_v27 }
 0x17d   :  { %768 = vmatprep.mubr.bf16.mxu0 %v10603_v28  ;;  %v10686_v28 = vld [vmem:[#allocation8 + $0x94] ss:$8 sps:$4 sm:$0xff]  }
 0x17e   :  { %1600 = vmatprep.subr.bf16.mxu0 %v10686_v28 }
 0x17f   :  { %1601 = vmatpush1.bf16.msra.mxu0 %v10684_v34 }
 0x180   :  { %1602 = vmatprep.subr.bf16.mxu0 %v10689_v36 }
 0x184   :  { %769 = vmatmul.mubr.bf16.gmra.mrb[56].mxu0 %v10605_v29 }
 0x185   :  { %778 = vmatprep.mubr.bf16.mxu0 %v10606_v30 }
 0x18c   :  { %779 = vmatmul.mubr.bf16.gmra.mrb[60].mxu0 %v10608_v31 }
 0x1e7   :  { %v630_v47 = vpop.f32.mrb[0].mxu0 }
 0x1e8   :  { %v631_v48 = vadd.f32 %v630_v47, %v11811_v43  ;;  %v632_v49 = vpop.f32.mrb[1].mxu0 }
 0x1e9   :  { %v634_v50 = vpop.f32.mrb[2].mxu0  ;;  %v633_v51 = vadd.f32 %v632_v49, %v11814_v44 }
 0x1ea   :  { %v635_v52 = vadd.f32 %v634_v50, %v11811_v43  ;;  %v636_v53 = vpop.f32.mrb[3].mxu0  ;;  %v789_v58 = vmax.f32 %v631_v48, 0.0  ;;  %v10687_v48 = vld [vmem:[#allocation8 + $0xa0] ss:$8 sps:$4 sm:$0xff]  }
 0x1eb   :  { %v637_v56 = vadd.f32 %v636_v53, %v11814_v44  ;;  %v790_v60 = vmax.f32 %v633_v51, 0.0  ;;  %v10692_v51 = vld [vmem:[#allocation8 + $0xb4] ss:$8 sps:$4 sm:$0xff]   ;;  %1603 = vmatpush1.bf16.msra.mxu0 %v10687_v48 }
 0x1ec   :  { %v791_v59 = vmax.f32 %v635_v52, 0.0  ;;  %1604 = vmatprep.subr.bf16.mxu0 %v10692_v51 }
 0x1ed   :  { %v792_v61 = vmax.f32 %v637_v56, 0.0 }
 0x1ee   :  { %v853_v63 = vpack.c.bf16 %v791_v59, %v789_v58  ;;  %v10695_v59 = vld [vmem:[#allocation8 + $0xc4] ss:$8 sps:$4 sm:$0xff]  }
 0x1ef   :  { %v640_v1 = vpop.f32.mrb[4].mxu0  ;;  %v854_v2 = vpack.c.bf16 %v792_v61, %v790_v60  ;;  %1605 = vmatpush1.bf16.msra.mxu0 %v10690_v57 }
 0x1f0   :  { %v641_v3 = vadd.f32 %v640_v1, %v11811_v43  ;;  %v642_v4 = vpop.f32.mrb[5].mxu0  ;;  %1606 = vmatprep.subr.bf16.mxu0 %v10695_v59 }
 0x1f1   :  { %v643_v5 = vadd.f32 %v642_v4, %v11814_v44  ;;  %v644_v6 = vpop.f32.mrb[6].mxu0  ;;  %1121 = vmatprep.mubr.bf16.mxu1 %v854_v2  ;;  %v10693_v2 = vld [vmem:[#allocation8 + $0xc0] ss:$8 sps:$4 sm:$0xff]  }
 0x1f2   :  { %v645_v8 = vadd.f32 %v644_v6, %v11811_v43  ;;  %v646_v9 = vpop.f32.mrb[7].mxu0  ;;  %1122 = vmatmul.mubr.bf16.vlgmr.msra.gmra.mrb[0].mxu1 %v853_v63  ;;  %v793_v12 = vmax.f32 %v641_v3, 0.0 }
 0x1f3   :  { %v647_v11 = vadd.f32 %v646_v9, %v11814_v44  ;;  %v794_v14 = vmax.f32 %v643_v5, 0.0  ;;  %v10698_v5 = vld [vmem:[#allocation8 + $0xd4] ss:$8 sps:$4 sm:$0xff]   ;;  %1607 = vmatpush1.bf16.msra.mxu0 %v10693_v2 }
 0x1f4   :  { %v795_v13 = vmax.f32 %v645_v8, 0.0  ;;  %1608 = vmatprep.subr.bf16.mxu0 %v10698_v5 }
 0x1f5   :  { %v796_v15 = vmax.f32 %v647_v11, 0.0  ;;  %v10696_v11 = vld [vmem:[#allocation8 + $0xd0] ss:$8 sps:$4 sm:$0xff]  }
 0x1f6   :  { %v855_v17 = vpack.c.bf16 %v795_v13, %v793_v12  ;;  %v10701_v13 = vld [vmem:[#allocation8 + $0xe4] ss:$8 sps:$4 sm:$0xff]  }
 0x1f7   :  { %v650_v19 = vpop.f32.mrb[8].mxu0  ;;  %v856_v20 = vpack.c.bf16 %v796_v15, %v794_v14  ;;  %1609 = vmatpush1.bf16.msra.mxu0 %v10696_v11 }
 0x1f8   :  { %v651_v21 = vadd.f32 %v650_v19, %v11811_v43  ;;  %v652_v22 = vpop.f32.mrb[9].mxu0  ;;  %1610 = vmatprep.subr.bf16.mxu0 %v10701_v13 }
 0x1f9   :  { %v653_v23 = vadd.f32 %v652_v22, %v11814_v44  ;;  %v654_v24 = vpop.f32.mrb[10].mxu0  ;;  %1131 = vmatprep.mubr.bf16.mxu1 %v856_v20  ;;  %v10699_v20 = vld [vmem:[#allocation8 + $0xe0] ss:$8 sps:$4 sm:$0xff]  }
 0x1fa   :  { %v655_v26 = vadd.f32 %v654_v24, %v11811_v43  ;;  %v656_v27 = vpop.f32.mrb[11].mxu0  ;;  %1132 = vmatmul.mubr.bf16.gmra.mrb[4].mxu1 %v855_v17  ;;  %v797_v30 = vmax.f32 %v651_v21, 0.0 }
 0x1fb   :  { %v657_v29 = vadd.f32 %v656_v27, %v11814_v44  ;;  %v798_v32 = vmax.f32 %v653_v23, 0.0  ;;  %1611 = vmatpush1.bf16.msra.mxu0 %v10699_v20 }
 0x1fc   :  { %v799_v31 = vmax.f32 %v655_v26, 0.0 }
 0x1fd   :  { %v800_v33 = vmax.f32 %v657_v29, 0.0 }
 0x1fe   :  { %v857_v35 = vpack.c.bf16 %v799_v31, %v797_v30 }
 0x1ff   :  { %v660_v39 = vpop.f32.mrb[12].mxu0  ;;  %v858_v41 = vpack.c.bf16 %v800_v33, %v798_v32 }
 0x200   :  { %v661_v42 = vadd.f32 %v660_v39, %v11811_v43  ;;  %v662_v45 = vpop.f32.mrb[13].mxu0 }
 0x201   :  { %v663_v46 = vadd.f32 %v662_v45, %v11814_v44  ;;  %v664_v47 = vpop.f32.mrb[14].mxu0  ;;  %1141 = vmatprep.mubr.bf16.mxu1 %v858_v41 }
 0x202   :  { %v665_v49 = vadd.f32 %v664_v47, %v11811_v43  ;;  %v666_v50 = vpop.f32.mrb[15].mxu0  ;;  %1142 = vmatmul.mubr.bf16.gmra.mrb[8].mxu1 %v857_v35  ;;  %v801_v53 = vmax.f32 %v661_v42, 0.0 }
 0x203   :  { %v667_v52 = vadd.f32 %v666_v50, %v11814_v44  ;;  %v802_v55 = vmax.f32 %v663_v46, 0.0 }
 0x204   :  { %v803_v54 = vmax.f32 %v665_v49, 0.0 }
 0x205   :  { %v804_v56 = vmax.f32 %v667_v52, 0.0 }
 0x206   :  { %v859_v58 = vpack.c.bf16 %v803_v54, %v801_v53 }
 0x207   :  { %v670_v60 = vpop.f32.mrb[16].mxu0  ;;  %v860_v61 = vpack.c.bf16 %v804_v56, %v802_v55 }
 0x208   :  { %v671_v62 = vadd.f32 %v670_v60, %v11811_v43  ;;  %v672_v63 = vpop.f32.mrb[17].mxu0 }
 0x209   :  { %v673_v0 = vadd.f32 %v672_v63, %v11814_v44  ;;  %v674_v1 = vpop.f32.mrb[18].mxu0  ;;  %1151 = vmatprep.mubr.bf16.mxu1 %v860_v61 }
 0x20a   :  { %v675_v3 = vadd.f32 %v674_v1, %v11811_v43  ;;  %v676_v4 = vpop.f32.mrb[19].mxu0  ;;  %1152 = vmatmul.mubr.bf16.gmra.mrb[12].mxu1 %v859_v58  ;;  %v805_v7 = vmax.f32 %v671_v62, 0.0 }
 0x20b   :  { %v677_v6 = vadd.f32 %v676_v4, %v11814_v44  ;;  %v806_v9 = vmax.f32 %v673_v0, 0.0 }
 0x20c   :  { %v807_v8 = vmax.f32 %v675_v3, 0.0 }
 0x20d   :  { %v808_v10 = vmax.f32 %v677_v6, 0.0 }
 0x20e   :  { %v861_v12 = vpack.c.bf16 %v807_v8, %v805_v7 }
 0x20f   :  { %v680_v14 = vpop.f32.mrb[20].mxu0  ;;  %v862_v15 = vpack.c.bf16 %v808_v10, %v806_v9 }
 0x210   :  { %v681_v16 = vadd.f32 %v680_v14, %v11811_v43  ;;  %v682_v17 = vpop.f32.mrb[21].mxu0 }
 0x211   :  { %v683_v18 = vadd.f32 %v682_v17, %v11814_v44  ;;  %v684_v19 = vpop.f32.mrb[22].mxu0  ;;  %1161 = vmatprep.mubr.bf16.mxu1 %v862_v15 }
 0x212   :  { %v685_v21 = vadd.f32 %v684_v19, %v11811_v43  ;;  %v686_v22 = vpop.f32.mrb[23].mxu0  ;;  %1162 = vmatmul.mubr.bf16.gmra.mrb[16].mxu1 %v861_v12  ;;  %v809_v24 = vmax.f32 %v681_v16, 0.0 }
 0x213   :  { %v687_v23 = vadd.f32 %v686_v22, %v11814_v44  ;;  %v810_v26 = vmax.f32 %v683_v18, 0.0 }
 0x214   :  { %v811_v25 = vmax.f32 %v685_v21, 0.0 }
 0x215   :  { %v812_v27 = vmax.f32 %v687_v23, 0.0 }
 0x216   :  { %v863_v28 = vpack.c.bf16 %v811_v25, %v809_v24 }
 0x217   :  { %v690_v29 = vpop.f32.mrb[24].mxu0  ;;  %v864_v30 = vpack.c.bf16 %v812_v27, %v810_v26 }
 0x218   :  { %v691_v31 = vadd.f32 %v690_v29, %v11811_v43  ;;  %v692_v32 = vpop.f32.mrb[25].mxu0 }
 0x219   :  { %v693_v33 = vadd.f32 %v692_v32, %v11814_v44  ;;  %v694_v34 = vpop.f32.mrb[26].mxu0  ;;  %1171 = vmatprep.mubr.bf16.mxu1 %v864_v30 }
 0x21a   :  { %v695_v35 = vadd.f32 %v694_v34, %v11811_v43  ;;  %v696_v36 = vpop.f32.mrb[27].mxu0  ;;  %1172 = vmatmul.mubr.bf16.gmra.mrb[20].mxu1 %v863_v28  ;;  %v813_v41 = vmax.f32 %v691_v31, 0.0 }
 0x21b   :  { %v697_v39 = vadd.f32 %v696_v36, %v11814_v44  ;;  %v814_v45 = vmax.f32 %v693_v33, 0.0 }
 0x21c   :  { %v815_v42 = vmax.f32 %v695_v35, 0.0 }
 0x21d   :  { %v816_v46 = vmax.f32 %v697_v39, 0.0 }
 0x21e   :  { %v865_v47 = vpack.c.bf16 %v815_v42, %v813_v41 }
 0x21f   :  { %v700_v48 = vpop.f32.mrb[28].mxu0  ;;  %v866_v49 = vpack.c.bf16 %v816_v46, %v814_v45 }
 0x220   :  { %v701_v50 = vadd.f32 %v700_v48, %v11811_v43  ;;  %v702_v51 = vpop.f32.mrb[29].mxu0 }
 0x221   :  { %v703_v52 = vadd.f32 %v702_v51, %v11814_v44  ;;  %v704_v53 = vpop.f32.mrb[30].mxu0  ;;  %1181 = vmatprep.mubr.bf16.mxu1 %v866_v49 }
 0x222   :  { %v705_v54 = vadd.f32 %v704_v53, %v11811_v43  ;;  %v706_v55 = vpop.f32.mrb[31].mxu0  ;;  %1182 = vmatmul.mubr.bf16.gmra.mrb[24].mxu1 %v865_v47  ;;  %v817_v57 = vmax.f32 %v701_v50, 0.0 }
 0x223   :  { %v707_v56 = vadd.f32 %v706_v55, %v11814_v44  ;;  %v818_v59 = vmax.f32 %v703_v52, 0.0 }
 0x224   :  { %v819_v58 = vmax.f32 %v705_v54, 0.0 }
 0x225   :  { %v820_v60 = vmax.f32 %v707_v56, 0.0 }
 0x226   :  { %v867_v61 = vpack.c.bf16 %v819_v58, %v817_v57 }
 0x227   :  { %v710_v62 = vpop.f32.mrb[32].mxu0  ;;  %v868_v63 = vpack.c.bf16 %v820_v60, %v818_v59 }
 0x228   :  { %v711_v0 = vadd.f32 %v710_v62, %v11811_v43  ;;  %v712_v1 = vpop.f32.mrb[33].mxu0 }
 0x229   :  { %v713_v2 = vadd.f32 %v712_v1, %v11814_v44  ;;  %v714_v3 = vpop.f32.mrb[34].mxu0  ;;  %1191 = vmatprep.mubr.bf16.mxu1 %v868_v63 }
 0x22a   :  { %v715_v4 = vadd.f32 %v714_v3, %v11811_v43  ;;  %v716_v5 = vpop.f32.mrb[35].mxu0  ;;  %1192 = vmatmul.mubr.bf16.gmra.mrb[28].mxu1 %v867_v61  ;;  %v821_v7 = vmax.f32 %v711_v0, 0.0  ;;  %v10702_v3 = vld [vmem:[#allocation8 + $0xf0] ss:$8 sps:$4 sm:$0xff]  }
 0x22b   :  { %v717_v6 = vadd.f32 %v716_v5, %v11814_v44  ;;  %v822_v9 = vmax.f32 %v713_v2, 0.0 }
 0x22c   :  { %v823_v8 = vmax.f32 %v715_v4, 0.0  ;;  %v10704_v4 = vld [vmem:[#allocation8 + $0xf4] ss:$8 sps:$4 sm:$0xff]  }
 0x22d   :  { %v824_v10 = vmax.f32 %v717_v6, 0.0  ;;  %1612 = vmatprep.subr.bf16.mxu0 %v10704_v4 }
 0x22e   :  { %v869_v11 = vpack.c.bf16 %v823_v8, %v821_v7  ;;  %1613 = vmatpush1.bf16.msra.mxu0 %v10702_v3 }
 0x22f   :  { %v720_v12 = vpop.f32.mrb[36].mxu0  ;;  %v870_v13 = vpack.c.bf16 %v824_v10, %v822_v9 }
 0x230   :  { %v721_v14 = vadd.f32 %v720_v12, %v11811_v43  ;;  %v722_v15 = vpop.f32.mrb[37].mxu0 }
 0x231   :  { %v723_v16 = vadd.f32 %v722_v15, %v11814_v44  ;;  %v724_v17 = vpop.f32.mrb[38].mxu0  ;;  %1201 = vmatprep.mubr.bf16.mxu1 %v870_v13 }
 0x232   :  { %v725_v18 = vadd.f32 %v724_v17, %v11811_v43  ;;  %v726_v19 = vpop.f32.mrb[39].mxu0  ;;  %1202 = vmatmul.mubr.bf16.gmra.mrb[32].mxu1 %v869_v11  ;;  %v825_v21 = vmax.f32 %v721_v14, 0.0 }
 0x233   :  { %v727_v20 = vadd.f32 %v726_v19, %v11814_v44  ;;  %v826_v23 = vmax.f32 %v723_v16, 0.0 }
 0x234   :  { %v827_v22 = vmax.f32 %v725_v18, 0.0 }
 0x235   :  { %v828_v24 = vmax.f32 %v727_v20, 0.0 }
 0x236   :  { %v871_v25 = vpack.c.bf16 %v827_v22, %v825_v21 }
 0x237   :  { %v730_v26 = vpop.f32.mrb[40].mxu0  ;;  %v872_v27 = vpack.c.bf16 %v828_v24, %v826_v23 }
 0x238   :  { %v731_v28 = vadd.f32 %v730_v26, %v11811_v43  ;;  %v732_v29 = vpop.f32.mrb[41].mxu0 }
 0x239   :  { %v733_v30 = vadd.f32 %v732_v29, %v11814_v44  ;;  %v734_v31 = vpop.f32.mrb[42].mxu0  ;;  %1211 = vmatprep.mubr.bf16.mxu1 %v872_v27 }
 0x23a   :  { %v735_v32 = vadd.f32 %v734_v31, %v11811_v43  ;;  %v736_v33 = vpop.f32.mrb[43].mxu0  ;;  %1212 = vmatmul.mubr.bf16.gmra.mrb[36].mxu1 %v871_v25  ;;  %v829_v35 = vmax.f32 %v731_v28, 0.0 }
 0x23b   :  { %v737_v34 = vadd.f32 %v736_v33, %v11814_v44  ;;  %v830_v39 = vmax.f32 %v733_v30, 0.0 }
 0x23c   :  { %v831_v36 = vmax.f32 %v735_v32, 0.0 }
 0x23d   :  { %v832_v41 = vmax.f32 %v737_v34, 0.0 }
 0x23e   :  { %v873_v42 = vpack.c.bf16 %v831_v36, %v829_v35 }
 0x23f   :  { %v740_v45 = vpop.f32.mrb[44].mxu0  ;;  %v874_v46 = vpack.c.bf16 %v832_v41, %v830_v39 }
 0x240   :  { %v741_v47 = vadd.f32 %v740_v45, %v11811_v43  ;;  %v742_v48 = vpop.f32.mrb[45].mxu0 }
 0x241   :  { %v743_v49 = vadd.f32 %v742_v48, %v11814_v44  ;;  %v744_v50 = vpop.f32.mrb[46].mxu0  ;;  %1221 = vmatprep.mubr.bf16.mxu1 %v874_v46 }
 0x242   :  { %v745_v51 = vadd.f32 %v744_v50, %v11811_v43  ;;  %v746_v52 = vpop.f32.mrb[47].mxu0  ;;  %1222 = vmatmul.mubr.bf16.gmra.mrb[40].mxu1 %v873_v42  ;;  %v833_v54 = vmax.f32 %v741_v47, 0.0 }
 0x243   :  { %v747_v53 = vadd.f32 %v746_v52, %v11814_v44  ;;  %v834_v56 = vmax.f32 %v743_v49, 0.0 }
 0x244   :  { %v835_v55 = vmax.f32 %v745_v51, 0.0 }
 0x245   :  { %v836_v57 = vmax.f32 %v747_v53, 0.0 }
 0x246   :  { %v875_v58 = vpack.c.bf16 %v835_v55, %v833_v54 }
 0x247   :  { %v750_v59 = vpop.f32.mrb[48].mxu0  ;;  %v876_v60 = vpack.c.bf16 %v836_v57, %v834_v56 }
 0x248   :  { %v751_v61 = vadd.f32 %v750_v59, %v11811_v43  ;;  %v752_v62 = vpop.f32.mrb[49].mxu0  ;;  %v10705_v59 = vld [vmem:[#allocation10] ss:$8 sps:$4 sm:$0xff]  }
 0x249   :  { %v753_v63 = vadd.f32 %v752_v62, %v11814_v44  ;;  %v754_v0 = vpop.f32.mrb[50].mxu0  ;;  %1231 = vmatprep.mubr.bf16.mxu1 %v876_v60  ;;  %v10707_v60 = vld [vmem:[#allocation10 + $0x4] ss:$8 sps:$4 sm:$0xff]   ;;  %v10710_v62 = vld [vmem:[#allocation10 + $0x14] ss:$8 sps:$4 sm:$0xff]  }
 0x24a   :  { %v755_v1 = vadd.f32 %v754_v0, %v11811_v43  ;;  %v756_v2 = vpop.f32.mrb[51].mxu0  ;;  %1232 = vmatmul.mubr.bf16.gmra.mrb[44].mxu1 %v875_v58  ;;  %v837_v6 = vmax.f32 %v751_v61, 0.0  ;;  %2075 = vmatprep.subr.bf16.mxu1 %v10707_v60  ;;  %v10708_v61 = vld [vmem:[#allocation10 + $0x10] ss:$8 sps:$4 sm:$0xff]  }
 0x24b   :  { %v757_v5 = vadd.f32 %v756_v2, %v11814_v44  ;;  %v838_v8 = vmax.f32 %v753_v63, 0.0  ;;  %2076 = vmatpush1.bf16.msra.mxu1 %v10705_v59  ;;  %v10713_v63 = vld [vmem:[#allocation10 + $0x24] ss:$8 sps:$4 sm:$0xff]   ;;  %v10714_v0 = vld [vmem:[#allocation10 + $0x30] ss:$8 sps:$4 sm:$0xff]  }
 0x24c   :  { %v839_v7 = vmax.f32 %v755_v1, 0.0  ;;  %2077 = vmatprep.subr.bf16.mxu1 %v10710_v62  ;;  %v10716_v1 = vld [vmem:[#allocation10 + $0x34] ss:$8 sps:$4 sm:$0xff]   ;;  %v10732_v60 = vld [vmem:[#allocation10 + $0x90] ss:$8 sps:$4 sm:$0xff]  }
 0x24d   :  { %v840_v9 = vmax.f32 %v757_v5, 0.0  ;;  %v10737_v62 = vld [vmem:[#allocation10 + $0xa4] ss:$8 sps:$4 sm:$0xff]  }
 0x24e   :  { %v877_v10 = vpack.c.bf16 %v839_v7, %v837_v6 }
 0x24f   :  { %v760_v11 = vpop.f32.mrb[52].mxu0  ;;  %v878_v12 = vpack.c.bf16 %v840_v9, %v838_v8  ;;  %2078 = vmatpush1.bf16.msra.mxu1 %v10708_v61 }
 0x250   :  { %v761_v13 = vadd.f32 %v760_v11, %v11811_v43  ;;  %v762_v14 = vpop.f32.mrb[53].mxu0  ;;  %2079 = vmatprep.subr.bf16.mxu1 %v10713_v63  ;;  %v10717_v11 = vld [vmem:[#allocation10 + $0x40] ss:$8 sps:$4 sm:$0xff]  }
 0x251   :  { %v763_v15 = vadd.f32 %v762_v14, %v11814_v44  ;;  %v764_v16 = vpop.f32.mrb[54].mxu0  ;;  %1241 = vmatprep.mubr.bf16.mxu1 %v878_v12  ;;  %v10719_v12 = vld [vmem:[#allocation10 + $0x44] ss:$8 sps:$4 sm:$0xff]   ;;  %v10722_v14 = vld [vmem:[#allocation10 + $0x54] ss:$8 sps:$4 sm:$0xff]  }
 0x252   :  { %v765_v17 = vadd.f32 %v764_v16, %v11811_v43  ;;  %v766_v18 = vpop.f32.mrb[55].mxu0  ;;  %1242 = vmatmul.mubr.bf16.gmra.mrb[48].mxu1 %v877_v10  ;;  %v841_v20 = vmax.f32 %v761_v13, 0.0 }
 0x253   :  { %v767_v19 = vadd.f32 %v766_v18, %v11814_v44  ;;  %v842_v22 = vmax.f32 %v763_v15, 0.0 }
 0x254   :  { %v843_v21 = vmax.f32 %v765_v17, 0.0 }
 0x255   :  { %v844_v23 = vmax.f32 %v767_v19, 0.0  ;;  %v10720_v19 = vld [vmem:[#allocation10 + $0x50] ss:$8 sps:$4 sm:$0xff]  }
 0x256   :  { %v879_v24 = vpack.c.bf16 %v843_v21, %v841_v20  ;;  %v10725_v21 = vld [vmem:[#allocation10 + $0x64] ss:$8 sps:$4 sm:$0xff]  }
 0x257   :  { %v770_v25 = vpop.f32.mrb[56].mxu0  ;;  %v880_v26 = vpack.c.bf16 %v844_v23, %v842_v22 }
 0x258   :  { %v771_v27 = vadd.f32 %v770_v25, %v11811_v43  ;;  %v772_v28 = vpop.f32.mrb[57].mxu0 }
 0x259   :  { %v773_v29 = vadd.f32 %v772_v28, %v11814_v44  ;;  %v774_v30 = vpop.f32.mrb[58].mxu0  ;;  %1251 = vmatprep.mubr.bf16.mxu1 %v880_v26  ;;  %v10723_v28 = vld [vmem:[#allocation10 + $0x60] ss:$8 sps:$4 sm:$0xff]  }
 0x25a   :  { %v775_v31 = vadd.f32 %v774_v30, %v11811_v43  ;;  %v776_v32 = vpop.f32.mrb[59].mxu0  ;;  %1252 = vmatmul.mubr.bf16.gmra.mrb[52].mxu1 %v879_v24  ;;  %v845_v34 = vmax.f32 %v771_v27, 0.0 }
 0x25b   :  { %v777_v33 = vadd.f32 %v776_v32, %v11814_v44  ;;  %v846_v36 = vmax.f32 %v773_v29, 0.0 }
 0x25c   :  { %v847_v35 = vmax.f32 %v775_v31, 0.0  ;;  %v10728_v31 = vld [vmem:[#allocation10 + $0x74] ss:$8 sps:$4 sm:$0xff]  }
 0x25d   :  { %v848_v39 = vmax.f32 %v777_v33, 0.0 }
 0x25e   :  { %v881_v41 = vpack.c.bf16 %v847_v35, %v845_v34 }
 0x25f   :  { %v780_v42 = vpop.f32.mrb[60].mxu0  ;;  %v882_v45 = vpack.c.bf16 %v848_v39, %v846_v36  ;;  %v10726_v39 = vld [vmem:[#allocation10 + $0x70] ss:$8 sps:$4 sm:$0xff]  }
 0x260   :  { %v781_v46 = vadd.f32 %v780_v42, %v11811_v43  ;;  %v782_v47 = vpop.f32.mrb[61].mxu0  ;;  %v10731_v42 = vld [vmem:[#allocation10 + $0x84] ss:$8 sps:$4 sm:$0xff]  }
 0x261   :  { %v783_v48 = vadd.f32 %v782_v47, %v11814_v44  ;;  %v784_v49 = vpop.f32.mrb[62].mxu0  ;;  %1261 = vmatprep.mubr.bf16.mxu1 %v882_v45 }
 0x262   :  { %v785_v50 = vadd.f32 %v784_v49, %v11811_v43  ;;  %v786_v51 = vpop.f32.mrb[63].mxu0  ;;  %1262 = vmatmul.mubr.bf16.gmra.mrb[56].mxu1 %v881_v41  ;;  %v849_v53 = vmax.f32 %v781_v46, 0.0  ;;  %v10711_v43 = vld [vmem:[#allocation10 + $0x20] ss:$8 sps:$4 sm:$0xff]  }
 0x263   :  { %v787_v52 = vadd.f32 %v786_v51, %v11814_v44  ;;  %v850_v55 = vmax.f32 %v783_v48, 0.0  ;;  %v917_v44 = vld [vmem:[%s13533_s11] sm:$0x3]  ;;  %2080 = vmatpush1.bf16.msra.mxu1 %v10711_v43 }
 0x264   :  { %v851_v54 = vmax.f32 %v785_v50, 0.0  ;;  %v11884_v2 = vrot.slane %v917_v44, %v11802_v38  ;;  %2081 = vmatprep.subr.bf16.mxu1 %v10716_v1  ;;  %v11887_v3 = vrot.slane %v917_v44, %v11808_v40  ;;  %v10729_v51 = vld [vmem:[#allocation10 + $0x80] ss:$8 sps:$4 sm:$0xff]  }
 0x265   :  { %v852_v56 = vmax.f32 %v787_v52, 0.0 }
 0x266   :  { %v883_v57 = vpack.c.bf16 %v851_v54, %v849_v53  ;;  %v10734_v54 = vld [vmem:[#allocation10 + $0x94] ss:$8 sps:$4 sm:$0xff]  }
 0x267   :  { %v884_v58 = vpack.c.bf16 %v852_v56, %v850_v55  ;;  %2082 = vmatpush1.bf16.msra.mxu1 %v10714_v0 }
 0x268   :  { %2083 = vmatprep.subr.bf16.mxu1 %v10719_v12 }
 0x269   :  { %1271 = vmatprep.mubr.bf16.mxu1 %v884_v58 }
 0x26a   :  { %1272 = vmatmul.mubr.bf16.gmra.mrb[60].mxu1 %v883_v57 }
 0x26b   :  { %2084 = vmatpush1.bf16.msra.mxu1 %v10717_v11 }
 0x26c   :  { %2085 = vmatprep.subr.bf16.mxu1 %v10722_v14  ;;  %v10738_v14 = vld [vmem:[#allocation10 + $0xb0] ss:$8 sps:$4 sm:$0xff]  }
 0x26f   :  { %2086 = vmatpush1.bf16.msra.mxu1 %v10720_v19 }
 0x270   :  { %2087 = vmatprep.subr.bf16.mxu1 %v10725_v21 }
 0x273   :  { %2088 = vmatpush1.bf16.msra.mxu1 %v10723_v28 }
 0x274   :  { %2089 = vmatprep.subr.bf16.mxu1 %v10728_v31 }
 0x277   :  { %2090 = vmatpush1.bf16.msra.mxu1 %v10726_v39 }
 0x278   :  { %2091 = vmatprep.subr.bf16.mxu1 %v10731_v42 }
 0x27b   :  { %2092 = vmatpush1.bf16.msra.mxu1 %v10729_v51 }
 0x27c   :  { %2093 = vmatprep.subr.bf16.mxu1 %v10734_v54 }
 0x27f   :  { %2094 = vmatpush1.bf16.msra.mxu1 %v10732_v60 }
 0x280   :  { %2095 = vmatprep.subr.bf16.mxu1 %v10737_v62 }
 0x2c5   :  { %v1123_v4 = vpop.f32.mrb[0].mxu1 }
 0x2c6   :  { %v1124_v5 = vadd.f32 %v1123_v4, %v11884_v2  ;;  %v1125_v6 = vpop.f32.mrb[1].mxu1 }
 0x2c7   :  { %v1127_v7 = vpop.f32.mrb[2].mxu1  ;;  %v1126_v8 = vadd.f32 %v1125_v6, %v11887_v3 }
 0x2c8   :  { %v1128_v9 = vadd.f32 %v1127_v7, %v11884_v2  ;;  %v1129_v10 = vpop.f32.mrb[3].mxu1  ;;  %v1282_v15 = vmax.f32 %v1124_v5, 0.0  ;;  %v10735_v5 = vld [vmem:[#allocation10 + $0xa0] ss:$8 sps:$4 sm:$0xff]  }
 0x2c9   :  { %v1130_v13 = vadd.f32 %v1129_v10, %v11887_v3  ;;  %v1283_v17 = vmax.f32 %v1126_v8, 0.0  ;;  %v10740_v8 = vld [vmem:[#allocation10 + $0xb4] ss:$8 sps:$4 sm:$0xff]   ;;  %2096 = vmatpush1.bf16.msra.mxu1 %v10735_v5 }
 0x2ca   :  { %v1284_v16 = vmax.f32 %v1128_v9, 0.0  ;;  %2097 = vmatprep.subr.bf16.mxu1 %v10740_v8 }
 0x2cb   :  { %v1285_v18 = vmax.f32 %v1130_v13, 0.0 }
 0x2cc   :  { %v1346_v20 = vpack.c.bf16 %v1284_v16, %v1282_v15  ;;  %v10743_v16 = vld [vmem:[#allocation10 + $0xc4] ss:$8 sps:$4 sm:$0xff]  }
 0x2cd   :  { %v1133_v22 = vpop.f32.mrb[4].mxu1  ;;  %v1347_v23 = vpack.c.bf16 %v1285_v18, %v1283_v17  ;;  %2098 = vmatpush1.bf16.msra.mxu1 %v10738_v14 }
 0x2ce   :  { %v1135_v24 = vpop.f32.mrb[5].mxu1  ;;  %v1134_v25 = vadd.f32 %v1133_v22, %v11884_v2  ;;  %2099 = vmatprep.subr.bf16.mxu1 %v10743_v16 }
 0x2cf   :  { %v1137_v26 = vpop.f32.mrb[6].mxu1  ;;  %1614 = vmatprep.mubr.bf16.mxu0 %v1347_v23  ;;  %v1136_v27 = vadd.f32 %v1135_v24, %v11887_v3  ;;  %v10741_v23 = vld [vmem:[#allocation10 + $0xc0] ss:$8 sps:$4 sm:$0xff]  }
 0x2d0   :  { %v1139_v29 = vpop.f32.mrb[7].mxu1  ;;  %1615 = vmatmul.mubr.bf16.vlgmr.msra.gmra.mrb[64].mxu0 %v1346_v20  ;;  %v1138_v30 = vadd.f32 %v1137_v26, %v11884_v2  ;;  %v1286_v33 = vmax.f32 %v1134_v25, 0.0  ;;  %v10746_v26 = vld [vmem:[#allocation10 + $0xd4] ss:$8 sps:$4 sm:$0xff]  }
 0x2d1   :  { %v1140_v32 = vadd.f32 %v1139_v29, %v11887_v3  ;;  %v1287_v35 = vmax.f32 %v1136_v27, 0.0  ;;  %2100 = vmatpush1.bf16.msra.mxu1 %v10741_v23 }
 0x2d2   :  { %v1288_v34 = vmax.f32 %v1138_v30, 0.0  ;;  %2101 = vmatprep.subr.bf16.mxu1 %v10746_v26 }
 0x2d3   :  { %v1289_v36 = vmax.f32 %v1140_v32, 0.0  ;;  %v10744_v32 = vld [vmem:[#allocation10 + $0xd0] ss:$8 sps:$4 sm:$0xff]  }
 0x2d4   :  { %v1348_v41 = vpack.c.bf16 %v1288_v34, %v1286_v33  ;;  %v10749_v34 = vld [vmem:[#allocation10 + $0xe4] ss:$8 sps:$4 sm:$0xff]  }
 0x2d5   :  { %v1143_v45 = vpop.f32.mrb[8].mxu1  ;;  %v1349_v46 = vpack.c.bf16 %v1289_v36, %v1287_v35  ;;  %2102 = vmatpush1.bf16.msra.mxu1 %v10744_v32 }
 0x2d6   :  { %v1145_v47 = vpop.f32.mrb[9].mxu1  ;;  %v1144_v48 = vadd.f32 %v1143_v45, %v11884_v2  ;;  %2103 = vmatprep.subr.bf16.mxu1 %v10749_v34 }
 0x2d7   :  { %v1147_v49 = vpop.f32.mrb[10].mxu1  ;;  %1624 = vmatprep.mubr.bf16.mxu0 %v1349_v46  ;;  %v1146_v50 = vadd.f32 %v1145_v47, %v11887_v3  ;;  %v10747_v46 = vld [vmem:[#allocation10 + $0xe0] ss:$8 sps:$4 sm:$0xff]  }
 0x2d8   :  { %v1149_v52 = vpop.f32.mrb[11].mxu1  ;;  %1625 = vmatmul.mubr.bf16.gmra.mrb[68].mxu0 %v1348_v41  ;;  %v1148_v53 = vadd.f32 %v1147_v49, %v11884_v2  ;;  %v1290_v56 = vmax.f32 %v1144_v48, 0.0 }
 0x2d9   :  { %v1150_v55 = vadd.f32 %v1149_v52, %v11887_v3  ;;  %v1291_v58 = vmax.f32 %v1146_v50, 0.0  ;;  %2104 = vmatpush1.bf16.msra.mxu1 %v10747_v46 }
 0x2da   :  { %v1292_v57 = vmax.f32 %v1148_v53, 0.0 }
 0x2db   :  { %v1293_v59 = vmax.f32 %v1150_v55, 0.0 }
 0x2dc   :  { %v1350_v61 = vpack.c.bf16 %v1292_v57, %v1290_v56 }
 0x2dd   :  { %v1153_v43 = vpop.f32.mrb[12].mxu1  ;;  %v1351_v63 = vpack.c.bf16 %v1293_v59, %v1291_v58 }
 0x2de   :  { %v1155_v44 = vpop.f32.mrb[13].mxu1  ;;  %v1154_v0 = vadd.f32 %v1153_v43, %v11884_v2 }
 0x2df   :  { %v1157_v1 = vpop.f32.mrb[14].mxu1  ;;  %1634 = vmatprep.mubr.bf16.mxu0 %v1351_v63  ;;  %v1156_v4 = vadd.f32 %v1155_v44, %v11887_v3 }
 0x2e0   :  { %v1159_v6 = vpop.f32.mrb[15].mxu1  ;;  %1635 = vmatmul.mubr.bf16.gmra.mrb[72].mxu0 %v1350_v61  ;;  %v1158_v7 = vadd.f32 %v1157_v1, %v11884_v2  ;;  %v1294_v10 = vmax.f32 %v1154_v0, 0.0 }
 0x2e1   :  { %v1160_v9 = vadd.f32 %v1159_v6, %v11887_v3  ;;  %v1295_v12 = vmax.f32 %v1156_v4, 0.0 }
 0x2e2   :  { %v1296_v11 = vmax.f32 %v1158_v7, 0.0 }
 0x2e3   :  { %v1297_v13 = vmax.f32 %v1160_v9, 0.0 }
 0x2e4   :  { %v1352_v15 = vpack.c.bf16 %v1296_v11, %v1294_v10 }
 0x2e5   :  { %v1163_v17 = vpop.f32.mrb[16].mxu1  ;;  %v1353_v18 = vpack.c.bf16 %v1297_v13, %v1295_v12 }
 0x2e6   :  { %v1165_v19 = vpop.f32.mrb[17].mxu1  ;;  %v1164_v20 = vadd.f32 %v1163_v17, %v11884_v2 }
 0x2e7   :  { %v1167_v21 = vpop.f32.mrb[18].mxu1  ;;  %1644 = vmatprep.mubr.bf16.mxu0 %v1353_v18  ;;  %v1166_v22 = vadd.f32 %v1165_v19, %v11887_v3 }
 0x2e8   :  { %v1169_v24 = vpop.f32.mrb[19].mxu1  ;;  %1645 = vmatmul.mubr.bf16.gmra.mrb[76].mxu0 %v1352_v15  ;;  %v1168_v25 = vadd.f32 %v1167_v21, %v11884_v2  ;;  %v1298_v28 = vmax.f32 %v1164_v20, 0.0 }
 0x2e9   :  { %v1170_v27 = vadd.f32 %v1169_v24, %v11887_v3  ;;  %v1299_v30 = vmax.f32 %v1166_v22, 0.0 }
 0x2ea   :  { %v1300_v29 = vmax.f32 %v1168_v25, 0.0 }
 0x2eb   :  { %v1301_v31 = vmax.f32 %v1170_v27, 0.0 }
 0x2ec   :  { %v1354_v33 = vpack.c.bf16 %v1300_v29, %v1298_v28 }
 0x2ed   :  { %v1173_v35 = vpop.f32.mrb[20].mxu1  ;;  %v1355_v36 = vpack.c.bf16 %v1301_v31, %v1299_v30 }
 0x2ee   :  { %v1175_v39 = vpop.f32.mrb[21].mxu1  ;;  %v1174_v41 = vadd.f32 %v1173_v35, %v11884_v2 }
 0x2ef   :  { %v1177_v42 = vpop.f32.mrb[22].mxu1  ;;  %1654 = vmatprep.mubr.bf16.mxu0 %v1355_v36  ;;  %v1176_v45 = vadd.f32 %v1175_v39, %v11887_v3 }
 0x2f0   :  { %v1179_v47 = vpop.f32.mrb[23].mxu1  ;;  %1655 = vmatmul.mubr.bf16.gmra.mrb[80].mxu0 %v1354_v33  ;;  %v1178_v48 = vadd.f32 %v1177_v42, %v11884_v2  ;;  %v1302_v50 = vmax.f32 %v1174_v41, 0.0 }
 0x2f1   :  { %v1180_v49 = vadd.f32 %v1179_v47, %v11887_v3  ;;  %v1303_v52 = vmax.f32 %v1176_v45, 0.0 }
 0x2f2   :  { %v1304_v51 = vmax.f32 %v1178_v48, 0.0 }
 0x2f3   :  { %v1305_v53 = vmax.f32 %v1180_v49, 0.0 }
 0x2f4   :  { %v1356_v54 = vpack.c.bf16 %v1304_v51, %v1302_v50 }
 0x2f5   :  { %v1183_v55 = vpop.f32.mrb[24].mxu1  ;;  %v1357_v56 = vpack.c.bf16 %v1305_v53, %v1303_v52 }
 0x2f6   :  { %v1185_v57 = vpop.f32.mrb[25].mxu1  ;;  %v1184_v58 = vadd.f32 %v1183_v55, %v11884_v2 }
 0x2f7   :  { %v1187_v59 = vpop.f32.mrb[26].mxu1  ;;  %1664 = vmatprep.mubr.bf16.mxu0 %v1357_v56  ;;  %v1186_v60 = vadd.f32 %v1185_v57, %v11887_v3 }
 0x2f8   :  { %v1189_v61 = vpop.f32.mrb[27].mxu1  ;;  %1665 = vmatmul.mubr.bf16.gmra.mrb[84].mxu0 %v1356_v54  ;;  %v1188_v62 = vadd.f32 %v1187_v59, %v11884_v2  ;;  %v1306_v63 = vmax.f32 %v1184_v58, 0.0 }
 0x2f9   :  { %v1190_v43 = vadd.f32 %v1189_v61, %v11887_v3  ;;  %v1307_v0 = vmax.f32 %v1186_v60, 0.0 }
 0x2fa   :  { %v1308_v44 = vmax.f32 %v1188_v62, 0.0 }
 0x2fb   :  { %v1309_v1 = vmax.f32 %v1190_v43, 0.0 }
 0x2fc   :  { %v1358_v4 = vpack.c.bf16 %v1308_v44, %v1306_v63 }
 0x2fd   :  { %v1193_v5 = vpop.f32.mrb[28].mxu1  ;;  %v1359_v6 = vpack.c.bf16 %v1309_v1, %v1307_v0 }
 0x2fe   :  { %v1195_v7 = vpop.f32.mrb[29].mxu1  ;;  %v1194_v8 = vadd.f32 %v1193_v5, %v11884_v2 }
 0x2ff   :  { %v1197_v9 = vpop.f32.mrb[30].mxu1  ;;  %1674 = vmatprep.mubr.bf16.mxu0 %v1359_v6  ;;  %v1196_v10 = vadd.f32 %v1195_v7, %v11887_v3 }
 0x300   :  { %v1199_v11 = vpop.f32.mrb[31].mxu1  ;;  %1675 = vmatmul.mubr.bf16.gmra.mrb[88].mxu0 %v1358_v4  ;;  %v1198_v12 = vadd.f32 %v1197_v9, %v11884_v2  ;;  %v1310_v14 = vmax.f32 %v1194_v8, 0.0 }
 0x301   :  { %v1200_v13 = vadd.f32 %v1199_v11, %v11887_v3  ;;  %v1311_v16 = vmax.f32 %v1196_v10, 0.0 }
 0x302   :  { %v1312_v15 = vmax.f32 %v1198_v12, 0.0 }
 0x303   :  { %v1313_v17 = vmax.f32 %v1200_v13, 0.0 }
 0x304   :  { %v1360_v18 = vpack.c.bf16 %v1312_v15, %v1310_v14 }
 0x305   :  { %v1203_v19 = vpop.f32.mrb[32].mxu1  ;;  %v1361_v20 = vpack.c.bf16 %v1313_v17, %v1311_v16 }
 0x306   :  { %v1205_v21 = vpop.f32.mrb[33].mxu1  ;;  %v1204_v22 = vadd.f32 %v1203_v19, %v11884_v2 }
 0x307   :  { %v1207_v23 = vpop.f32.mrb[34].mxu1  ;;  %1684 = vmatprep.mubr.bf16.mxu0 %v1361_v20  ;;  %v1206_v24 = vadd.f32 %v1205_v21, %v11887_v3 }
 0x308   :  { %v1209_v25 = vpop.f32.mrb[35].mxu1  ;;  %1685 = vmatmul.mubr.bf16.gmra.mrb[92].mxu0 %v1360_v18  ;;  %v1208_v26 = vadd.f32 %v1207_v23, %v11884_v2  ;;  %v1314_v28 = vmax.f32 %v1204_v22, 0.0 }
 0x309   :  { %v1210_v27 = vadd.f32 %v1209_v25, %v11887_v3  ;;  %v1315_v30 = vmax.f32 %v1206_v24, 0.0  ;;  %v10750_v24 = vld [vmem:[#allocation10 + $0xf0] ss:$8 sps:$4 sm:$0xff]   ;;  %v10752_v25 = vld [vmem:[#allocation10 + $0xf4] ss:$8 sps:$4 sm:$0xff]  }
 0x30a   :  { %v1316_v29 = vmax.f32 %v1208_v26, 0.0  ;;  %2105 = vmatprep.subr.bf16.mxu1 %v10752_v25 }
 0x30b   :  { %v1317_v31 = vmax.f32 %v1210_v27, 0.0  ;;  %2106 = vmatpush1.bf16.msra.mxu1 %v10750_v24 }
 0x30c   :  { %v1362_v32 = vpack.c.bf16 %v1316_v29, %v1314_v28 }
 0x30d   :  { %v1213_v33 = vpop.f32.mrb[36].mxu1  ;;  %v1363_v34 = vpack.c.bf16 %v1317_v31, %v1315_v30 }
 0x30e   :  { %v1215_v35 = vpop.f32.mrb[37].mxu1  ;;  %v1214_v36 = vadd.f32 %v1213_v33, %v11884_v2 }
 0x30f   :  { %v1217_v39 = vpop.f32.mrb[38].mxu1  ;;  %1694 = vmatprep.mubr.bf16.mxu0 %v1363_v34  ;;  %v1216_v41 = vadd.f32 %v1215_v35, %v11887_v3 }
 0x310   :  { %v1219_v42 = vpop.f32.mrb[39].mxu1  ;;  %1695 = vmatmul.mubr.bf16.gmra.mrb[96].mxu0 %v1362_v32  ;;  %v1218_v45 = vadd.f32 %v1217_v39, %v11884_v2  ;;  %v1318_v47 = vmax.f32 %v1214_v36, 0.0 }
 0x311   :  { %v1220_v46 = vadd.f32 %v1219_v42, %v11887_v3  ;;  %v1319_v49 = vmax.f32 %v1216_v41, 0.0 }
 0x312   :  { %v1320_v48 = vmax.f32 %v1218_v45, 0.0 }
 0x313   :  { %v1321_v50 = vmax.f32 %v1220_v46, 0.0 }
 0x314   :  { %v1364_v51 = vpack.c.bf16 %v1320_v48, %v1318_v47 }
 0x315   :  { %v1223_v52 = vpop.f32.mrb[40].mxu1  ;;  %v1365_v53 = vpack.c.bf16 %v1321_v50, %v1319_v49 }
 0x316   :  { %v1225_v54 = vpop.f32.mrb[41].mxu1  ;;  %v1224_v55 = vadd.f32 %v1223_v52, %v11884_v2 }
 0x317   :  { %v1227_v56 = vpop.f32.mrb[42].mxu1  ;;  %1704 = vmatprep.mubr.bf16.mxu0 %v1365_v53  ;;  %v1226_v57 = vadd.f32 %v1225_v54, %v11887_v3 }
 0x318   :  { %v1229_v58 = vpop.f32.mrb[43].mxu1  ;;  %1705 = vmatmul.mubr.bf16.gmra.mrb[100].mxu0 %v1364_v51  ;;  %v1228_v59 = vadd.f32 %v1227_v56, %v11884_v2  ;;  %v1322_v61 = vmax.f32 %v1224_v55, 0.0 }
 0x319   :  { %v1230_v60 = vadd.f32 %v1229_v58, %v11887_v3  ;;  %v1323_v43 = vmax.f32 %v1226_v57, 0.0 }
 0x31a   :  { %v1324_v62 = vmax.f32 %v1228_v59, 0.0 }
 0x31b   :  { %v1325_v63 = vmax.f32 %v1230_v60, 0.0 }
 0x31c   :  { %v1366_v44 = vpack.c.bf16 %v1324_v62, %v1322_v61 }
 0x31d   :  { %v1233_v0 = vpop.f32.mrb[44].mxu1  ;;  %v1367_v1 = vpack.c.bf16 %v1325_v63, %v1323_v43 }
 0x31e   :  { %v1235_v4 = vpop.f32.mrb[45].mxu1  ;;  %v1234_v5 = vadd.f32 %v1233_v0, %v11884_v2 }
 0x31f   :  { %v1237_v6 = vpop.f32.mrb[46].mxu1  ;;  %1714 = vmatprep.mubr.bf16.mxu0 %v1367_v1  ;;  %v1236_v7 = vadd.f32 %v1235_v4, %v11887_v3 }
 0x320   :  { %v1239_v8 = vpop.f32.mrb[47].mxu1  ;;  %1715 = vmatmul.mubr.bf16.gmra.mrb[104].mxu0 %v1366_v44  ;;  %v1238_v9 = vadd.f32 %v1237_v6, %v11884_v2  ;;  %v1326_v11 = vmax.f32 %v1234_v5, 0.0 }
 0x321   :  { %v1240_v10 = vadd.f32 %v1239_v8, %v11887_v3  ;;  %v1327_v13 = vmax.f32 %v1236_v7, 0.0 }
 0x322   :  { %v1328_v12 = vmax.f32 %v1238_v9, 0.0 }
 0x323   :  { %v1329_v14 = vmax.f32 %v1240_v10, 0.0 }
 0x324   :  { %v1368_v15 = vpack.c.bf16 %v1328_v12, %v1326_v11 }
 0x325   :  { %v1243_v16 = vpop.f32.mrb[48].mxu1  ;;  %v1369_v17 = vpack.c.bf16 %v1329_v14, %v1327_v13 }
 0x326   :  { %v1245_v18 = vpop.f32.mrb[49].mxu1  ;;  %v1244_v19 = vadd.f32 %v1243_v16, %v11884_v2  ;;  %v10753_v16 = vld [vmem:[#allocation11] ss:$8 sps:$4 sm:$0xff]  }
 0x327   :  { %v1247_v20 = vpop.f32.mrb[50].mxu1  ;;  %1724 = vmatprep.mubr.bf16.mxu0 %v1369_v17  ;;  %v1246_v21 = vadd.f32 %v1245_v18, %v11887_v3  ;;  %v10755_v17 = vld [vmem:[#allocation11 + $0x4] ss:$8 sps:$4 sm:$0xff]   ;;  %v10756_v18 = vld [vmem:[#allocation11 + $0x10] ss:$8 sps:$4 sm:$0xff]  }
 0x328   :  { %v1249_v22 = vpop.f32.mrb[51].mxu1  ;;  %1725 = vmatmul.mubr.bf16.gmra.mrb[108].mxu0 %v1368_v15  ;;  %v1248_v23 = vadd.f32 %v1247_v20, %v11884_v2  ;;  %v1330_v27 = vmax.f32 %v1244_v19, 0.0  ;;  %2568 = vmatprep.subr.bf16.mxu0 %v10755_v17  ;;  %v10758_v19 = vld [vmem:[#allocation11 + $0x14] ss:$8 sps:$4 sm:$0xff]   ;;  %v10759_v20 = vld [vmem:[#allocation11 + $0x20] ss:$8 sps:$4 sm:$0xff]  }
 0x329   :  { %v1250_v26 = vadd.f32 %v1249_v22, %v11887_v3  ;;  %v1331_v29 = vmax.f32 %v1246_v21, 0.0  ;;  %2569 = vmatpush1.bf16.msra.mxu0 %v10753_v16  ;;  %v10762_v21 = vld [vmem:[#allocation11 + $0x30] ss:$8 sps:$4 sm:$0xff]   ;;  %v10764_v22 = vld [vmem:[#allocation11 + $0x34] ss:$8 sps:$4 sm:$0xff]  }
 0x32a   :  { %v1332_v28 = vmax.f32 %v1248_v23, 0.0  ;;  %2570 = vmatprep.subr.bf16.mxu0 %v10758_v19  ;;  %v10780_v17 = vld [vmem:[#allocation11 + $0x90] ss:$8 sps:$4 sm:$0xff]   ;;  %v10785_v19 = vld [vmem:[#allocation11 + $0xa4] ss:$8 sps:$4 sm:$0xff]  }
 0x32b   :  { %v1333_v30 = vmax.f32 %v1250_v26, 0.0 }
 0x32c   :  { %v1370_v31 = vpack.c.bf16 %v1332_v28, %v1330_v27 }
 0x32d   :  { %v1253_v32 = vpop.f32.mrb[52].mxu1  ;;  %v1371_v33 = vpack.c.bf16 %v1333_v30, %v1331_v29  ;;  %2571 = vmatpush1.bf16.msra.mxu0 %v10756_v18 }
 0x32e   :  { %v1255_v34 = vpop.f32.mrb[53].mxu1  ;;  %v1254_v35 = vadd.f32 %v1253_v32, %v11884_v2  ;;  %v10765_v32 = vld [vmem:[#allocation11 + $0x40] ss:$8 sps:$4 sm:$0xff]  }
 0x32f   :  { %v1257_v36 = vpop.f32.mrb[54].mxu1  ;;  %1734 = vmatprep.mubr.bf16.mxu0 %v1371_v33  ;;  %v1256_v39 = vadd.f32 %v1255_v34, %v11887_v3  ;;  %v10767_v33 = vld [vmem:[#allocation11 + $0x44] ss:$8 sps:$4 sm:$0xff]  }
 0x330   :  { %v1259_v41 = vpop.f32.mrb[55].mxu1  ;;  %1735 = vmatmul.mubr.bf16.gmra.mrb[112].mxu0 %v1370_v31  ;;  %v1258_v42 = vadd.f32 %v1257_v36, %v11884_v2  ;;  %v1334_v46 = vmax.f32 %v1254_v35, 0.0  ;;  %v10770_v35 = vld [vmem:[#allocation11 + $0x54] ss:$8 sps:$4 sm:$0xff]  }
 0x331   :  { %v1260_v45 = vadd.f32 %v1259_v41, %v11887_v3  ;;  %v1335_v48 = vmax.f32 %v1256_v39, 0.0 }
 0x332   :  { %v1336_v47 = vmax.f32 %v1258_v42, 0.0 }
 0x333   :  { %v1337_v49 = vmax.f32 %v1260_v45, 0.0  ;;  %v10768_v45 = vld [vmem:[#allocation11 + $0x50] ss:$8 sps:$4 sm:$0xff]  }
 0x334   :  { %v1372_v50 = vpack.c.bf16 %v1336_v47, %v1334_v46  ;;  %v10773_v47 = vld [vmem:[#allocation11 + $0x64] ss:$8 sps:$4 sm:$0xff]  }
 0x335   :  { %v1263_v51 = vpop.f32.mrb[56].mxu1  ;;  %v1373_v52 = vpack.c.bf16 %v1337_v49, %v1335_v48 }
 0x336   :  { %v1265_v53 = vpop.f32.mrb[57].mxu1  ;;  %v1264_v54 = vadd.f32 %v1263_v51, %v11884_v2 }
 0x337   :  { %v1267_v55 = vpop.f32.mrb[58].mxu1  ;;  %1744 = vmatprep.mubr.bf16.mxu0 %v1373_v52  ;;  %v1266_v56 = vadd.f32 %v1265_v53, %v11887_v3 }
 0x338   :  { %v1269_v57 = vpop.f32.mrb[59].mxu1  ;;  %1745 = vmatmul.mubr.bf16.gmra.mrb[116].mxu0 %v1372_v50  ;;  %v1268_v58 = vadd.f32 %v1267_v55, %v11884_v2  ;;  %v1338_v60 = vmax.f32 %v1264_v54, 0.0  ;;  %v10771_v54 = vld [vmem:[#allocation11 + $0x60] ss:$8 sps:$4 sm:$0xff]  }
 0x339   :  { %v1270_v59 = vadd.f32 %v1269_v57, %v11887_v3  ;;  %v1339_v62 = vmax.f32 %v1266_v56, 0.0  ;;  %v10776_v57 = vld [vmem:[#allocation11 + $0x74] ss:$8 sps:$4 sm:$0xff]  }
 0x33a   :  { %v1340_v61 = vmax.f32 %v1268_v58, 0.0 }
 0x33b   :  { %v1341_v43 = vmax.f32 %v1270_v59, 0.0 }
 0x33c   :  { %v1374_v63 = vpack.c.bf16 %v1340_v61, %v1338_v60 }
 0x33d   :  { %v1273_v44 = vpop.f32.mrb[60].mxu1  ;;  %v1375_v0 = vpack.c.bf16 %v1341_v43, %v1339_v62  ;;  %v10774_v43 = vld [vmem:[#allocation11 + $0x70] ss:$8 sps:$4 sm:$0xff]  }
 0x33e   :  { %v1275_v1 = vpop.f32.mrb[61].mxu1  ;;  %v1274_v4 = vadd.f32 %v1273_v44, %v11884_v2  ;;  %v10779_v44 = vld [vmem:[#allocation11 + $0x84] ss:$8 sps:$4 sm:$0xff]  }
 0x33f   :  { %v1277_v5 = vpop.f32.mrb[62].mxu1  ;;  %1754 = vmatprep.mubr.bf16.mxu0 %v1375_v0  ;;  %v1276_v6 = vadd.f32 %v1275_v1, %v11887_v3 }
 0x340   :  { %v1279_v7 = vpop.f32.mrb[63].mxu1  ;;  %1755 = vmatmul.mubr.bf16.gmra.mrb[120].mxu0 %v1374_v63  ;;  %v1278_v8 = vadd.f32 %v1277_v5, %v11884_v2  ;;  %v1342_v10 = vmax.f32 %v1274_v4, 0.0  ;;  %v10761_v2 = vld [vmem:[#allocation11 + $0x24] ss:$8 sps:$4 sm:$0xff]  }
 0x341   :  { %v1280_v9 = vadd.f32 %v1279_v7, %v11887_v3  ;;  %v1343_v12 = vmax.f32 %v1276_v6, 0.0  ;;  %v1410_v3 = vld [vmem:[%s13534_s12] sm:$0x3]  ;;  %2572 = vmatprep.subr.bf16.mxu0 %v10761_v2 }
 0x342   :  { %v1344_v11 = vmax.f32 %v1278_v8, 0.0  ;;  %2573 = vmatpush1.bf16.msra.mxu0 %v10759_v20  ;;  %v11957_v23 = vrot.slane %v1410_v3, %v11802_v38  ;;  %v11960_v24 = vrot.slane %v1410_v3, %v11808_v40  ;;  %v10777_v8 = vld [vmem:[#allocation11 + $0x80] ss:$8 sps:$4 sm:$0xff]  }
 0x343   :  { %v1345_v13 = vmax.f32 %v1280_v9, 0.0  ;;  %2574 = vmatprep.subr.bf16.mxu0 %v10764_v22 }
 0x344   :  { %v1376_v14 = vpack.c.bf16 %v1344_v11, %v1342_v10  ;;  %v10782_v11 = vld [vmem:[#allocation11 + $0x94] ss:$8 sps:$4 sm:$0xff]  }
 0x345   :  { %v1377_v15 = vpack.c.bf16 %v1345_v13, %v1343_v12 }
 0x346   :  { %2575 = vmatpush1.bf16.msra.mxu0 %v10762_v21 }
 0x347   :  { %1764 = vmatprep.mubr.bf16.mxu0 %v1377_v15  ;;  %2576 = vmatprep.subr.bf16.mxu0 %v10767_v33 }
 0x348   :  { %1765 = vmatmul.mubr.bf16.gmra.mrb[124].mxu0 %v1376_v14 }
 0x34a   :  { %2577 = vmatpush1.bf16.msra.mxu0 %v10765_v32 }
 0x34b   :  { %2578 = vmatprep.subr.bf16.mxu0 %v10770_v35  ;;  %v10786_v35 = vld [vmem:[#allocation11 + $0xb0] ss:$8 sps:$4 sm:$0xff]  }
 0x34e   :  { %2579 = vmatpush1.bf16.msra.mxu0 %v10768_v45 }
 0x34f   :  { %2580 = vmatprep.subr.bf16.mxu0 %v10773_v47 }
 0x352   :  { %2581 = vmatpush1.bf16.msra.mxu0 %v10771_v54 }
 0x353   :  { %2582 = vmatprep.subr.bf16.mxu0 %v10776_v57 }
 0x356   :  { %2583 = vmatpush1.bf16.msra.mxu0 %v10774_v43 }
 0x357   :  { %2584 = vmatprep.subr.bf16.mxu0 %v10779_v44 }
 0x35a   :  { %2585 = vmatpush1.bf16.msra.mxu0 %v10777_v8 }
 0x35b   :  { %2586 = vmatprep.subr.bf16.mxu0 %v10782_v11 }
 0x35e   :  { %2587 = vmatpush1.bf16.msra.mxu0 %v10780_v17 }
 0x35f   :  { %2588 = vmatprep.subr.bf16.mxu0 %v10785_v19 }
 0x3a3   :  { %v1616_v25 = vpop.f32.mrb[64].mxu0 }
 0x3a4   :  { %v1617_v26 = vadd.f32 %v1616_v25, %v11957_v23  ;;  %v1618_v27 = vpop.f32.mrb[65].mxu0 }
 0x3a5   :  { %v1620_v28 = vpop.f32.mrb[66].mxu0  ;;  %v1619_v29 = vadd.f32 %v1618_v27, %v11960_v24 }
 0x3a6   :  { %v1621_v30 = vadd.f32 %v1620_v28, %v11957_v23  ;;  %v1622_v31 = vpop.f32.mrb[67].mxu0  ;;  %v1775_v36 = vmax.f32 %v1617_v26, 0.0  ;;  %v10783_v26 = vld [vmem:[#allocation11 + $0xa0] ss:$8 sps:$4 sm:$0xff]  }
 0x3a7   :  { %v1623_v34 = vadd.f32 %v1622_v31, %v11960_v24  ;;  %v1776_v41 = vmax.f32 %v1619_v29, 0.0  ;;  %v10788_v29 = vld [vmem:[#allocation11 + $0xb4] ss:$8 sps:$4 sm:$0xff]   ;;  %2589 = vmatpush1.bf16.msra.mxu0 %v10783_v26 }
 0x3a8   :  { %v1777_v39 = vmax.f32 %v1621_v30, 0.0  ;;  %2590 = vmatprep.subr.bf16.mxu0 %v10788_v29 }
 0x3a9   :  { %v1778_v42 = vmax.f32 %v1623_v34, 0.0 }
 0x3aa   :  { %v1839_v46 = vpack.c.bf16 %v1777_v39, %v1775_v36  ;;  %v10791_v39 = vld [vmem:[#allocation11 + $0xc4] ss:$8 sps:$4 sm:$0xff]  }
 0x3ab   :  { %v1626_v48 = vpop.f32.mrb[68].mxu0  ;;  %v1840_v49 = vpack.c.bf16 %v1778_v42, %v1776_v41  ;;  %2591 = vmatpush1.bf16.msra.mxu0 %v10786_v35 }
 0x3ac   :  { %v1628_v50 = vpop.f32.mrb[69].mxu0  ;;  %v1627_v51 = vadd.f32 %v1626_v48, %v11957_v23  ;;  %2592 = vmatprep.subr.bf16.mxu0 %v10791_v39 }
 0x3ad   :  { %v1630_v52 = vpop.f32.mrb[70].mxu0  ;;  %2107 = vmatprep.mubr.bf16.mxu1 %v1840_v49  ;;  %v1629_v53 = vadd.f32 %v1628_v50, %v11960_v24  ;;  %v10789_v49 = vld [vmem:[#allocation11 + $0xc0] ss:$8 sps:$4 sm:$0xff]  }
 0x3ae   :  { %v1632_v55 = vpop.f32.mrb[71].mxu0  ;;  %2108 = vmatmul.mubr.bf16.vlgmr.msra.gmra.mrb[64].mxu1 %v1839_v46  ;;  %v1631_v56 = vadd.f32 %v1630_v52, %v11957_v23  ;;  %v1779_v59 = vmax.f32 %v1627_v51, 0.0  ;;  %v10794_v52 = vld [vmem:[#allocation11 + $0xd4] ss:$8 sps:$4 sm:$0xff]  }
 0x3af   :  { %v1633_v58 = vadd.f32 %v1632_v55, %v11960_v24  ;;  %v1780_v61 = vmax.f32 %v1629_v53, 0.0  ;;  %2593 = vmatpush1.bf16.msra.mxu0 %v10789_v49 }
 0x3b0   :  { %v1781_v60 = vmax.f32 %v1631_v56, 0.0  ;;  %2594 = vmatprep.subr.bf16.mxu0 %v10794_v52 }
 0x3b1   :  { %v1782_v62 = vmax.f32 %v1633_v58, 0.0  ;;  %v10792_v58 = vld [vmem:[#allocation11 + $0xd0] ss:$8 sps:$4 sm:$0xff]  }
 0x3b2   :  { %v1841_v63 = vpack.c.bf16 %v1781_v60, %v1779_v59  ;;  %v10797_v60 = vld [vmem:[#allocation11 + $0xe4] ss:$8 sps:$4 sm:$0xff]  }
 0x3b3   :  { %v1636_v0 = vpop.f32.mrb[72].mxu0  ;;  %v1842_v1 = vpack.c.bf16 %v1782_v62, %v1780_v61  ;;  %2595 = vmatpush1.bf16.msra.mxu0 %v10792_v58 }
 0x3b4   :  { %v1638_v4 = vpop.f32.mrb[73].mxu0  ;;  %v1637_v5 = vadd.f32 %v1636_v0, %v11957_v23  ;;  %2596 = vmatprep.subr.bf16.mxu0 %v10797_v60 }
 0x3b5   :  { %v1640_v6 = vpop.f32.mrb[74].mxu0  ;;  %2117 = vmatprep.mubr.bf16.mxu1 %v1842_v1  ;;  %v1639_v7 = vadd.f32 %v1638_v4, %v11960_v24  ;;  %v10795_v1 = vld [vmem:[#allocation11 + $0xe0] ss:$8 sps:$4 sm:$0xff]  }
 0x3b6   :  { %v1642_v9 = vpop.f32.mrb[75].mxu0  ;;  %2118 = vmatmul.mubr.bf16.gmra.mrb[68].mxu1 %v1841_v63  ;;  %v1641_v10 = vadd.f32 %v1640_v6, %v11957_v23  ;;  %v1783_v13 = vmax.f32 %v1637_v5, 0.0 }
 0x3b7   :  { %v1643_v12 = vadd.f32 %v1642_v9, %v11960_v24  ;;  %v1784_v15 = vmax.f32 %v1639_v7, 0.0  ;;  %2597 = vmatpush1.bf16.msra.mxu0 %v10795_v1 }
 0x3b8   :  { %v1785_v14 = vmax.f32 %v1641_v10, 0.0 }
 0x3b9   :  { %v1786_v16 = vmax.f32 %v1643_v12, 0.0 }
 0x3ba   :  { %v1843_v18 = vpack.c.bf16 %v1785_v14, %v1783_v13 }
 0x3bb   :  { %v1646_v20 = vpop.f32.mrb[76].mxu0  ;;  %v1844_v2 = vpack.c.bf16 %v1786_v16, %v1784_v15 }
 0x3bc   :  { %v1648_v3 = vpop.f32.mrb[77].mxu0  ;;  %v1647_v21 = vadd.f32 %v1646_v20, %v11957_v23 }
 0x3bd   :  { %v1650_v22 = vpop.f32.mrb[78].mxu0  ;;  %2127 = vmatprep.mubr.bf16.mxu1 %v1844_v2  ;;  %v1649_v25 = vadd.f32 %v1648_v3, %v11960_v24 }
 0x3be   :  { %v1652_v27 = vpop.f32.mrb[79].mxu0  ;;  %2128 = vmatmul.mubr.bf16.gmra.mrb[72].mxu1 %v1843_v18  ;;  %v1651_v28 = vadd.f32 %v1650_v22, %v11957_v23  ;;  %v1787_v31 = vmax.f32 %v1647_v21, 0.0 }
 0x3bf   :  { %v1653_v30 = vadd.f32 %v1652_v27, %v11960_v24  ;;  %v1788_v33 = vmax.f32 %v1649_v25, 0.0 }
 0x3c0   :  { %v1789_v32 = vmax.f32 %v1651_v28, 0.0 }
 0x3c1   :  { %v1790_v34 = vmax.f32 %v1653_v30, 0.0 }
 0x3c2   :  { %v1845_v36 = vpack.c.bf16 %v1789_v32, %v1787_v31 }
 0x3c3   :  { %v1656_v41 = vpop.f32.mrb[80].mxu0  ;;  %v1846_v42 = vpack.c.bf16 %v1790_v34, %v1788_v33 }
 0x3c4   :  { %v1658_v45 = vpop.f32.mrb[81].mxu0  ;;  %v1657_v46 = vadd.f32 %v1656_v41, %v11957_v23 }
 0x3c5   :  { %v1660_v47 = vpop.f32.mrb[82].mxu0  ;;  %2137 = vmatprep.mubr.bf16.mxu1 %v1846_v42  ;;  %v1659_v48 = vadd.f32 %v1658_v45, %v11960_v24 }
 0x3c6   :  { %v1662_v50 = vpop.f32.mrb[83].mxu0  ;;  %2138 = vmatmul.mubr.bf16.gmra.mrb[76].mxu1 %v1845_v36  ;;  %v1661_v51 = vadd.f32 %v1660_v47, %v11957_v23  ;;  %v1791_v54 = vmax.f32 %v1657_v46, 0.0 }
 0x3c7   :  { %v1663_v53 = vadd.f32 %v1662_v50, %v11960_v24  ;;  %v1792_v56 = vmax.f32 %v1659_v48, 0.0 }
 0x3c8   :  { %v1793_v55 = vmax.f32 %v1661_v51, 0.0 }
 0x3c9   :  { %v1794_v57 = vmax.f32 %v1663_v53, 0.0 }
 0x3ca   :  { %v1847_v59 = vpack.c.bf16 %v1793_v55, %v1791_v54 }
 0x3cb   :  { %v1666_v61 = vpop.f32.mrb[84].mxu0  ;;  %v1848_v62 = vpack.c.bf16 %v1794_v57, %v1792_v56 }
 0x3cc   :  { %v1668_v43 = vpop.f32.mrb[85].mxu0  ;;  %v1667_v63 = vadd.f32 %v1666_v61, %v11957_v23 }
 0x3cd   :  { %v1670_v44 = vpop.f32.mrb[86].mxu0  ;;  %2147 = vmatprep.mubr.bf16.mxu1 %v1848_v62  ;;  %v1669_v0 = vadd.f32 %v1668_v43, %v11960_v24 }
 0x3ce   :  { %v1672_v4 = vpop.f32.mrb[87].mxu0  ;;  %2148 = vmatmul.mubr.bf16.gmra.mrb[80].mxu1 %v1847_v59  ;;  %v1671_v5 = vadd.f32 %v1670_v44, %v11957_v23  ;;  %v1795_v7 = vmax.f32 %v1667_v63, 0.0 }
 0x3cf   :  { %v1673_v6 = vadd.f32 %v1672_v4, %v11960_v24  ;;  %v1796_v9 = vmax.f32 %v1669_v0, 0.0 }
 0x3d0   :  { %v1797_v8 = vmax.f32 %v1671_v5, 0.0 }
 0x3d1   :  { %v1798_v10 = vmax.f32 %v1673_v6, 0.0 }
 0x3d2   :  { %v1849_v11 = vpack.c.bf16 %v1797_v8, %v1795_v7 }
 0x3d3   :  { %v1676_v12 = vpop.f32.mrb[88].mxu0  ;;  %v1850_v13 = vpack.c.bf16 %v1798_v10, %v1796_v9 }
 0x3d4   :  { %v1678_v14 = vpop.f32.mrb[89].mxu0  ;;  %v1677_v15 = vadd.f32 %v1676_v12, %v11957_v23 }
 0x3d5   :  { %v1680_v16 = vpop.f32.mrb[90].mxu0  ;;  %2157 = vmatprep.mubr.bf16.mxu1 %v1850_v13  ;;  %v1679_v17 = vadd.f32 %v1678_v14, %v11960_v24 }
 0x3d6   :  { %v1682_v18 = vpop.f32.mrb[91].mxu0  ;;  %2158 = vmatmul.mubr.bf16.gmra.mrb[84].mxu1 %v1849_v11  ;;  %v1681_v19 = vadd.f32 %v1680_v16, %v11957_v23  ;;  %v1799_v2 = vmax.f32 %v1677_v15, 0.0 }
 0x3d7   :  { %v1683_v20 = vadd.f32 %v1682_v18, %v11960_v24  ;;  %v1800_v21 = vmax.f32 %v1679_v17, 0.0 }
 0x3d8   :  { %v1801_v3 = vmax.f32 %v1681_v19, 0.0 }
 0x3d9   :  { %v1802_v22 = vmax.f32 %v1683_v20, 0.0 }
 0x3da   :  { %v1851_v25 = vpack.c.bf16 %v1801_v3, %v1799_v2 }
 0x3db   :  { %v1686_v26 = vpop.f32.mrb[92].mxu0  ;;  %v1852_v27 = vpack.c.bf16 %v1802_v22, %v1800_v21 }
 0x3dc   :  { %v1688_v28 = vpop.f32.mrb[93].mxu0  ;;  %v1687_v29 = vadd.f32 %v1686_v26, %v11957_v23 }
 0x3dd   :  { %v1690_v30 = vpop.f32.mrb[94].mxu0  ;;  %2167 = vmatprep.mubr.bf16.mxu1 %v1852_v27  ;;  %v1689_v31 = vadd.f32 %v1688_v28, %v11960_v24 }
 0x3de   :  { %v1692_v32 = vpop.f32.mrb[95].mxu0  ;;  %2168 = vmatmul.mubr.bf16.gmra.mrb[88].mxu1 %v1851_v25  ;;  %v1691_v33 = vadd.f32 %v1690_v30, %v11957_v23  ;;  %v1803_v35 = vmax.f32 %v1687_v29, 0.0 }
 0x3df   :  { %v1693_v34 = vadd.f32 %v1692_v32, %v11960_v24  ;;  %v1804_v39 = vmax.f32 %v1689_v31, 0.0 }
 0x3e0   :  { %v1805_v36 = vmax.f32 %v1691_v33, 0.0 }
 0x3e1   :  { %v1806_v41 = vmax.f32 %v1693_v34, 0.0 }
 0x3e2   :  { %v1853_v42 = vpack.c.bf16 %v1805_v36, %v1803_v35 }
 0x3e3   :  { %v1696_v45 = vpop.f32.mrb[96].mxu0  ;;  %v1854_v46 = vpack.c.bf16 %v1806_v41, %v1804_v39 }
 0x3e4   :  { %v1698_v47 = vpop.f32.mrb[97].mxu0  ;;  %v1697_v48 = vadd.f32 %v1696_v45, %v11957_v23 }
 0x3e5   :  { %v1700_v49 = vpop.f32.mrb[98].mxu0  ;;  %2177 = vmatprep.mubr.bf16.mxu1 %v1854_v46  ;;  %v1699_v50 = vadd.f32 %v1698_v47, %v11960_v24 }
 0x3e6   :  { %v1702_v51 = vpop.f32.mrb[99].mxu0  ;;  %2178 = vmatmul.mubr.bf16.gmra.mrb[92].mxu1 %v1853_v42  ;;  %v1701_v52 = vadd.f32 %v1700_v49, %v11957_v23  ;;  %v1807_v54 = vmax.f32 %v1697_v48, 0.0 }
 0x3e7   :  { %v1703_v53 = vadd.f32 %v1702_v51, %v11960_v24  ;;  %v1808_v56 = vmax.f32 %v1699_v50, 0.0  ;;  %v10800_v50 = vld [vmem:[#allocation11 + $0xf4] ss:$8 sps:$4 sm:$0xff]  }
 0x3e8   :  { %v1809_v55 = vmax.f32 %v1701_v52, 0.0  ;;  %v10798_v52 = vld [vmem:[#allocation11 + $0xf0] ss:$8 sps:$4 sm:$0xff]   ;;  %2598 = vmatprep.subr.bf16.mxu0 %v10800_v50  ;;  %v2877_v50 = vld [vmem:[#allocation13 + $0xa0] sm:$0xff] }
 0x3e9   :  { %v1810_v57 = vmax.f32 %v1703_v53, 0.0  ;;  %2599 = vmatpush1.bf16.msra.mxu0 %v10798_v52 }
 0x3ea   :  { %v1855_v58 = vpack.c.bf16 %v1809_v55, %v1807_v54 }
 0x3eb   :  { %v1706_v59 = vpop.f32.mrb[100].mxu0  ;;  %v1856_v60 = vpack.c.bf16 %v1810_v57, %v1808_v56 }
 0x3ec   :  { %v1708_v61 = vpop.f32.mrb[101].mxu0  ;;  %v1707_v62 = vadd.f32 %v1706_v59, %v11957_v23 }
 0x3ed   :  { %v1710_v43 = vpop.f32.mrb[102].mxu0  ;;  %2187 = vmatprep.mubr.bf16.mxu1 %v1856_v60  ;;  %v1709_v63 = vadd.f32 %v1708_v61, %v11960_v24 }
 0x3ee   :  { %v1712_v44 = vpop.f32.mrb[103].mxu0  ;;  %2188 = vmatmul.mubr.bf16.gmra.mrb[96].mxu1 %v1855_v58  ;;  %v1711_v0 = vadd.f32 %v1710_v43, %v11957_v23  ;;  %v1811_v4 = vmax.f32 %v1707_v62, 0.0 }
 0x3ef   :  { %v1713_v1 = vadd.f32 %v1712_v44, %v11960_v24  ;;  %v1812_v6 = vmax.f32 %v1709_v63, 0.0 }
 0x3f0   :  { %v1813_v5 = vmax.f32 %v1711_v0, 0.0 }
 0x3f1   :  { %v1814_v7 = vmax.f32 %v1713_v1, 0.0 }
 0x3f2   :  { %v1857_v8 = vpack.c.bf16 %v1813_v5, %v1811_v4 }
 0x3f3   :  { %v1716_v9 = vpop.f32.mrb[104].mxu0  ;;  %v1858_v10 = vpack.c.bf16 %v1814_v7, %v1812_v6 }
 0x3f4   :  { %v1718_v11 = vpop.f32.mrb[105].mxu0  ;;  %v1717_v12 = vadd.f32 %v1716_v9, %v11957_v23 }
 0x3f5   :  { %v1720_v13 = vpop.f32.mrb[106].mxu0  ;;  %2197 = vmatprep.mubr.bf16.mxu1 %v1858_v10  ;;  %v1719_v14 = vadd.f32 %v1718_v11, %v11960_v24 }
 0x3f6   :  { %v1722_v15 = vpop.f32.mrb[107].mxu0  ;;  %2198 = vmatmul.mubr.bf16.gmra.mrb[100].mxu1 %v1857_v8  ;;  %v1721_v16 = vadd.f32 %v1720_v13, %v11957_v23  ;;  %v1815_v18 = vmax.f32 %v1717_v12, 0.0 }
 0x3f7   :  { %v1723_v17 = vadd.f32 %v1722_v15, %v11960_v24  ;;  %v1816_v20 = vmax.f32 %v1719_v14, 0.0 }
 0x3f8   :  { %v1817_v19 = vmax.f32 %v1721_v16, 0.0 }
 0x3f9   :  { %v1818_v2 = vmax.f32 %v1723_v17, 0.0 }
 0x3fa   :  { %v1859_v3 = vpack.c.bf16 %v1817_v19, %v1815_v18 }
 0x3fb   :  { %v1726_v21 = vpop.f32.mrb[108].mxu0  ;;  %v1860_v22 = vpack.c.bf16 %v1818_v2, %v1816_v20 }
 0x3fc   :  { %v1728_v25 = vpop.f32.mrb[109].mxu0  ;;  %v1727_v26 = vadd.f32 %v1726_v21, %v11957_v23 }
 0x3fd   :  { %v1730_v27 = vpop.f32.mrb[110].mxu0  ;;  %2207 = vmatprep.mubr.bf16.mxu1 %v1860_v22  ;;  %v1729_v28 = vadd.f32 %v1728_v25, %v11960_v24 }
 0x3fe   :  { %v1732_v29 = vpop.f32.mrb[111].mxu0  ;;  %2208 = vmatmul.mubr.bf16.gmra.mrb[104].mxu1 %v1859_v3  ;;  %v1731_v30 = vadd.f32 %v1730_v27, %v11957_v23  ;;  %v1819_v32 = vmax.f32 %v1727_v26, 0.0 }
 0x3ff   :  { %v1733_v31 = vadd.f32 %v1732_v29, %v11960_v24  ;;  %v1820_v34 = vmax.f32 %v1729_v28, 0.0 }
 0x400   :  { %v1821_v33 = vmax.f32 %v1731_v30, 0.0 }
 0x401   :  { %v1822_v35 = vmax.f32 %v1733_v31, 0.0 }
 0x402   :  { %v1861_v36 = vpack.c.bf16 %v1821_v33, %v1819_v32 }
 0x403   :  { %v1736_v39 = vpop.f32.mrb[112].mxu0  ;;  %v1862_v41 = vpack.c.bf16 %v1822_v35, %v1820_v34 }
 0x404   :  { %v1738_v42 = vpop.f32.mrb[113].mxu0  ;;  %v1737_v45 = vadd.f32 %v1736_v39, %v11957_v23  ;;  %v2857_v39 = vld [vmem:[#allocation13] sm:$0xff] }
 0x405   :  { %v1740_v46 = vpop.f32.mrb[114].mxu0  ;;  %2217 = vmatprep.mubr.bf16.mxu1 %v1862_v41  ;;  %v1739_v47 = vadd.f32 %v1738_v42, %v11960_v24  ;;  %v2861_v41 = vld [vmem:[#allocation13 + $0x20] sm:$0xff] }
 0x406   :  { %v1742_v48 = vpop.f32.mrb[115].mxu0  ;;  %2218 = vmatmul.mubr.bf16.gmra.mrb[108].mxu1 %v1861_v36  ;;  %v1741_v49 = vadd.f32 %v1740_v46, %v11957_v23  ;;  %v1823_v53 = vmax.f32 %v1737_v45, 0.0  ;;  %v9228_v42 = vcombine.low %v2857_v39, %v2861_v41  ;;  %v9229_v45 = vcombine.high %v2857_v39, %v2861_v41  ;;  %v2865_v46 = vld [vmem:[#allocation13 + $0x40] sm:$0xff] }
 0x407   :  { %v1743_v51 = vadd.f32 %v1742_v48, %v11960_v24  ;;  %v1824_v55 = vmax.f32 %v1739_v47, 0.0  ;;  %v2869_v47 = vld [vmem:[#allocation13 + $0x60] sm:$0xff] }
 0x408   :  { %v1825_v54 = vmax.f32 %v1741_v49, 0.0  ;;  %3667 = vmatprep.subr.bf16.mxu1 %v9229_v45  ;;  %v9236_v48 = vcombine.low %v2865_v46, %v2869_v47  ;;  %v2873_v49 = vld [vmem:[#allocation13 + $0x80] sm:$0xff] }
 0x409   :  { %v1826_v56 = vmax.f32 %v1743_v51, 0.0  ;;  %3668 = vmatpush1.bf16.msra.mxu1 %v9228_v42  ;;  %v9244_v51 = vcombine.low %v2873_v49, %v2877_v50  ;;  %v9245_v52 = vcombine.high %v2873_v49, %v2877_v50 }
 0x40a   :  { %v1863_v57 = vpack.c.bf16 %v1825_v54, %v1823_v53 }
 0x40b   :  { %v1746_v58 = vpop.f32.mrb[116].mxu0  ;;  %v1864_v59 = vpack.c.bf16 %v1826_v56, %v1824_v55  ;;  %v2881_v55 = vld [vmem:[#allocation13 + $0xc0] sm:$0xff] }
 0x40c   :  { %v1748_v60 = vpop.f32.mrb[117].mxu0  ;;  %v1747_v61 = vadd.f32 %v1746_v58, %v11957_v23  ;;  %v2885_v56 = vld [vmem:[#allocation13 + $0xe0] sm:$0xff] }
 0x40d   :  { %v1750_v62 = vpop.f32.mrb[118].mxu0  ;;  %2227 = vmatprep.mubr.bf16.mxu1 %v1864_v59  ;;  %v1749_v43 = vadd.f32 %v1748_v60, %v11960_v24  ;;  %v9253_v58 = vcombine.high %v2881_v55, %v2885_v56 }
 0x40e   :  { %v1752_v63 = vpop.f32.mrb[119].mxu0  ;;  %2228 = vmatmul.mubr.bf16.gmra.mrb[112].mxu1 %v1863_v57  ;;  %v1751_v44 = vadd.f32 %v1750_v62, %v11957_v23  ;;  %v1827_v1 = vmax.f32 %v1747_v61, 0.0  ;;  %v9252_v57 = vcombine.low %v2881_v55, %v2885_v56  ;;  %v2886_v55 = vld [vmem:[#allocation13 + $0xe8] sm:$0xff] }
 0x40f   :  { %v1753_v0 = vadd.f32 %v1752_v63, %v11960_v24  ;;  %v1828_v5 = vmax.f32 %v1749_v43, 0.0 }
 0x410   :  { %v1829_v4 = vmax.f32 %v1751_v44, 0.0 }
 0x411   :  { %v1830_v6 = vmax.f32 %v1753_v0, 0.0  ;;  %v2889_v0 = vld [vmem:[#allocation13 + $0x100] sm:$0xff] }
 0x412   :  { %v1865_v7 = vpack.c.bf16 %v1829_v4, %v1827_v1  ;;  %v2893_v1 = vld [vmem:[#allocation13 + $0x120] sm:$0xff] }
 0x413   :  { %v1756_v8 = vpop.f32.mrb[120].mxu0  ;;  %v1866_v9 = vpack.c.bf16 %v1830_v6, %v1828_v5  ;;  %v2897_v4 = vld [vmem:[#allocation13 + $0x140] sm:$0xff]  ;;  %v9260_v6 = vcombine.low %v2889_v0, %v2893_v1 }
 0x414   :  { %v1758_v10 = vpop.f32.mrb[121].mxu0  ;;  %v1757_v11 = vadd.f32 %v1756_v8, %v11957_v23  ;;  %v2901_v8 = vld [vmem:[#allocation13 + $0x160] sm:$0xff] }
 0x415   :  { %v1760_v12 = vpop.f32.mrb[122].mxu0  ;;  %2237 = vmatprep.mubr.bf16.mxu1 %v1866_v9  ;;  %v1759_v13 = vadd.f32 %v1758_v10, %v11960_v24 }
 0x416   :  { %v1762_v14 = vpop.f32.mrb[123].mxu0  ;;  %2238 = vmatmul.mubr.bf16.gmra.mrb[116].mxu1 %v1865_v7  ;;  %v1761_v15 = vadd.f32 %v1760_v12, %v11957_v23  ;;  %v1831_v17 = vmax.f32 %v1757_v11, 0.0  ;;  %v9261_v7 = vcombine.high %v2889_v0, %v2893_v1  ;;  %v9269_v11 = vcombine.high %v2897_v4, %v2901_v8  ;;  %v2905_v12 = vld [vmem:[#allocation13 + $0x180] sm:$0xff] }
 0x417   :  { %v1763_v16 = vadd.f32 %v1762_v14, %v11960_v24  ;;  %v1832_v19 = vmax.f32 %v1759_v13, 0.0  ;;  %v2909_v13 = vld [vmem:[#allocation13 + $0x1a0] sm:$0xff] }
 0x418   :  { %v1833_v18 = vmax.f32 %v1761_v15, 0.0  ;;  %v9276_v41 = vcombine.low %v2905_v12, %v2909_v13 }
 0x419   :  { %v1834_v20 = vmax.f32 %v1763_v16, 0.0  ;;  %v2858_v16 = vld [vmem:[#allocation13 + $0x8] sm:$0xff] }
 0x41a   :  { %v1867_v2 = vpack.c.bf16 %v1833_v18, %v1831_v17  ;;  %v2862_v17 = vld [vmem:[#allocation13 + $0x28] sm:$0xff] }
 0x41b   :  { %v1766_v3 = vpop.f32.mrb[124].mxu0  ;;  %v1868_v21 = vpack.c.bf16 %v1834_v20, %v1832_v19  ;;  %v9268_v19 = vcombine.low %v2897_v4, %v2901_v8  ;;  %v2866_v20 = vld [vmem:[#allocation13 + $0x48] sm:$0xff] }
 0x41c   :  { %v1768_v22 = vpop.f32.mrb[125].mxu0  ;;  %v1767_v25 = vadd.f32 %v1766_v3, %v11957_v23 }
 0x41d   :  { %v1770_v26 = vpop.f32.mrb[126].mxu0  ;;  %2247 = vmatprep.mubr.bf16.mxu1 %v1868_v21  ;;  %v1769_v27 = vadd.f32 %v1768_v22, %v11960_v24  ;;  %v9277_v22 = vcombine.high %v2905_v12, %v2909_v13 }
 0x41e   :  { %v1772_v28 = vpop.f32.mrb[127].mxu0  ;;  %2248 = vmatmul.mubr.bf16.gmra.mrb[120].mxu1 %v1867_v2  ;;  %v1771_v29 = vadd.f32 %v1770_v26, %v11957_v23  ;;  %v1835_v31 = vmax.f32 %v1767_v25, 0.0  ;;  %v9237_v23 = vcombine.high %v2865_v46, %v2869_v47  ;;  %v2870_v2 = vld [vmem:[#allocation13 + $0x68] sm:$0xff]  ;;  %v9230_v25 = vcombine.low %v2858_v16, %v2862_v17 }
 0x41f   :  { %v1773_v30 = vadd.f32 %v1772_v28, %v11960_v24  ;;  %v1836_v33 = vmax.f32 %v1769_v27, 0.0  ;;  %v1903_v24 = vld [vmem:[%s13535_s13] sm:$0x3]  ;;  %v9231_v26 = vcombine.high %v2858_v16, %v2862_v17  ;;  %v9238_v46 = vcombine.low %v2866_v20, %v2870_v2 }
 0x420   :  { %v1837_v32 = vmax.f32 %v1771_v29, 0.0  ;;  %3669 = vmatprep.subr.bf16.mxu1 %v9237_v23  ;;  %v12030_v53 = vrot.slane %v1903_v24, %v11802_v38  ;;  %v12033_v54 = vrot.slane %v1903_v24, %v11808_v40  ;;  %v2913_v29 = vld [vmem:[#allocation13 + $0x1c0] sm:$0xff] }
 0x421   :  { %v1838_v34 = vmax.f32 %v1773_v30, 0.0  ;;  %3670 = vmatpush1.bf16.msra.mxu1 %v9236_v48  ;;  %v2917_v30 = vld [vmem:[#allocation13 + $0x1e0] sm:$0xff]  ;;  %3860 = vmatprep.subr.bf16.mxu0 %v9231_v26 }
 0x422   :  { %v1869_v35 = vpack.c.bf16 %v1837_v32, %v1835_v31  ;;  %3671 = vmatprep.subr.bf16.mxu1 %v9245_v52  ;;  %v9239_v31 = vcombine.high %v2866_v20, %v2870_v2  ;;  %v9285_v45 = vcombine.high %v2913_v29, %v2917_v30  ;;  %v2921_v23 = vld [vmem:[#allocation13 + $0x200] sm:$0xff]  ;;  %v2882_v52 = vld [vmem:[#allocation13 + $0xc8] sm:$0xff] }
 0x423   :  { %v1870_v36 = vpack.c.bf16 %v1838_v34, %v1836_v33  ;;  %v2874_v34 = vld [vmem:[#allocation13 + $0x88] sm:$0xff]  ;;  %v2925_v24 = vld [vmem:[#allocation13 + $0x220] sm:$0xff]  ;;  %v9255_v0 = vcombine.high %v2882_v52, %v2886_v55  ;;  %v9254_v12 = vcombine.low %v2882_v52, %v2886_v55 }
 0x424   :  { %v2941_v16 = vld [vmem:[#allocation13 + $0x2a0] sm:$0xff]  ;;  %v2898_v20 = vld [vmem:[#allocation13 + $0x148] sm:$0xff] }
 0x425   :  { %2257 = vmatprep.mubr.bf16.mxu1 %v1870_v36  ;;  %3672 = vmatpush1.bf16.msra.mxu1 %v9244_v51  ;;  %v2902_v2 = vld [vmem:[#allocation13 + $0x168] sm:$0xff] }
 0x426   :  { %2258 = vmatmul.mubr.bf16.gmra.mrb[124].mxu1 %v1869_v35  ;;  %3673 = vmatprep.subr.bf16.mxu1 %v9253_v58  ;;  %v2878_v35 = vld [vmem:[#allocation13 + $0xa8] sm:$0xff] }
 0x427   :  { %v9247_v49 = vcombine.high %v2874_v34, %v2878_v35  ;;  %v2914_v55 = vld [vmem:[#allocation13 + $0x1c8] sm:$0xff] }
 0x429   :  { %3674 = vmatpush1.bf16.msra.mxu1 %v9252_v57  ;;  %v9284_v57 = vcombine.low %v2913_v29, %v2917_v30  ;;  %v9271_v30 = vcombine.high %v2898_v20, %v2902_v2 }
 0x42a   :  { %3675 = vmatprep.subr.bf16.mxu1 %v9261_v7 }
 0x42d   :  { %3676 = vmatpush1.bf16.msra.mxu1 %v9260_v6  ;;  %v2894_v6 = vld [vmem:[#allocation13 + $0x128] sm:$0xff] }
 0x42e   :  { %3677 = vmatprep.subr.bf16.mxu1 %v9269_v11 }
 0x431   :  { %3678 = vmatpush1.bf16.msra.mxu1 %v9268_v19 }
 0x432   :  { %3679 = vmatprep.subr.bf16.mxu1 %v9277_v22 }
 0x435   :  { %3680 = vmatpush1.bf16.msra.mxu1 %v9276_v41 }
 0x436   :  { %3681 = vmatprep.subr.bf16.mxu1 %v9285_v45 }
 0x439   :  { %3682 = vmatpush1.bf16.msra.mxu1 %v9284_v57 }
 0x481   :  { %v2109_v59 = vpop.f32.mrb[64].mxu1 }
 0x482   :  { %v2110_v60 = vadd.f32 %v2109_v59, %v12030_v53  ;;  %v2111_v61 = vpop.f32.mrb[65].mxu1 }
 0x483   :  { %v2112_v62 = vadd.f32 %v2111_v61, %v12033_v54  ;;  %v2113_v43 = vpop.f32.mrb[66].mxu1  ;;  %v9246_v61 = vcombine.low %v2874_v34, %v2878_v35  ;;  %v2906_v35 = vld [vmem:[#allocation13 + $0x188] sm:$0xff] }
 0x484   :  { %v2114_v63 = vadd.f32 %v2113_v43, %v12030_v53  ;;  %v2115_v44 = vpop.f32.mrb[67].mxu1  ;;  %v2268_v9 = vmax.f32 %v2110_v60, 0.0  ;;  %v9293_v60 = vcombine.high %v2921_v23, %v2925_v24 }
 0x485   :  { %v2116_v5 = vadd.f32 %v2115_v44, %v12033_v54  ;;  %v2269_v14 = vmax.f32 %v2112_v62, 0.0  ;;  %v2933_v44 = vld [vmem:[#allocation13 + $0x260] sm:$0xff] }
 0x486   :  { %v2270_v10 = vmax.f32 %v2114_v63, 0.0  ;;  %v2929_v63 = vld [vmem:[#allocation13 + $0x240] sm:$0xff]  ;;  %3683 = vmatprep.subr.bf16.mxu1 %v9293_v60 }
 0x487   :  { %v2271_v15 = vmax.f32 %v2116_v5, 0.0  ;;  %v2890_v5 = vld [vmem:[#allocation13 + $0x108] sm:$0xff]  ;;  %v9301_v11 = vcombine.high %v2929_v63, %v2933_v44 }
 0x488   :  { %v2332_v18 = vpack.c.bf16 %v2270_v10, %v2268_v9  ;;  %v9292_v9 = vcombine.low %v2921_v23, %v2925_v24  ;;  %v9263_v17 = vcombine.high %v2890_v5, %v2894_v6 }
 0x489   :  { %v2119_v3 = vpop.f32.mrb[68].mxu1  ;;  %v2333_v21 = vpack.c.bf16 %v2271_v15, %v2269_v14  ;;  %v2937_v15 = vld [vmem:[#allocation13 + $0x280] sm:$0xff] }
 0x48a   :  { %v2120_v27 = vadd.f32 %v2119_v3, %v12030_v53  ;;  %v2121_v28 = vpop.f32.mrb[69].mxu1  ;;  %3684 = vmatpush1.bf16.msra.mxu1 %v9292_v9  ;;  %v9309_v26 = vcombine.high %v2937_v15, %v2941_v16 }
 0x48b   :  { %v2122_v32 = vadd.f32 %v2121_v28, %v12033_v54  ;;  %v2123_v33 = vpop.f32.mrb[70].mxu1  ;;  %2600 = vmatprep.mubr.bf16.mxu0 %v2333_v21  ;;  %v9300_v21 = vcombine.low %v2929_v63, %v2933_v44  ;;  %3685 = vmatprep.subr.bf16.mxu1 %v9301_v11 }
 0x48c   :  { %v2124_v36 = vadd.f32 %v2123_v33, %v12030_v53  ;;  %v2125_v39 = vpop.f32.mrb[71].mxu1  ;;  %2601 = vmatmul.mubr.bf16.vlgmr.msra.gmra.mrb[128].mxu0 %v2332_v18  ;;  %v2272_v47 = vmax.f32 %v2120_v27, 0.0  ;;  %v9262_v27 = vcombine.low %v2890_v5, %v2894_v6  ;;  %v2922_v6 = vld [vmem:[#allocation13 + $0x208] sm:$0xff] }
 0x48d   :  { %v2126_v42 = vadd.f32 %v2125_v39, %v12033_v54  ;;  %3861 = vmatpush1.bf16.msra.mxu0 %v9230_v25  ;;  %v2273_v50 = vmax.f32 %v2122_v32, 0.0  ;;  %v2949_v32 = vld [vmem:[#allocation13 + $0x2e0] sm:$0xff] }
 0x48e   :  { %v2274_v48 = vmax.f32 %v2124_v36, 0.0  ;;  %3862 = vmatprep.subr.bf16.mxu0 %v9239_v31  ;;  %v2945_v31 = vld [vmem:[#allocation13 + $0x2c0] sm:$0xff]  ;;  %v2910_v36 = vld [vmem:[#allocation13 + $0x1a8] sm:$0xff]  ;;  %3686 = vmatpush1.bf16.msra.mxu1 %v9300_v21 }
 0x48f   :  { %v2275_v51 = vmax.f32 %v2126_v42, 0.0  ;;  %v9308_v42 = vcombine.low %v2937_v15, %v2941_v16  ;;  %3687 = vmatprep.subr.bf16.mxu1 %v9309_v26  ;;  %v9279_v24 = vcombine.high %v2906_v35, %v2910_v36 }
 0x490   :  { %v2334_v56 = vpack.c.bf16 %v2274_v48, %v2272_v47  ;;  %v9317_v47 = vcombine.high %v2945_v31, %v2949_v32 }
 0x491   :  { %v2129_v58 = vpop.f32.mrb[72].mxu1  ;;  %v2335_v59 = vpack.c.bf16 %v2275_v51, %v2273_v50  ;;  %3863 = vmatpush1.bf16.msra.mxu0 %v9238_v46  ;;  %v9270_v46 = vcombine.low %v2898_v20, %v2902_v2  ;;  %v2957_v50 = vld [vmem:[#allocation13 + $0x320] sm:$0xff]  ;;  %v2930_v2 = vld [vmem:[#allocation13 + $0x248] sm:$0xff] }
 0x492   :  { %v2130_v62 = vadd.f32 %v2129_v58, %v12030_v53  ;;  %v2131_v43 = vpop.f32.mrb[73].mxu1  ;;  %3864 = vmatprep.subr.bf16.mxu0 %v9247_v49  ;;  %v2953_v49 = vld [vmem:[#allocation13 + $0x300] sm:$0xff]  ;;  %3688 = vmatpush1.bf16.msra.mxu1 %v9308_v42  ;;  %v9316_v58 = vcombine.low %v2945_v31, %v2949_v32 }
 0x493   :  { %v2132_v1 = vadd.f32 %v2131_v43, %v12033_v54  ;;  %v2133_v4 = vpop.f32.mrb[74].mxu1  ;;  %2610 = vmatprep.mubr.bf16.mxu0 %v2335_v59  ;;  %3689 = vmatprep.subr.bf16.mxu1 %v9317_v47 }
 0x494   :  { %v2134_v7 = vadd.f32 %v2133_v4, %v12030_v53  ;;  %v2135_v8 = vpop.f32.mrb[75].mxu1  ;;  %2611 = vmatmul.mubr.bf16.gmra.mrb[132].mxu0 %v2334_v56  ;;  %v2276_v13 = vmax.f32 %v2130_v62, 0.0  ;;  %v2918_v56 = vld [vmem:[#allocation13 + $0x1e8] sm:$0xff]  ;;  %v9325_v62 = vcombine.high %v2953_v49, %v2957_v50 }
 0x495   :  { %v2136_v10 = vadd.f32 %v2135_v8, %v12033_v54  ;;  %3865 = vmatpush1.bf16.msra.mxu0 %v9246_v61  ;;  %v2277_v18 = vmax.f32 %v2132_v1, 0.0  ;;  %v9278_v61 = vcombine.low %v2906_v35, %v2910_v36  ;;  %v9287_v44 = vcombine.high %v2914_v55, %v2918_v56  ;;  %v2965_v1 = vld [vmem:[#allocation13 + $0x360] sm:$0xff]  ;;  %v2942_v35 = vld [vmem:[#allocation13 + $0x2a8] sm:$0xff] }
 0x496   :  { %v2278_v14 = vmax.f32 %v2134_v7, 0.0  ;;  %3866 = vmatprep.subr.bf16.mxu0 %v9255_v0  ;;  %v2961_v0 = vld [vmem:[#allocation13 + $0x340] sm:$0xff]  ;;  %v2926_v7 = vld [vmem:[#allocation13 + $0x228] sm:$0xff]  ;;  %3690 = vmatpush1.bf16.msra.mxu1 %v9316_v58 }
 0x497   :  { %v2279_v19 = vmax.f32 %v2136_v10, 0.0  ;;  %v9324_v10 = vcombine.low %v2953_v49, %v2957_v50  ;;  %3691 = vmatprep.subr.bf16.mxu1 %v9325_v62  ;;  %v9295_v16 = vcombine.high %v2922_v6, %v2926_v7  ;;  %v2946_v49 = vld [vmem:[#allocation13 + $0x2c8] sm:$0xff] }
 0x498   :  { %v2336_v3 = vpack.c.bf16 %v2278_v14, %v2276_v13  ;;  %v9333_v13 = vcombine.high %v2961_v0, %v2965_v1  ;;  %v2950_v50 = vld [vmem:[#allocation13 + $0x2e8] sm:$0xff] }
 0x499   :  { %v2139_v22 = vpop.f32.mrb[76].mxu1  ;;  %v2337_v25 = vpack.c.bf16 %v2279_v19, %v2277_v18  ;;  %3867 = vmatpush1.bf16.msra.mxu0 %v9254_v12  ;;  %v9286_v12 = vcombine.low %v2914_v55, %v2918_v56  ;;  %v2973_v18 = vld [vmem:[#allocation13 + $0x3a0] sm:$0xff]  ;;  %v2954_v62 = vld [vmem:[#allocation13 + $0x308] sm:$0xff] }
 0x49a   :  { %v2140_v28 = vadd.f32 %v2139_v22, %v12030_v53  ;;  %v2141_v29 = vpop.f32.mrb[77].mxu1  ;;  %3868 = vmatprep.subr.bf16.mxu0 %v9263_v17  ;;  %v2969_v17 = vld [vmem:[#allocation13 + $0x380] sm:$0xff]  ;;  %3692 = vmatpush1.bf16.msra.mxu1 %v9324_v10  ;;  %v9332_v22 = vcombine.low %v2961_v0, %v2965_v1  ;;  %v9318_v1 = vcombine.low %v2946_v49, %v2950_v50  ;;  %v2966_v10 = vld [vmem:[#allocation13 + $0x368] sm:$0xff] }
 0x49b   :  { %v2142_v33 = vadd.f32 %v2141_v29, %v12033_v54  ;;  %v2143_v34 = vpop.f32.mrb[78].mxu1  ;;  %2620 = vmatprep.mubr.bf16.mxu0 %v2337_v25  ;;  %3693 = vmatprep.subr.bf16.mxu1 %v9333_v13 }
 0x49c   :  { %v2144_v39 = vadd.f32 %v2143_v34, %v12030_v53  ;;  %v2145_v41 = vpop.f32.mrb[79].mxu1  ;;  %2621 = vmatmul.mubr.bf16.gmra.mrb[136].mxu0 %v2336_v3  ;;  %v2280_v48 = vmax.f32 %v2140_v28, 0.0  ;;  %v2934_v3 = vld [vmem:[#allocation13 + $0x268] sm:$0xff]  ;;  %v9341_v28 = vcombine.high %v2969_v17, %v2973_v18 }
 0x49d   :  { %v2146_v45 = vadd.f32 %v2145_v41, %v12033_v54  ;;  %3869 = vmatpush1.bf16.msra.mxu0 %v9262_v27  ;;  %v2281_v51 = vmax.f32 %v2142_v33, 0.0  ;;  %v9294_v27 = vcombine.low %v2922_v6, %v2926_v7  ;;  %v9303_v31 = vcombine.high %v2930_v2, %v2934_v3  ;;  %v2938_v34 = vld [vmem:[#allocation13 + $0x288] sm:$0xff] }
 0x49e   :  { %v2282_v23 = vmax.f32 %v2144_v39, 0.0  ;;  %3870 = vmatprep.subr.bf16.mxu0 %v9271_v30  ;;  %3694 = vmatpush1.bf16.msra.mxu1 %v9332_v22  ;;  %v9340_v41 = vcombine.low %v2969_v17, %v2973_v18  ;;  %v9310_v56 = vcombine.low %v2938_v34, %v2942_v35 }
 0x49f   :  { %v2283_v52 = vmax.f32 %v2146_v45, 0.0  ;;  %v9302_v45 = vcombine.low %v2930_v2, %v2934_v3  ;;  %3695 = vmatprep.subr.bf16.mxu1 %v9341_v28 }
 0x4a0   :  { %v2338_v57 = vpack.c.bf16 %v2282_v23, %v2280_v48  ;;  %v9311_v48 = vcombine.high %v2938_v34, %v2942_v35 }
 0x4a1   :  { %v2149_v59 = vpop.f32.mrb[80].mxu1  ;;  %v2339_v60 = vpack.c.bf16 %v2283_v52, %v2281_v51  ;;  %3871 = vmatpush1.bf16.msra.mxu0 %v9270_v46 }
 0x4a2   :  { %v2150_v43 = vadd.f32 %v2149_v59, %v12030_v53  ;;  %v2151_v63 = vpop.f32.mrb[81].mxu1  ;;  %3872 = vmatprep.subr.bf16.mxu0 %v9279_v24  ;;  %3696 = vmatpush1.bf16.msra.mxu1 %v9340_v41  ;;  %v9319_v59 = vcombine.high %v2946_v49, %v2950_v50 }
 0x4a3   :  { %v2152_v4 = vadd.f32 %v2151_v63, %v12033_v54  ;;  %v2153_v5 = vpop.f32.mrb[82].mxu1  ;;  %2630 = vmatprep.mubr.bf16.mxu0 %v2339_v60 }
 0x4a4   :  { %v2154_v8 = vadd.f32 %v2153_v5, %v12030_v53  ;;  %v2155_v9 = vpop.f32.mrb[83].mxu1  ;;  %2631 = vmatmul.mubr.bf16.gmra.mrb[140].mxu0 %v2338_v57  ;;  %v2284_v14 = vmax.f32 %v2150_v43, 0.0  ;;  %v2958_v43 = vld [vmem:[#allocation13 + $0x328] sm:$0xff] }
 0x4a5   :  { %v2156_v11 = vadd.f32 %v2155_v9, %v12033_v54  ;;  %3873 = vmatpush1.bf16.msra.mxu0 %v9278_v61  ;;  %v2285_v19 = vmax.f32 %v2152_v4, 0.0  ;;  %v9327_v6 = vcombine.high %v2954_v62, %v2958_v43  ;;  %v2962_v9 = vld [vmem:[#allocation13 + $0x348] sm:$0xff] }
 0x4a6   :  { %v2286_v15 = vmax.f32 %v2154_v8, 0.0  ;;  %3874 = vmatprep.subr.bf16.mxu0 %v9287_v44  ;;  %v9335_v17 = vcombine.high %v2962_v9, %v2966_v10 }
 0x4a7   :  { %v2287_v20 = vmax.f32 %v2156_v11, 0.0 }
 0x4a8   :  { %v2340_v21 = vpack.c.bf16 %v2286_v15, %v2284_v14  ;;  %v9326_v14 = vcombine.low %v2954_v62, %v2958_v43 }
 0x4a9   :  { %v2159_v25 = vpop.f32.mrb[84].mxu1  ;;  %v2341_v26 = vpack.c.bf16 %v2287_v20, %v2285_v19  ;;  %3875 = vmatpush1.bf16.msra.mxu0 %v9286_v12 }
 0x4aa   :  { %v2160_v29 = vadd.f32 %v2159_v25, %v12030_v53  ;;  %v2161_v30 = vpop.f32.mrb[85].mxu1  ;;  %3876 = vmatprep.subr.bf16.mxu0 %v9295_v16 }
 0x4ab   :  { %v2162_v32 = vadd.f32 %v2161_v30, %v12033_v54  ;;  %v2163_v33 = vpop.f32.mrb[86].mxu1  ;;  %2640 = vmatprep.mubr.bf16.mxu0 %v2341_v26 }
 0x4ac   :  { %v2164_v36 = vadd.f32 %v2163_v33, %v12030_v53  ;;  %v2165_v39 = vpop.f32.mrb[87].mxu1  ;;  %2641 = vmatmul.mubr.bf16.gmra.mrb[144].mxu0 %v2340_v21  ;;  %v2288_v46 = vmax.f32 %v2160_v29, 0.0  ;;  %v9334_v21 = vcombine.low %v2962_v9, %v2966_v10 }
 0x4ad   :  { %v2166_v42 = vadd.f32 %v2165_v39, %v12033_v54  ;;  %3877 = vmatpush1.bf16.msra.mxu0 %v9294_v27  ;;  %v2289_v23 = vmax.f32 %v2162_v32, 0.0 }
 0x4ae   :  { %v2290_v47 = vmax.f32 %v2164_v36, 0.0  ;;  %3878 = vmatprep.subr.bf16.mxu0 %v9303_v31 }
 0x4af   :  { %v2291_v24 = vmax.f32 %v2166_v42, 0.0 }
 0x4b0   :  { %v2342_v51 = vpack.c.bf16 %v2290_v47, %v2288_v46 }
 0x4b1   :  { %v2169_v52 = vpop.f32.mrb[88].mxu1  ;;  %v2343_v55 = vpack.c.bf16 %v2291_v24, %v2289_v23  ;;  %3879 = vmatpush1.bf16.msra.mxu0 %v9302_v45 }
 0x4b2   :  { %v2170_v57 = vadd.f32 %v2169_v52, %v12030_v53  ;;  %v2171_v58 = vpop.f32.mrb[89].mxu1  ;;  %3880 = vmatprep.subr.bf16.mxu0 %v9311_v48 }
 0x4b3   :  { %v2172_v60 = vadd.f32 %v2171_v58, %v12033_v54  ;;  %v2173_v61 = vpop.f32.mrb[90].mxu1  ;;  %2650 = vmatprep.mubr.bf16.mxu0 %v2343_v55 }
 0x4b4   :  { %v2174_v63 = vadd.f32 %v2173_v61, %v12030_v53  ;;  %v2175_v44 = vpop.f32.mrb[91].mxu1  ;;  %2651 = vmatmul.mubr.bf16.gmra.mrb[148].mxu0 %v2342_v51  ;;  %v2292_v4 = vmax.f32 %v2170_v57, 0.0 }
 0x4b5   :  { %v2176_v0 = vadd.f32 %v2175_v44, %v12033_v54  ;;  %3881 = vmatpush1.bf16.msra.mxu0 %v9310_v56  ;;  %v2293_v7 = vmax.f32 %v2172_v60, 0.0 }
 0x4b6   :  { %v2294_v5 = vmax.f32 %v2174_v63, 0.0  ;;  %3882 = vmatprep.subr.bf16.mxu0 %v9319_v59 }
 0x4b7   :  { %v2295_v8 = vmax.f32 %v2176_v0, 0.0 }
 0x4b8   :  { %v2344_v11 = vpack.c.bf16 %v2294_v5, %v2292_v4 }
 0x4b9   :  { %v2179_v12 = vpop.f32.mrb[92].mxu1  ;;  %v2345_v13 = vpack.c.bf16 %v2295_v8, %v2293_v7  ;;  %3883 = vmatpush1.bf16.msra.mxu0 %v9318_v1 }
 0x4ba   :  { %v2180_v15 = vadd.f32 %v2179_v12, %v12030_v53  ;;  %v2181_v16 = vpop.f32.mrb[93].mxu1  ;;  %3884 = vmatprep.subr.bf16.mxu0 %v9327_v6 }
 0x4bb   :  { %v2182_v18 = vadd.f32 %v2181_v16, %v12033_v54  ;;  %v2183_v19 = vpop.f32.mrb[94].mxu1  ;;  %2660 = vmatprep.mubr.bf16.mxu0 %v2345_v13 }
 0x4bc   :  { %v2184_v20 = vadd.f32 %v2183_v19, %v12030_v53  ;;  %v2185_v2 = vpop.f32.mrb[95].mxu1  ;;  %2661 = vmatmul.mubr.bf16.gmra.mrb[152].mxu0 %v2344_v11  ;;  %v2296_v22 = vmax.f32 %v2180_v15, 0.0 }
 0x4bd   :  { %v2186_v3 = vadd.f32 %v2185_v2, %v12033_v54  ;;  %3885 = vmatpush1.bf16.msra.mxu0 %v9326_v14  ;;  %v2297_v26 = vmax.f32 %v2182_v18, 0.0 }
 0x4be   :  { %v2298_v25 = vmax.f32 %v2184_v20, 0.0  ;;  %3886 = vmatprep.subr.bf16.mxu0 %v9335_v17 }
 0x4bf   :  { %v2299_v27 = vmax.f32 %v2186_v3, 0.0 }
 0x4c0   :  { %v2346_v28 = vpack.c.bf16 %v2298_v25, %v2296_v22  ;;  %v2970_v25 = vld [vmem:[#allocation13 + $0x388] sm:$0xff] }
 0x4c1   :  { %v2189_v29 = vpop.f32.mrb[96].mxu1  ;;  %v2347_v30 = vpack.c.bf16 %v2299_v27, %v2297_v26  ;;  %3887 = vmatpush1.bf16.msra.mxu0 %v9334_v21  ;;  %v2974_v26 = vld [vmem:[#allocation13 + $0x3a8] sm:$0xff] }
 0x4c2   :  { %v2190_v31 = vadd.f32 %v2189_v29, %v12030_v53  ;;  %v2191_v32 = vpop.f32.mrb[97].mxu1 }
 0x4c3   :  { %v2192_v33 = vadd.f32 %v2191_v32, %v12033_v54  ;;  %v2193_v34 = vpop.f32.mrb[98].mxu1  ;;  %2670 = vmatprep.mubr.bf16.mxu0 %v2347_v30 }
 0x4c4   :  { %v2194_v35 = vadd.f32 %v2193_v34, %v12030_v53  ;;  %v2195_v36 = vpop.f32.mrb[99].mxu1  ;;  %2671 = vmatmul.mubr.bf16.gmra.mrb[156].mxu0 %v2346_v28  ;;  %v2300_v41 = vmax.f32 %v2190_v31, 0.0  ;;  %v9343_v28 = vcombine.high %v2970_v25, %v2974_v26  ;;  %v9342_v31 = vcombine.low %v2970_v25, %v2974_v26 }
 0x4c5   :  { %v2196_v39 = vadd.f32 %v2195_v36, %v12033_v54  ;;  %v2301_v45 = vmax.f32 %v2192_v33, 0.0  ;;  %v2977_v36 = vld [vmem:[#allocation13 + $0x3c0] sm:$0xff] }
 0x4c6   :  { %v2302_v42 = vmax.f32 %v2194_v35, 0.0  ;;  %3888 = vmatprep.subr.bf16.mxu0 %v9343_v28 }
 0x4c7   :  { %v2303_v46 = vmax.f32 %v2196_v39, 0.0  ;;  %v2981_v39 = vld [vmem:[#allocation13 + $0x3e0] sm:$0xff]  ;;  %3889 = vmatpush1.bf16.msra.mxu0 %v9342_v31 }
 0x4c8   :  { %v2348_v47 = vpack.c.bf16 %v2302_v42, %v2300_v41  ;;  %v2978_v41 = vld [vmem:[#allocation13 + $0x3c8] sm:$0xff] }
 0x4c9   :  { %v2199_v48 = vpop.f32.mrb[100].mxu1  ;;  %v2349_v23 = vpack.c.bf16 %v2303_v46, %v2301_v45  ;;  %v9349_v46 = vcombine.high %v2977_v36, %v2981_v39 }
 0x4ca   :  { %v2200_v24 = vadd.f32 %v2199_v48, %v12030_v53  ;;  %v2201_v49 = vpop.f32.mrb[101].mxu1 }
 0x4cb   :  { %v2202_v50 = vadd.f32 %v2201_v49, %v12033_v54  ;;  %v2203_v51 = vpop.f32.mrb[102].mxu1  ;;  %2680 = vmatprep.mubr.bf16.mxu0 %v2349_v23  ;;  %v9348_v23 = vcombine.low %v2977_v36, %v2981_v39  ;;  %3697 = vmatprep.subr.bf16.mxu1 %v9349_v46  ;;  %v2864_v46 = vld [vmem:[#allocation13 + $0x38] sm:$0xff] }
 0x4cc   :  { %v2204_v52 = vadd.f32 %v2203_v51, %v12030_v53  ;;  %v2205_v55 = vpop.f32.mrb[103].mxu1  ;;  %2681 = vmatmul.mubr.bf16.gmra.mrb[160].mxu0 %v2348_v47  ;;  %v2304_v57 = vmax.f32 %v2200_v24, 0.0  ;;  %v2982_v47 = vld [vmem:[#allocation13 + $0x3e8] sm:$0xff] }
 0x4cd   :  { %v2206_v56 = vadd.f32 %v2205_v55, %v12033_v54  ;;  %v2305_v59 = vmax.f32 %v2202_v50, 0.0  ;;  %v9350_v24 = vcombine.low %v2978_v41, %v2982_v47  ;;  %v9351_v51 = vcombine.high %v2978_v41, %v2982_v47  ;;  %3698 = vmatpush1.bf16.msra.mxu1 %v9348_v23 }
 0x4ce   :  { %v2306_v58 = vmax.f32 %v2204_v52, 0.0 }
 0x4cf   :  { %v2307_v60 = vmax.f32 %v2206_v56, 0.0  ;;  %3890 = vmatprep.subr.bf16.mxu0 %v9351_v51 }
 0x4d0   :  { %v2350_v61 = vpack.c.bf16 %v2306_v58, %v2304_v57  ;;  %3891 = vmatpush1.bf16.msra.mxu0 %v9350_v24 }
 0x4d1   :  { %v2209_v62 = vpop.f32.mrb[104].mxu1  ;;  %v2351_v43 = vpack.c.bf16 %v2307_v60, %v2305_v59 }
 0x4d2   :  { %v2210_v63 = vadd.f32 %v2209_v62, %v12030_v53  ;;  %v2211_v44 = vpop.f32.mrb[105].mxu1 }
 0x4d3   :  { %v2212_v0 = vadd.f32 %v2211_v44, %v12033_v54  ;;  %v2213_v1 = vpop.f32.mrb[106].mxu1  ;;  %2690 = vmatprep.mubr.bf16.mxu0 %v2351_v43 }
 0x4d4   :  { %v2214_v4 = vadd.f32 %v2213_v1, %v12030_v53  ;;  %v2215_v5 = vpop.f32.mrb[107].mxu1  ;;  %2691 = vmatmul.mubr.bf16.gmra.mrb[164].mxu0 %v2350_v61  ;;  %v2308_v7 = vmax.f32 %v2210_v63, 0.0 }
 0x4d5   :  { %v2216_v6 = vadd.f32 %v2215_v5, %v12033_v54  ;;  %v2309_v9 = vmax.f32 %v2212_v0, 0.0  ;;  %v12093_v5 = vld [vmem:[#allocation13 + $0x30] sm:$0xff] }
 0x4d6   :  { %v2310_v8 = vmax.f32 %v2214_v4, 0.0  ;;  %v12091_v4 = vld [vmem:[#allocation13 + $0x10] sm:$0xff] }
 0x4d7   :  { %v2311_v10 = vmax.f32 %v2216_v6, 0.0 }
 0x4d8   :  { %v2352_v11 = vpack.c.bf16 %v2310_v8, %v2308_v7  ;;  %v9232_v8 = vcombine.low %v12091_v4, %v12093_v5 }
 0x4d9   :  { %v2219_v12 = vpop.f32.mrb[108].mxu1  ;;  %v2353_v13 = vpack.c.bf16 %v2311_v10, %v2309_v9  ;;  %v9233_v9 = vcombine.high %v12091_v4, %v12093_v5 }
 0x4da   :  { %v2220_v14 = vadd.f32 %v2219_v12, %v12030_v53  ;;  %v2221_v15 = vpop.f32.mrb[109].mxu1 }
 0x4db   :  { %v2222_v16 = vadd.f32 %v2221_v15, %v12033_v54  ;;  %v2223_v17 = vpop.f32.mrb[110].mxu1  ;;  %2700 = vmatprep.mubr.bf16.mxu0 %v2353_v13  ;;  %4053 = vmatprep.subr.bf16.mxu1 %v9233_v9 }
 0x4dc   :  { %v2224_v18 = vadd.f32 %v2223_v17, %v12030_v53  ;;  %v2225_v19 = vpop.f32.mrb[111].mxu1  ;;  %2701 = vmatmul.mubr.bf16.gmra.mrb[168].mxu0 %v2352_v11  ;;  %v2312_v2 = vmax.f32 %v2220_v14, 0.0 }
 0x4dd   :  { %v2226_v20 = vadd.f32 %v2225_v19, %v12033_v54  ;;  %v2313_v21 = vmax.f32 %v2222_v16, 0.0 }
 0x4de   :  { %v2314_v3 = vmax.f32 %v2224_v18, 0.0 }
 0x4df   :  { %v2315_v22 = vmax.f32 %v2226_v20, 0.0 }
 0x4e0   :  { %v2354_v27 = vpack.c.bf16 %v2314_v3, %v2312_v2 }
 0x4e1   :  { %v2229_v29 = vpop.f32.mrb[112].mxu1  ;;  %v2355_v30 = vpack.c.bf16 %v2315_v22, %v2313_v21 }
 0x4e2   :  { %v2230_v32 = vadd.f32 %v2229_v29, %v12030_v53  ;;  %v2231_v33 = vpop.f32.mrb[113].mxu1 }
 0x4e3   :  { %v2232_v34 = vadd.f32 %v2231_v33, %v12033_v54  ;;  %v2233_v35 = vpop.f32.mrb[114].mxu1  ;;  %2710 = vmatprep.mubr.bf16.mxu0 %v2355_v30 }
 0x4e4   :  { %v2234_v42 = vadd.f32 %v2233_v35, %v12030_v53  ;;  %v2235_v45 = vpop.f32.mrb[115].mxu1  ;;  %2711 = vmatmul.mubr.bf16.gmra.mrb[172].mxu0 %v2354_v27  ;;  %v2316_v49 = vmax.f32 %v2230_v32, 0.0 }
 0x4e5   :  { %v2236_v48 = vadd.f32 %v2235_v45, %v12033_v54  ;;  %v2317_v52 = vmax.f32 %v2232_v34, 0.0  ;;  %v2860_v45 = vld [vmem:[#allocation13 + $0x18] sm:$0xff] }
 0x4e6   :  { %v2318_v50 = vmax.f32 %v2234_v42, 0.0  ;;  %v9235_v47 = vcombine.high %v2860_v45, %v2864_v46 }
 0x4e7   :  { %v2319_v55 = vmax.f32 %v2236_v48, 0.0  ;;  %v9234_v48 = vcombine.low %v2860_v45, %v2864_v46 }
 0x4e8   :  { %v2356_v56 = vpack.c.bf16 %v2318_v50, %v2316_v49  ;;  %4246 = vmatprep.subr.bf16.mxu0 %v9235_v47  ;;  %v2895_v47 = vld [vmem:[#allocation13 + $0x130] sm:$0xff] }
 0x4e9   :  { %v2239_v57 = vpop.f32.mrb[116].mxu1  ;;  %v2357_v58 = vpack.c.bf16 %v2319_v55, %v2317_v52 }
 0x4ea   :  { %v2240_v59 = vadd.f32 %v2239_v57, %v12030_v53  ;;  %v2241_v60 = vpop.f32.mrb[117].mxu1 }
 0x4eb   :  { %v2242_v61 = vadd.f32 %v2241_v60, %v12033_v54  ;;  %v2243_v62 = vpop.f32.mrb[118].mxu1  ;;  %2720 = vmatprep.mubr.bf16.mxu0 %v2357_v58  ;;  %v2867_v60 = vld [vmem:[#allocation13 + $0x50] sm:$0xff] }
 0x4ec   :  { %v2244_v43 = vadd.f32 %v2243_v62, %v12030_v53  ;;  %v2245_v63 = vpop.f32.mrb[119].mxu1  ;;  %2721 = vmatmul.mubr.bf16.gmra.mrb[176].mxu0 %v2356_v56  ;;  %v2320_v0 = vmax.f32 %v2240_v59, 0.0 }
 0x4ed   :  { %v2246_v44 = vadd.f32 %v2245_v63, %v12033_v54  ;;  %v2321_v6 = vmax.f32 %v2242_v61, 0.0  ;;  %v2868_v63 = vld [vmem:[#allocation13 + $0x58] sm:$0xff] }
 0x4ee   :  { %v2322_v1 = vmax.f32 %v2244_v43, 0.0  ;;  %v2871_v43 = vld [vmem:[#allocation13 + $0x70] sm:$0xff] }
 0x4ef   :  { %v2323_v7 = vmax.f32 %v2246_v44, 0.0  ;;  %v2872_v44 = vld [vmem:[#allocation13 + $0x78] sm:$0xff] }
 0x4f0   :  { %v2358_v10 = vpack.c.bf16 %v2322_v1, %v2320_v0 }
 0x4f1   :  { %v2249_v11 = vpop.f32.mrb[120].mxu1  ;;  %v2359_v12 = vpack.c.bf16 %v2323_v7, %v2321_v6 }
 0x4f2   :  { %v2250_v13 = vadd.f32 %v2249_v11, %v12030_v53  ;;  %v2251_v14 = vpop.f32.mrb[121].mxu1  ;;  %v2875_v11 = vld [vmem:[#allocation13 + $0x90] sm:$0xff] }
 0x4f3   :  { %v2252_v15 = vadd.f32 %v2251_v14, %v12033_v54  ;;  %v2253_v16 = vpop.f32.mrb[122].mxu1  ;;  %2730 = vmatprep.mubr.bf16.mxu0 %v2359_v12  ;;  %v9243_v12 = vcombine.high %v2868_v63, %v2872_v44 }
 0x4f4   :  { %v2254_v17 = vadd.f32 %v2253_v16, %v12030_v53  ;;  %v2255_v18 = vpop.f32.mrb[123].mxu1  ;;  %2731 = vmatmul.mubr.bf16.gmra.mrb[180].mxu0 %v2358_v10  ;;  %v2324_v20 = vmax.f32 %v2250_v13, 0.0  ;;  %v9241_v10 = vcombine.high %v2867_v60, %v2871_v43  ;;  %v2876_v16 = vld [vmem:[#allocation13 + $0x98] sm:$0xff] }
 0x4f5   :  { %v2256_v19 = vadd.f32 %v2255_v18, %v12033_v54  ;;  %v2325_v3 = vmax.f32 %v2252_v15, 0.0  ;;  %v2879_v15 = vld [vmem:[#allocation13 + $0xb0] sm:$0xff] }
 0x4f6   :  { %v2326_v2 = vmax.f32 %v2254_v17, 0.0  ;;  %v2880_v17 = vld [vmem:[#allocation13 + $0xb8] sm:$0xff]  ;;  %v9248_v5 = vcombine.low %v2875_v11, %v2879_v15 }
 0x4f7   :  { %v2327_v21 = vmax.f32 %v2256_v19, 0.0 }
 0x4f8   :  { %v2360_v22 = vpack.c.bf16 %v2326_v2, %v2324_v20  ;;  %v9240_v2 = vcombine.low %v2867_v60, %v2871_v43  ;;  %v2900_v43 = vld [vmem:[#allocation13 + $0x158] sm:$0xff] }
 0x4f9   :  { %v2259_v25 = vpop.f32.mrb[124].mxu1  ;;  %v2361_v26 = vpack.c.bf16 %v2327_v21, %v2325_v3  ;;  %v9242_v3 = vcombine.low %v2868_v63, %v2872_v44  ;;  %v2904_v63 = vld [vmem:[#allocation13 + $0x178] sm:$0xff] }
 0x4fa   :  { %v2260_v27 = vadd.f32 %v2259_v25, %v12030_v53  ;;  %v2261_v28 = vpop.f32.mrb[125].mxu1  ;;  %v9249_v25 = vcombine.high %v2875_v11, %v2879_v15  ;;  %v9275_v15 = vcombine.high %v2900_v43, %v2904_v63 }
 0x4fb   :  { %v2262_v29 = vadd.f32 %v2261_v28, %v12033_v54  ;;  %v2263_v30 = vpop.f32.mrb[126].mxu1  ;;  %2740 = vmatprep.mubr.bf16.mxu0 %v2361_v26  ;;  %v2883_v26 = vld [vmem:[#allocation13 + $0xd0] sm:$0xff] }
 0x4fc   :  { %v2264_v31 = vadd.f32 %v2263_v30, %v12030_v53  ;;  %v2265_v32 = vpop.f32.mrb[127].mxu1  ;;  %2741 = vmatmul.mubr.bf16.gmra.mrb[184].mxu0 %v2360_v22  ;;  %v2328_v34 = vmax.f32 %v2260_v27, 0.0  ;;  %v2396_v53 = vld [vmem:[%s13536_s14] sm:$0x3]  ;;  %v9251_v27 = vcombine.high %v2876_v16, %v2880_v17  ;;  %v2887_v30 = vld [vmem:[#allocation13 + $0xf0] sm:$0xff] }
 0x4fd   :  { %v2266_v33 = vadd.f32 %v2265_v32, %v12033_v54  ;;  %v2329_v36 = vmax.f32 %v2262_v29, 0.0  ;;  %v12111_v23 = vrot.slane %v2396_v53, %v11802_v38  ;;  %v12114_v54 = vrot.slane %v2396_v53, %v11808_v40  ;;  %v2888_v32 = vld [vmem:[#allocation13 + $0xf8] sm:$0xff] }
 0x4fe   :  { %v2330_v35 = vmax.f32 %v2264_v31, 0.0  ;;  %v2884_v31 = vld [vmem:[#allocation13 + $0xd8] sm:$0xff] }
 0x4ff   :  { %v2331_v39 = vmax.f32 %v2266_v33, 0.0  ;;  %v2896_v53 = vld [vmem:[#allocation13 + $0x138] sm:$0xff] }
 0x500   :  { %v2362_v41 = vpack.c.bf16 %v2330_v35, %v2328_v34 }
 0x501   :  { %v2363_v42 = vpack.c.bf16 %v2331_v39, %v2329_v36  ;;  %v9257_v39 = vcombine.high %v2883_v26, %v2887_v30 }
 0x503   :  { %2750 = vmatprep.mubr.bf16.mxu0 %v2363_v42  ;;  %v9259_v42 = vcombine.high %v2884_v31, %v2888_v32 }
 0x504   :  { %2751 = vmatmul.mubr.bf16.gmra.mrb[188].mxu0 %v2362_v41  ;;  %v2891_v41 = vld [vmem:[#allocation13 + $0x110] sm:$0xff] }
 0x55f   :  { %v2602_v24 = vpop.f32.mrb[128].mxu0 }
 0x560   :  { %v2603_v49 = vadd.f32 %v2602_v24, %v12111_v23  ;;  %v2604_v50 = vpop.f32.mrb[129].mxu0 }
 0x561   :  { %v2605_v51 = vadd.f32 %v2604_v50, %v12114_v54  ;;  %v2606_v52 = vpop.f32.mrb[130].mxu0 }
 0x562   :  { %v2607_v55 = vadd.f32 %v2606_v52, %v12111_v23  ;;  %v2608_v56 = vpop.f32.mrb[131].mxu0  ;;  %v2761_v58 = vmax.f32 %v2603_v49, 0.0  ;;  %v9258_v52 = vcombine.low %v2884_v31, %v2888_v32 }
 0x563   :  { %v2609_v57 = vadd.f32 %v2608_v56, %v12114_v54  ;;  %v2762_v61 = vmax.f32 %v2605_v51, 0.0  ;;  %v9256_v51 = vcombine.low %v2883_v26, %v2887_v30 }
 0x564   :  { %v2763_v59 = vmax.f32 %v2607_v55, 0.0 }
 0x565   :  { %v2764_v62 = vmax.f32 %v2609_v57, 0.0  ;;  %v9265_v57 = vcombine.high %v2891_v41, %v2895_v47 }
 0x566   :  { %v12120_v0 = vpack.c.bf16 %v2763_v59, %v2761_v58  ;;  %v2899_v58 = vld [vmem:[#allocation13 + $0x150] sm:$0xff] }
 0x567   :  { %v12122_v1 = vpack.c.bf16 %v2764_v62, %v2762_v61  ;;  %v2612_v6 = vpop.f32.mrb[132].mxu0  ;;  %v2903_v62 = vld [vmem:[#allocation13 + $0x170] sm:$0xff] }
 0x568   :  { %v2613_v7 = vadd.f32 %v2612_v6, %v12111_v23  ;;  %v2614_v9 = vpop.f32.mrb[133].mxu0 }
 0x569   :  { %v2615_v13 = vadd.f32 %v2614_v9, %v12114_v54  ;;  %v2616_v14 = vpop.f32.mrb[134].mxu0  ;;  %3699 = vmatprep.mubr.bf16.mxu1 %v12122_v1  ;;  %3892 = vmatprep.mubr.bf16.mxu0 %v12122_v1  ;;  %v9264_v9 = vcombine.low %v2891_v41, %v2895_v47 }
 0x56a   :  { %v2617_v18 = vadd.f32 %v2616_v14, %v12111_v23  ;;  %v2618_v19 = vpop.f32.mrb[135].mxu0  ;;  %3700 = vmatmul.mubr.bf16.vlgmr.msra.gmra.mrb[128].mxu1 %v12120_v0  ;;  %3893 = vmatmul.mubr.bf16.vlgmr.msra.gmra.mrb[192].mxu0 %v12120_v0  ;;  %v2765_v21 = vmax.f32 %v2613_v7, 0.0  ;;  %v2907_v14 = vld [vmem:[#allocation13 + $0x190] sm:$0xff] }
 0x56b   :  { %v2619_v20 = vadd.f32 %v2618_v19, %v12114_v54  ;;  %4054 = vmatpush1.bf16.msra.mxu1 %v9232_v8  ;;  %4247 = vmatpush1.bf16.msra.mxu0 %v9234_v48  ;;  %v2766_v28 = vmax.f32 %v2615_v13, 0.0  ;;  %v9250_v8 = vcombine.low %v2876_v16, %v2880_v17  ;;  %v2892_v48 = vld [vmem:[#allocation13 + $0x118] sm:$0xff]  ;;  %v9273_v13 = vcombine.high %v2899_v58, %v2903_v62 }
 0x56c   :  { %v2767_v22 = vmax.f32 %v2617_v18, 0.0  ;;  %4055 = vmatprep.subr.bf16.mxu1 %v9241_v10  ;;  %4248 = vmatprep.subr.bf16.mxu0 %v9243_v12  ;;  %v9267_v59 = vcombine.high %v2892_v48, %v2896_v53  ;;  %v9266_v10 = vcombine.low %v2892_v48, %v2896_v53  ;;  %v2911_v18 = vld [vmem:[#allocation13 + $0x1b0] sm:$0xff]  ;;  %v2908_v19 = vld [vmem:[#allocation13 + $0x198] sm:$0xff] }
 0x56d   :  { %v2768_v29 = vmax.f32 %v2619_v20, 0.0  ;;  %v2912_v20 = vld [vmem:[#allocation13 + $0x1b8] sm:$0xff]  ;;  %v9280_v41 = vcombine.low %v2907_v14, %v2911_v18  ;;  %v2923_v48 = vld [vmem:[#allocation13 + $0x210] sm:$0xff] }
 0x56e   :  { %v12135_v33 = vpack.c.bf16 %v2767_v22, %v2765_v21  ;;  %v9272_v22 = vcombine.low %v2899_v58, %v2903_v62  ;;  %v9283_v30 = vcombine.high %v2908_v19, %v2912_v20 }
 0x56f   :  { %v12137_v34 = vpack.c.bf16 %v2768_v29, %v2766_v28  ;;  %v2622_v4 = vpop.f32.mrb[136].mxu0  ;;  %4056 = vmatpush1.bf16.msra.mxu1 %v9240_v2  ;;  %4249 = vmatpush1.bf16.msra.mxu0 %v9242_v3  ;;  %v9281_v28 = vcombine.high %v2907_v14, %v2911_v18  ;;  %v2915_v29 = vld [vmem:[#allocation13 + $0x1d0] sm:$0xff] }
 0x570   :  { %v2623_v35 = vadd.f32 %v2622_v4, %v12111_v23  ;;  %v2624_v36 = vpop.f32.mrb[137].mxu0  ;;  %4057 = vmatprep.subr.bf16.mxu1 %v9249_v25  ;;  %4250 = vmatprep.subr.bf16.mxu0 %v9251_v27  ;;  %v9274_v25 = vcombine.low %v2900_v43, %v2904_v63  ;;  %v2919_v4 = vld [vmem:[#allocation13 + $0x1f0] sm:$0xff] }
 0x571   :  { %v2625_v45 = vadd.f32 %v2624_v36, %v12114_v54  ;;  %v2626_v46 = vpop.f32.mrb[138].mxu0  ;;  %3709 = vmatprep.mubr.bf16.mxu1 %v12137_v34  ;;  %3902 = vmatprep.mubr.bf16.mxu0 %v12137_v34  ;;  %v9289_v47 = vcombine.high %v2915_v29, %v2919_v4  ;;  %v9288_v58 = vcombine.low %v2915_v29, %v2919_v4  ;;  %v2931_v43 = vld [vmem:[#allocation13 + $0x250] sm:$0xff] }
 0x572   :  { %v2627_v24 = vadd.f32 %v2626_v46, %v12111_v23  ;;  %v2628_v49 = vpop.f32.mrb[139].mxu0  ;;  %3710 = vmatmul.mubr.bf16.gmra.mrb[132].mxu1 %v12135_v33  ;;  %3903 = vmatmul.mubr.bf16.gmra.mrb[196].mxu0 %v12135_v33  ;;  %v2769_v55 = vmax.f32 %v2623_v35, 0.0 }
 0x573   :  { %v2629_v50 = vadd.f32 %v2628_v49, %v12114_v54  ;;  %4058 = vmatpush1.bf16.msra.mxu1 %v9248_v5  ;;  %4251 = vmatpush1.bf16.msra.mxu0 %v9250_v8  ;;  %v2770_v60 = vmax.f32 %v2625_v45, 0.0  ;;  %v2916_v5 = vld [vmem:[#allocation13 + $0x1d8] sm:$0xff] }
 0x574   :  { %v2771_v56 = vmax.f32 %v2627_v24, 0.0  ;;  %4059 = vmatprep.subr.bf16.mxu1 %v9257_v39  ;;  %4252 = vmatprep.subr.bf16.mxu0 %v9259_v42  ;;  %v2920_v8 = vld [vmem:[#allocation13 + $0x1f8] sm:$0xff]  ;;  %v9282_v42 = vcombine.low %v2908_v19, %v2912_v20 }
 0x575   :  { %v2772_v61 = vmax.f32 %v2629_v50, 0.0  ;;  %v9291_v53 = vcombine.high %v2916_v5, %v2920_v8  ;;  %v2927_v50 = vld [vmem:[#allocation13 + $0x230] sm:$0xff] }
 0x576   :  { %v12147_v44 = vpack.c.bf16 %v2771_v56, %v2769_v55  ;;  %v9297_v62 = vcombine.high %v2923_v48, %v2927_v50 }
 0x577   :  { %v12149_v6 = vpack.c.bf16 %v2772_v61, %v2770_v60  ;;  %v2632_v7 = vpop.f32.mrb[140].mxu0  ;;  %4060 = vmatpush1.bf16.msra.mxu1 %v9256_v51  ;;  %4253 = vmatpush1.bf16.msra.mxu0 %v9258_v52  ;;  %v2924_v51 = vld [vmem:[#allocation13 + $0x218] sm:$0xff] }
 0x578   :  { %v2633_v11 = vadd.f32 %v2632_v7, %v12111_v23  ;;  %v2634_v12 = vpop.f32.mrb[141].mxu0  ;;  %4061 = vmatprep.subr.bf16.mxu1 %v9265_v57  ;;  %4254 = vmatprep.subr.bf16.mxu0 %v9267_v59  ;;  %v2928_v52 = vld [vmem:[#allocation13 + $0x238] sm:$0xff]  ;;  %v9290_v59 = vcombine.low %v2916_v5, %v2920_v8 }
 0x579   :  { %v2635_v16 = vadd.f32 %v2634_v12, %v12114_v54  ;;  %v2636_v17 = vpop.f32.mrb[142].mxu0  ;;  %3719 = vmatprep.mubr.bf16.mxu1 %v12149_v6  ;;  %3912 = vmatprep.mubr.bf16.mxu0 %v12149_v6  ;;  %v9299_v63 = vcombine.high %v2924_v51, %v2928_v52  ;;  %v2936_v12 = vld [vmem:[#allocation13 + $0x278] sm:$0xff] }
 0x57a   :  { %v2637_v2 = vadd.f32 %v2636_v17, %v12111_v23  ;;  %v2638_v3 = vpop.f32.mrb[143].mxu0  ;;  %3720 = vmatmul.mubr.bf16.gmra.mrb[136].mxu1 %v12147_v44  ;;  %3913 = vmatmul.mubr.bf16.gmra.mrb[200].mxu0 %v12147_v44  ;;  %v2773_v26 = vmax.f32 %v2633_v11, 0.0  ;;  %v2932_v11 = vld [vmem:[#allocation13 + $0x258] sm:$0xff]  ;;  %v9298_v17 = vcombine.low %v2924_v51, %v2928_v52 }
 0x57b   :  { %v2639_v21 = vadd.f32 %v2638_v3, %v12114_v54  ;;  %4062 = vmatpush1.bf16.msra.mxu1 %v9264_v9  ;;  %4255 = vmatpush1.bf16.msra.mxu0 %v9266_v10  ;;  %v2774_v31 = vmax.f32 %v2635_v16, 0.0  ;;  %v2935_v10 = vld [vmem:[#allocation13 + $0x270] sm:$0xff]  ;;  %v9296_v16 = vcombine.low %v2923_v48, %v2927_v50  ;;  %v9307_v3 = vcombine.high %v2932_v11, %v2936_v12  ;;  %v2952_v48 = vld [vmem:[#allocation13 + $0x2f8] sm:$0xff] }
 0x57c   :  { %v2775_v27 = vmax.f32 %v2637_v2, 0.0  ;;  %4063 = vmatprep.subr.bf16.mxu1 %v9273_v13  ;;  %4256 = vmatprep.subr.bf16.mxu0 %v9275_v15  ;;  %v9305_v20 = vcombine.high %v2931_v43, %v2935_v10  ;;  %v2939_v2 = vld [vmem:[#allocation13 + $0x290] sm:$0xff] }
 0x57d   :  { %v2776_v32 = vmax.f32 %v2639_v21, 0.0 }
 0x57e   :  { %v12159_v35 = vpack.c.bf16 %v2775_v27, %v2773_v26  ;;  %v2940_v26 = vld [vmem:[#allocation13 + $0x298] sm:$0xff] }
 0x57f   :  { %v12161_v36 = vpack.c.bf16 %v2776_v32, %v2774_v31  ;;  %v2642_v39 = vpop.f32.mrb[144].mxu0  ;;  %4064 = vmatpush1.bf16.msra.mxu1 %v9272_v22  ;;  %4257 = vmatpush1.bf16.msra.mxu0 %v9274_v25  ;;  %v2943_v25 = vld [vmem:[#allocation13 + $0x2b0] sm:$0xff]  ;;  %v2944_v27 = vld [vmem:[#allocation13 + $0x2b8] sm:$0xff]  ;;  %v9304_v31 = vcombine.low %v2931_v43, %v2935_v10  ;;  %v9306_v32 = vcombine.low %v2932_v11, %v2936_v12 }
 0x580   :  { %v2643_v45 = vadd.f32 %v2642_v39, %v12111_v23  ;;  %v2644_v46 = vpop.f32.mrb[145].mxu0  ;;  %4065 = vmatprep.subr.bf16.mxu1 %v9281_v28  ;;  %4258 = vmatprep.subr.bf16.mxu0 %v9283_v30  ;;  %v9313_v8 = vcombine.high %v2939_v2, %v2943_v25  ;;  %v2947_v39 = vld [vmem:[#allocation13 + $0x2d0] sm:$0xff]  ;;  %v9312_v50 = vcombine.low %v2939_v2, %v2943_v25  ;;  %v2960_v43 = vld [vmem:[#allocation13 + $0x338] sm:$0xff] }
 0x581   :  { %v2645_v24 = vadd.f32 %v2644_v46, %v12114_v54  ;;  %v2646_v49 = vpop.f32.mrb[146].mxu0  ;;  %3729 = vmatprep.mubr.bf16.mxu1 %v12161_v36  ;;  %3922 = vmatprep.mubr.bf16.mxu0 %v12161_v36  ;;  %v2951_v46 = vld [vmem:[#allocation13 + $0x2f0] sm:$0xff]  ;;  %v9314_v51 = vcombine.low %v2940_v26, %v2944_v27 }
 0x582   :  { %v2647_v55 = vadd.f32 %v2646_v49, %v12111_v23  ;;  %v2648_v56 = vpop.f32.mrb[147].mxu0  ;;  %3730 = vmatmul.mubr.bf16.gmra.mrb[140].mxu1 %v12159_v35  ;;  %3923 = vmatmul.mubr.bf16.gmra.mrb[204].mxu0 %v12159_v35  ;;  %v2777_v60 = vmax.f32 %v2643_v45, 0.0  ;;  %v9320_v10 = vcombine.low %v2947_v39, %v2951_v46  ;;  %v2967_v2 = vld [vmem:[#allocation13 + $0x370] sm:$0xff] }
 0x583   :  { %v2649_v57 = vadd.f32 %v2648_v56, %v12114_v54  ;;  %4066 = vmatpush1.bf16.msra.mxu1 %v9280_v41  ;;  %4259 = vmatpush1.bf16.msra.mxu0 %v9282_v42  ;;  %v2778_v7 = vmax.f32 %v2645_v24, 0.0  ;;  %v9315_v41 = vcombine.high %v2940_v26, %v2944_v27  ;;  %v9321_v56 = vcombine.high %v2947_v39, %v2951_v46  ;;  %v2975_v39 = vld [vmem:[#allocation13 + $0x3b0] sm:$0xff] }
 0x584   :  { %v2779_v61 = vmax.f32 %v2647_v55, 0.0  ;;  %4067 = vmatprep.subr.bf16.mxu1 %v9289_v47  ;;  %4260 = vmatprep.subr.bf16.mxu0 %v9291_v53  ;;  %v2948_v47 = vld [vmem:[#allocation13 + $0x2d8] sm:$0xff] }
 0x585   :  { %v2780_v9 = vmax.f32 %v2649_v57, 0.0  ;;  %v2955_v57 = vld [vmem:[#allocation13 + $0x310] sm:$0xff]  ;;  %v9322_v11 = vcombine.low %v2948_v47, %v2952_v48 }
 0x586   :  { %v12171_v13 = vpack.c.bf16 %v2779_v61, %v2777_v60  ;;  %v2959_v61 = vld [vmem:[#allocation13 + $0x330] sm:$0xff] }
 0x587   :  { %v12173_v14 = vpack.c.bf16 %v2780_v9, %v2778_v7  ;;  %v2652_v15 = vpop.f32.mrb[148].mxu0  ;;  %4068 = vmatpush1.bf16.msra.mxu1 %v9288_v58  ;;  %4261 = vmatpush1.bf16.msra.mxu0 %v9290_v59  ;;  %v9323_v58 = vcombine.high %v2948_v47, %v2952_v48  ;;  %v9328_v27 = vcombine.low %v2955_v57, %v2959_v61 }
 0x588   :  { %v2653_v18 = vadd.f32 %v2652_v15, %v12111_v23  ;;  %v2654_v19 = vpop.f32.mrb[149].mxu0  ;;  %4069 = vmatprep.subr.bf16.mxu1 %v9297_v62  ;;  %4262 = vmatprep.subr.bf16.mxu0 %v9299_v63  ;;  %v2956_v62 = vld [vmem:[#allocation13 + $0x318] sm:$0xff] }
 0x589   :  { %v2655_v21 = vadd.f32 %v2654_v19, %v12114_v54  ;;  %v2656_v22 = vpop.f32.mrb[150].mxu0  ;;  %3739 = vmatprep.mubr.bf16.mxu1 %v12173_v14  ;;  %3932 = vmatprep.mubr.bf16.mxu0 %v12173_v14 }
 0x58a   :  { %v2657_v28 = vadd.f32 %v2656_v22, %v12111_v23  ;;  %v2658_v29 = vpop.f32.mrb[151].mxu0  ;;  %3740 = vmatmul.mubr.bf16.gmra.mrb[144].mxu1 %v12171_v13  ;;  %3933 = vmatmul.mubr.bf16.gmra.mrb[208].mxu0 %v12171_v13  ;;  %v2781_v4 = vmax.f32 %v2653_v18, 0.0  ;;  %v9331_v18 = vcombine.high %v2956_v62, %v2960_v43 }
 0x58b   :  { %v2659_v30 = vadd.f32 %v2658_v29, %v12114_v54  ;;  %4070 = vmatpush1.bf16.msra.mxu1 %v9296_v16  ;;  %4263 = vmatpush1.bf16.msra.mxu0 %v9298_v17  ;;  %v2782_v42 = vmax.f32 %v2655_v21, 0.0  ;;  %v9329_v16 = vcombine.high %v2955_v57, %v2959_v61  ;;  %v2963_v17 = vld [vmem:[#allocation13 + $0x350] sm:$0xff]  ;;  %v2968_v21 = vld [vmem:[#allocation13 + $0x378] sm:$0xff] }
 0x58c   :  { %v2783_v5 = vmax.f32 %v2657_v28, 0.0  ;;  %4071 = vmatprep.subr.bf16.mxu1 %v9305_v20  ;;  %4264 = vmatprep.subr.bf16.mxu0 %v9307_v3  ;;  %v2964_v3 = vld [vmem:[#allocation13 + $0x358] sm:$0xff]  ;;  %v9330_v28 = vcombine.low %v2956_v62, %v2960_v43  ;;  %v9336_v48 = vcombine.low %v2963_v17, %v2967_v2 }
 0x58d   :  { %v2784_v45 = vmax.f32 %v2659_v30, 0.0  ;;  %v2984_v61 = vld [vmem:[#allocation13 + $0x3f8] sm:$0xff] }
 0x58e   :  { %v12183_v53 = vpack.c.bf16 %v2783_v5, %v2781_v4  ;;  %v9339_v4 = vcombine.high %v2964_v3, %v2968_v21 }
 0x58f   :  { %v12185_v24 = vpack.c.bf16 %v2784_v45, %v2782_v42  ;;  %v2662_v49 = vpop.f32.mrb[152].mxu0  ;;  %4072 = vmatpush1.bf16.msra.mxu1 %v9304_v31  ;;  %4265 = vmatpush1.bf16.msra.mxu0 %v9306_v32  ;;  %v9337_v31 = vcombine.high %v2963_v17, %v2967_v2  ;;  %v2971_v32 = vld [vmem:[#allocation13 + $0x390] sm:$0xff]  ;;  %v2976_v42 = vld [vmem:[#allocation13 + $0x3b8] sm:$0xff] }
 0x590   :  { %v2663_v52 = vadd.f32 %v2662_v49, %v12111_v23  ;;  %v2664_v55 = vpop.f32.mrb[153].mxu0  ;;  %4073 = vmatprep.subr.bf16.mxu1 %v9313_v8  ;;  %4266 = vmatprep.subr.bf16.mxu0 %v9315_v41  ;;  %v2972_v41 = vld [vmem:[#allocation13 + $0x398] sm:$0xff]  ;;  %v9338_v49 = vcombine.low %v2964_v3, %v2968_v21 }
 0x591   :  { %v2665_v59 = vadd.f32 %v2664_v55, %v12114_v54  ;;  %v2666_v60 = vpop.f32.mrb[154].mxu0  ;;  %3749 = vmatprep.mubr.bf16.mxu1 %v12185_v24  ;;  %3942 = vmatprep.mubr.bf16.mxu0 %v12185_v24  ;;  %v2979_v55 = vld [vmem:[#allocation13 + $0x3d0] sm:$0xff] }
 0x592   :  { %v2667_v63 = vadd.f32 %v2666_v60, %v12111_v23  ;;  %v2668_v7 = vpop.f32.mrb[155].mxu0  ;;  %3750 = vmatmul.mubr.bf16.gmra.mrb[148].mxu1 %v12183_v53  ;;  %3943 = vmatmul.mubr.bf16.gmra.mrb[212].mxu0 %v12183_v53  ;;  %v2785_v12 = vmax.f32 %v2663_v52, 0.0  ;;  %v9345_v52 = vcombine.high %v2971_v32, %v2975_v39  ;;  %v2980_v60 = vld [vmem:[#allocation13 + $0x3d8] sm:$0xff] }
 0x593   :  { %v2669_v9 = vadd.f32 %v2668_v7, %v12114_v54  ;;  %4074 = vmatpush1.bf16.msra.mxu1 %v9312_v50  ;;  %4267 = vmatpush1.bf16.msra.mxu0 %v9314_v51  ;;  %v2786_v19 = vmax.f32 %v2665_v59, 0.0  ;;  %v2983_v59 = vld [vmem:[#allocation13 + $0x3f0] sm:$0xff]  ;;  %v9344_v7 = vcombine.low %v2971_v32, %v2975_v39  ;;  %v9354_v3 = vcombine.low %v2980_v60, %v2984_v61 }
 0x594   :  { %v2787_v15 = vmax.f32 %v2667_v63, 0.0  ;;  %4075 = vmatprep.subr.bf16.mxu1 %v9321_v56  ;;  %4268 = vmatprep.subr.bf16.mxu0 %v9323_v58  ;;  %v9347_v56 = vcombine.high %v2972_v41, %v2976_v42  ;;  %v9352_v2 = vcombine.low %v2979_v55, %v2983_v59 }
 0x595   :  { %v2788_v20 = vmax.f32 %v2669_v9, 0.0  ;;  %v9346_v9 = vcombine.low %v2972_v41, %v2976_v42  ;;  %v10830_v41 = vld [vmem:[#allocation14 + $0xc] ss:$16 sps:$4 sm:$0xff]  }
 0x596   :  { %v12195_v22 = vpack.c.bf16 %v2787_v15, %v2785_v12  ;;  %v9353_v12 = vcombine.high %v2979_v55, %v2983_v59  ;;  %v9355_v15 = vcombine.high %v2980_v60, %v2984_v61 }
 0x597   :  { %v12197_v25 = vpack.c.bf16 %v2788_v20, %v2786_v19  ;;  %v2672_v26 = vpop.f32.mrb[156].mxu0  ;;  %4076 = vmatpush1.bf16.msra.mxu1 %v9320_v10  ;;  %4269 = vmatpush1.bf16.msra.mxu0 %v9322_v11 }
 0x598   :  { %v2673_v29 = vadd.f32 %v2672_v26, %v12111_v23  ;;  %v2674_v30 = vpop.f32.mrb[157].mxu0  ;;  %4077 = vmatprep.subr.bf16.mxu1 %v9329_v16  ;;  %4270 = vmatprep.subr.bf16.mxu0 %v9331_v18 }
 0x599   :  { %v2675_v5 = vadd.f32 %v2674_v30, %v12114_v54  ;;  %v2676_v8 = vpop.f32.mrb[158].mxu0  ;;  %3759 = vmatprep.mubr.bf16.mxu1 %v12197_v25  ;;  %3952 = vmatprep.mubr.bf16.mxu0 %v12197_v25 }
 0x59a   :  { %v2677_v45 = vadd.f32 %v2676_v8, %v12111_v23  ;;  %v2678_v46 = vpop.f32.mrb[159].mxu0  ;;  %3760 = vmatmul.mubr.bf16.gmra.mrb[152].mxu1 %v12195_v22  ;;  %3953 = vmatmul.mubr.bf16.gmra.mrb[216].mxu0 %v12195_v22  ;;  %v2789_v50 = vmax.f32 %v2673_v29, 0.0 }
 0x59b   :  { %v2679_v47 = vadd.f32 %v2678_v46, %v12114_v54  ;;  %4078 = vmatpush1.bf16.msra.mxu1 %v9328_v27  ;;  %4271 = vmatpush1.bf16.msra.mxu0 %v9330_v28  ;;  %v2790_v57 = vmax.f32 %v2675_v5, 0.0  ;;  %v10803_v27 = vld [vmem:[#allocation14 + $0x4] ss:$16 sps:$4 sm:$0xff]  }
 0x59c   :  { %v2791_v51 = vmax.f32 %v2677_v45, 0.0  ;;  %4079 = vmatprep.subr.bf16.mxu1 %v9337_v31  ;;  %4272 = vmatprep.subr.bf16.mxu0 %v9339_v4 }
 0x59d   :  { %v2792_v58 = vmax.f32 %v2679_v47, 0.0 }
 0x59e   :  { %v12207_v62 = vpack.c.bf16 %v2791_v51, %v2789_v50 }
 0x59f   :  { %v12209_v43 = vpack.c.bf16 %v2792_v58, %v2790_v57  ;;  %v2682_v63 = vpop.f32.mrb[160].mxu0  ;;  %4080 = vmatpush1.bf16.msra.mxu1 %v9336_v48  ;;  %4273 = vmatpush1.bf16.msra.mxu0 %v9338_v49 }
 0x5a0   :  { %v2683_v10 = vadd.f32 %v2682_v63, %v12111_v23  ;;  %v2684_v11 = vpop.f32.mrb[161].mxu0  ;;  %4081 = vmatprep.subr.bf16.mxu1 %v9345_v52  ;;  %4274 = vmatprep.subr.bf16.mxu0 %v9347_v56 }
 0x5a1   :  { %v2685_v16 = vadd.f32 %v2684_v11, %v12114_v54  ;;  %v2686_v17 = vpop.f32.mrb[162].mxu0  ;;  %3769 = vmatprep.mubr.bf16.mxu1 %v12209_v43  ;;  %3962 = vmatprep.mubr.bf16.mxu0 %v12209_v43 }
 0x5a2   :  { %v2687_v18 = vadd.f32 %v2686_v17, %v12111_v23  ;;  %v2688_v19 = vpop.f32.mrb[163].mxu0  ;;  %3770 = vmatmul.mubr.bf16.gmra.mrb[156].mxu1 %v12207_v62  ;;  %3963 = vmatmul.mubr.bf16.gmra.mrb[220].mxu0 %v12207_v62  ;;  %v2793_v21 = vmax.f32 %v2683_v10, 0.0 }
 0x5a3   :  { %v2689_v20 = vadd.f32 %v2688_v19, %v12114_v54  ;;  %4082 = vmatpush1.bf16.msra.mxu1 %v9344_v7  ;;  %4275 = vmatpush1.bf16.msra.mxu0 %v9346_v9  ;;  %v2794_v28 = vmax.f32 %v2685_v16, 0.0 }
 0x5a4   :  { %v2795_v26 = vmax.f32 %v2687_v18, 0.0  ;;  %4083 = vmatprep.subr.bf16.mxu1 %v9353_v12  ;;  %4276 = vmatprep.subr.bf16.mxu0 %v9355_v15 }
 0x5a5   :  { %v2796_v29 = vmax.f32 %v2689_v20, 0.0 }
 0x5a6   :  { %v12219_v30 = vpack.c.bf16 %v2795_v26, %v2793_v21 }
 0x5a7   :  { %v12221_v31 = vpack.c.bf16 %v2796_v29, %v2794_v28  ;;  %v2692_v32 = vpop.f32.mrb[164].mxu0  ;;  %4084 = vmatpush1.bf16.msra.mxu1 %v9352_v2  ;;  %4277 = vmatpush1.bf16.msra.mxu0 %v9354_v3 }
 0x5a8   :  { %v2693_v4 = vadd.f32 %v2692_v32, %v12111_v23  ;;  %v2694_v5 = vpop.f32.mrb[165].mxu0  ;;  %6381 = vmatprep.subr.bf16.mxu1 %v10803_v27  ;;  %7153 = vmatprep.subr.bf16.mxu0 %v10830_v41 }
 0x5a9   :  { %v2695_v8 = vadd.f32 %v2694_v5, %v12114_v54  ;;  %v2696_v39 = vpop.f32.mrb[166].mxu0  ;;  %3779 = vmatprep.mubr.bf16.mxu1 %v12221_v31  ;;  %3972 = vmatprep.mubr.bf16.mxu0 %v12221_v31 }
 0x5aa   :  { %v2697_v42 = vadd.f32 %v2696_v39, %v12111_v23  ;;  %v2698_v45 = vpop.f32.mrb[167].mxu0  ;;  %3780 = vmatmul.mubr.bf16.gmra.mrb[160].mxu1 %v12219_v30  ;;  %3973 = vmatmul.mubr.bf16.gmra.mrb[224].mxu0 %v12219_v30  ;;  %v2797_v47 = vmax.f32 %v2693_v4, 0.0 }
 0x5ab   :  { %v2699_v46 = vadd.f32 %v2698_v45, %v12114_v54  ;;  %v2798_v49 = vmax.f32 %v2695_v8, 0.0 }
 0x5ac   :  { %v2799_v48 = vmax.f32 %v2697_v42, 0.0 }
 0x5ad   :  { %v2800_v50 = vmax.f32 %v2699_v46, 0.0 }
 0x5ae   :  { %v12231_v51 = vpack.c.bf16 %v2799_v48, %v2797_v47 }
 0x5af   :  { %v12233_v52 = vpack.c.bf16 %v2800_v50, %v2798_v49  ;;  %v2702_v55 = vpop.f32.mrb[168].mxu0 }
 0x5b0   :  { %v2703_v56 = vadd.f32 %v2702_v55, %v12111_v23  ;;  %v2704_v57 = vpop.f32.mrb[169].mxu0 }
 0x5b1   :  { %v2705_v58 = vadd.f32 %v2704_v57, %v12114_v54  ;;  %v2706_v59 = vpop.f32.mrb[170].mxu0  ;;  %3789 = vmatprep.mubr.bf16.mxu1 %v12233_v52  ;;  %3982 = vmatprep.mubr.bf16.mxu0 %v12233_v52 }
 0x5b2   :  { %v2707_v60 = vadd.f32 %v2706_v59, %v12111_v23  ;;  %v2708_v61 = vpop.f32.mrb[171].mxu0  ;;  %3790 = vmatmul.mubr.bf16.gmra.mrb[164].mxu1 %v12231_v51  ;;  %3983 = vmatmul.mubr.bf16.gmra.mrb[228].mxu0 %v12231_v51  ;;  %v2801_v7 = vmax.f32 %v2703_v56, 0.0 }
 0x5b3   :  { %v2709_v63 = vadd.f32 %v2708_v61, %v12114_v54  ;;  %v2802_v10 = vmax.f32 %v2705_v58, 0.0 }
 0x5b4   :  { %v2803_v9 = vmax.f32 %v2707_v60, 0.0 }
 0x5b5   :  { %v2804_v11 = vmax.f32 %v2709_v63, 0.0 }
 0x5b6   :  { %v12243_v12 = vpack.c.bf16 %v2803_v9, %v2801_v7 }
 0x5b7   :  { %v12245_v15 = vpack.c.bf16 %v2804_v11, %v2802_v10  ;;  %v2712_v16 = vpop.f32.mrb[172].mxu0 }
 0x5b8   :  { %v2713_v17 = vadd.f32 %v2712_v16, %v12111_v23  ;;  %v2714_v18 = vpop.f32.mrb[173].mxu0 }
 0x5b9   :  { %v2715_v19 = vadd.f32 %v2714_v18, %v12114_v54  ;;  %v2716_v20 = vpop.f32.mrb[174].mxu0  ;;  %3799 = vmatprep.mubr.bf16.mxu1 %v12245_v15  ;;  %3992 = vmatprep.mubr.bf16.mxu0 %v12245_v15 }
 0x5ba   :  { %v2717_v2 = vadd.f32 %v2716_v20, %v12111_v23  ;;  %v2718_v3 = vpop.f32.mrb[175].mxu0  ;;  %3800 = vmatmul.mubr.bf16.gmra.mrb[168].mxu1 %v12243_v12  ;;  %3993 = vmatmul.mubr.bf16.gmra.mrb[232].mxu0 %v12243_v12  ;;  %v2805_v26 = vmax.f32 %v2713_v17, 0.0 }
 0x5bb   :  { %v2719_v21 = vadd.f32 %v2718_v3, %v12114_v54  ;;  %v2806_v28 = vmax.f32 %v2715_v19, 0.0 }
 0x5bc   :  { %v2807_v27 = vmax.f32 %v2717_v2, 0.0 }
 0x5bd   :  { %v2808_v29 = vmax.f32 %v2719_v21, 0.0 }
 0x5be   :  { %v12255_v32 = vpack.c.bf16 %v2807_v27, %v2805_v26 }
 0x5bf   :  { %v12257_v4 = vpack.c.bf16 %v2808_v29, %v2806_v28  ;;  %v2722_v5 = vpop.f32.mrb[176].mxu0 }
 0x5c0   :  { %v2723_v8 = vadd.f32 %v2722_v5, %v12111_v23  ;;  %v2724_v39 = vpop.f32.mrb[177].mxu0 }
 0x5c1   :  { %v2725_v41 = vadd.f32 %v2724_v39, %v12114_v54  ;;  %v2726_v42 = vpop.f32.mrb[178].mxu0  ;;  %3809 = vmatprep.mubr.bf16.mxu1 %v12257_v4  ;;  %4002 = vmatprep.mubr.bf16.mxu0 %v12257_v4 }
 0x5c2   :  { %v2727_v45 = vadd.f32 %v2726_v42, %v12111_v23  ;;  %v2728_v46 = vpop.f32.mrb[179].mxu0  ;;  %3810 = vmatmul.mubr.bf16.gmra.mrb[172].mxu1 %v12255_v32  ;;  %4003 = vmatmul.mubr.bf16.gmra.mrb[236].mxu0 %v12255_v32  ;;  %v2809_v48 = vmax.f32 %v2723_v8, 0.0 }
 0x5c3   :  { %v2729_v47 = vadd.f32 %v2728_v46, %v12114_v54  ;;  %v2810_v50 = vmax.f32 %v2725_v41, 0.0 }
 0x5c4   :  { %v2811_v49 = vmax.f32 %v2727_v45, 0.0 }
 0x5c5   :  { %v2812_v55 = vmax.f32 %v2729_v47, 0.0 }
 0x5c6   :  { %v12267_v56 = vpack.c.bf16 %v2811_v49, %v2809_v48 }
 0x5c7   :  { %v12269_v57 = vpack.c.bf16 %v2812_v55, %v2810_v50  ;;  %v2732_v58 = vpop.f32.mrb[180].mxu0 }
 0x5c8   :  { %v2733_v59 = vadd.f32 %v2732_v58, %v12111_v23  ;;  %v2734_v60 = vpop.f32.mrb[181].mxu0 }
 0x5c9   :  { %v2735_v61 = vadd.f32 %v2734_v60, %v12114_v54  ;;  %v2736_v63 = vpop.f32.mrb[182].mxu0  ;;  %3819 = vmatprep.mubr.bf16.mxu1 %v12269_v57  ;;  %4012 = vmatprep.mubr.bf16.mxu0 %v12269_v57 }
 0x5ca   :  { %v2737_v7 = vadd.f32 %v2736_v63, %v12111_v23  ;;  %v2738_v9 = vpop.f32.mrb[183].mxu0  ;;  %3820 = vmatmul.mubr.bf16.gmra.mrb[176].mxu1 %v12267_v56  ;;  %4013 = vmatmul.mubr.bf16.gmra.mrb[240].mxu0 %v12267_v56  ;;  %v2813_v11 = vmax.f32 %v2733_v59, 0.0 }
 0x5cb   :  { %v2739_v10 = vadd.f32 %v2738_v9, %v12114_v54  ;;  %v2814_v17 = vmax.f32 %v2735_v61, 0.0 }
 0x5cc   :  { %v2815_v16 = vmax.f32 %v2737_v7, 0.0 }
 0x5cd   :  { %v2816_v18 = vmax.f32 %v2739_v10, 0.0 }
 0x5ce   :  { %v12279_v19 = vpack.c.bf16 %v2815_v16, %v2813_v11  ;;  %v10828_v16 = vld [vmem:[#allocation14 + $0x8] ss:$16 sps:$4 sm:$0xff]  }
 0x5cf   :  { %v12281_v20 = vpack.c.bf16 %v2816_v18, %v2814_v17  ;;  %v2742_v2 = vpop.f32.mrb[184].mxu0  ;;  %v10833_v17 = vld [vmem:[#allocation14 + $0x2c] ss:$16 sps:$4 sm:$0xff]   ;;  %v10804_v18 = vld [vmem:[#allocation14 + $0x20] ss:$16 sps:$4 sm:$0xff]  }
 0x5d0   :  { %v2743_v3 = vadd.f32 %v2742_v2, %v12111_v23  ;;  %v2744_v21 = vpop.f32.mrb[185].mxu0  ;;  %v10809_v2 = vld [vmem:[#allocation14 + $0x44] ss:$16 sps:$4 sm:$0xff]  }
 0x5d1   :  { %v2745_v26 = vadd.f32 %v2744_v21, %v12114_v54  ;;  %v2746_v27 = vpop.f32.mrb[186].mxu0  ;;  %3829 = vmatprep.mubr.bf16.mxu1 %v12281_v20  ;;  %4022 = vmatprep.mubr.bf16.mxu0 %v12281_v20  ;;  %v10839_v21 = vld [vmem:[#allocation14 + $0x4c] ss:$16 sps:$4 sm:$0xff]  }
 0x5d2   :  { %v2747_v28 = vadd.f32 %v2746_v27, %v12111_v23  ;;  %v2748_v29 = vpop.f32.mrb[187].mxu0  ;;  %3830 = vmatmul.mubr.bf16.gmra.mrb[180].mxu1 %v12279_v19  ;;  %4023 = vmatmul.mubr.bf16.gmra.mrb[244].mxu0 %v12279_v19  ;;  %v2817_v8 = vmax.f32 %v2743_v3, 0.0  ;;  %v10831_v3 = vld [vmem:[#allocation14 + $0x28] ss:$16 sps:$4 sm:$0xff]  }
 0x5d3   :  { %v2749_v5 = vadd.f32 %v2748_v29, %v12114_v54  ;;  %v2818_v41 = vmax.f32 %v2745_v26, 0.0  ;;  %v10812_v26 = vld [vmem:[#allocation14 + $0x64] ss:$16 sps:$4 sm:$0xff]   ;;  %v10837_v27 = vld [vmem:[#allocation14 + $0x48] ss:$16 sps:$4 sm:$0xff]  }
 0x5d4   :  { %v2819_v39 = vmax.f32 %v2747_v28, 0.0  ;;  %v10815_v28 = vld [vmem:[#allocation14 + $0x84] ss:$16 sps:$4 sm:$0xff]   ;;  %v10840_v29 = vld [vmem:[#allocation14 + $0x68] ss:$16 sps:$4 sm:$0xff]  }
 0x5d5   :  { %v2820_v42 = vmax.f32 %v2749_v5, 0.0  ;;  %v10813_v5 = vld [vmem:[#allocation14 + $0x80] ss:$16 sps:$4 sm:$0xff]  }
 0x5d6   :  { %v12291_v45 = vpack.c.bf16 %v2819_v39, %v2817_v8  ;;  %v10848_v8 = vld [vmem:[#allocation14 + $0x8c] ss:$16 sps:$4 sm:$0xff]   ;;  %v10818_v39 = vld [vmem:[#allocation14 + $0xa4] ss:$16 sps:$4 sm:$0xff]  }
 0x5d7   :  { %v12293_v46 = vpack.c.bf16 %v2820_v42, %v2818_v41  ;;  %v2752_v47 = vpop.f32.mrb[188].mxu0  ;;  %v10816_v41 = vld [vmem:[#allocation14 + $0xa0] ss:$16 sps:$4 sm:$0xff]   ;;  %v10821_v42 = vld [vmem:[#allocation14 + $0xc4] ss:$16 sps:$4 sm:$0xff]  }
 0x5d8   :  { %v2753_v48 = vadd.f32 %v2752_v47, %v12111_v23  ;;  %v2754_v49 = vpop.f32.mrb[189].mxu0  ;;  %v10849_v47 = vld [vmem:[#allocation14 + $0xa8] ss:$16 sps:$4 sm:$0xff]  }
 0x5d9   :  { %v2755_v50 = vadd.f32 %v2754_v49, %v12114_v54  ;;  %v2756_v55 = vpop.f32.mrb[190].mxu0  ;;  %3839 = vmatprep.mubr.bf16.mxu1 %v12293_v46  ;;  %4032 = vmatprep.mubr.bf16.mxu0 %v12293_v46  ;;  %v10857_v49 = vld [vmem:[#allocation14 + $0xcc] ss:$16 sps:$4 sm:$0xff]  }
 0x5da   :  { %v2757_v58 = vadd.f32 %v2756_v55, %v12111_v23  ;;  %v2758_v59 = vpop.f32.mrb[191].mxu0  ;;  %3840 = vmatmul.mubr.bf16.gmra.mrb[184].mxu1 %v12291_v45  ;;  %4033 = vmatmul.mubr.bf16.gmra.mrb[248].mxu0 %v12291_v45  ;;  %v2821_v61 = vmax.f32 %v2753_v48, 0.0  ;;  %v10801_v23 = vld [vmem:[#allocation14] ss:$16 sps:$4 sm:$0xff]  }
 0x5db   :  { %v2759_v60 = vadd.f32 %v2758_v59, %v12114_v54  ;;  %v2822_v7 = vmax.f32 %v2755_v50, 0.0  ;;  %v10806_v54 = vld [vmem:[#allocation14 + $0x24] ss:$16 sps:$4 sm:$0xff]   ;;  %v10819_v48 = vld [vmem:[#allocation14 + $0xc0] ss:$16 sps:$4 sm:$0xff]  }
 0x5dc   :  { %v2823_v63 = vmax.f32 %v2757_v58, 0.0  ;;  %v10824_v50 = vld [vmem:[#allocation14 + $0xe4] ss:$16 sps:$4 sm:$0xff]   ;;  %v10822_v55 = vld [vmem:[#allocation14 + $0xe0] ss:$16 sps:$4 sm:$0xff]  }
 0x5dd   :  { %v2824_v9 = vmax.f32 %v2759_v60, 0.0  ;;  %v10827_v58 = vld [vmem:[#allocation14 + $0x104] ss:$16 sps:$4 sm:$0xff]   ;;  %v10858_v59 = vld [vmem:[#allocation14 + $0xe8] ss:$16 sps:$4 sm:$0xff]  }
 0x5de   :  { %v12303_v10 = vpack.c.bf16 %v2823_v63, %v2821_v61  ;;  %v10825_v60 = vld [vmem:[#allocation14 + $0x100] ss:$16 sps:$4 sm:$0xff]   ;;  %v10866_v61 = vld [vmem:[#allocation14 + $0x10c] ss:$16 sps:$4 sm:$0xff]   ;;  %v10836_v63 = vld [vmem:[#allocation14 + $0x124] ss:$16 sps:$4 sm:$0xff]  }
 0x5df   :  { %v12305_v11 = vpack.c.bf16 %v2824_v9, %v2822_v7  ;;  %v10834_v7 = vld [vmem:[#allocation14 + $0x120] ss:$16 sps:$4 sm:$0xff]   ;;  %v10845_v9 = vld [vmem:[#allocation14 + $0x144] ss:$16 sps:$4 sm:$0xff]  }
 0x5e1   :  { %3849 = vmatprep.mubr.bf16.mxu1 %v12305_v11  ;;  %4042 = vmatprep.mubr.bf16.mxu0 %v12305_v11 }
 0x5e2   :  { %3850 = vmatmul.mubr.bf16.gmra.mrb[188].mxu1 %v12303_v10  ;;  %4043 = vmatmul.mubr.bf16.gmra.mrb[252].mxu0 %v12303_v10 }
 0x5e3   :  { %4085 = vmatprep.mubr.bf16.mxu1 %v12122_v1  ;;  %4278 = vmatprep.mubr.bf16.mxu0 %v12122_v1  ;;  %v10807_v1 = vld [vmem:[#allocation14 + $0x40] ss:$16 sps:$4 sm:$0xff]  }
 0x5ea   :  { %4086 = vmatmul.mubr.bf16.vlgmr.msra.gmra.mrb[192].mxu1 %v12120_v0  ;;  %4279 = vmatmul.mubr.bf16.vlgmr.msra.gmra.mrb[0].mxu0 %v12120_v0  ;;  %v10842_v0 = vld [vmem:[#allocation14 + $0x6c] ss:$16 sps:$4 sm:$0xff]  }
 0x5eb   :  { %6382 = vmatpush1.bf16.msra.mxu1 %v10801_v23  ;;  %4095 = vmatprep.mubr.bf16.mxu1 %v12137_v34  ;;  %v10867_v23 = vld [vmem:[#allocation14 + $0x128] ss:$16 sps:$4 sm:$0xff]  }
 0x5ec   :  { %4288 = vmatprep.mubr.bf16.mxu0 %v12137_v34  ;;  %6383 = vmatprep.subr.bf16.mxu1 %v10806_v54  ;;  %v10810_v34 = vld [vmem:[#allocation14 + $0x60] ss:$16 sps:$4 sm:$0xff]  }
 0x5ed   :  { %7154 = vmatpush1.bf16.msra.mxu0 %v10828_v16  ;;  %v10843_v54 = vld [vmem:[#allocation14 + $0x140] ss:$16 sps:$4 sm:$0xff]   ;;  %v10875_v16 = vld [vmem:[#allocation14 + $0x14c] ss:$16 sps:$4 sm:$0xff]  }
 0x5ee   :  { %7155 = vmatprep.subr.bf16.mxu0 %v10833_v17  ;;  %v10854_v17 = vld [vmem:[#allocation14 + $0x164] ss:$16 sps:$4 sm:$0xff]  }
 0x5ef   :  { %6384 = vmatpush1.bf16.msra.mxu1 %v10804_v18  ;;  %v10852_v18 = vld [vmem:[#allocation14 + $0x160] ss:$16 sps:$4 sm:$0xff]  }
 0x5f0   :  { %6385 = vmatprep.subr.bf16.mxu1 %v10809_v2  ;;  %v10863_v2 = vld [vmem:[#allocation14 + $0x184] ss:$16 sps:$4 sm:$0xff]  }
 0x5f1   :  { %7156 = vmatpush1.bf16.msra.mxu0 %v10831_v3  ;;  %v10876_v3 = vld [vmem:[#allocation14 + $0x168] ss:$16 sps:$4 sm:$0xff]  }
 0x5f2   :  { %4096 = vmatmul.mubr.bf16.gmra.mrb[196].mxu1 %v12135_v33  ;;  %4289 = vmatmul.mubr.bf16.gmra.mrb[4].mxu0 %v12135_v33  ;;  %v10846_v33 = vld [vmem:[#allocation14 + $0x88] ss:$16 sps:$4 sm:$0xff]  }
 0x5f3   :  { %4105 = vmatprep.mubr.bf16.mxu1 %v12149_v6  ;;  %4298 = vmatprep.mubr.bf16.mxu0 %v12149_v6  ;;  %v10851_v6 = vld [vmem:[#allocation14 + $0xac] ss:$16 sps:$4 sm:$0xff]  }
 0x5f4   :  { %6386 = vmatpush1.bf16.msra.mxu1 %v10807_v1  ;;  %7157 = vmatprep.subr.bf16.mxu0 %v10839_v21  ;;  %v10861_v1 = vld [vmem:[#allocation14 + $0x180] ss:$16 sps:$4 sm:$0xff]   ;;  %v10884_v21 = vld [vmem:[#allocation14 + $0x18c] ss:$16 sps:$4 sm:$0xff]  }
 0x5f5   :  { %6387 = vmatprep.subr.bf16.mxu1 %v10812_v26  ;;  %7158 = vmatpush1.bf16.msra.mxu0 %v10837_v27  ;;  %v10872_v26 = vld [vmem:[#allocation14 + $0x1a4] ss:$16 sps:$4 sm:$0xff]   ;;  %v10870_v27 = vld [vmem:[#allocation14 + $0x1a0] ss:$16 sps:$4 sm:$0xff]  }
 0x5f6   :  { %7159 = vmatprep.subr.bf16.mxu0 %v10842_v0  ;;  %v10881_v0 = vld [vmem:[#allocation14 + $0x1c4] ss:$16 sps:$4 sm:$0xff]  }
 0x5f8   :  { %6388 = vmatpush1.bf16.msra.mxu1 %v10810_v34  ;;  %v10885_v34 = vld [vmem:[#allocation14 + $0x1a8] ss:$16 sps:$4 sm:$0xff]  }
 0x5f9   :  { %6389 = vmatprep.subr.bf16.mxu1 %v10815_v28  ;;  %7160 = vmatpush1.bf16.msra.mxu0 %v10840_v29  ;;  %v10879_v28 = vld [vmem:[#allocation14 + $0x1c0] ss:$16 sps:$4 sm:$0xff]   ;;  %v10893_v29 = vld [vmem:[#allocation14 + $0x1cc] ss:$16 sps:$4 sm:$0xff]  }
 0x5fa   :  { %4106 = vmatmul.mubr.bf16.gmra.mrb[200].mxu1 %v12147_v44  ;;  %4299 = vmatmul.mubr.bf16.gmra.mrb[8].mxu0 %v12147_v44  ;;  %v10855_v44 = vld [vmem:[#allocation14 + $0xc8] ss:$16 sps:$4 sm:$0xff]  }
 0x5fb   :  { %4115 = vmatprep.mubr.bf16.mxu1 %v12161_v36  ;;  %4308 = vmatprep.mubr.bf16.mxu0 %v12161_v36  ;;  %v10860_v36 = vld [vmem:[#allocation14 + $0xec] ss:$16 sps:$4 sm:$0xff]  }
 0x5fc   :  { %6390 = vmatpush1.bf16.msra.mxu1 %v10813_v5  ;;  %7161 = vmatprep.subr.bf16.mxu0 %v10848_v8  ;;  %v10890_v5 = vld [vmem:[#allocation14 + $0x1e4] ss:$16 sps:$4 sm:$0xff]   ;;  %v10888_v8 = vld [vmem:[#allocation14 + $0x1e0] ss:$16 sps:$4 sm:$0xff]  }
 0x5fd   :  { %6391 = vmatprep.subr.bf16.mxu1 %v10818_v39  ;;  %7162 = vmatpush1.bf16.msra.mxu0 %v10846_v33  ;;  %v10894_v39 = vld [vmem:[#allocation14 + $0x1e8] ss:$16 sps:$4 sm:$0xff]   ;;  %v10899_v33 = vld [vmem:[#allocation14 + $0x204] ss:$16 sps:$4 sm:$0xff]  }
 0x5fe   :  { %7163 = vmatprep.subr.bf16.mxu0 %v10851_v6  ;;  %v10914_v6 = vld [vmem:[#allocation14 + $0x20c] ss:$16 sps:$4 sm:$0xff]  }
 0x600   :  { %6392 = vmatpush1.bf16.msra.mxu1 %v10816_v41 }
 0x601   :  { %6393 = vmatprep.subr.bf16.mxu1 %v10821_v42  ;;  %7164 = vmatpush1.bf16.msra.mxu0 %v10849_v47 }
 0x602   :  { %4116 = vmatmul.mubr.bf16.gmra.mrb[204].mxu1 %v12159_v35  ;;  %4309 = vmatmul.mubr.bf16.gmra.mrb[12].mxu0 %v12159_v35  ;;  %v10864_v35 = vld [vmem:[#allocation14 + $0x108] ss:$16 sps:$4 sm:$0xff]  }
 0x603   :  { %4125 = vmatprep.mubr.bf16.mxu1 %v12173_v14  ;;  %4318 = vmatprep.mubr.bf16.mxu0 %v12173_v14  ;;  %v10869_v14 = vld [vmem:[#allocation14 + $0x12c] ss:$16 sps:$4 sm:$0xff]  }
 0x604   :  { %6394 = vmatpush1.bf16.msra.mxu1 %v10819_v48  ;;  %7165 = vmatprep.subr.bf16.mxu0 %v10857_v49 }
 0x605   :  { %6395 = vmatprep.subr.bf16.mxu1 %v10824_v50  ;;  %7166 = vmatpush1.bf16.msra.mxu0 %v10855_v44 }
 0x606   :  { %7167 = vmatprep.subr.bf16.mxu0 %v10860_v36 }
 0x608   :  { %6396 = vmatpush1.bf16.msra.mxu1 %v10822_v55 }
 0x609   :  { %6397 = vmatprep.subr.bf16.mxu1 %v10827_v58  ;;  %7168 = vmatpush1.bf16.msra.mxu0 %v10858_v59 }
 0x60a   :  { %4126 = vmatmul.mubr.bf16.gmra.mrb[208].mxu1 %v12171_v13  ;;  %4319 = vmatmul.mubr.bf16.gmra.mrb[16].mxu0 %v12171_v13  ;;  %v10873_v13 = vld [vmem:[#allocation14 + $0x148] ss:$16 sps:$4 sm:$0xff]  }
 0x60b   :  { %4135 = vmatprep.mubr.bf16.mxu1 %v12185_v24  ;;  %4328 = vmatprep.mubr.bf16.mxu0 %v12185_v24  ;;  %v10878_v24 = vld [vmem:[#allocation14 + $0x16c] ss:$16 sps:$4 sm:$0xff]  }
 0x60c   :  { %6398 = vmatpush1.bf16.msra.mxu1 %v10825_v60  ;;  %7169 = vmatprep.subr.bf16.mxu0 %v10866_v61 }
 0x60d   :  { %6399 = vmatprep.subr.bf16.mxu1 %v10836_v63  ;;  %7170 = vmatpush1.bf16.msra.mxu0 %v10864_v35 }
 0x60e   :  { %7171 = vmatprep.subr.bf16.mxu0 %v10869_v14 }
 0x610   :  { %6400 = vmatpush1.bf16.msra.mxu1 %v10834_v7 }
 0x611   :  { %6401 = vmatprep.subr.bf16.mxu1 %v10845_v9  ;;  %7172 = vmatpush1.bf16.msra.mxu0 %v10867_v23 }
 0x612   :  { %4136 = vmatmul.mubr.bf16.gmra.mrb[212].mxu1 %v12183_v53  ;;  %4329 = vmatmul.mubr.bf16.gmra.mrb[20].mxu0 %v12183_v53  ;;  %v10882_v53 = vld [vmem:[#allocation14 + $0x188] ss:$16 sps:$4 sm:$0xff]  }
 0x613   :  { %4145 = vmatprep.mubr.bf16.mxu1 %v12197_v25  ;;  %4338 = vmatprep.mubr.bf16.mxu0 %v12197_v25  ;;  %v10887_v25 = vld [vmem:[#allocation14 + $0x1ac] ss:$16 sps:$4 sm:$0xff]  }
 0x614   :  { %6402 = vmatpush1.bf16.msra.mxu1 %v10843_v54  ;;  %7173 = vmatprep.subr.bf16.mxu0 %v10875_v16 }
 0x615   :  { %6403 = vmatprep.subr.bf16.mxu1 %v10854_v17  ;;  %7174 = vmatpush1.bf16.msra.mxu0 %v10873_v13 }
 0x616   :  { %7175 = vmatprep.subr.bf16.mxu0 %v10878_v24 }
 0x618   :  { %6404 = vmatpush1.bf16.msra.mxu1 %v10852_v18 }
 0x619   :  { %6405 = vmatprep.subr.bf16.mxu1 %v10863_v2  ;;  %7176 = vmatpush1.bf16.msra.mxu0 %v10876_v3 }
 0x61a   :  { %4146 = vmatmul.mubr.bf16.gmra.mrb[216].mxu1 %v12195_v22  ;;  %4339 = vmatmul.mubr.bf16.gmra.mrb[24].mxu0 %v12195_v22  ;;  %v10891_v22 = vld [vmem:[#allocation14 + $0x1c8] ss:$16 sps:$4 sm:$0xff]  }
 0x61b   :  { %4155 = vmatprep.mubr.bf16.mxu1 %v12209_v43  ;;  %4348 = vmatprep.mubr.bf16.mxu0 %v12209_v43  ;;  %v10896_v43 = vld [vmem:[#allocation14 + $0x1ec] ss:$16 sps:$4 sm:$0xff]  }
 0x61c   :  { %6406 = vmatpush1.bf16.msra.mxu1 %v10861_v1  ;;  %7177 = vmatprep.subr.bf16.mxu0 %v10884_v21 }
 0x61d   :  { %6407 = vmatprep.subr.bf16.mxu1 %v10872_v26  ;;  %7178 = vmatpush1.bf16.msra.mxu0 %v10882_v53 }
 0x61e   :  { %7179 = vmatprep.subr.bf16.mxu0 %v10887_v25 }
 0x620   :  { %6408 = vmatpush1.bf16.msra.mxu1 %v10870_v27 }
 0x621   :  { %6409 = vmatprep.subr.bf16.mxu1 %v10881_v0  ;;  %7180 = vmatpush1.bf16.msra.mxu0 %v10885_v34 }
 0x622   :  { %4156 = vmatmul.mubr.bf16.gmra.mrb[220].mxu1 %v12207_v62  ;;  %4349 = vmatmul.mubr.bf16.gmra.mrb[28].mxu0 %v12207_v62  ;;  %v13550_v62 = vsub.s32 2, %v11799_v37 }
 0x623   :  { %4165 = vmatprep.mubr.bf16.mxu1 %v12221_v31  ;;  %4358 = vmatprep.mubr.bf16.mxu0 %v12221_v31  ;;  %v2985_v31 = vld [vmem:[%s13537_s15] sm:$0xff] }
 0x624   :  { %6410 = vmatpush1.bf16.msra.mxu1 %v10879_v28  ;;  %7181 = vmatprep.subr.bf16.mxu0 %v10893_v29 }
 0x625   :  { %6411 = vmatprep.subr.bf16.mxu1 %v10890_v5  ;;  %7182 = vmatpush1.bf16.msra.mxu0 %v10891_v22 }
 0x626   :  { %7183 = vmatprep.subr.bf16.mxu0 %v10896_v43 }
 0x628   :  { %6412 = vmatpush1.bf16.msra.mxu1 %v10888_v8 }
 0x629   :  { %7184 = vmatpush1.bf16.msra.mxu0 %v10894_v39  ;;  %6574 = vmatprep.subr.bf16.mxu1 %v10899_v33 }
 0x62a   :  { %4166 = vmatmul.mubr.bf16.gmra.mrb[224].mxu1 %v12219_v30  ;;  %4359 = vmatmul.mubr.bf16.gmra.mrb[32].mxu0 %v12219_v30  ;;  %v13549_v30 = vsub.s32 3, %v11799_v37 }
 0x62b   :  { %4175 = vmatprep.mubr.bf16.mxu1 %v12233_v52  ;;  %4368 = vmatprep.mubr.bf16.mxu0 %v12233_v52  ;;  %v12361_v52 = vrot.slane %v2985_v31, %v11802_v38 }
 0x62c   :  { %7346 = vmatprep.subr.bf16.mxu0 %v10914_v6  ;;  %v12374_v41 = vrot.slane %v2985_v31, %v13549_v30 }
 0x632   :  { %4176 = vmatmul.mubr.bf16.gmra.mrb[228].mxu1 %v12231_v51  ;;  %4369 = vmatmul.mubr.bf16.gmra.mrb[36].mxu0 %v12231_v51  ;;  %v12365_v51 = vrot.slane %v2985_v31, %v13550_v62 }
 0x633   :  { %4185 = vmatprep.mubr.bf16.mxu1 %v12245_v15  ;;  %4378 = vmatprep.mubr.bf16.mxu0 %v12245_v15  ;;  %v12370_v15 = vrot.slane %v2985_v31, %v11808_v40 }
 0x63a   :  { %4186 = vmatmul.mubr.bf16.gmra.mrb[232].mxu1 %v12243_v12  ;;  %4379 = vmatmul.mubr.bf16.gmra.mrb[40].mxu0 %v12243_v12 }
 0x63b   :  { %4195 = vmatprep.mubr.bf16.mxu1 %v12257_v4  ;;  %4388 = vmatprep.mubr.bf16.mxu0 %v12257_v4 }
 0x63d   :  { %v3701_v42 = vpop.f32.mrb[128].mxu1  ;;  %v3894_v12 = vpop.f32.mrb[192].mxu0 }
 0x63e   :  { %v3702_v47 = vadd.f32 %v3701_v42, %v12361_v52  ;;  %v3895_v48 = vadd.f32 %v3894_v12, %v12365_v51  ;;  %v3703_v49 = vpop.f32.mrb[129].mxu1  ;;  %v3896_v50 = vpop.f32.mrb[193].mxu0 }
 0x63f   :  { %v3704_v44 = vadd.f32 %v3703_v49, %v12370_v15  ;;  %v3897_v36 = vadd.f32 %v3896_v50, %v12374_v41  ;;  %v3705_v4 = vpop.f32.mrb[130].mxu1  ;;  %v3898_v55 = vpop.f32.mrb[194].mxu0 }
 0x640   :  { %v3706_v58 = vadd.f32 %v3705_v4, %v12361_v52  ;;  %v3899_v59 = vadd.f32 %v3898_v55, %v12365_v51  ;;  %v3707_v60 = vpop.f32.mrb[131].mxu1  ;;  %v3900_v61 = vpop.f32.mrb[195].mxu0  ;;  %v4439_v14 = vmax.f32 %v3702_v47, 0.0  ;;  %v4441_v7 = vmax.f32 %v3895_v48, 0.0 }
 0x641   :  { %v3708_v63 = vadd.f32 %v3707_v60, %v12370_v15  ;;  %v3901_v35 = vadd.f32 %v3900_v61, %v12374_v41  ;;  %v4440_v54 = vmax.f32 %v3704_v44, 0.0  ;;  %v4442_v16 = vmax.f32 %v3897_v36, 0.0 }
 0x642   :  { %v4447_v9 = vmax.f32 %v3706_v58, 0.0  ;;  %v4449_v23 = vmax.f32 %v3899_v59, 0.0  ;;  %4196 = vmatmul.mubr.bf16.gmra.mrb[236].mxu1 %v12255_v32  ;;  %4389 = vmatmul.mubr.bf16.gmra.mrb[44].mxu0 %v12255_v32 }
 0x643   :  { %v4448_v17 = vmax.f32 %v3708_v63, 0.0  ;;  %v4450_v13 = vmax.f32 %v3901_v35, 0.0  ;;  %4205 = vmatprep.mubr.bf16.mxu1 %v12269_v57  ;;  %4398 = vmatprep.mubr.bf16.mxu0 %v12269_v57 }
 0x644   :  { %v12388_v24 = vpack.c.bf16 %v4447_v9, %v4439_v14  ;;  %v12390_v18 = vpack.c.bf16 %v4449_v23, %v4441_v7 }
 0x645   :  { %v12392_v2 = vpack.c.bf16 %v4450_v13, %v4442_v16  ;;  %v3711_v3 = vpop.f32.mrb[132].mxu1  ;;  %v3904_v1 = vpop.f32.mrb[196].mxu0  ;;  %v12394_v21 = vpack.c.bf16 %v4448_v17, %v4440_v54 }
 0x646   :  { %v3712_v32 = vadd.f32 %v3711_v3, %v12361_v52  ;;  %v3905_v26 = vadd.f32 %v3904_v1, %v12365_v51  ;;  %v3713_v53 = vpop.f32.mrb[133].mxu1  ;;  %v3906_v25 = vpop.f32.mrb[197].mxu0 }
 0x647   :  { %v3714_v27 = vadd.f32 %v3713_v53, %v12370_v15  ;;  %v3907_v57 = vadd.f32 %v3906_v25, %v12374_v41  ;;  %v3715_v0 = vpop.f32.mrb[134].mxu1  ;;  %v3908_v34 = vpop.f32.mrb[198].mxu0 }
 0x648   :  { %v3716_v28 = vadd.f32 %v3715_v0, %v12361_v52  ;;  %v3909_v29 = vadd.f32 %v3908_v34, %v12365_v51  ;;  %v3717_v5 = vpop.f32.mrb[135].mxu1  ;;  %v3910_v22 = vpop.f32.mrb[199].mxu0  ;;  %v4455_v39 = vmax.f32 %v3712_v32, 0.0  ;;  %v4457_v33 = vmax.f32 %v3905_v26, 0.0 }
 0x649   :  { %v3718_v43 = vadd.f32 %v3717_v5, %v12370_v15  ;;  %v3911_v8 = vadd.f32 %v3910_v22, %v12374_v41  ;;  %v4456_v42 = vmax.f32 %v3714_v27, 0.0  ;;  %v4458_v12 = vmax.f32 %v3907_v57, 0.0 }
 0x64a   :  { %v4463_v6 = vmax.f32 %v3716_v28, 0.0  ;;  %v4465_v31 = vmax.f32 %v3909_v29, 0.0  ;;  %4206 = vmatmul.mubr.bf16.gmra.mrb[240].mxu1 %v12267_v56  ;;  %4399 = vmatmul.mubr.bf16.gmra.mrb[48].mxu0 %v12267_v56 }
 0x64b   :  { %v4464_v47 = vmax.f32 %v3718_v43, 0.0  ;;  %v4466_v48 = vmax.f32 %v3911_v8, 0.0  ;;  %4215 = vmatprep.mubr.bf16.mxu1 %v12281_v20  ;;  %4408 = vmatprep.mubr.bf16.mxu0 %v12281_v20 }
 0x64c   :  { %v12408_v49 = vpack.c.bf16 %v4463_v6, %v4455_v39  ;;  %v12410_v50 = vpack.c.bf16 %v4465_v31, %v4457_v33 }
 0x64d   :  { %v12412_v44 = vpack.c.bf16 %v4466_v48, %v4458_v12  ;;  %v3721_v36 = vpop.f32.mrb[136].mxu1  ;;  %v3914_v4 = vpop.f32.mrb[200].mxu0  ;;  %v12414_v55 = vpack.c.bf16 %v4464_v47, %v4456_v42 }
 0x64e   :  { %v3722_v56 = vadd.f32 %v3721_v36, %v12361_v52  ;;  %v3915_v58 = vadd.f32 %v3914_v4, %v12365_v51  ;;  %v3723_v59 = vpop.f32.mrb[137].mxu1  ;;  %v3916_v60 = vpop.f32.mrb[201].mxu0 }
 0x64f   :  { %v3724_v61 = vadd.f32 %v3723_v59, %v12370_v15  ;;  %v3917_v20 = vadd.f32 %v3916_v60, %v12374_v41  ;;  %v3725_v63 = vpop.f32.mrb[138].mxu1  ;;  %v3918_v35 = vpop.f32.mrb[202].mxu0 }
 0x650   :  { %v3726_v14 = vadd.f32 %v3725_v63, %v12361_v52  ;;  %v3919_v7 = vadd.f32 %v3918_v35, %v12365_v51  ;;  %v3727_v9 = vpop.f32.mrb[139].mxu1  ;;  %v3920_v23 = vpop.f32.mrb[203].mxu0  ;;  %v4471_v17 = vmax.f32 %v3722_v56, 0.0  ;;  %v4473_v13 = vmax.f32 %v3915_v58, 0.0 }
 0x651   :  { %v3728_v54 = vadd.f32 %v3727_v9, %v12370_v15  ;;  %v3921_v16 = vadd.f32 %v3920_v23, %v12374_v41  ;;  %v4472_v32 = vmax.f32 %v3724_v61, 0.0  ;;  %v4474_v26 = vmax.f32 %v3917_v20, 0.0 }
 0x652   :  { %v4479_v3 = vmax.f32 %v3726_v14, 0.0  ;;  %v4481_v1 = vmax.f32 %v3919_v7, 0.0  ;;  %4216 = vmatmul.mubr.bf16.gmra.mrb[244].mxu1 %v12279_v19  ;;  %4409 = vmatmul.mubr.bf16.gmra.mrb[52].mxu0 %v12279_v19 }
 0x653   :  { %v4480_v53 = vmax.f32 %v3728_v54, 0.0  ;;  %v4482_v25 = vmax.f32 %v3921_v16, 0.0  ;;  %4225 = vmatprep.mubr.bf16.mxu1 %v12293_v46  ;;  %4418 = vmatprep.mubr.bf16.mxu0 %v12293_v46 }
 0x654   :  { %v12428_v27 = vpack.c.bf16 %v4479_v3, %v4471_v17  ;;  %v12430_v57 = vpack.c.bf16 %v4481_v1, %v4473_v13 }
 0x655   :  { %v12432_v0 = vpack.c.bf16 %v4482_v25, %v4474_v26  ;;  %v3731_v34 = vpop.f32.mrb[140].mxu1  ;;  %v3924_v28 = vpop.f32.mrb[204].mxu0  ;;  %v12434_v29 = vpack.c.bf16 %v4480_v53, %v4472_v32 }
 0x656   :  { %v3732_v19 = vadd.f32 %v3731_v34, %v12361_v52  ;;  %v3925_v5 = vadd.f32 %v3924_v28, %v12365_v51  ;;  %v3733_v22 = vpop.f32.mrb[141].mxu1  ;;  %v3926_v43 = vpop.f32.mrb[205].mxu0 }
 0x657   :  { %v3734_v8 = vadd.f32 %v3733_v22, %v12370_v15  ;;  %v3927_v46 = vadd.f32 %v3926_v43, %v12374_v41  ;;  %v3735_v39 = vpop.f32.mrb[142].mxu1  ;;  %v3928_v33 = vpop.f32.mrb[206].mxu0 }
 0x658   :  { %v3736_v6 = vadd.f32 %v3735_v39, %v12361_v52  ;;  %v3929_v31 = vadd.f32 %v3928_v33, %v12365_v51  ;;  %v3737_v42 = vpop.f32.mrb[143].mxu1  ;;  %v3930_v12 = vpop.f32.mrb[207].mxu0  ;;  %v4487_v36 = vmax.f32 %v3732_v19, 0.0  ;;  %v4489_v4 = vmax.f32 %v3925_v5, 0.0 }
 0x659   :  { %v3738_v47 = vadd.f32 %v3737_v42, %v12370_v15  ;;  %v3931_v48 = vadd.f32 %v3930_v12, %v12374_v41  ;;  %v4488_v59 = vmax.f32 %v3734_v8, 0.0  ;;  %v4490_v60 = vmax.f32 %v3927_v46, 0.0 }
 0x65a   :  { %v4495_v56 = vmax.f32 %v3736_v6, 0.0  ;;  %v4497_v58 = vmax.f32 %v3929_v31, 0.0  ;;  %4226 = vmatmul.mubr.bf16.gmra.mrb[248].mxu1 %v12291_v45  ;;  %4419 = vmatmul.mubr.bf16.gmra.mrb[56].mxu0 %v12291_v45 }
 0x65b   :  { %v4496_v61 = vmax.f32 %v3738_v47, 0.0  ;;  %v4498_v20 = vmax.f32 %v3931_v48, 0.0  ;;  %4235 = vmatprep.mubr.bf16.mxu1 %v12305_v11  ;;  %4428 = vmatprep.mubr.bf16.mxu0 %v12305_v11 }
 0x65c   :  { %v12448_v63 = vpack.c.bf16 %v4495_v56, %v4487_v36  ;;  %v12450_v35 = vpack.c.bf16 %v4497_v58, %v4489_v4 }
 0x65d   :  { %v12452_v14 = vpack.c.bf16 %v4498_v20, %v4490_v60  ;;  %v3741_v7 = vpop.f32.mrb[144].mxu1  ;;  %v3934_v9 = vpop.f32.mrb[208].mxu0  ;;  %v12454_v23 = vpack.c.bf16 %v4496_v61, %v4488_v59  ;;  %v10897_v61 = vld [vmem:[#allocation14 + $0x200] ss:$16 sps:$4 sm:$0xff]  }
 0x65e   :  { %v3742_v45 = vadd.f32 %v3741_v7, %v12361_v52  ;;  %v3935_v54 = vadd.f32 %v3934_v9, %v12365_v51  ;;  %v3743_v16 = vpop.f32.mrb[145].mxu1  ;;  %v3936_v17 = vpop.f32.mrb[209].mxu0 }
 0x65f   :  { %v3744_v13 = vadd.f32 %v3743_v16, %v12370_v15  ;;  %v3937_v11 = vadd.f32 %v3936_v17, %v12374_v41  ;;  %v3745_v3 = vpop.f32.mrb[146].mxu1  ;;  %v3938_v1 = vpop.f32.mrb[210].mxu0 }
 0x660   :  { %v3746_v32 = vadd.f32 %v3745_v3, %v12361_v52  ;;  %v3939_v26 = vadd.f32 %v3938_v1, %v12365_v51  ;;  %v3747_v53 = vpop.f32.mrb[147].mxu1  ;;  %v3940_v25 = vpop.f32.mrb[211].mxu0  ;;  %v4503_v19 = vmax.f32 %v3742_v45, 0.0  ;;  %v4505_v5 = vmax.f32 %v3935_v54, 0.0  ;;  %v10902_v54 = vld [vmem:[#allocation14 + $0x224] ss:$16 sps:$4 sm:$0xff]  }
 0x661   :  { %v3748_v34 = vadd.f32 %v3747_v53, %v12370_v15  ;;  %v3941_v28 = vadd.f32 %v3940_v25, %v12374_v41  ;;  %v4504_v8 = vmax.f32 %v3744_v13, 0.0  ;;  %v4506_v46 = vmax.f32 %v3937_v11, 0.0  ;;  %v10912_v13 = vld [vmem:[#allocation14 + $0x208] ss:$16 sps:$4 sm:$0xff]  }
 0x662   :  { %v4511_v22 = vmax.f32 %v3746_v32, 0.0  ;;  %v4513_v43 = vmax.f32 %v3939_v26, 0.0  ;;  %4236 = vmatmul.mubr.bf16.gmra.mrb[252].mxu1 %v12303_v10  ;;  %4429 = vmatmul.mubr.bf16.gmra.mrb[60].mxu0 %v12303_v10  ;;  %v10917_v26 = vld [vmem:[#allocation14 + $0x22c] ss:$16 sps:$4 sm:$0xff]  }
 0x663   :  { %v4512_v39 = vmax.f32 %v3748_v34, 0.0  ;;  %v4514_v33 = vmax.f32 %v3941_v28, 0.0  ;;  %6413 = vmatprep.mubr.bf16.mxu1 %v12394_v21  ;;  %7185 = vmatprep.mubr.bf16.mxu0 %v12394_v21 }
 0x664   :  { %v12468_v6 = vpack.c.bf16 %v4511_v22, %v4503_v19  ;;  %v12470_v31 = vpack.c.bf16 %v4513_v43, %v4505_v5  ;;  %v10900_v19 = vld [vmem:[#allocation14 + $0x220] ss:$16 sps:$4 sm:$0xff]   ;;  %v10905_v43 = vld [vmem:[#allocation14 + $0x244] ss:$16 sps:$4 sm:$0xff]  }
 0x665   :  { %v12472_v42 = vpack.c.bf16 %v4514_v33, %v4506_v46  ;;  %v3751_v12 = vpop.f32.mrb[148].mxu1  ;;  %v3944_v47 = vpop.f32.mrb[212].mxu0  ;;  %v12474_v48 = vpack.c.bf16 %v4512_v39, %v4504_v8  ;;  %v10915_v33 = vld [vmem:[#allocation14 + $0x228] ss:$16 sps:$4 sm:$0xff]  }
 0x666   :  { %v3752_v10 = vadd.f32 %v3751_v12, %v12361_v52  ;;  %v3945_v36 = vadd.f32 %v3944_v47, %v12365_v51  ;;  %v3753_v4 = vpop.f32.mrb[149].mxu1  ;;  %v3946_v56 = vpop.f32.mrb[213].mxu0 }
 0x667   :  { %v3754_v58 = vadd.f32 %v3753_v4, %v12370_v15  ;;  %v3947_v21 = vadd.f32 %v3946_v56, %v12374_v41  ;;  %v3755_v59 = vpop.f32.mrb[150].mxu1  ;;  %v3948_v60 = vpop.f32.mrb[214].mxu0 }
 0x668   :  { %v3756_v20 = vadd.f32 %v3755_v59, %v12361_v52  ;;  %v3949_v7 = vadd.f32 %v3948_v60, %v12365_v51  ;;  %v3757_v9 = vpop.f32.mrb[151].mxu1  ;;  %v3950_v45 = vpop.f32.mrb[215].mxu0  ;;  %v4519_v11 = vmax.f32 %v3752_v10, 0.0  ;;  %v4521_v3 = vmax.f32 %v3945_v36, 0.0 }
 0x669   :  { %v3758_v16 = vadd.f32 %v3757_v9, %v12370_v15  ;;  %v3951_v17 = vadd.f32 %v3950_v45, %v12374_v41  ;;  %v4520_v53 = vmax.f32 %v3754_v58, 0.0  ;;  %v4522_v25 = vmax.f32 %v3947_v21, 0.0 }
 0x66a   :  { %v4527_v1 = vmax.f32 %v3756_v20, 0.0  ;;  %v4529_v32 = vmax.f32 %v3949_v7, 0.0  ;;  %6414 = vmatmul.mubr.bf16.vlgmr.msra.gmra.mrb[0].mxu1 %v12388_v24  ;;  %7186 = vmatmul.mubr.bf16.vlgmr.msra.gmra.mrb[64].mxu0 %v12388_v24  ;;  %v10903_v20 = vld [vmem:[#allocation14 + $0x240] ss:$16 sps:$4 sm:$0xff]   ;;  %v10923_v7 = vld [vmem:[#allocation14 + $0x24c] ss:$16 sps:$4 sm:$0xff]  }
 0x66b   :  { %v4528_v34 = vmax.f32 %v3758_v16, 0.0  ;;  %v4530_v28 = vmax.f32 %v3951_v17, 0.0  ;;  %6575 = vmatpush1.bf16.msra.mxu1 %v10897_v61  ;;  %6423 = vmatprep.mubr.bf16.mxu1 %v12414_v55  ;;  %v10921_v16 = vld [vmem:[#allocation14 + $0x248] ss:$16 sps:$4 sm:$0xff]  }
 0x66c   :  { %v12487_v5 = vpack.c.bf16 %v4527_v1, %v4519_v11  ;;  %v12489_v22 = vpack.c.bf16 %v4529_v32, %v4521_v3  ;;  %7195 = vmatprep.mubr.bf16.mxu0 %v12414_v55  ;;  %6576 = vmatprep.subr.bf16.mxu1 %v10902_v54  ;;  %v10908_v54 = vld [vmem:[#allocation14 + $0x264] ss:$16 sps:$4 sm:$0xff]   ;;  %v10926_v1 = vld [vmem:[#allocation14 + $0x26c] ss:$16 sps:$4 sm:$0xff]  }
 0x66d   :  { %v12492_v8 = vpack.c.bf16 %v4530_v28, %v4522_v25  ;;  %v3761_v24 = vpop.f32.mrb[152].mxu1  ;;  %v3954_v46 = vpop.f32.mrb[216].mxu0  ;;  %v12494_v39 = vpack.c.bf16 %v4528_v34, %v4520_v53  ;;  %7347 = vmatpush1.bf16.msra.mxu0 %v10912_v13 }
 0x66e   :  { %v3762_v12 = vadd.f32 %v3761_v24, %v12361_v52  ;;  %v3955_v47 = vadd.f32 %v3954_v46, %v12365_v51  ;;  %v3763_v10 = vpop.f32.mrb[153].mxu1  ;;  %v3956_v36 = vpop.f32.mrb[217].mxu0  ;;  %7348 = vmatprep.subr.bf16.mxu0 %v10917_v26  ;;  %v10911_v46 = vld [vmem:[#allocation14 + $0x284] ss:$16 sps:$4 sm:$0xff]  }
 0x66f   :  { %v3764_v4 = vadd.f32 %v3763_v10, %v12370_v15  ;;  %v3957_v55 = vadd.f32 %v3956_v36, %v12374_v41  ;;  %v3765_v56 = vpop.f32.mrb[154].mxu1  ;;  %v3958_v58 = vpop.f32.mrb[218].mxu0  ;;  %6577 = vmatpush1.bf16.msra.mxu1 %v10900_v19  ;;  %v10906_v19 = vld [vmem:[#allocation14 + $0x260] ss:$16 sps:$4 sm:$0xff]  }
 0x670   :  { %v3766_v21 = vadd.f32 %v3765_v56, %v12361_v52  ;;  %v3959_v59 = vadd.f32 %v3958_v58, %v12365_v51  ;;  %v3767_v60 = vpop.f32.mrb[155].mxu1  ;;  %v3960_v61 = vpop.f32.mrb[219].mxu0  ;;  %6578 = vmatprep.subr.bf16.mxu1 %v10905_v43  ;;  %v4535_v17 = vmax.f32 %v3762_v12, 0.0  ;;  %v4537_v13 = vmax.f32 %v3955_v47, 0.0  ;;  %v10924_v12 = vld [vmem:[#allocation14 + $0x268] ss:$16 sps:$4 sm:$0xff]  }
 0x671   :  { %v3768_v9 = vadd.f32 %v3767_v60, %v12370_v15  ;;  %v3961_v45 = vadd.f32 %v3960_v61, %v12374_v41  ;;  %7349 = vmatpush1.bf16.msra.mxu0 %v10915_v33  ;;  %v4536_v32 = vmax.f32 %v3764_v4, 0.0  ;;  %v4538_v26 = vmax.f32 %v3957_v55, 0.0 }
 0x672   :  { %v4543_v11 = vmax.f32 %v3766_v21, 0.0  ;;  %v4545_v3 = vmax.f32 %v3959_v59, 0.0  ;;  %6424 = vmatmul.mubr.bf16.gmra.mrb[4].mxu1 %v12408_v49  ;;  %7196 = vmatmul.mubr.bf16.gmra.mrb[68].mxu0 %v12408_v49 }
 0x673   :  { %v4544_v53 = vmax.f32 %v3768_v9, 0.0  ;;  %v4546_v25 = vmax.f32 %v3961_v45, 0.0  ;;  %6433 = vmatprep.mubr.bf16.mxu1 %v12434_v29  ;;  %7205 = vmatprep.mubr.bf16.mxu0 %v12434_v29 }
 0x674   :  { %v12508_v34 = vpack.c.bf16 %v4543_v11, %v4535_v17  ;;  %v12510_v28 = vpack.c.bf16 %v4545_v3, %v4537_v13  ;;  %6579 = vmatpush1.bf16.msra.mxu1 %v10903_v20  ;;  %7350 = vmatprep.subr.bf16.mxu0 %v10923_v7  ;;  %v10909_v20 = vld [vmem:[#allocation14 + $0x280] ss:$16 sps:$4 sm:$0xff]   ;;  %v10932_v7 = vld [vmem:[#allocation14 + $0x28c] ss:$16 sps:$4 sm:$0xff]  }
 0x675   :  { %v12512_v43 = vpack.c.bf16 %v4546_v25, %v4538_v26  ;;  %v3771_v24 = vpop.f32.mrb[156].mxu1  ;;  %v3964_v49 = vpop.f32.mrb[220].mxu0  ;;  %6580 = vmatprep.subr.bf16.mxu1 %v10908_v54  ;;  %v12514_v33 = vpack.c.bf16 %v4544_v53, %v4536_v32  ;;  %7351 = vmatpush1.bf16.msra.mxu0 %v10921_v16  ;;  %v10920_v54 = vld [vmem:[#allocation14 + $0x2a4] ss:$16 sps:$4 sm:$0xff]   ;;  %v10930_v16 = vld [vmem:[#allocation14 + $0x288] ss:$16 sps:$4 sm:$0xff]  }
 0x676   :  { %v3772_v47 = vadd.f32 %v3771_v24, %v12361_v52  ;;  %v3965_v29 = vadd.f32 %v3964_v49, %v12365_v51  ;;  %v3773_v10 = vpop.f32.mrb[157].mxu1  ;;  %v3966_v36 = vpop.f32.mrb[221].mxu0  ;;  %7352 = vmatprep.subr.bf16.mxu0 %v10926_v1  ;;  %v10935_v1 = vld [vmem:[#allocation14 + $0x2ac] ss:$16 sps:$4 sm:$0xff]   ;;  %v10918_v49 = vld [vmem:[#allocation14 + $0x2a0] ss:$16 sps:$4 sm:$0xff]  }
 0x677   :  { %v3774_v4 = vadd.f32 %v3773_v10, %v12370_v15  ;;  %v3967_v55 = vadd.f32 %v3966_v36, %v12374_v41  ;;  %v3775_v56 = vpop.f32.mrb[158].mxu1  ;;  %v3968_v58 = vpop.f32.mrb[222].mxu0  ;;  %v10933_v10 = vld [vmem:[#allocation14 + $0x2a8] ss:$16 sps:$4 sm:$0xff]  }
 0x678   :  { %v3776_v21 = vadd.f32 %v3775_v56, %v12361_v52  ;;  %v3969_v59 = vadd.f32 %v3968_v58, %v12365_v51  ;;  %v3777_v60 = vpop.f32.mrb[159].mxu1  ;;  %v3970_v61 = vpop.f32.mrb[223].mxu0  ;;  %6581 = vmatpush1.bf16.msra.mxu1 %v10906_v19  ;;  %v4551_v17 = vmax.f32 %v3772_v47, 0.0  ;;  %v4553_v13 = vmax.f32 %v3965_v29, 0.0  ;;  %v10929_v47 = vld [vmem:[#allocation14 + $0x2c4] ss:$16 sps:$4 sm:$0xff]  }
 0x679   :  { %v3778_v9 = vadd.f32 %v3777_v60, %v12370_v15  ;;  %v3971_v45 = vadd.f32 %v3970_v61, %v12374_v41  ;;  %6582 = vmatprep.subr.bf16.mxu1 %v10911_v46  ;;  %7353 = vmatpush1.bf16.msra.mxu0 %v10924_v12  ;;  %v4552_v32 = vmax.f32 %v3774_v4, 0.0  ;;  %v4554_v26 = vmax.f32 %v3967_v55, 0.0 }
 0x67a   :  { %v4559_v11 = vmax.f32 %v3776_v21, 0.0  ;;  %v4561_v3 = vmax.f32 %v3969_v59, 0.0  ;;  %6434 = vmatmul.mubr.bf16.gmra.mrb[8].mxu1 %v12428_v27  ;;  %7206 = vmatmul.mubr.bf16.gmra.mrb[72].mxu0 %v12428_v27 }
 0x67b   :  { %v4560_v53 = vmax.f32 %v3778_v9, 0.0  ;;  %v4562_v25 = vmax.f32 %v3971_v45, 0.0  ;;  %6443 = vmatprep.mubr.bf16.mxu1 %v12454_v23  ;;  %7215 = vmatprep.mubr.bf16.mxu0 %v12454_v23  ;;  %v10927_v9 = vld [vmem:[#allocation14 + $0x2c0] ss:$16 sps:$4 sm:$0xff]   ;;  %v10941_v45 = vld [vmem:[#allocation14 + $0x2cc] ss:$16 sps:$4 sm:$0xff]  }
 0x67c   :  { %v12528_v19 = vpack.c.bf16 %v4559_v11, %v4551_v17  ;;  %v12530_v24 = vpack.c.bf16 %v4561_v3, %v4553_v13  ;;  %6583 = vmatpush1.bf16.msra.mxu1 %v10909_v20  ;;  %7354 = vmatprep.subr.bf16.mxu0 %v10932_v7  ;;  %v10938_v17 = vld [vmem:[#allocation14 + $0x2e4] ss:$16 sps:$4 sm:$0xff]   ;;  %v10939_v13 = vld [vmem:[#allocation14 + $0x2c8] ss:$16 sps:$4 sm:$0xff]  }
 0x67d   :  { %v12532_v46 = vpack.c.bf16 %v4562_v25, %v4554_v26  ;;  %v3781_v12 = vpop.f32.mrb[160].mxu1  ;;  %v3974_v27 = vpop.f32.mrb[224].mxu0  ;;  %6584 = vmatprep.subr.bf16.mxu1 %v10920_v54  ;;  %v12534_v29 = vpack.c.bf16 %v4560_v53, %v4552_v32  ;;  %7355 = vmatpush1.bf16.msra.mxu0 %v10930_v16  ;;  %v10944_v26 = vld [vmem:[#allocation14 + $0x2ec] ss:$16 sps:$4 sm:$0xff]  }
 0x67e   :  { %v3782_v36 = vadd.f32 %v3781_v12, %v12361_v52  ;;  %v3975_v23 = vadd.f32 %v3974_v27, %v12365_v51  ;;  %v3783_v4 = vpop.f32.mrb[161].mxu1  ;;  %v3976_v55 = vpop.f32.mrb[225].mxu0  ;;  %7356 = vmatprep.subr.bf16.mxu0 %v10935_v1 }
 0x67f   :  { %v3784_v56 = vadd.f32 %v3783_v4, %v12370_v15  ;;  %v3977_v58 = vadd.f32 %v3976_v55, %v12374_v41  ;;  %v3785_v21 = vpop.f32.mrb[162].mxu1  ;;  %v3978_v59 = vpop.f32.mrb[226].mxu0  ;;  %v10942_v55 = vld [vmem:[#allocation14 + $0x2e8] ss:$16 sps:$4 sm:$0xff]  }
 0x680   :  { %v3786_v60 = vadd.f32 %v3785_v21, %v12361_v52  ;;  %v3979_v61 = vadd.f32 %v3978_v59, %v12365_v51  ;;  %v3787_v20 = vpop.f32.mrb[163].mxu1  ;;  %v3980_v7 = vpop.f32.mrb[227].mxu0  ;;  %6585 = vmatpush1.bf16.msra.mxu1 %v10918_v49  ;;  %v4567_v11 = vmax.f32 %v3782_v36, 0.0  ;;  %v4569_v3 = vmax.f32 %v3975_v23, 0.0 }
 0x681   :  { %v3788_v54 = vadd.f32 %v3787_v20, %v12370_v15  ;;  %v3981_v16 = vadd.f32 %v3980_v7, %v12374_v41  ;;  %6586 = vmatprep.subr.bf16.mxu1 %v10929_v47  ;;  %7357 = vmatpush1.bf16.msra.mxu0 %v10933_v10  ;;  %v4568_v53 = vmax.f32 %v3784_v56, 0.0  ;;  %v4570_v25 = vmax.f32 %v3977_v58, 0.0  ;;  %v10936_v10 = vld [vmem:[#allocation14 + $0x2e0] ss:$16 sps:$4 sm:$0xff]   ;;  %v10947_v56 = vld [vmem:[#allocation14 + $0x304] ss:$16 sps:$4 sm:$0xff]  }
 0x682   :  { %v4575_v1 = vmax.f32 %v3786_v60, 0.0  ;;  %v4577_v32 = vmax.f32 %v3979_v61, 0.0  ;;  %6444 = vmatmul.mubr.bf16.gmra.mrb[12].mxu1 %v12448_v63  ;;  %7216 = vmatmul.mubr.bf16.gmra.mrb[76].mxu0 %v12448_v63 }
 0x683   :  { %v4576_v49 = vmax.f32 %v3788_v54, 0.0  ;;  %v4578_v12 = vmax.f32 %v3981_v16, 0.0  ;;  %6453 = vmatprep.mubr.bf16.mxu1 %v12474_v48  ;;  %7225 = vmatprep.mubr.bf16.mxu0 %v12474_v48 }
 0x684   :  { %v12548_v27 = vpack.c.bf16 %v4575_v1, %v4567_v11  ;;  %v12550_v47 = vpack.c.bf16 %v4577_v32, %v4569_v3  ;;  %6587 = vmatpush1.bf16.msra.mxu1 %v10927_v9  ;;  %7358 = vmatprep.subr.bf16.mxu0 %v10941_v45  ;;  %v10948_v1 = vld [vmem:[#allocation14 + $0x308] ss:$16 sps:$4 sm:$0xff]   ;;  %v10956_v32 = vld [vmem:[#allocation14 + $0x324] ss:$16 sps:$4 sm:$0xff]  }
 0x685   :  { %v12552_v36 = vpack.c.bf16 %v4578_v12, %v4570_v25  ;;  %v3791_v23 = vpop.f32.mrb[164].mxu1  ;;  %v3984_v63 = vpop.f32.mrb[228].mxu0  ;;  %6588 = vmatprep.subr.bf16.mxu1 %v10938_v17  ;;  %v12554_v4 = vpack.c.bf16 %v4576_v49, %v4568_v53  ;;  %7359 = vmatpush1.bf16.msra.mxu0 %v10939_v13  ;;  %v10945_v17 = vld [vmem:[#allocation14 + $0x300] ss:$16 sps:$4 sm:$0xff]   ;;  %v10950_v13 = vld [vmem:[#allocation14 + $0x30c] ss:$16 sps:$4 sm:$0xff]  }
 0x686   :  { %v3792_v58 = vadd.f32 %v3791_v23, %v12361_v52  ;;  %v3985_v48 = vadd.f32 %v3984_v63, %v12365_v51  ;;  %v3793_v21 = vpop.f32.mrb[165].mxu1  ;;  %v3986_v59 = vpop.f32.mrb[229].mxu0  ;;  %7360 = vmatprep.subr.bf16.mxu0 %v10944_v26  ;;  %v10953_v12 = vld [vmem:[#allocation14 + $0x32c] ss:$16 sps:$4 sm:$0xff]  }
 0x687   :  { %v3794_v60 = vadd.f32 %v3793_v21, %v12370_v15  ;;  %v3987_v61 = vadd.f32 %v3986_v59, %v12374_v41  ;;  %v3795_v20 = vpop.f32.mrb[166].mxu1  ;;  %v3988_v7 = vpop.f32.mrb[230].mxu0 }
 0x688   :  { %v3796_v9 = vadd.f32 %v3795_v20, %v12361_v52  ;;  %v3989_v45 = vadd.f32 %v3988_v7, %v12365_v51  ;;  %v3797_v54 = vpop.f32.mrb[167].mxu1  ;;  %v3990_v16 = vpop.f32.mrb[231].mxu0  ;;  %6589 = vmatpush1.bf16.msra.mxu1 %v10936_v10  ;;  %v4583_v26 = vmax.f32 %v3792_v58, 0.0  ;;  %v4585_v53 = vmax.f32 %v3985_v48, 0.0  ;;  %v10954_v58 = vld [vmem:[#allocation14 + $0x320] ss:$16 sps:$4 sm:$0xff]  }
 0x689   :  { %v3798_v11 = vadd.f32 %v3797_v54, %v12370_v15  ;;  %v3991_v3 = vadd.f32 %v3990_v16, %v12374_v41  ;;  %7361 = vmatpush1.bf16.msra.mxu0 %v10942_v55  ;;  %6590 = vmatprep.subr.bf16.mxu1 %v10947_v56  ;;  %v4584_v10 = vmax.f32 %v3794_v60, 0.0  ;;  %v4586_v23 = vmax.f32 %v3987_v61, 0.0  ;;  %v10951_v60 = vld [vmem:[#allocation14 + $0x328] ss:$16 sps:$4 sm:$0xff]   ;;  %v10965_v61 = vld [vmem:[#allocation14 + $0x344] ss:$16 sps:$4 sm:$0xff]  }
 0x68a   :  { %v4591_v25 = vmax.f32 %v3796_v9, 0.0  ;;  %v4593_v49 = vmax.f32 %v3989_v45, 0.0  ;;  %6454 = vmatmul.mubr.bf16.gmra.mrb[16].mxu1 %v12468_v6  ;;  %7226 = vmatmul.mubr.bf16.gmra.mrb[80].mxu0 %v12468_v6 }
 0x68b   :  { %v4592_v63 = vmax.f32 %v3798_v11, 0.0  ;;  %v4594_v21 = vmax.f32 %v3991_v3, 0.0  ;;  %6463 = vmatprep.mubr.bf16.mxu1 %v12494_v39  ;;  %7235 = vmatprep.mubr.bf16.mxu0 %v12494_v39 }
 0x68c   :  { %v12568_v55 = vpack.c.bf16 %v4591_v25, %v4583_v26  ;;  %v12570_v56 = vpack.c.bf16 %v4593_v49, %v4585_v53  ;;  %6591 = vmatpush1.bf16.msra.mxu1 %v10945_v17  ;;  %7362 = vmatprep.subr.bf16.mxu0 %v10950_v13  ;;  %v10959_v26 = vld [vmem:[#allocation14 + $0x34c] ss:$16 sps:$4 sm:$0xff]   ;;  %v10963_v53 = vld [vmem:[#allocation14 + $0x340] ss:$16 sps:$4 sm:$0xff]  }
 0x68d   :  { %v12572_v48 = vpack.c.bf16 %v4594_v21, %v4586_v23  ;;  %v3801_v59 = vpop.f32.mrb[168].mxu1  ;;  %v3994_v6 = vpop.f32.mrb[232].mxu0  ;;  %v12574_v20 = vpack.c.bf16 %v4592_v63, %v4584_v10  ;;  %7363 = vmatpush1.bf16.msra.mxu0 %v10948_v1  ;;  %6592 = vmatprep.subr.bf16.mxu1 %v10956_v32  ;;  %v10974_v10 = vld [vmem:[#allocation14 + $0x364] ss:$16 sps:$4 sm:$0xff]  }
 0x68e   :  { %v3802_v7 = vadd.f32 %v3801_v59, %v12361_v52  ;;  %v3995_v39 = vadd.f32 %v3994_v6, %v12365_v51  ;;  %v3803_v9 = vpop.f32.mrb[169].mxu1  ;;  %v3996_v45 = vpop.f32.mrb[233].mxu0  ;;  %7364 = vmatprep.subr.bf16.mxu0 %v10953_v12  ;;  %v10957_v12 = vld [vmem:[#allocation14 + $0x348] ss:$16 sps:$4 sm:$0xff]   ;;  %v10962_v6 = vld [vmem:[#allocation14 + $0x36c] ss:$16 sps:$4 sm:$0xff]  }
 0x68f   :  { %v3804_v54 = vadd.f32 %v3803_v9, %v12370_v15  ;;  %v3997_v16 = vadd.f32 %v3996_v45, %v12374_v41  ;;  %v3805_v17 = vpop.f32.mrb[170].mxu1  ;;  %v3998_v13 = vpop.f32.mrb[234].mxu0 }
 0x690   :  { %v3806_v11 = vadd.f32 %v3805_v17, %v12361_v52  ;;  %v3999_v3 = vadd.f32 %v3998_v13, %v12365_v51  ;;  %v3807_v1 = vpop.f32.mrb[171].mxu1  ;;  %v4000_v32 = vpop.f32.mrb[235].mxu0  ;;  %6593 = vmatpush1.bf16.msra.mxu1 %v10954_v58  ;;  %v4599_v23 = vmax.f32 %v3802_v7, 0.0  ;;  %v4601_v63 = vmax.f32 %v3995_v39, 0.0  ;;  %v10972_v7 = vld [vmem:[#allocation14 + $0x360] ss:$16 sps:$4 sm:$0xff]  }
 0x691   :  { %v3808_v25 = vadd.f32 %v3807_v1, %v12370_v15  ;;  %v4001_v49 = vadd.f32 %v4000_v32, %v12374_v41  ;;  %7365 = vmatpush1.bf16.msra.mxu0 %v10951_v60  ;;  %6594 = vmatprep.subr.bf16.mxu1 %v10965_v61  ;;  %v4600_v58 = vmax.f32 %v3804_v54, 0.0  ;;  %v4602_v9 = vmax.f32 %v3997_v16, 0.0  ;;  %v10960_v54 = vld [vmem:[#allocation14 + $0x368] ss:$16 sps:$4 sm:$0xff]   ;;  %v10983_v16 = vld [vmem:[#allocation14 + $0x384] ss:$16 sps:$4 sm:$0xff]  }
 0x692   :  { %v4607_v21 = vmax.f32 %v3806_v11, 0.0  ;;  %v4609_v59 = vmax.f32 %v3999_v3, 0.0  ;;  %6464 = vmatmul.mubr.bf16.gmra.mrb[20].mxu1 %v12487_v5  ;;  %7236 = vmatmul.mubr.bf16.gmra.mrb[84].mxu0 %v12487_v5 }
 0x693   :  { %v4608_v45 = vmax.f32 %v3808_v25, 0.0  ;;  %v4610_v17 = vmax.f32 %v4001_v49, 0.0  ;;  %6473 = vmatprep.mubr.bf16.mxu1 %v12514_v33  ;;  %7245 = vmatprep.mubr.bf16.mxu0 %v12514_v33 }
 0x694   :  { %v12588_v60 = vpack.c.bf16 %v4607_v21, %v4599_v23  ;;  %v12590_v61 = vpack.c.bf16 %v4609_v59, %v4601_v63  ;;  %7366 = vmatprep.subr.bf16.mxu0 %v10959_v26  ;;  %6595 = vmatpush1.bf16.msra.mxu1 %v10963_v53  ;;  %v10968_v21 = vld [vmem:[#allocation14 + $0x38c] ss:$16 sps:$4 sm:$0xff]   ;;  %v10981_v59 = vld [vmem:[#allocation14 + $0x380] ss:$16 sps:$4 sm:$0xff]  }
 0x695   :  { %v12592_v39 = vpack.c.bf16 %v4610_v17, %v4602_v9  ;;  %v3811_v13 = vpop.f32.mrb[172].mxu1  ;;  %v4004_v5 = vpop.f32.mrb[236].mxu0  ;;  %v12594_v11 = vpack.c.bf16 %v4608_v45, %v4600_v58  ;;  %7367 = vmatpush1.bf16.msra.mxu0 %v10957_v12  ;;  %6596 = vmatprep.subr.bf16.mxu1 %v10974_v10  ;;  %v10986_v45 = vld [vmem:[#allocation14 + $0x3a4] ss:$16 sps:$4 sm:$0xff]  }
 0x696   :  { %v3812_v3 = vadd.f32 %v3811_v13, %v12361_v52  ;;  %v4005_v33 = vadd.f32 %v4004_v5, %v12365_v51  ;;  %v3813_v1 = vpop.f32.mrb[173].mxu1  ;;  %v4006_v32 = vpop.f32.mrb[237].mxu0  ;;  %7368 = vmatprep.subr.bf16.mxu0 %v10962_v6  ;;  %v10966_v6 = vld [vmem:[#allocation14 + $0x388] ss:$16 sps:$4 sm:$0xff]  }
 0x697   :  { %v3814_v26 = vadd.f32 %v3813_v1, %v12370_v15  ;;  %v4007_v53 = vadd.f32 %v4006_v32, %v12374_v41  ;;  %v3815_v25 = vpop.f32.mrb[174].mxu1  ;;  %v4008_v49 = vpop.f32.mrb[238].mxu0  ;;  %v10971_v32 = vld [vmem:[#allocation14 + $0x3ac] ss:$16 sps:$4 sm:$0xff]  }
 0x698   :  { %v3816_v23 = vadd.f32 %v3815_v25, %v12361_v52  ;;  %v4009_v12 = vadd.f32 %v4008_v49, %v12365_v51  ;;  %v3817_v63 = vpop.f32.mrb[175].mxu1  ;;  %v4010_v10 = vpop.f32.mrb[239].mxu0  ;;  %6597 = vmatpush1.bf16.msra.mxu1 %v10972_v7  ;;  %v4615_v17 = vmax.f32 %v3812_v3, 0.0  ;;  %v4617_v13 = vmax.f32 %v4005_v33, 0.0  ;;  %v10984_v3 = vld [vmem:[#allocation14 + $0x3a0] ss:$16 sps:$4 sm:$0xff]  }
 0x699   :  { %v3818_v58 = vadd.f32 %v3817_v63, %v12370_v15  ;;  %v4011_v9 = vadd.f32 %v4010_v10, %v12374_v41  ;;  %7369 = vmatpush1.bf16.msra.mxu0 %v10960_v54  ;;  %6598 = vmatprep.subr.bf16.mxu1 %v10983_v16  ;;  %v4616_v25 = vmax.f32 %v3814_v26, 0.0  ;;  %v4618_v7 = vmax.f32 %v4007_v53, 0.0  ;;  %v10969_v26 = vld [vmem:[#allocation14 + $0x3a8] ss:$16 sps:$4 sm:$0xff]   ;;  %v10989_v53 = vld [vmem:[#allocation14 + $0x3c4] ss:$16 sps:$4 sm:$0xff]  }
 0x69a   :  { %v4623_v5 = vmax.f32 %v3816_v23, 0.0  ;;  %v4625_v1 = vmax.f32 %v4009_v12, 0.0  ;;  %6474 = vmatmul.mubr.bf16.gmra.mrb[24].mxu1 %v12508_v34  ;;  %7246 = vmatmul.mubr.bf16.gmra.mrb[88].mxu0 %v12508_v34 }
 0x69b   :  { %v4624_v49 = vmax.f32 %v3818_v58, 0.0  ;;  %v4626_v30 = vmax.f32 %v4011_v9, 0.0  ;;  %6483 = vmatprep.mubr.bf16.mxu1 %v12534_v29  ;;  %7255 = vmatprep.mubr.bf16.mxu0 %v12534_v29 }
 0x69c   :  { %v12608_v54 = vpack.c.bf16 %v4623_v5, %v4615_v17  ;;  %v12610_v16 = vpack.c.bf16 %v4625_v1, %v4617_v13  ;;  %7370 = vmatprep.subr.bf16.mxu0 %v10968_v21  ;;  %6599 = vmatpush1.bf16.msra.mxu1 %v10981_v59  ;;  %v10977_v5 = vld [vmem:[#allocation14 + $0x3cc] ss:$16 sps:$4 sm:$0xff]   ;;  %v10987_v1 = vld [vmem:[#allocation14 + $0x3c0] ss:$16 sps:$4 sm:$0xff]  }
 0x69d   :  { %v12612_v33 = vpack.c.bf16 %v4626_v30, %v4618_v7  ;;  %v3821_v23 = vpop.f32.mrb[176].mxu1  ;;  %v4014_v34 = vpop.f32.mrb[240].mxu0  ;;  %v12614_v12 = vpack.c.bf16 %v4624_v49, %v4616_v25  ;;  %7371 = vmatpush1.bf16.msra.mxu0 %v10966_v6  ;;  %6600 = vmatprep.subr.bf16.mxu1 %v10986_v45  ;;  %v10992_v49 = vld [vmem:[#allocation14 + $0x3e4] ss:$16 sps:$4 sm:$0xff]  }
 0x69e   :  { %v3822_v63 = vadd.f32 %v3821_v23, %v12361_v52  ;;  %v4015_v29 = vadd.f32 %v4014_v34, %v12365_v51  ;;  %v3823_v10 = vpop.f32.mrb[177].mxu1  ;;  %v4016_v58 = vpop.f32.mrb[241].mxu0  ;;  %7372 = vmatprep.subr.bf16.mxu0 %v10971_v32  ;;  %v10975_v32 = vld [vmem:[#allocation14 + $0x3c8] ss:$16 sps:$4 sm:$0xff]  }
 0x69f   :  { %v3824_v21 = vadd.f32 %v3823_v10, %v12370_v15  ;;  %v4017_v30 = vadd.f32 %v4016_v58, %v12374_v41  ;;  %v3825_v59 = vpop.f32.mrb[178].mxu1  ;;  %v4018_v9 = vpop.f32.mrb[242].mxu0 }
 0x6a0   :  { %v3826_v17 = vadd.f32 %v3825_v59, %v12361_v52  ;;  %v4019_v6 = vadd.f32 %v4018_v9, %v12365_v51  ;;  %v3827_v13 = vpop.f32.mrb[179].mxu1  ;;  %v4020_v45 = vpop.f32.mrb[243].mxu0  ;;  %6601 = vmatpush1.bf16.msra.mxu1 %v10984_v3  ;;  %v4631_v23 = vmax.f32 %v3822_v63, 0.0  ;;  %v4633_v34 = vmax.f32 %v4015_v29, 0.0  ;;  %v10980_v59 = vld [vmem:[#allocation14 + $0x3ec] ss:$16 sps:$4 sm:$0xff]  }
 0x6a1   :  { %v3828_v25 = vadd.f32 %v3827_v13, %v12370_v15  ;;  %v4021_v7 = vadd.f32 %v4020_v45, %v12374_v41  ;;  %7373 = vmatpush1.bf16.msra.mxu0 %v10969_v26  ;;  %6602 = vmatprep.subr.bf16.mxu1 %v10989_v53  ;;  %v4632_v9 = vmax.f32 %v3824_v21, 0.0  ;;  %v4634_v3 = vmax.f32 %v4017_v30, 0.0  ;;  %v10990_v63 = vld [vmem:[#allocation14 + $0x3e0] ss:$16 sps:$4 sm:$0xff]   ;;  %v10978_v30 = vld [vmem:[#allocation14 + $0x3e8] ss:$16 sps:$4 sm:$0xff]  }
 0x6a2   :  { %v4639_v10 = vmax.f32 %v3826_v17, 0.0  ;;  %v4641_v58 = vmax.f32 %v4019_v6, 0.0  ;;  %6484 = vmatmul.mubr.bf16.gmra.mrb[28].mxu1 %v12528_v19  ;;  %7256 = vmatmul.mubr.bf16.gmra.mrb[92].mxu0 %v12528_v19  ;;  %v10995_v6 = vld [vmem:[#allocation14 + $0x404] ss:$16 sps:$4 sm:$0xff]  }
 0x6a3   :  { %v4640_v62 = vmax.f32 %v3828_v25, 0.0  ;;  %v4642_v40 = vmax.f32 %v4021_v7, 0.0  ;;  %6493 = vmatprep.mubr.bf16.mxu1 %v12554_v4  ;;  %7265 = vmatprep.mubr.bf16.mxu0 %v12554_v4 }
 0x6a4   :  { %v12628_v26 = vpack.c.bf16 %v4639_v10, %v4631_v23  ;;  %v12630_v53 = vpack.c.bf16 %v4641_v58, %v4633_v34  ;;  %7374 = vmatprep.subr.bf16.mxu0 %v10977_v5  ;;  %6603 = vmatpush1.bf16.msra.mxu1 %v10987_v1  ;;  %v11010_v34 = vld [vmem:[#allocation14 + $0x40c] ss:$16 sps:$4 sm:$0xff]  }
 0x6a5   :  { %v12632_v29 = vpack.c.bf16 %v4640_v62, %v4632_v9  ;;  %v12634_v17 = vpack.c.bf16 %v4642_v40, %v4634_v3  ;;  %v3831_v19 = vpop.f32.mrb[180].mxu1  ;;  %v4024_v21 = vpop.f32.mrb[244].mxu0  ;;  %7375 = vmatpush1.bf16.msra.mxu0 %v10975_v32  ;;  %6604 = vmatprep.subr.bf16.mxu1 %v10992_v49 }
 0x6a6   :  { %13609 = vst [vmem:[#allocation30_spill] sm:$0xff] %v12628_v26  ;;  %v3832_v13 = vadd.f32 %v3831_v19, %v12361_v52  ;;  %v4025_v4 = vadd.f32 %v4024_v21, %v12365_v51  ;;  %v3833_v45 = vpop.f32.mrb[181].mxu1  ;;  %v4026_v25 = vpop.f32.mrb[245].mxu0  ;;  %7376 = vmatprep.subr.bf16.mxu0 %v10980_v59 }
 0x6a7   :  { %13610 = vst [vmem:[#allocation31_spill] sm:$0xff] %v12632_v29  ;;  %v3834_v5 = vadd.f32 %v3833_v45, %v12370_v15  ;;  %v4027_v62 = vadd.f32 %v4026_v25, %v12374_v41  ;;  %v3835_v1 = vpop.f32.mrb[182].mxu1  ;;  %v4028_v40 = vpop.f32.mrb[246].mxu0 }
 0x6a8   :  { %v3836_v7 = vadd.f32 %v3835_v1, %v12361_v52  ;;  %v4029_v32 = vadd.f32 %v4028_v40, %v12365_v51  ;;  %v3837_v23 = vpop.f32.mrb[183].mxu1  ;;  %v4030_v49 = vpop.f32.mrb[247].mxu0  ;;  %6605 = vmatpush1.bf16.msra.mxu1 %v10990_v63  ;;  %v4647_v59 = vmax.f32 %v3832_v13, 0.0  ;;  %v4649_v9 = vmax.f32 %v4025_v4, 0.0 }
 0x6a9   :  { %v3838_v10 = vadd.f32 %v3837_v23, %v12370_v15  ;;  %v4031_v58 = vadd.f32 %v4030_v49, %v12374_v41  ;;  %7377 = vmatpush1.bf16.msra.mxu0 %v10978_v30  ;;  %6767 = vmatprep.subr.bf16.mxu1 %v10995_v6  ;;  %v4648_v21 = vmax.f32 %v3834_v5, 0.0  ;;  %v4650_v45 = vmax.f32 %v4027_v62, 0.0 }
 0x6aa   :  { %v4655_v3 = vmax.f32 %v3836_v7, 0.0  ;;  %v4657_v19 = vmax.f32 %v4029_v32, 0.0  ;;  %6494 = vmatmul.mubr.bf16.gmra.mrb[32].mxu1 %v12548_v27  ;;  %7266 = vmatmul.mubr.bf16.gmra.mrb[96].mxu0 %v12548_v27 }
 0x6ab   :  { %v4656_v25 = vmax.f32 %v3838_v10, 0.0  ;;  %v4658_v1 = vmax.f32 %v4031_v58, 0.0  ;;  %6503 = vmatprep.mubr.bf16.mxu1 %v12574_v20  ;;  %7275 = vmatprep.mubr.bf16.mxu0 %v12574_v20 }
 0x6ac   :  { %v12648_v63 = vpack.c.bf16 %v4655_v3, %v4647_v59  ;;  %v12650_v30 = vpack.c.bf16 %v4657_v19, %v4649_v9  ;;  %7539 = vmatprep.subr.bf16.mxu0 %v11010_v34 }
 0x6ad   :  { %v12652_v6 = vpack.c.bf16 %v4656_v25, %v4648_v21  ;;  %v12654_v13 = vpack.c.bf16 %v4658_v1, %v4650_v45  ;;  %v3841_v4 = vpop.f32.mrb[184].mxu1  ;;  %v4034_v40 = vpop.f32.mrb[248].mxu0 }
 0x6ae   :  { %13611 = vst [vmem:[#allocation32_spill] sm:$0xff] %v12648_v63  ;;  %v3842_v27 = vadd.f32 %v3841_v4, %v12361_v52  ;;  %v4035_v5 = vadd.f32 %v4034_v40, %v12365_v51  ;;  %v3843_v62 = vpop.f32.mrb[185].mxu1  ;;  %v4036_v7 = vpop.f32.mrb[249].mxu0 }
 0x6af   :  { %13612 = vst [vmem:[#allocation33_spill] sm:$0xff] %v12652_v6  ;;  %v3844_v32 = vadd.f32 %v3843_v62, %v12370_v15  ;;  %v4037_v20 = vadd.f32 %v4036_v7, %v12374_v41  ;;  %v3845_v23 = vpop.f32.mrb[186].mxu1  ;;  %v4038_v49 = vpop.f32.mrb[250].mxu0 }
 0x6b0   :  { %v3846_v34 = vadd.f32 %v3845_v23, %v12361_v52  ;;  %v4039_v10 = vadd.f32 %v4038_v49, %v12365_v51  ;;  %v3847_v58 = vpop.f32.mrb[187].mxu1  ;;  %v4040_v59 = vpop.f32.mrb[251].mxu0  ;;  %v4663_v19 = vmax.f32 %v3842_v27, 0.0  ;;  %v4665_v21 = vmax.f32 %v4035_v5, 0.0 }
 0x6b1   :  { %v3848_v9 = vadd.f32 %v3847_v58, %v12370_v15  ;;  %v4041_v3 = vadd.f32 %v4040_v59, %v12374_v41  ;;  %v4664_v1 = vmax.f32 %v3844_v32, 0.0  ;;  %v4666_v4 = vmax.f32 %v4037_v20, 0.0 }
 0x6b2   :  { %v4671_v45 = vmax.f32 %v3846_v34, 0.0  ;;  %v4673_v25 = vmax.f32 %v4039_v10, 0.0  ;;  %6504 = vmatmul.mubr.bf16.gmra.mrb[36].mxu1 %v12568_v55  ;;  %7276 = vmatmul.mubr.bf16.gmra.mrb[100].mxu0 %v12568_v55  ;;  %v3005_v27 = vsub.s32 4, %v11799_v37  ;;  %v3013_v5 = vsub.s32 6, %v11799_v37 }
 0x6b3   :  { %v4672_v40 = vmax.f32 %v3848_v9, 0.0  ;;  %v4674_v62 = vmax.f32 %v4041_v3, 0.0  ;;  %6513 = vmatprep.mubr.bf16.mxu1 %v12594_v11  ;;  %7285 = vmatprep.mubr.bf16.mxu0 %v12594_v11  ;;  %v3009_v20 = vsub.s32 5, %v11799_v37  ;;  %v3017_v10 = vsub.s32 7, %v11799_v37 }
 0x6b4   :  { %v12668_v7 = vpack.c.bf16 %v4671_v45, %v4663_v19  ;;  %v12670_v23 = vpack.c.bf16 %v4673_v25, %v4665_v21 }
 0x6b5   :  { %v12674_v49 = vpack.c.bf16 %v4672_v40, %v4664_v1  ;;  %v12676_v34 = vpack.c.bf16 %v4674_v62, %v4666_v4  ;;  %v3851_v55 = vpop.f32.mrb[188].mxu1  ;;  %v4044_v32 = vpop.f32.mrb[252].mxu0  ;;  %v11225_v62 = vld [vmem:[%s13537_s15] sm:$0xff] }
 0x6b6   :  { %13613 = vst [vmem:[#allocation34_spill] sm:$0xff] %v12668_v7  ;;  %13614 = vst [vmem:[#allocation35_spill] sm:$0xff] %v12670_v23  ;;  %v3852_v11 = vadd.f32 %v3851_v55, %v12361_v52  ;;  %v4045_v58 = vadd.f32 %v4044_v32, %v12365_v51  ;;  %v3853_v59 = vpop.f32.mrb[189].mxu1  ;;  %v4046_v9 = vpop.f32.mrb[253].mxu0  ;;  %v12689_v55 = vrot.slane %v11225_v62, %v3005_v27 }
 0x6b7   :  { %13615 = vst [vmem:[#allocation36_spill] sm:$0xff] %v12674_v49  ;;  %13616 = vst [vmem:[#allocation37_spill] sm:$0xff] %v12676_v34  ;;  %v3854_v3 = vadd.f32 %v3853_v59, %v12370_v15  ;;  %v4047_v19 = vadd.f32 %v4046_v9, %v12374_v41  ;;  %v3855_v21 = vpop.f32.mrb[190].mxu1  ;;  %v4048_v45 = vpop.f32.mrb[254].mxu0  ;;  %v12691_v32 = vrot.slane %v11225_v62, %v3013_v5 }
 0x6b8   :  { %v3856_v25 = vadd.f32 %v3855_v21, %v12361_v52  ;;  %v4049_v1 = vadd.f32 %v4048_v45, %v12365_v51  ;;  %v3857_v4 = vpop.f32.mrb[191].mxu1  ;;  %v4050_v40 = vpop.f32.mrb[255].mxu0  ;;  %v12695_v38 = vrot.slane %v11225_v62, %v3009_v20  ;;  %v12697_v37 = vrot.slane %v11225_v62, %v3017_v10 }
 0x6b9   :  { %v3858_v59 = vadd.f32 %v3857_v4, %v12370_v15  ;;  %v4051_v9 = vadd.f32 %v4050_v40, %v12374_v41  ;;  %v4679_v52 = vmax.f32 %v3852_v11, 0.0  ;;  %v4681_v51 = vmax.f32 %v4045_v58, 0.0 }
 0x6ba   :  { %v4687_v21 = vmax.f32 %v3856_v25, 0.0  ;;  %v4689_v45 = vmax.f32 %v4049_v1, 0.0  ;;  %6514 = vmatmul.mubr.bf16.gmra.mrb[40].mxu1 %v12588_v60  ;;  %7286 = vmatmul.mubr.bf16.gmra.mrb[104].mxu0 %v12588_v60  ;;  %v4680_v27 = vmax.f32 %v3854_v3, 0.0  ;;  %v4682_v23 = vmax.f32 %v4047_v19, 0.0 }
 0x6bb   :  { %v4688_v5 = vmax.f32 %v3858_v59, 0.0  ;;  %v4690_v34 = vmax.f32 %v4051_v9, 0.0  ;;  %6523 = vmatprep.mubr.bf16.mxu1 %v12614_v12  ;;  %7295 = vmatprep.mubr.bf16.mxu0 %v12614_v12 }
 0x6bc   :  { %v12703_v15 = vpack.c.bf16 %v4687_v21, %v4679_v52  ;;  %v12705_v41 = vpack.c.bf16 %v4689_v45, %v4681_v51 }
 0x6bd   :  { %v12707_v20 = vpack.c.bf16 %v4688_v5, %v4680_v27  ;;  %v12709_v10 = vpack.c.bf16 %v4690_v34, %v4682_v23  ;;  %v4087_v11 = vpop.f32.mrb[192].mxu1  ;;  %v4280_v58 = vpop.f32.mrb[0].mxu0 }
 0x6be   :  { %13617 = vst [vmem:[#allocation38_spill] sm:$0xff] %v12703_v15  ;;  %v4088_v60 = vadd.f32 %v4087_v11, %v12689_v55  ;;  %v4281_v3 = vadd.f32 %v4280_v58, %v12691_v32  ;;  %v4089_v19 = vpop.f32.mrb[193].mxu1  ;;  %v4282_v25 = vpop.f32.mrb[1].mxu0 }
 0x6bf   :  { %13618 = vst [vmem:[#allocation39_spill] sm:$0xff] %v12707_v20  ;;  %v4090_v1 = vadd.f32 %v4089_v19, %v12695_v38  ;;  %v4283_v12 = vadd.f32 %v4282_v25, %v12697_v37  ;;  %v4091_v4 = vpop.f32.mrb[194].mxu1  ;;  %v4284_v40 = vpop.f32.mrb[2].mxu0 }
 0x6c0   :  { %v4092_v62 = vadd.f32 %v4091_v4, %v12689_v55  ;;  %v4285_v59 = vadd.f32 %v4284_v40, %v12691_v32  ;;  %v4093_v23 = vpop.f32.mrb[195].mxu1  ;;  %v4286_v34 = vpop.f32.mrb[3].mxu0  ;;  %v4443_v51 = vmax.f32 %v4088_v60, 0.0  ;;  %v4445_v21 = vmax.f32 %v4281_v3, 0.0 }
 0x6c1   :  { %v4094_v9 = vadd.f32 %v4093_v23, %v12695_v38  ;;  %v4287_v52 = vadd.f32 %v4286_v34, %v12697_v37  ;;  %v4444_v5 = vmax.f32 %v4090_v1, 0.0  ;;  %v4446_v11 = vmax.f32 %v4283_v12, 0.0 }
 0x6c2   :  { %v4451_v45 = vmax.f32 %v4092_v62, 0.0  ;;  %v4453_v27 = vmax.f32 %v4285_v59, 0.0  ;;  %6524 = vmatmul.mubr.bf16.gmra.mrb[44].mxu1 %v12608_v54  ;;  %7296 = vmatmul.mubr.bf16.gmra.mrb[108].mxu0 %v12608_v54 }
 0x6c3   :  { %v4452_v58 = vmax.f32 %v4094_v9, 0.0  ;;  %v4454_v19 = vmax.f32 %v4287_v52, 0.0  ;;  %6533 = vmatprep.mubr.bf16.mxu1 %v12632_v29  ;;  %7378 = vmatprep.mubr.bf16.mxu0 %v12392_v2 }
 0x6c4   :  { %v12723_v25 = vpack.c.bf16 %v4451_v45, %v4443_v51  ;;  %v12725_v4 = vpack.c.bf16 %v4453_v27, %v4445_v21 }
 0x6c5   :  { %v12727_v60 = vpack.c.bf16 %v4452_v58, %v4444_v5  ;;  %v12729_v3 = vpack.c.bf16 %v4454_v19, %v4446_v11  ;;  %v4097_v40 = vpop.f32.mrb[196].mxu1  ;;  %v4290_v62 = vpop.f32.mrb[4].mxu0  ;;  %v11008_v5 = vld [vmem:[#allocation14 + $0x408] ss:$16 sps:$4 sm:$0xff]   ;;  %v11013_v19 = vld [vmem:[#allocation14 + $0x42c] ss:$16 sps:$4 sm:$0xff]  }
 0x6c6   :  { %13619 = vst [vmem:[#allocation40_spill] sm:$0xff] %v12725_v4  ;;  %v4098_v54 = vadd.f32 %v4097_v40, %v12689_v55  ;;  %v4291_v1 = vadd.f32 %v4290_v62, %v12691_v32  ;;  %v4099_v12 = vpop.f32.mrb[197].mxu1  ;;  %v4292_v59 = vpop.f32.mrb[5].mxu0 }
 0x6c7   :  { %13620 = vst [vmem:[#allocation41_spill] sm:$0xff] %v12729_v3  ;;  %v4100_v23 = vadd.f32 %v4099_v12, %v12695_v38  ;;  %v4293_v34 = vadd.f32 %v4292_v59, %v12697_v37  ;;  %v4101_v9 = vpop.f32.mrb[198].mxu1  ;;  %v4294_v52 = vpop.f32.mrb[6].mxu0 }
 0x6c8   :  { %v4102_v51 = vadd.f32 %v4101_v9, %v12689_v55  ;;  %v4295_v21 = vadd.f32 %v4294_v52, %v12691_v32  ;;  %v4103_v45 = vpop.f32.mrb[199].mxu1  ;;  %v4296_v27 = vpop.f32.mrb[7].mxu0  ;;  %v4459_v40 = vmax.f32 %v4098_v54, 0.0  ;;  %v4461_v62 = vmax.f32 %v4291_v1, 0.0  ;;  %v11011_v54 = vld [vmem:[#allocation14 + $0x428] ss:$16 sps:$4 sm:$0xff]  }
 0x6c9   :  { %v4104_v11 = vadd.f32 %v4103_v45, %v12695_v38  ;;  %v4297_v58 = vadd.f32 %v4296_v27, %v12697_v37  ;;  %v4460_v59 = vmax.f32 %v4100_v23, 0.0  ;;  %v4462_v9 = vmax.f32 %v4293_v34, 0.0  ;;  %v11019_v23 = vld [vmem:[#allocation14 + $0x44c] ss:$16 sps:$4 sm:$0xff]  }
 0x6ca   :  { %v4467_v29 = vmax.f32 %v4102_v51, 0.0  ;;  %v4469_v12 = vmax.f32 %v4295_v21, 0.0  ;;  %6534 = vmatmul.mubr.bf16.gmra.mrb[48].mxu1 %v12628_v26  ;;  %7379 = vmatmul.mubr.bf16.vlgmr.msra.gmra.mrb[64].mxu0 %v12390_v18 }
 0x6cb   :  { %v4468_v4 = vmax.f32 %v4104_v11, 0.0  ;;  %v4470_v52 = vmax.f32 %v4297_v58, 0.0  ;;  %6543 = vmatprep.mubr.bf16.mxu1 %v12652_v6  ;;  %7388 = vmatprep.mubr.bf16.mxu0 %v12412_v44 }
 0x6cc   :  { %v12743_v45 = vpack.c.bf16 %v4467_v29, %v4459_v40  ;;  %v12745_v27 = vpack.c.bf16 %v4469_v12, %v4461_v62  ;;  %7540 = vmatpush1.bf16.msra.mxu0 %v11008_v5 }
 0x6cd   :  { %v12747_v1 = vpack.c.bf16 %v4468_v4, %v4460_v59  ;;  %v12749_v51 = vpack.c.bf16 %v4470_v52, %v4462_v9  ;;  %v4107_v21 = vpop.f32.mrb[200].mxu1  ;;  %v4300_v26 = vpop.f32.mrb[8].mxu0  ;;  %7541 = vmatprep.subr.bf16.mxu0 %v11013_v19  ;;  %v11017_v19 = vld [vmem:[#allocation14 + $0x448] ss:$16 sps:$4 sm:$0xff]  }
 0x6ce   :  { %13621 = vst [vmem:[#allocation42_spill] sm:$0xff] %v12743_v45  ;;  %13622 = vst [vmem:[#allocation43_spill] sm:$0xff] %v12745_v27  ;;  %v4108_v34 = vadd.f32 %v4107_v21, %v12689_v55  ;;  %v4301_v11 = vadd.f32 %v4300_v26, %v12691_v32  ;;  %v4109_v58 = vpop.f32.mrb[201].mxu1  ;;  %v4302_v6 = vpop.f32.mrb[9].mxu0  ;;  %v11022_v21 = vld [vmem:[#allocation14 + $0x46c] ss:$16 sps:$4 sm:$0xff]  }
 0x6cf   :  { %13623 = vst [vmem:[#allocation44_spill] sm:$0xff] %v12749_v51  ;;  %v4110_v29 = vadd.f32 %v4109_v58, %v12695_v38  ;;  %v4303_v40 = vadd.f32 %v4302_v6, %v12697_v37  ;;  %v4111_v5 = vpop.f32.mrb[202].mxu1  ;;  %v4304_v62 = vpop.f32.mrb[10].mxu0 }
 0x6d0   :  { %v4112_v4 = vadd.f32 %v4111_v5, %v12689_v55  ;;  %v4305_v12 = vadd.f32 %v4304_v62, %v12691_v32  ;;  %v4113_v59 = vpop.f32.mrb[203].mxu1  ;;  %v4306_v9 = vpop.f32.mrb[11].mxu0  ;;  %7542 = vmatpush1.bf16.msra.mxu0 %v11011_v54  ;;  %v4475_v27 = vmax.f32 %v4108_v34, 0.0  ;;  %v4477_v58 = vmax.f32 %v4301_v11, 0.0  ;;  %v11020_v34 = vld [vmem:[#allocation14 + $0x468] ss:$16 sps:$4 sm:$0xff]  }
 0x6d1   :  { %v4114_v52 = vadd.f32 %v4113_v59, %v12695_v38  ;;  %v4307_v26 = vadd.f32 %v4306_v9, %v12697_v37  ;;  %7543 = vmatprep.subr.bf16.mxu0 %v11019_v23  ;;  %v4476_v5 = vmax.f32 %v4110_v29, 0.0  ;;  %v4478_v62 = vmax.f32 %v4303_v40, 0.0  ;;  %v11028_v29 = vld [vmem:[#allocation14 + $0x48c] ss:$16 sps:$4 sm:$0xff]  }
 0x6d2   :  { %v4483_v51 = vmax.f32 %v4112_v4, 0.0  ;;  %v4485_v6 = vmax.f32 %v4305_v12, 0.0  ;;  %6544 = vmatmul.mubr.bf16.gmra.mrb[52].mxu1 %v12648_v63  ;;  %7389 = vmatmul.mubr.bf16.gmra.mrb[68].mxu0 %v12410_v50 }
 0x6d3   :  { %v4484_v3 = vmax.f32 %v4114_v52, 0.0  ;;  %v4486_v45 = vmax.f32 %v4307_v26, 0.0  ;;  %6553 = vmatprep.mubr.bf16.mxu1 %v12674_v49  ;;  %7398 = vmatprep.mubr.bf16.mxu0 %v12432_v0 }
 0x6d4   :  { %v12763_v54 = vpack.c.bf16 %v4483_v51, %v4475_v27  ;;  %v12765_v23 = vpack.c.bf16 %v4485_v6, %v4477_v58  ;;  %7544 = vmatpush1.bf16.msra.mxu0 %v11017_v19 }
 0x6d5   :  { %v12767_v11 = vpack.c.bf16 %v4484_v3, %v4476_v5  ;;  %v12769_v4 = vpack.c.bf16 %v4486_v45, %v4478_v62  ;;  %v4117_v12 = vpop.f32.mrb[204].mxu1  ;;  %v4310_v59 = vpop.f32.mrb[12].mxu0  ;;  %7545 = vmatprep.subr.bf16.mxu0 %v11022_v21  ;;  %v11026_v21 = vld [vmem:[#allocation14 + $0x488] ss:$16 sps:$4 sm:$0xff]  }
 0x6d6   :  { %13624 = vst [vmem:[#allocation45_spill] sm:$0xff] %v12765_v23  ;;  %v4118_v40 = vadd.f32 %v4117_v12, %v12689_v55  ;;  %v4311_v9 = vadd.f32 %v4310_v59, %v12691_v32  ;;  %v4119_v52 = vpop.f32.mrb[205].mxu1  ;;  %v4312_v26 = vpop.f32.mrb[13].mxu0  ;;  %v11031_v59 = vld [vmem:[#allocation14 + $0x4ac] ss:$16 sps:$4 sm:$0xff]  }
 0x6d7   :  { %13625 = vst [vmem:[#allocation46_spill] sm:$0xff] %v12769_v4  ;;  %v4120_v27 = vadd.f32 %v4119_v52, %v12695_v38  ;;  %v4313_v51 = vadd.f32 %v4312_v26, %v12697_v37  ;;  %v4121_v19 = vpop.f32.mrb[206].mxu1  ;;  %v4314_v58 = vpop.f32.mrb[14].mxu0 }
 0x6d8   :  { %v4122_v3 = vadd.f32 %v4121_v19, %v12689_v55  ;;  %v4315_v45 = vadd.f32 %v4314_v58, %v12691_v32  ;;  %v4123_v6 = vpop.f32.mrb[207].mxu1  ;;  %v4316_v5 = vpop.f32.mrb[15].mxu0  ;;  %7546 = vmatpush1.bf16.msra.mxu0 %v11020_v34  ;;  %v4491_v49 = vmax.f32 %v4118_v40, 0.0  ;;  %v4493_v52 = vmax.f32 %v4311_v9, 0.0  ;;  %v11029_v40 = vld [vmem:[#allocation14 + $0x4a8] ss:$16 sps:$4 sm:$0xff]  }
 0x6d9   :  { %v4124_v62 = vadd.f32 %v4123_v6, %v12695_v38  ;;  %v4317_v12 = vadd.f32 %v4316_v5, %v12697_v37  ;;  %7547 = vmatprep.subr.bf16.mxu0 %v11028_v29  ;;  %v4492_v19 = vmax.f32 %v4120_v27, 0.0  ;;  %v4494_v58 = vmax.f32 %v4313_v51, 0.0  ;;  %v11037_v27 = vld [vmem:[#allocation14 + $0x4cc] ss:$16 sps:$4 sm:$0xff]  }
 0x6da   :  { %v4499_v63 = vmax.f32 %v4122_v3, 0.0  ;;  %v4501_v26 = vmax.f32 %v4315_v45, 0.0  ;;  %6554 = vmatmul.mubr.bf16.gmra.mrb[56].mxu1 %v12668_v7  ;;  %7399 = vmatmul.mubr.bf16.gmra.mrb[72].mxu0 %v12430_v57 }
 0x6db   :  { %v4500_v23 = vmax.f32 %v4124_v62, 0.0  ;;  %v4502_v4 = vmax.f32 %v4317_v12, 0.0  ;;  %6563 = vmatprep.mubr.bf16.mxu1 %v12707_v20  ;;  %7408 = vmatprep.mubr.bf16.mxu0 %v12452_v14 }
 0x6dc   :  { %v12783_v34 = vpack.c.bf16 %v4499_v63, %v4491_v49  ;;  %v12785_v29 = vpack.c.bf16 %v4501_v26, %v4493_v52  ;;  %7548 = vmatpush1.bf16.msra.mxu0 %v11026_v21 }
 0x6dd   :  { %v12787_v9 = vpack.c.bf16 %v4500_v23, %v4492_v19  ;;  %v12789_v3 = vpack.c.bf16 %v4502_v4, %v4494_v58  ;;  %v4127_v45 = vpop.f32.mrb[208].mxu1  ;;  %v4320_v6 = vpop.f32.mrb[16].mxu0  ;;  %7549 = vmatprep.subr.bf16.mxu0 %v11031_v59  ;;  %v11035_v59 = vld [vmem:[#allocation14 + $0x4c8] ss:$16 sps:$4 sm:$0xff]  }
 0x6de   :  { %13626 = vst [vmem:[#allocation47_spill] sm:$0xff] %v12785_v29  ;;  %v4128_v51 = vadd.f32 %v4127_v45, %v12689_v55  ;;  %v4321_v5 = vadd.f32 %v4320_v6, %v12691_v32  ;;  %v4129_v62 = vpop.f32.mrb[209].mxu1  ;;  %v4322_v12 = vpop.f32.mrb[17].mxu0  ;;  %v11040_v6 = vld [vmem:[#allocation14 + $0x4ec] ss:$16 sps:$4 sm:$0xff]  }
 0x6df   :  { %13627 = vst [vmem:[#allocation48_spill] sm:$0xff] %v12789_v3  ;;  %v4130_v63 = vadd.f32 %v4129_v62, %v12695_v38  ;;  %v4323_v49 = vadd.f32 %v4322_v12, %v12697_v37  ;;  %v4131_v21 = vpop.f32.mrb[210].mxu1  ;;  %v4324_v52 = vpop.f32.mrb[18].mxu0 }
 0x6e0   :  { %v4132_v23 = vadd.f32 %v4131_v21, %v12689_v55  ;;  %v4325_v4 = vadd.f32 %v4324_v52, %v12691_v32  ;;  %v4133_v26 = vpop.f32.mrb[211].mxu1  ;;  %v4326_v19 = vpop.f32.mrb[19].mxu0  ;;  %7550 = vmatpush1.bf16.msra.mxu0 %v11029_v40  ;;  %v4507_v20 = vmax.f32 %v4128_v51, 0.0  ;;  %v4509_v62 = vmax.f32 %v4321_v5, 0.0  ;;  %v11038_v51 = vld [vmem:[#allocation14 + $0x4e8] ss:$16 sps:$4 sm:$0xff]  }
 0x6e1   :  { %v4134_v58 = vadd.f32 %v4133_v26, %v12695_v38  ;;  %v4327_v45 = vadd.f32 %v4326_v19, %v12697_v37  ;;  %7551 = vmatprep.subr.bf16.mxu0 %v11037_v27  ;;  %v4508_v21 = vmax.f32 %v4130_v63, 0.0  ;;  %v4510_v52 = vmax.f32 %v4323_v49, 0.0  ;;  %v11046_v63 = vld [vmem:[#allocation14 + $0x50c] ss:$16 sps:$4 sm:$0xff]  }
 0x6e2   :  { %v4515_v7 = vmax.f32 %v4132_v23, 0.0  ;;  %v4517_v12 = vmax.f32 %v4325_v4, 0.0  ;;  %6564 = vmatmul.mubr.bf16.gmra.mrb[60].mxu1 %v12703_v15  ;;  %7409 = vmatmul.mubr.bf16.gmra.mrb[76].mxu0 %v12450_v35 }
 0x6e3   :  { %v4516_v29 = vmax.f32 %v4134_v58, 0.0  ;;  %v4518_v3 = vmax.f32 %v4327_v45, 0.0  ;;  %6606 = vmatprep.mubr.bf16.mxu1 %v12392_v2  ;;  %7418 = vmatprep.mubr.bf16.mxu0 %v12472_v42 }
 0x6e4   :  { %v12803_v40 = vpack.c.bf16 %v4515_v7, %v4507_v20  ;;  %v12805_v27 = vpack.c.bf16 %v4517_v12, %v4509_v62  ;;  %7552 = vmatpush1.bf16.msra.mxu0 %v11035_v59 }
 0x6e5   :  { %v12807_v5 = vpack.c.bf16 %v4516_v29, %v4508_v21  ;;  %v12809_v23 = vpack.c.bf16 %v4518_v3, %v4510_v52  ;;  %v4137_v4 = vpop.f32.mrb[212].mxu1  ;;  %v4330_v26 = vpop.f32.mrb[20].mxu0  ;;  %7553 = vmatprep.subr.bf16.mxu0 %v11040_v6  ;;  %v10993_v29 = vld [vmem:[#allocation14 + $0x400] ss:$16 sps:$4 sm:$0xff]   ;;  %v10998_v21 = vld [vmem:[#allocation14 + $0x424] ss:$16 sps:$4 sm:$0xff]  }
 0x6e6   :  { %13628 = vst [vmem:[#allocation49_spill] sm:$0xff] %v12803_v40  ;;  %13629 = vst [vmem:[#allocation50_spill] sm:$0xff] %v12805_v27  ;;  %v4138_v49 = vadd.f32 %v4137_v4, %v12689_v55  ;;  %v4331_v2 = vadd.f32 %v4330_v26, %v12691_v32  ;;  %v4139_v19 = vpop.f32.mrb[213].mxu1  ;;  %v4332_v58 = vpop.f32.mrb[21].mxu0  ;;  %v11044_v26 = vld [vmem:[#allocation14 + $0x508] ss:$16 sps:$4 sm:$0xff]  }
 0x6e7   :  { %13630 = vst [vmem:[#allocation51_spill] sm:$0xff] %v12807_v5  ;;  %13631 = vst [vmem:[#allocation52_spill] sm:$0xff] %v12809_v23  ;;  %v4140_v7 = vadd.f32 %v4139_v19, %v12695_v38  ;;  %v4333_v20 = vadd.f32 %v4332_v58, %v12697_v37  ;;  %v4141_v59 = vpop.f32.mrb[214].mxu1  ;;  %v4334_v45 = vpop.f32.mrb[22].mxu0 }
 0x6e8   :  { %v4142_v3 = vadd.f32 %v4141_v59, %v12689_v55  ;;  %v4335_v62 = vadd.f32 %v4334_v45, %v12691_v32  ;;  %v4143_v12 = vpop.f32.mrb[215].mxu1  ;;  %v4336_v6 = vpop.f32.mrb[23].mxu0  ;;  %7554 = vmatpush1.bf16.msra.mxu0 %v11038_v51  ;;  %v4523_v19 = vmax.f32 %v4138_v49, 0.0  ;;  %v4525_v15 = vmax.f32 %v4331_v2, 0.0  ;;  %v11049_v59 = vld [vmem:[#allocation14 + $0x52c] ss:$16 sps:$4 sm:$0xff]  }
 0x6e9   :  { %v4144_v52 = vadd.f32 %v4143_v12, %v12695_v38  ;;  %v4337_v4 = vadd.f32 %v4336_v6, %v12697_v37  ;;  %7555 = vmatprep.subr.bf16.mxu0 %v11046_v63  ;;  %v4524_v45 = vmax.f32 %v4140_v7, 0.0  ;;  %v4526_v23 = vmax.f32 %v4333_v20, 0.0  ;;  %v10996_v51 = vld [vmem:[#allocation14 + $0x420] ss:$16 sps:$4 sm:$0xff]   ;;  %v11001_v49 = vld [vmem:[#allocation14 + $0x444] ss:$16 sps:$4 sm:$0xff]  }
 0x6ea   :  { %v4531_v58 = vmax.f32 %v4142_v3, 0.0  ;;  %v4533_v27 = vmax.f32 %v4335_v62, 0.0  ;;  %6607 = vmatmul.mubr.bf16.vlgmr.msra.gmra.mrb[0].mxu1 %v12390_v18  ;;  %7419 = vmatmul.mubr.bf16.gmra.mrb[80].mxu0 %v12470_v31  ;;  %v11047_v3 = vld [vmem:[#allocation14 + $0x528] ss:$16 sps:$4 sm:$0xff]  }
 0x6eb   :  { %v4532_v40 = vmax.f32 %v4144_v52, 0.0  ;;  %v4534_v5 = vmax.f32 %v4337_v4, 0.0  ;;  %6768 = vmatpush1.bf16.msra.mxu1 %v10993_v29  ;;  %6616 = vmatprep.mubr.bf16.mxu1 %v12412_v44 }
 0x6ec   :  { %v12822_v12 = vpack.c.bf16 %v4531_v58, %v4523_v19  ;;  %v12824_v63 = vpack.c.bf16 %v4533_v27, %v4525_v15  ;;  %7428 = vmatprep.mubr.bf16.mxu0 %v12492_v8  ;;  %6769 = vmatprep.subr.bf16.mxu1 %v10998_v21  ;;  %v11055_v19 = vld [vmem:[#allocation14 + $0x54c] ss:$16 sps:$4 sm:$0xff]  }
 0x6ed   :  { %v12827_v18 = vpack.c.bf16 %v4532_v40, %v4524_v45  ;;  %v12829_v2 = vpack.c.bf16 %v4534_v5, %v4526_v23  ;;  %v4147_v7 = vpop.f32.mrb[216].mxu1  ;;  %v4340_v20 = vpop.f32.mrb[24].mxu0  ;;  %7556 = vmatpush1.bf16.msra.mxu0 %v11044_v26  ;;  %v10999_v26 = vld [vmem:[#allocation14 + $0x440] ss:$16 sps:$4 sm:$0xff]   ;;  %v11004_v45 = vld [vmem:[#allocation14 + $0x464] ss:$16 sps:$4 sm:$0xff]  }
 0x6ee   :  { %13632 = vst [vmem:[#allocation53_spill] sm:$0xff] %v12824_v63  ;;  %v4148_v29 = vadd.f32 %v4147_v7, %v12689_v55  ;;  %v4341_v44 = vadd.f32 %v4340_v20, %v12691_v32  ;;  %v4149_v62 = vpop.f32.mrb[217].mxu1  ;;  %v4342_v6 = vpop.f32.mrb[25].mxu0  ;;  %7557 = vmatprep.subr.bf16.mxu0 %v11049_v59  ;;  %v11053_v7 = vld [vmem:[#allocation14 + $0x548] ss:$16 sps:$4 sm:$0xff]  }
 0x6ef   :  { %13633 = vst [vmem:[#allocation54_spill] sm:$0xff] %v12829_v2  ;;  %v4150_v15 = vadd.f32 %v4149_v62, %v12695_v38  ;;  %v4343_v27 = vadd.f32 %v4342_v6, %v12697_v37  ;;  %v4151_v21 = vpop.f32.mrb[218].mxu1  ;;  %v4344_v40 = vpop.f32.mrb[26].mxu0  ;;  %6770 = vmatpush1.bf16.msra.mxu1 %v10996_v51 }
 0x6f0   :  { %v4152_v5 = vadd.f32 %v4151_v21, %v12689_v55  ;;  %v4345_v23 = vadd.f32 %v4344_v40, %v12691_v32  ;;  %v4153_v52 = vpop.f32.mrb[219].mxu1  ;;  %v4346_v4 = vpop.f32.mrb[27].mxu0  ;;  %6771 = vmatprep.subr.bf16.mxu1 %v11001_v49  ;;  %v4539_v20 = vmax.f32 %v4148_v29, 0.0  ;;  %v4541_v62 = vmax.f32 %v4341_v44, 0.0  ;;  %v11058_v21 = vld [vmem:[#allocation14 + $0x56c] ss:$16 sps:$4 sm:$0xff]  }
 0x6f1   :  { %v4154_v58 = vadd.f32 %v4153_v52, %v12695_v38  ;;  %v4347_v59 = vadd.f32 %v4346_v4, %v12697_v37  ;;  %7558 = vmatpush1.bf16.msra.mxu0 %v11047_v3  ;;  %v4540_v40 = vmax.f32 %v4150_v15, 0.0  ;;  %v4542_v63 = vmax.f32 %v4343_v27, 0.0  ;;  %v11002_v29 = vld [vmem:[#allocation14 + $0x460] ss:$16 sps:$4 sm:$0xff]   ;;  %v11007_v27 = vld [vmem:[#allocation14 + $0x484] ss:$16 sps:$4 sm:$0xff]  }
 0x6f2   :  { %v4547_v6 = vmax.f32 %v4152_v5, 0.0  ;;  %v4549_v51 = vmax.f32 %v4345_v23, 0.0  ;;  %6617 = vmatmul.mubr.bf16.gmra.mrb[4].mxu1 %v12410_v50  ;;  %7429 = vmatmul.mubr.bf16.gmra.mrb[84].mxu0 %v12489_v22  ;;  %v11056_v23 = vld [vmem:[#allocation14 + $0x568] ss:$16 sps:$4 sm:$0xff]  }
 0x6f3   :  { %v4548_v49 = vmax.f32 %v4154_v58, 0.0  ;;  %v4550_v2 = vmax.f32 %v4347_v59, 0.0  ;;  %6626 = vmatprep.mubr.bf16.mxu1 %v12432_v0  ;;  %7438 = vmatprep.mubr.bf16.mxu0 %v12512_v43 }
 0x6f4   :  { %v12843_v52 = vpack.c.bf16 %v4547_v6, %v4539_v20  ;;  %v12845_v3 = vpack.c.bf16 %v4549_v51, %v4541_v62  ;;  %6772 = vmatpush1.bf16.msra.mxu1 %v10999_v26  ;;  %7559 = vmatprep.subr.bf16.mxu0 %v11055_v19  ;;  %v11005_v6 = vld [vmem:[#allocation14 + $0x480] ss:$16 sps:$4 sm:$0xff]   ;;  %v11064_v51 = vld [vmem:[#allocation14 + $0x58c] ss:$16 sps:$4 sm:$0xff]  }
 0x6f5   :  { %v12847_v44 = vpack.c.bf16 %v4548_v49, %v4540_v40  ;;  %v12849_v50 = vpack.c.bf16 %v4550_v2, %v4542_v63  ;;  %v4157_v5 = vpop.f32.mrb[220].mxu1  ;;  %v4350_v15 = vpop.f32.mrb[28].mxu0  ;;  %6773 = vmatprep.subr.bf16.mxu1 %v11004_v45  ;;  %7560 = vmatpush1.bf16.msra.mxu0 %v11053_v7 }
 0x6f6   :  { %13634 = vst [vmem:[#allocation55_spill] sm:$0xff] %v12843_v52  ;;  %13635 = vst [vmem:[#allocation56_spill] sm:$0xff] %v12845_v3  ;;  %v4158_v0 = vadd.f32 %v4157_v5, %v12689_v55  ;;  %v4351_v4 = vadd.f32 %v4350_v15, %v12691_v32  ;;  %v4159_v58 = vpop.f32.mrb[221].mxu1  ;;  %v4352_v59 = vpop.f32.mrb[29].mxu0  ;;  %7561 = vmatprep.subr.bf16.mxu0 %v11058_v21  ;;  %v11016_v21 = vld [vmem:[#allocation14 + $0x4a4] ss:$16 sps:$4 sm:$0xff]  }
 0x6f7   :  { %13636 = vst [vmem:[#allocation57_spill] sm:$0xff] %v12849_v50  ;;  %v4160_v26 = vadd.f32 %v4159_v58, %v12695_v38  ;;  %v4353_v19 = vadd.f32 %v4352_v59, %v12697_v37  ;;  %v4161_v20 = vpop.f32.mrb[222].mxu1  ;;  %v4354_v63 = vpop.f32.mrb[30].mxu0  ;;  %v11062_v5 = vld [vmem:[#allocation14 + $0x588] ss:$16 sps:$4 sm:$0xff]  }
 0x6f8   :  { %v4162_v2 = vadd.f32 %v4161_v20, %v12689_v55  ;;  %v4355_v45 = vadd.f32 %v4354_v63, %v12691_v32  ;;  %v4163_v62 = vpop.f32.mrb[223].mxu1  ;;  %v4356_v7 = vpop.f32.mrb[31].mxu0  ;;  %6774 = vmatpush1.bf16.msra.mxu1 %v11002_v29  ;;  %v4555_v15 = vmax.f32 %v4158_v0, 0.0  ;;  %v4557_v58 = vmax.f32 %v4351_v4, 0.0  ;;  %v11067_v20 = vld [vmem:[#allocation14 + $0x5ac] ss:$16 sps:$4 sm:$0xff]  }
 0x6f9   :  { %v4164_v40 = vadd.f32 %v4163_v62, %v12695_v38  ;;  %v4357_v49 = vadd.f32 %v4356_v7, %v12697_v37  ;;  %6775 = vmatprep.subr.bf16.mxu1 %v11007_v27  ;;  %7562 = vmatpush1.bf16.msra.mxu0 %v11056_v23  ;;  %v4556_v29 = vmax.f32 %v4160_v26, 0.0  ;;  %v4558_v63 = vmax.f32 %v4353_v19, 0.0  ;;  %v11014_v0 = vld [vmem:[#allocation14 + $0x4a0] ss:$16 sps:$4 sm:$0xff]   ;;  %v11025_v19 = vld [vmem:[#allocation14 + $0x4c4] ss:$16 sps:$4 sm:$0xff]  }
 0x6fa   :  { %v4563_v59 = vmax.f32 %v4162_v2, 0.0  ;;  %v4565_v3 = vmax.f32 %v4355_v45, 0.0  ;;  %6627 = vmatmul.mubr.bf16.gmra.mrb[8].mxu1 %v12430_v57  ;;  %7439 = vmatmul.mubr.bf16.gmra.mrb[88].mxu0 %v12510_v28  ;;  %v11065_v45 = vld [vmem:[#allocation14 + $0x5a8] ss:$16 sps:$4 sm:$0xff]  }
 0x6fb   :  { %v4564_v50 = vmax.f32 %v4164_v40, 0.0  ;;  %v4566_v52 = vmax.f32 %v4357_v49, 0.0  ;;  %6636 = vmatprep.mubr.bf16.mxu1 %v12452_v14  ;;  %7448 = vmatprep.mubr.bf16.mxu0 %v12532_v46 }
 0x6fc   :  { %v12863_v27 = vpack.c.bf16 %v4563_v59, %v4555_v15  ;;  %v12865_v23 = vpack.c.bf16 %v4565_v3, %v4557_v58  ;;  %6776 = vmatpush1.bf16.msra.mxu1 %v11005_v6  ;;  %7563 = vmatprep.subr.bf16.mxu0 %v11064_v51  ;;  %v11023_v15 = vld [vmem:[#allocation14 + $0x4c0] ss:$16 sps:$4 sm:$0xff]   ;;  %v11073_v58 = vld [vmem:[#allocation14 + $0x5cc] ss:$16 sps:$4 sm:$0xff]  }
 0x6fd   :  { %v12867_v4 = vpack.c.bf16 %v4564_v50, %v4556_v29  ;;  %v12869_v57 = vpack.c.bf16 %v4566_v52, %v4558_v63  ;;  %v4167_v2 = vpop.f32.mrb[224].mxu1  ;;  %v4360_v26 = vpop.f32.mrb[32].mxu0  ;;  %6777 = vmatprep.subr.bf16.mxu1 %v11016_v21  ;;  %7564 = vmatpush1.bf16.msra.mxu0 %v11062_v5  ;;  %v11071_v63 = vld [vmem:[#allocation14 + $0x5c8] ss:$16 sps:$4 sm:$0xff]  }
 0x6fe   :  { %13637 = vst [vmem:[#allocation58_spill] sm:$0xff] %v12865_v23  ;;  %v4168_v14 = vadd.f32 %v4167_v2, %v12689_v55  ;;  %v4361_v62 = vadd.f32 %v4360_v26, %v12691_v32  ;;  %v4169_v7 = vpop.f32.mrb[225].mxu1  ;;  %v4362_v3 = vpop.f32.mrb[33].mxu0  ;;  %7565 = vmatprep.subr.bf16.mxu0 %v11067_v20  ;;  %v11034_v20 = vld [vmem:[#allocation14 + $0x4e4] ss:$16 sps:$4 sm:$0xff]  }
 0x6ff   :  { %13638 = vst [vmem:[#allocation59_spill] sm:$0xff] %v12869_v57  ;;  %v4170_v6 = vadd.f32 %v4169_v7, %v12695_v38  ;;  %v4363_v50 = vadd.f32 %v4362_v3, %v12697_v37  ;;  %v4171_v51 = vpop.f32.mrb[226].mxu1  ;;  %v4364_v52 = vpop.f32.mrb[34].mxu0 }
 0x700   :  { %v4172_v40 = vadd.f32 %v4171_v51, %v12689_v55  ;;  %v4365_v49 = vadd.f32 %v4364_v52, %v12691_v32  ;;  %v4173_v21 = vpop.f32.mrb[227].mxu1  ;;  %v4366_v5 = vpop.f32.mrb[35].mxu0  ;;  %6778 = vmatpush1.bf16.msra.mxu1 %v11014_v0  ;;  %v4571_v2 = vmax.f32 %v4168_v14, 0.0  ;;  %v4573_v26 = vmax.f32 %v4361_v62, 0.0  ;;  %v11076_v51 = vld [vmem:[#allocation14 + $0x5ec] ss:$16 sps:$4 sm:$0xff]  }
 0x701   :  { %v4174_v59 = vadd.f32 %v4173_v21, %v12695_v38  ;;  %v4367_v29 = vadd.f32 %v4366_v5, %v12697_v37  ;;  %6779 = vmatprep.subr.bf16.mxu1 %v11025_v19  ;;  %7566 = vmatpush1.bf16.msra.mxu0 %v11065_v45  ;;  %v4572_v0 = vmax.f32 %v4170_v6, 0.0  ;;  %v4574_v52 = vmax.f32 %v4363_v50, 0.0  ;;  %v11032_v14 = vld [vmem:[#allocation14 + $0x4e0] ss:$16 sps:$4 sm:$0xff]   ;;  %v11043_v50 = vld [vmem:[#allocation14 + $0x504] ss:$16 sps:$4 sm:$0xff]  }
 0x702   :  { %v4579_v7 = vmax.f32 %v4172_v40, 0.0  ;;  %v4581_v3 = vmax.f32 %v4365_v49, 0.0  ;;  %6637 = vmatmul.mubr.bf16.gmra.mrb[12].mxu1 %v12450_v35  ;;  %7449 = vmatmul.mubr.bf16.gmra.mrb[92].mxu0 %v12530_v24  ;;  %v11074_v49 = vld [vmem:[#allocation14 + $0x5e8] ss:$16 sps:$4 sm:$0xff]  }
 0x703   :  { %v4580_v23 = vmax.f32 %v4174_v59, 0.0  ;;  %v4582_v57 = vmax.f32 %v4367_v29, 0.0  ;;  %6646 = vmatprep.mubr.bf16.mxu1 %v12472_v42  ;;  %7458 = vmatprep.mubr.bf16.mxu0 %v12552_v36 }
 0x704   :  { %v12883_v19 = vpack.c.bf16 %v4579_v7, %v4571_v2  ;;  %v12885_v45 = vpack.c.bf16 %v4581_v3, %v4573_v26  ;;  %6780 = vmatpush1.bf16.msra.mxu1 %v11023_v15  ;;  %7567 = vmatprep.subr.bf16.mxu0 %v11073_v58  ;;  %v11041_v26 = vld [vmem:[#allocation14 + $0x500] ss:$16 sps:$4 sm:$0xff]  }
 0x705   :  { %v12887_v62 = vpack.c.bf16 %v4580_v23, %v4572_v0  ;;  %v12889_v35 = vpack.c.bf16 %v4582_v57, %v4574_v52  ;;  %v4177_v40 = vpop.f32.mrb[228].mxu1  ;;  %v4370_v6 = vpop.f32.mrb[36].mxu0  ;;  %6781 = vmatprep.subr.bf16.mxu1 %v11034_v20  ;;  %7568 = vmatpush1.bf16.msra.mxu0 %v11071_v63  ;;  %v11106_v0 = vld [vmem:[#allocation14 + $0x60c] ss:$16 sps:$4 sm:$0xff]  }
 0x706   :  { %v4178_v42 = vadd.f32 %v4177_v40, %v12689_v55  ;;  %v4371_v21 = vadd.f32 %v4370_v6, %v12691_v32  ;;  %v4179_v5 = vpop.f32.mrb[229].mxu1  ;;  %v4372_v59 = vpop.f32.mrb[37].mxu0  ;;  %7569 = vmatprep.subr.bf16.mxu0 %v11076_v51  ;;  %v11052_v51 = vld [vmem:[#allocation14 + $0x524] ss:$16 sps:$4 sm:$0xff]  }
 0x707   :  { %v4180_v15 = vadd.f32 %v4179_v5, %v12695_v38  ;;  %v4373_v23 = vadd.f32 %v4372_v59, %v12697_v37  ;;  %v4181_v58 = vpop.f32.mrb[230].mxu1  ;;  %v4374_v57 = vpop.f32.mrb[38].mxu0 }
 0x708   :  { %v4182_v29 = vadd.f32 %v4181_v58, %v12689_v55  ;;  %v4375_v20 = vadd.f32 %v4374_v57, %v12691_v32  ;;  %v4183_v2 = vpop.f32.mrb[231].mxu1  ;;  %v4376_v63 = vpop.f32.mrb[39].mxu0  ;;  %6782 = vmatpush1.bf16.msra.mxu1 %v11032_v14  ;;  %v4587_v52 = vmax.f32 %v4178_v42, 0.0  ;;  %v4589_v40 = vmax.f32 %v4371_v21, 0.0  ;;  %v11050_v42 = vld [vmem:[#allocation14 + $0x520] ss:$16 sps:$4 sm:$0xff]  }
 0x709   :  { %v4184_v7 = vadd.f32 %v4183_v2, %v12695_v38  ;;  %v4377_v3 = vadd.f32 %v4376_v63, %v12697_v37  ;;  %6783 = vmatprep.subr.bf16.mxu1 %v11043_v50  ;;  %7570 = vmatpush1.bf16.msra.mxu0 %v11074_v49  ;;  %v4588_v59 = vmax.f32 %v4180_v15, 0.0  ;;  %v4590_v58 = vmax.f32 %v4373_v23, 0.0  ;;  %v11061_v23 = vld [vmem:[#allocation14 + $0x544] ss:$16 sps:$4 sm:$0xff]  }
 0x70a   :  { %v4595_v6 = vmax.f32 %v4182_v29, 0.0  ;;  %v4597_v5 = vmax.f32 %v4375_v20, 0.0  ;;  %6647 = vmatmul.mubr.bf16.gmra.mrb[16].mxu1 %v12470_v31  ;;  %7459 = vmatmul.mubr.bf16.gmra.mrb[96].mxu0 %v12550_v47 }
 0x70b   :  { %v4596_v14 = vmax.f32 %v4184_v7, 0.0  ;;  %v4598_v57 = vmax.f32 %v4377_v3, 0.0  ;;  %6656 = vmatprep.mubr.bf16.mxu1 %v12492_v8  ;;  %7468 = vmatprep.mubr.bf16.mxu0 %v12572_v48 }
 0x70c   :  { %v12903_v50 = vpack.c.bf16 %v4595_v6, %v4587_v52  ;;  %v12905_v49 = vpack.c.bf16 %v4597_v5, %v4589_v40  ;;  %6784 = vmatpush1.bf16.msra.mxu1 %v11041_v26  ;;  %7732 = vmatprep.subr.bf16.mxu0 %v11106_v0 }
 0x70d   :  { %v12907_v21 = vpack.c.bf16 %v4596_v14, %v4588_v59  ;;  %v12909_v31 = vpack.c.bf16 %v4598_v57, %v4590_v58  ;;  %v4187_v29 = vpop.f32.mrb[232].mxu1  ;;  %v4380_v15 = vpop.f32.mrb[40].mxu0  ;;  %6785 = vmatprep.subr.bf16.mxu1 %v11052_v51  ;;  %v11059_v51 = vld [vmem:[#allocation14 + $0x540] ss:$16 sps:$4 sm:$0xff]   ;;  %v11070_v14 = vld [vmem:[#allocation14 + $0x564] ss:$16 sps:$4 sm:$0xff]  }
 0x70e   :  { %13639 = vst [vmem:[#allocation60_spill] sm:$0xff] %v12905_v49  ;;  %v4188_v20 = vadd.f32 %v4187_v29, %v12689_v55  ;;  %v4381_v8 = vadd.f32 %v4380_v15, %v12691_v32  ;;  %v4189_v2 = vpop.f32.mrb[233].mxu1  ;;  %v4382_v63 = vpop.f32.mrb[41].mxu0 }
 0x70f   :  { %v4190_v7 = vadd.f32 %v4189_v2, %v12695_v38  ;;  %v4383_v26 = vadd.f32 %v4382_v63, %v12697_v37  ;;  %v4191_v3 = vpop.f32.mrb[234].mxu1  ;;  %v4384_v0 = vpop.f32.mrb[42].mxu0 }
 0x710   :  { %v4192_v52 = vadd.f32 %v4191_v3, %v12689_v55  ;;  %v4385_v40 = vadd.f32 %v4384_v0, %v12691_v32  ;;  %v4193_v6 = vpop.f32.mrb[235].mxu1  ;;  %v4386_v5 = vpop.f32.mrb[43].mxu0  ;;  %6786 = vmatpush1.bf16.msra.mxu1 %v11050_v42  ;;  %v4603_v57 = vmax.f32 %v4188_v20, 0.0  ;;  %v4605_v29 = vmax.f32 %v4381_v8, 0.0  ;;  %v11068_v20 = vld [vmem:[#allocation14 + $0x560] ss:$16 sps:$4 sm:$0xff]  }
 0x711   :  { %v4194_v59 = vadd.f32 %v4193_v6, %v12695_v38  ;;  %v4387_v58 = vadd.f32 %v4386_v5, %v12697_v37  ;;  %6787 = vmatprep.subr.bf16.mxu1 %v11061_v23  ;;  %v4604_v63 = vmax.f32 %v4190_v7, 0.0  ;;  %v4606_v3 = vmax.f32 %v4383_v26, 0.0  ;;  %v11079_v7 = vld [vmem:[#allocation14 + $0x584] ss:$16 sps:$4 sm:$0xff]  }
 0x712   :  { %v4611_v15 = vmax.f32 %v4192_v52, 0.0  ;;  %v4613_v2 = vmax.f32 %v4385_v40, 0.0  ;;  %6657 = vmatmul.mubr.bf16.gmra.mrb[20].mxu1 %v12489_v22  ;;  %7469 = vmatmul.mubr.bf16.gmra.mrb[100].mxu0 %v12570_v56 }
 0x713   :  { %v4612_v0 = vmax.f32 %v4194_v59, 0.0  ;;  %v4614_v49 = vmax.f32 %v4387_v58, 0.0  ;;  %6666 = vmatprep.mubr.bf16.mxu1 %v12512_v43  ;;  %7478 = vmatprep.mubr.bf16.mxu0 %v12592_v39 }
 0x714   :  { %v12923_v42 = vpack.c.bf16 %v4611_v15, %v4603_v57  ;;  %v12925_v23 = vpack.c.bf16 %v4613_v2, %v4605_v29  ;;  %6788 = vmatpush1.bf16.msra.mxu1 %v11059_v51 }
 0x715   :  { %v12927_v8 = vpack.c.bf16 %v4612_v0, %v4604_v63  ;;  %v12929_v52 = vpack.c.bf16 %v4614_v49, %v4606_v3  ;;  %v4197_v22 = vpop.f32.mrb[236].mxu1  ;;  %v4390_v40 = vpop.f32.mrb[44].mxu0  ;;  %6789 = vmatprep.subr.bf16.mxu1 %v11070_v14  ;;  %v11077_v14 = vld [vmem:[#allocation14 + $0x580] ss:$16 sps:$4 sm:$0xff]   ;;  %v11082_v0 = vld [vmem:[#allocation14 + $0x5a4] ss:$16 sps:$4 sm:$0xff]  }
 0x716   :  { %13640 = vst [vmem:[#allocation61_spill] sm:$0xff] %v12925_v23  ;;  %v4198_v26 = vadd.f32 %v4197_v22, %v12689_v55  ;;  %v4391_v43 = vadd.f32 %v4390_v40, %v12691_v32  ;;  %v4199_v6 = vpop.f32.mrb[237].mxu1  ;;  %v4392_v5 = vpop.f32.mrb[45].mxu0 }
 0x717   :  { %13641 = vst [vmem:[#allocation62_spill] sm:$0xff] %v12929_v52  ;;  %v4200_v59 = vadd.f32 %v4199_v6, %v12695_v38  ;;  %v4393_v58 = vadd.f32 %v4392_v5, %v12697_v37  ;;  %v4201_v51 = vpop.f32.mrb[238].mxu1  ;;  %v4394_v57 = vpop.f32.mrb[46].mxu0 }
 0x718   :  { %v4202_v29 = vadd.f32 %v4201_v51, %v12689_v55  ;;  %v4395_v49 = vadd.f32 %v4394_v57, %v12691_v32  ;;  %v4203_v15 = vpop.f32.mrb[239].mxu1  ;;  %v4396_v2 = vpop.f32.mrb[47].mxu0  ;;  %6790 = vmatpush1.bf16.msra.mxu1 %v11068_v20  ;;  %v4619_v22 = vmax.f32 %v4198_v26, 0.0  ;;  %v4621_v40 = vmax.f32 %v4391_v43, 0.0  ;;  %v11080_v26 = vld [vmem:[#allocation14 + $0x5a0] ss:$16 sps:$4 sm:$0xff]  }
 0x719   :  { %v4204_v63 = vadd.f32 %v4203_v15, %v12695_v38  ;;  %v4397_v3 = vadd.f32 %v4396_v2, %v12697_v37  ;;  %6791 = vmatprep.subr.bf16.mxu1 %v11079_v7  ;;  %v4620_v51 = vmax.f32 %v4200_v59, 0.0  ;;  %v4622_v57 = vmax.f32 %v4393_v58, 0.0  ;;  %v11085_v59 = vld [vmem:[#allocation14 + $0x5c4] ss:$16 sps:$4 sm:$0xff]  }
 0x71a   :  { %v4627_v6 = vmax.f32 %v4202_v29, 0.0  ;;  %v4629_v5 = vmax.f32 %v4395_v49, 0.0  ;;  %6667 = vmatmul.mubr.bf16.gmra.mrb[24].mxu1 %v12510_v28  ;;  %7479 = vmatmul.mubr.bf16.gmra.mrb[104].mxu0 %v12590_v61 }
 0x71b   :  { %v4628_v23 = vmax.f32 %v4204_v63, 0.0  ;;  %v4630_v52 = vmax.f32 %v4397_v3, 0.0  ;;  %6676 = vmatprep.mubr.bf16.mxu1 %v12532_v46  ;;  %7488 = vmatprep.mubr.bf16.mxu0 %v12612_v33 }
 0x71c   :  { %v12943_v20 = vpack.c.bf16 %v4627_v6, %v4619_v22  ;;  %v12945_v7 = vpack.c.bf16 %v4629_v5, %v4621_v40  ;;  %6792 = vmatpush1.bf16.msra.mxu1 %v11077_v14 }
 0x71d   :  { %v12947_v43 = vpack.c.bf16 %v4628_v23, %v4620_v51  ;;  %v12949_v29 = vpack.c.bf16 %v4630_v52, %v4622_v57  ;;  %v4207_v28 = vpop.f32.mrb[240].mxu1  ;;  %v4400_v49 = vpop.f32.mrb[48].mxu0  ;;  %6793 = vmatprep.subr.bf16.mxu1 %v11082_v0  ;;  %v11083_v0 = vld [vmem:[#allocation14 + $0x5c0] ss:$16 sps:$4 sm:$0xff]   ;;  %v11088_v57 = vld [vmem:[#allocation14 + $0x5e4] ss:$16 sps:$4 sm:$0xff]  }
 0x71e   :  { %13642 = vst [vmem:[#allocation63_spill] sm:$0xff] %v12945_v7  ;;  %v4208_v58 = vadd.f32 %v4207_v28, %v12689_v55  ;;  %v4401_v46 = vadd.f32 %v4400_v49, %v12691_v32  ;;  %v4209_v15 = vpop.f32.mrb[241].mxu1  ;;  %v4402_v2 = vpop.f32.mrb[49].mxu0 }
 0x71f   :  { %13643 = vst [vmem:[#allocation64_spill] sm:$0xff] %v12949_v29  ;;  %v4210_v63 = vadd.f32 %v4209_v15, %v12695_v38  ;;  %v4403_v3 = vadd.f32 %v4402_v2, %v12697_v37  ;;  %v4211_v14 = vpop.f32.mrb[242].mxu1  ;;  %v4404_v22 = vpop.f32.mrb[50].mxu0 }
 0x720   :  { %v4212_v23 = vadd.f32 %v4211_v14, %v12689_v55  ;;  %v4405_v52 = vadd.f32 %v4404_v22, %v12691_v32  ;;  %v4213_v40 = vpop.f32.mrb[243].mxu1  ;;  %v4406_v6 = vpop.f32.mrb[51].mxu0  ;;  %6794 = vmatpush1.bf16.msra.mxu1 %v11080_v26  ;;  %v4635_v28 = vmax.f32 %v4208_v58, 0.0  ;;  %v4637_v49 = vmax.f32 %v4401_v46, 0.0  ;;  %v11086_v58 = vld [vmem:[#allocation14 + $0x5e0] ss:$16 sps:$4 sm:$0xff]  }
 0x721   :  { %v4214_v5 = vadd.f32 %v4213_v40, %v12695_v38  ;;  %v4407_v51 = vadd.f32 %v4406_v6, %v12697_v37  ;;  %6795 = vmatprep.subr.bf16.mxu1 %v11085_v59  ;;  %v4636_v14 = vmax.f32 %v4210_v63, 0.0  ;;  %v4638_v22 = vmax.f32 %v4403_v3, 0.0  ;;  %v11091_v63 = vld [vmem:[#allocation14 + $0x604] ss:$16 sps:$4 sm:$0xff]  }
 0x722   :  { %v4643_v15 = vmax.f32 %v4212_v23, 0.0  ;;  %v4645_v2 = vmax.f32 %v4405_v52, 0.0  ;;  %6677 = vmatmul.mubr.bf16.gmra.mrb[28].mxu1 %v12530_v24  ;;  %7489 = vmatmul.mubr.bf16.gmra.mrb[108].mxu0 %v12610_v16 }
 0x723   :  { %v4644_v7 = vmax.f32 %v4214_v5, 0.0  ;;  %v4646_v29 = vmax.f32 %v4407_v51, 0.0  ;;  %6686 = vmatprep.mubr.bf16.mxu1 %v12552_v36  ;;  %7498 = vmatprep.mubr.bf16.mxu0 %v12634_v17 }
 0x724   :  { %v12963_v26 = vpack.c.bf16 %v4643_v15, %v4635_v28  ;;  %v12965_v59 = vpack.c.bf16 %v4645_v2, %v4637_v49  ;;  %6796 = vmatpush1.bf16.msra.mxu1 %v11083_v0 }
 0x725   :  { %v12967_v46 = vpack.c.bf16 %v4644_v7, %v4636_v14  ;;  %v12969_v23 = vpack.c.bf16 %v4646_v29, %v4638_v22  ;;  %v4217_v24 = vpop.f32.mrb[244].mxu1  ;;  %v4410_v52 = vpop.f32.mrb[52].mxu0  ;;  %6797 = vmatprep.subr.bf16.mxu1 %v11088_v57 }
 0x726   :  { %13644 = vst [vmem:[#allocation65_spill] sm:$0xff] %v12965_v59  ;;  %v4218_v3 = vadd.f32 %v4217_v24, %v12689_v55  ;;  %v4411_v36 = vadd.f32 %v4410_v52, %v12691_v32  ;;  %v4219_v40 = vpop.f32.mrb[245].mxu1  ;;  %v4412_v6 = vpop.f32.mrb[53].mxu0 }
 0x727   :  { %v4220_v5 = vadd.f32 %v4219_v40, %v12695_v38  ;;  %v4413_v51 = vadd.f32 %v4412_v6, %v12697_v37  ;;  %v4221_v0 = vpop.f32.mrb[246].mxu1  ;;  %v4414_v28 = vpop.f32.mrb[54].mxu0 }
 0x728   :  { %v4222_v7 = vadd.f32 %v4221_v0, %v12689_v55  ;;  %v4415_v29 = vadd.f32 %v4414_v28, %v12691_v32  ;;  %v4223_v49 = vpop.f32.mrb[247].mxu1  ;;  %v4416_v15 = vpop.f32.mrb[55].mxu0  ;;  %6798 = vmatpush1.bf16.msra.mxu1 %v11086_v58  ;;  %v4651_v14 = vmax.f32 %v4218_v3, 0.0  ;;  %v4653_v22 = vmax.f32 %v4411_v36, 0.0 }
 0x729   :  { %v4224_v57 = vadd.f32 %v4223_v49, %v12695_v38  ;;  %v4417_v2 = vadd.f32 %v4416_v15, %v12697_v37  ;;  %6960 = vmatprep.subr.bf16.mxu1 %v11091_v63  ;;  %v4652_v40 = vmax.f32 %v4220_v5, 0.0  ;;  %v4654_v6 = vmax.f32 %v4413_v51, 0.0 }
 0x72a   :  { %v4659_v24 = vmax.f32 %v4222_v7, 0.0  ;;  %v4661_v52 = vmax.f32 %v4415_v29, 0.0  ;;  %6687 = vmatmul.mubr.bf16.gmra.mrb[32].mxu1 %v12550_v47  ;;  %7499 = vmatmul.mubr.bf16.gmra.mrb[112].mxu0 %v12630_v53 }
 0x72b   :  { %v4660_v0 = vmax.f32 %v4224_v57, 0.0  ;;  %v4662_v28 = vmax.f32 %v4417_v2, 0.0  ;;  %6696 = vmatprep.mubr.bf16.mxu1 %v12572_v48  ;;  %7508 = vmatprep.mubr.bf16.mxu0 %v12654_v13 }
 0x72c   :  { %v12983_v58 = vpack.c.bf16 %v4659_v24, %v4651_v14  ;;  %v12985_v49 = vpack.c.bf16 %v4661_v52, %v4653_v22 }
 0x72d   :  { %v12987_v63 = vpack.c.bf16 %v4660_v0, %v4652_v40  ;;  %v12989_v3 = vpack.c.bf16 %v4662_v28, %v4654_v6  ;;  %v4227_v36 = vpop.f32.mrb[248].mxu1  ;;  %v4420_v47 = vpop.f32.mrb[56].mxu0 }
 0x72e   :  { %13645 = vst [vmem:[#allocation66_spill] sm:$0xff] %v12985_v49  ;;  %v4228_v7 = vadd.f32 %v4227_v36, %v12689_v55  ;;  %v4421_v5 = vadd.f32 %v4420_v47, %v12691_v32  ;;  %v4229_v51 = vpop.f32.mrb[249].mxu1  ;;  %v4422_v29 = vpop.f32.mrb[57].mxu0 }
 0x72f   :  { %13646 = vst [vmem:[#allocation67_spill] sm:$0xff] %v12989_v3  ;;  %v4230_v48 = vadd.f32 %v4229_v51, %v12695_v38  ;;  %v4423_v15 = vadd.f32 %v4422_v29, %v12697_v37  ;;  %v4231_v57 = vpop.f32.mrb[250].mxu1  ;;  %v4424_v2 = vpop.f32.mrb[58].mxu0 }
 0x730   :  { %v4232_v14 = vadd.f32 %v4231_v57, %v12689_v55  ;;  %v4425_v22 = vadd.f32 %v4424_v2, %v12691_v32  ;;  %v4233_v24 = vpop.f32.mrb[251].mxu1  ;;  %v4426_v52 = vpop.f32.mrb[59].mxu0  ;;  %v4667_v0 = vmax.f32 %v4228_v7, 0.0  ;;  %v4669_v28 = vmax.f32 %v4421_v5, 0.0  ;;  %v13647_v2 = vld [vmem:[#allocation37_spill] sm:$0xff] }
 0x731   :  { %v4234_v40 = vadd.f32 %v4233_v24, %v12695_v38  ;;  %v4427_v6 = vadd.f32 %v4426_v52, %v12697_v37  ;;  %v4668_v51 = vmax.f32 %v4230_v48, 0.0  ;;  %v4670_v29 = vmax.f32 %v4423_v15, 0.0 }
 0x732   :  { %v4675_v36 = vmax.f32 %v4232_v14, 0.0  ;;  %v4677_v47 = vmax.f32 %v4425_v22, 0.0  ;;  %6697 = vmatmul.mubr.bf16.gmra.mrb[36].mxu1 %v12570_v56  ;;  %7509 = vmatmul.mubr.bf16.gmra.mrb[116].mxu0 %v12650_v30 }
 0x733   :  { %v4676_v49 = vmax.f32 %v4234_v40, 0.0  ;;  %v4678_v57 = vmax.f32 %v4427_v6, 0.0  ;;  %6706 = vmatprep.mubr.bf16.mxu1 %v12592_v39  ;;  %7518 = vmatprep.mubr.bf16.mxu0 %v13647_v2 }
 0x734   :  { %v13003_v3 = vpack.c.bf16 %v4675_v36, %v4667_v0  ;;  %v13005_v24 = vpack.c.bf16 %v4677_v47, %v4669_v28 }
 0x735   :  { %v13007_v7 = vpack.c.bf16 %v4676_v49, %v4668_v51  ;;  %v13009_v5 = vpack.c.bf16 %v4678_v57, %v4670_v29  ;;  %v4237_v14 = vpop.f32.mrb[252].mxu1  ;;  %v4430_v56 = vpop.f32.mrb[60].mxu0 }
 0x736   :  { %13648 = vst [vmem:[#allocation37_spill] sm:$0xff] %v13005_v24  ;;  %v4238_v22 = vadd.f32 %v4237_v14, %v12689_v55  ;;  %v4431_v48 = vadd.f32 %v4430_v56, %v12691_v32  ;;  %v4239_v15 = vpop.f32.mrb[253].mxu1  ;;  %v4432_v52 = vpop.f32.mrb[61].mxu0 }
 0x737   :  { %13649 = vst [vmem:[#allocation68_spill] sm:$0xff] %v13009_v5  ;;  %v4240_v39 = vadd.f32 %v4239_v15, %v12695_v38  ;;  %v4433_v40 = vadd.f32 %v4432_v52, %v12697_v37  ;;  %v4241_v6 = vpop.f32.mrb[254].mxu1  ;;  %v4434_v0 = vpop.f32.mrb[62].mxu0  ;;  %v13650_v15 = vld [vmem:[#allocation35_spill] sm:$0xff] }
 0x738   :  { %v4242_v28 = vadd.f32 %v4241_v6, %v12689_v55  ;;  %v4435_v49 = vadd.f32 %v4434_v0, %v12691_v32  ;;  %v4243_v36 = vpop.f32.mrb[255].mxu1  ;;  %v4436_v47 = vpop.f32.mrb[63].mxu0  ;;  %v4683_v57 = vmax.f32 %v4238_v22, 0.0  ;;  %v4685_v14 = vmax.f32 %v4431_v48, 0.0  ;;  %v11122_v48 = vld [vmem:[#allocation14 + $0x688] ss:$16 sps:$4 sm:$0xff]  }
 0x739   :  { %v4244_v51 = vadd.f32 %v4243_v36, %v12695_v38  ;;  %v4437_v29 = vadd.f32 %v4436_v47, %v12697_v37  ;;  %v4684_v52 = vmax.f32 %v4240_v39, 0.0  ;;  %v4686_v5 = vmax.f32 %v4433_v40, 0.0  ;;  %v11127_v39 = vld [vmem:[#allocation14 + $0x6ac] ss:$16 sps:$4 sm:$0xff]   ;;  %v11131_v40 = vld [vmem:[#allocation14 + $0x6c8] ss:$16 sps:$4 sm:$0xff]  }
 0x73a   :  { %v4691_v56 = vmax.f32 %v4242_v28, 0.0  ;;  %v4693_v24 = vmax.f32 %v4435_v49, 0.0  ;;  %6707 = vmatmul.mubr.bf16.gmra.mrb[40].mxu1 %v12590_v61  ;;  %7519 = vmatmul.mubr.bf16.gmra.mrb[120].mxu0 %v13650_v15  ;;  %v11104_v61 = vld [vmem:[#allocation14 + $0x608] ss:$16 sps:$4 sm:$0xff]   ;;  %v11136_v6 = vld [vmem:[#allocation14 + $0x6ec] ss:$16 sps:$4 sm:$0xff]  }
 0x73b   :  { %v4692_v59 = vmax.f32 %v4244_v51, 0.0  ;;  %v4694_v55 = vmax.f32 %v4437_v29, 0.0  ;;  %6716 = vmatprep.mubr.bf16.mxu1 %v12612_v33  ;;  %7528 = vmatprep.mubr.bf16.mxu0 %v12709_v10  ;;  %v11109_v33 = vld [vmem:[#allocation14 + $0x62c] ss:$16 sps:$4 sm:$0xff]   ;;  %v13652_v0 = vld [vmem:[#allocation51_spill] sm:$0xff]  ;;  %v13653_v51 = vld [vmem:[#allocation49_spill] sm:$0xff] }
 0x73c   :  { %v13023_v32 = vpack.c.bf16 %v4691_v56, %v4683_v57  ;;  %v13025_v38 = vpack.c.bf16 %v4693_v24, %v4685_v14  ;;  %v11113_v24 = vld [vmem:[#allocation14 + $0x648] ss:$16 sps:$4 sm:$0xff]   ;;  %v11142_v28 = vld [vmem:[#allocation14 + $0x70c] ss:$16 sps:$4 sm:$0xff]   ;;  %v11089_v49 = vld [vmem:[#allocation14 + $0x600] ss:$16 sps:$4 sm:$0xff]  }
 0x73d   :  { %v13027_v37 = vpack.c.bf16 %v4692_v59, %v4684_v52  ;;  %v13029_v22 = vpack.c.bf16 %v4694_v55, %v4686_v5  ;;  %v11107_v59 = vld [vmem:[#allocation14 + $0x628] ss:$16 sps:$4 sm:$0xff]   ;;  %v11094_v36 = vld [vmem:[#allocation14 + $0x624] ss:$16 sps:$4 sm:$0xff]   ;;  %v11095_v14 = vld [vmem:[#allocation14 + $0x640] ss:$16 sps:$4 sm:$0xff]  }
 0x73e   :  { %v13651_v5 = vld [vmem:[#allocation42_spill] sm:$0xff]  ;;  %v11097_v29 = vld [vmem:[#allocation14 + $0x644] ss:$16 sps:$4 sm:$0xff]   ;;  %v11098_v52 = vld [vmem:[#allocation14 + $0x660] ss:$16 sps:$4 sm:$0xff]  }
 0x73f   :  { %v11140_v47 = vld [vmem:[#allocation14 + $0x708] ss:$16 sps:$4 sm:$0xff]   ;;  %v11151_v56 = vld [vmem:[#allocation14 + $0x74c] ss:$16 sps:$4 sm:$0xff]   ;;  %v11103_v55 = vld [vmem:[#allocation14 + $0x684] ss:$16 sps:$4 sm:$0xff]  }
 0x740   :  { %v11143_v57 = vld [vmem:[#allocation14 + $0x728] ss:$16 sps:$4 sm:$0xff]  }
 0x742   :  { %6717 = vmatmul.mubr.bf16.gmra.mrb[44].mxu1 %v12610_v16  ;;  %7529 = vmatmul.mubr.bf16.gmra.mrb[124].mxu0 %v12705_v41  ;;  %v11115_v16 = vld [vmem:[#allocation14 + $0x64c] ss:$16 sps:$4 sm:$0xff]  }
 0x743   :  { %6726 = vmatprep.mubr.bf16.mxu1 %v12634_v17  ;;  %7571 = vmatprep.mubr.bf16.mxu0 %v12727_v60  ;;  %v11118_v17 = vld [vmem:[#allocation14 + $0x66c] ss:$16 sps:$4 sm:$0xff]  }
 0x74a   :  { %6727 = vmatmul.mubr.bf16.gmra.mrb[48].mxu1 %v12630_v53  ;;  %7572 = vmatmul.mubr.bf16.vlgmr.msra.gmra.mrb[64].mxu0 %v12723_v25  ;;  %v11116_v53 = vld [vmem:[#allocation14 + $0x668] ss:$16 sps:$4 sm:$0xff]  }
 0x74b   :  { %6736 = vmatprep.mubr.bf16.mxu1 %v12654_v13  ;;  %7581 = vmatprep.mubr.bf16.mxu0 %v12747_v1  ;;  %v11124_v13 = vld [vmem:[#allocation14 + $0x68c] ss:$16 sps:$4 sm:$0xff]  }
 0x74c   :  { %7733 = vmatpush1.bf16.msra.mxu0 %v11104_v61  ;;  %v11152_v61 = vld [vmem:[#allocation14 + $0x768] ss:$16 sps:$4 sm:$0xff]  }
 0x74d   :  { %7734 = vmatprep.subr.bf16.mxu0 %v11109_v33  ;;  %v11101_v33 = vld [vmem:[#allocation14 + $0x680] ss:$16 sps:$4 sm:$0xff]  }
 0x750   :  { %7735 = vmatpush1.bf16.msra.mxu0 %v11107_v59  ;;  %v11160_v59 = vld [vmem:[#allocation14 + $0x78c] ss:$16 sps:$4 sm:$0xff]  }
 0x751   :  { %7736 = vmatprep.subr.bf16.mxu0 %v11115_v16  ;;  %v11112_v16 = vld [vmem:[#allocation14 + $0x6a4] ss:$16 sps:$4 sm:$0xff]  }
 0x752   :  { %6737 = vmatmul.mubr.bf16.gmra.mrb[52].mxu1 %v12650_v30  ;;  %7582 = vmatmul.mubr.bf16.gmra.mrb[68].mxu0 %v13651_v5  ;;  %v11125_v30 = vld [vmem:[#allocation14 + $0x6a8] ss:$16 sps:$4 sm:$0xff]  }
 0x753   :  { %6746 = vmatprep.mubr.bf16.mxu1 %v13647_v2  ;;  %7591 = vmatprep.mubr.bf16.mxu0 %v12767_v11  ;;  %v11133_v2 = vld [vmem:[#allocation14 + $0x6cc] ss:$16 sps:$4 sm:$0xff]  }
 0x754   :  { %7737 = vmatpush1.bf16.msra.mxu0 %v11113_v24  ;;  %v11158_v24 = vld [vmem:[#allocation14 + $0x788] ss:$16 sps:$4 sm:$0xff]  }
 0x755   :  { %7738 = vmatprep.subr.bf16.mxu0 %v11118_v17  ;;  %v11163_v17 = vld [vmem:[#allocation14 + $0x7ac] ss:$16 sps:$4 sm:$0xff]  }
 0x758   :  { %7739 = vmatpush1.bf16.msra.mxu0 %v11116_v53  ;;  %v11121_v53 = vld [vmem:[#allocation14 + $0x6c4] ss:$16 sps:$4 sm:$0xff]  }
 0x759   :  { %7740 = vmatprep.subr.bf16.mxu0 %v11124_v13  ;;  %v11161_v13 = vld [vmem:[#allocation14 + $0x7a8] ss:$16 sps:$4 sm:$0xff]  }
 0x75a   :  { %6747 = vmatmul.mubr.bf16.gmra.mrb[56].mxu1 %v13650_v15  ;;  %7592 = vmatmul.mubr.bf16.gmra.mrb[72].mxu0 %v12763_v54  ;;  %v11100_v15 = vld [vmem:[#allocation14 + $0x664] ss:$16 sps:$4 sm:$0xff]  }
 0x75b   :  { %6756 = vmatprep.mubr.bf16.mxu1 %v12709_v10  ;;  %7601 = vmatprep.mubr.bf16.mxu0 %v12787_v9  ;;  %v11134_v10 = vld [vmem:[#allocation14 + $0x6e8] ss:$16 sps:$4 sm:$0xff]  }
 0x75c   :  { %7741 = vmatpush1.bf16.msra.mxu0 %v11122_v48  ;;  %v11119_v48 = vld [vmem:[#allocation14 + $0x6c0] ss:$16 sps:$4 sm:$0xff]  }
 0x75d   :  { %7742 = vmatprep.subr.bf16.mxu0 %v11127_v39  ;;  %v11169_v39 = vld [vmem:[#allocation14 + $0x7cc] ss:$16 sps:$4 sm:$0xff]  }
 0x760   :  { %7743 = vmatpush1.bf16.msra.mxu0 %v11125_v30  ;;  %v11167_v30 = vld [vmem:[#allocation14 + $0x7c8] ss:$16 sps:$4 sm:$0xff]  }
 0x761   :  { %7744 = vmatprep.subr.bf16.mxu0 %v11133_v2  ;;  %v11128_v2 = vld [vmem:[#allocation14 + $0x6e0] ss:$16 sps:$4 sm:$0xff]  }
 0x762   :  { %6757 = vmatmul.mubr.bf16.gmra.mrb[60].mxu1 %v12705_v41  ;;  %7602 = vmatmul.mubr.bf16.gmra.mrb[76].mxu0 %v12783_v34  ;;  %v11145_v41 = vld [vmem:[#allocation14 + $0x72c] ss:$16 sps:$4 sm:$0xff]  }
 0x763   :  { %6799 = vmatprep.mubr.bf16.mxu1 %v12727_v60  ;;  %7611 = vmatprep.mubr.bf16.mxu0 %v13652_v0  ;;  %v11092_v60 = vld [vmem:[#allocation14 + $0x620] ss:$16 sps:$4 sm:$0xff]  }
 0x764   :  { %7745 = vmatpush1.bf16.msra.mxu0 %v11131_v40  ;;  %v11139_v40 = vld [vmem:[#allocation14 + $0x704] ss:$16 sps:$4 sm:$0xff]  }
 0x765   :  { %7746 = vmatprep.subr.bf16.mxu0 %v11136_v6  ;;  %v11170_v6 = vld [vmem:[#allocation14 + $0x7e8] ss:$16 sps:$4 sm:$0xff]  }
 0x768   :  { %7747 = vmatpush1.bf16.msra.mxu0 %v11134_v10  ;;  %v11137_v10 = vld [vmem:[#allocation14 + $0x700] ss:$16 sps:$4 sm:$0xff]  }
 0x769   :  { %7748 = vmatprep.subr.bf16.mxu0 %v11142_v28  ;;  %v11148_v28 = vld [vmem:[#allocation14 + $0x724] ss:$16 sps:$4 sm:$0xff]  }
 0x76a   :  { %6800 = vmatmul.mubr.bf16.vlgmr.msra.gmra.mrb[0].mxu1 %v12723_v25  ;;  %7612 = vmatmul.mubr.bf16.gmra.mrb[80].mxu0 %v13653_v51  ;;  %v11149_v25 = vld [vmem:[#allocation14 + $0x748] ss:$16 sps:$4 sm:$0xff]  }
 0x76b   :  { %6961 = vmatpush1.bf16.msra.mxu1 %v11089_v49  ;;  %6809 = vmatprep.mubr.bf16.mxu1 %v12747_v1  ;;  %v11154_v1 = vld [vmem:[#allocation14 + $0x76c] ss:$16 sps:$4 sm:$0xff]   ;;  %v11155_v49 = vld [vmem:[#allocation14 + $0x740] ss:$16 sps:$4 sm:$0xff]  }
 0x76c   :  { %7621 = vmatprep.mubr.bf16.mxu0 %v12827_v18  ;;  %6962 = vmatprep.subr.bf16.mxu1 %v11094_v36  ;;  %v11166_v36 = vld [vmem:[#allocation14 + $0x764] ss:$16 sps:$4 sm:$0xff]  }
 0x76d   :  { %7749 = vmatpush1.bf16.msra.mxu0 %v11140_v47  ;;  %v11175_v47 = vld [vmem:[#allocation14 + $0x784] ss:$16 sps:$4 sm:$0xff]  }
 0x76e   :  { %7750 = vmatprep.subr.bf16.mxu0 %v11145_v41  ;;  %v11178_v41 = vld [vmem:[#allocation14 + $0x7a4] ss:$16 sps:$4 sm:$0xff]  }
 0x76f   :  { %6963 = vmatpush1.bf16.msra.mxu1 %v11092_v60  ;;  %v11179_v60 = vld [vmem:[#allocation14 + $0x7c0] ss:$16 sps:$4 sm:$0xff]  }
 0x770   :  { %6964 = vmatprep.subr.bf16.mxu1 %v11097_v29  ;;  %v11184_v29 = vld [vmem:[#allocation14 + $0x7e4] ss:$16 sps:$4 sm:$0xff]  }
 0x771   :  { %7751 = vmatpush1.bf16.msra.mxu0 %v11143_v57  ;;  %v11226_v57 = vld [vmem:[#allocation14 + $0xc] ss:$16 sps:$4 sm:$0xff]  }
 0x772   :  { %6810 = vmatmul.mubr.bf16.gmra.mrb[4].mxu1 %v13651_v5  ;;  %7622 = vmatmul.mubr.bf16.gmra.mrb[84].mxu0 %v12822_v12  ;;  %v11110_v5 = vld [vmem:[#allocation14 + $0x6a0] ss:$16 sps:$4 sm:$0xff]  }
 0x773   :  { %6819 = vmatprep.mubr.bf16.mxu1 %v12767_v11  ;;  %7631 = vmatprep.mubr.bf16.mxu0 %v12847_v44  ;;  %v13654_v11 = vld [vmem:[#allocation55_spill] sm:$0xff] }
 0x774   :  { %6965 = vmatpush1.bf16.msra.mxu1 %v11095_v14  ;;  %7752 = vmatprep.subr.bf16.mxu0 %v11151_v56  ;;  %v13666_v14 = vld [vmem:[#allocation53_spill] sm:$0xff] }
 0x775   :  { %6966 = vmatprep.subr.bf16.mxu1 %v11100_v15  ;;  %7753 = vmatpush1.bf16.msra.mxu0 %v11149_v25  ;;  %v13667_v56 = vld [vmem:[#allocation57_spill] sm:$0xff]  ;;  %v11187_v15 = vld [vmem:[#allocation16 + $0xc8] sm:$0xff]  }
 0x776   :  { %7754 = vmatprep.subr.bf16.mxu0 %v11154_v1  ;;  %v11231_v25 = vld [vmem:[#allocation14 + $0x48] ss:$16 sps:$4 sm:$0xff]   ;;  %v11232_v1 = vld [vmem:[#allocation14 + $0x6c] ss:$16 sps:$4 sm:$0xff]  }
 0x778   :  { %6967 = vmatpush1.bf16.msra.mxu1 %v11098_v52  ;;  %v11233_v52 = vld [vmem:[#allocation14 + $0x68] ss:$16 sps:$4 sm:$0xff]  }
 0x779   :  { %6968 = vmatprep.subr.bf16.mxu1 %v11103_v55  ;;  %7755 = vmatpush1.bf16.msra.mxu0 %v11152_v61  ;;  %v11234_v55 = vld [vmem:[#allocation14 + $0x8c] ss:$16 sps:$4 sm:$0xff]  }
 0x77a   :  { %6820 = vmatmul.mubr.bf16.gmra.mrb[8].mxu1 %v12763_v54  ;;  %7632 = vmatmul.mubr.bf16.gmra.mrb[88].mxu0 %v13654_v11  ;;  %v11130_v54 = vld [vmem:[#allocation14 + $0x6e4] ss:$16 sps:$4 sm:$0xff]   ;;  %v13668_v61 = vld [vmem:[#allocation56_spill] sm:$0xff] }
 0x77b   :  { %6829 = vmatprep.mubr.bf16.mxu1 %v12787_v9  ;;  %7641 = vmatprep.mubr.bf16.mxu0 %v12867_v4  ;;  %v11172_v9 = vld [vmem:[#allocation14 + $0x7ec] ss:$16 sps:$4 sm:$0xff]  }
 0x77c   :  { %6969 = vmatpush1.bf16.msra.mxu1 %v11101_v33  ;;  %7756 = vmatprep.subr.bf16.mxu0 %v11160_v59  ;;  %v11188_v33 = vld [vmem:[#allocation16 + $0x88] sm:$0xff]   ;;  %v13669_v59 = vld [vmem:[#allocation59_spill] sm:$0xff] }
 0x77d   :  { %6970 = vmatprep.subr.bf16.mxu1 %v11112_v16  ;;  %7757 = vmatpush1.bf16.msra.mxu0 %v11158_v24  ;;  %v11235_v16 = vld [vmem:[#allocation14 + $0x88] ss:$16 sps:$4 sm:$0xff]   ;;  %v11236_v24 = vld [vmem:[#allocation14 + $0xac] ss:$16 sps:$4 sm:$0xff]  }
 0x77e   :  { %7758 = vmatprep.subr.bf16.mxu0 %v11163_v17  ;;  %v11238_v17 = vld [vmem:[#allocation14 + $0xcc] ss:$16 sps:$4 sm:$0xff]  }
 0x780   :  { %6971 = vmatpush1.bf16.msra.mxu1 %v11110_v5  ;;  %v13670_v5 = vld [vmem:[#allocation58_spill] sm:$0xff] }
 0x781   :  { %6972 = vmatprep.subr.bf16.mxu1 %v11121_v53  ;;  %7759 = vmatpush1.bf16.msra.mxu0 %v11161_v13  ;;  %v11189_v53 = vld [vmem:[#allocation16 + $0xd0] sm:$0xff]  }
 0x782   :  { %6830 = vmatmul.mubr.bf16.gmra.mrb[12].mxu1 %v12783_v34  ;;  %7642 = vmatmul.mubr.bf16.gmra.mrb[92].mxu0 %v12863_v27  ;;  %v11146_v34 = vld [vmem:[#allocation14 + $0x720] ss:$16 sps:$4 sm:$0xff]  }
 0x783   :  { %6839 = vmatprep.mubr.bf16.mxu1 %v13652_v0  ;;  %7651 = vmatprep.mubr.bf16.mxu0 %v12887_v62  ;;  %v11157_v0 = vld [vmem:[#allocation14 + $0x744] ss:$16 sps:$4 sm:$0xff]  }
 0x784   :  { %6973 = vmatpush1.bf16.msra.mxu1 %v11119_v48  ;;  %7760 = vmatprep.subr.bf16.mxu0 %v11169_v39  ;;  %v11190_v13 = vld [vmem:[#allocation16 + $0x90] sm:$0xff]   ;;  %v11191_v48 = vld [vmem:[#allocation16 + $0xd8] sm:$0xff]  }
 0x785   :  { %6974 = vmatprep.subr.bf16.mxu1 %v11130_v54  ;;  %7761 = vmatpush1.bf16.msra.mxu0 %v11167_v30  ;;  %v11239_v39 = vld [vmem:[#allocation14 + $0xc8] ss:$16 sps:$4 sm:$0xff]   ;;  %v11240_v54 = vld [vmem:[#allocation14 + $0xec] ss:$16 sps:$4 sm:$0xff]  }
 0x786   :  { %7762 = vmatprep.subr.bf16.mxu0 %v11172_v9  ;;  %v11192_v30 = vld [vmem:[#allocation16 + $0x98] sm:$0xff]  }
 0x787   :  { %v11241_v9 = vld [vmem:[#allocation14 + $0xe8] ss:$16 sps:$4 sm:$0xff]  }
 0x788   :  { %6975 = vmatpush1.bf16.msra.mxu1 %v11128_v2  ;;  %v11193_v2 = vld [vmem:[#allocation16 + $0xe0] sm:$0xff]  }
 0x789   :  { %6976 = vmatprep.subr.bf16.mxu1 %v11139_v40  ;;  %7763 = vmatpush1.bf16.msra.mxu0 %v11170_v6  ;;  %v11242_v40 = vld [vmem:[#allocation14 + $0x10c] ss:$16 sps:$4 sm:$0xff]   ;;  %v11194_v6 = vld [vmem:[#allocation16 + $0xa0] sm:$0xff]  }
 0x78a   :  { %6840 = vmatmul.mubr.bf16.gmra.mrb[16].mxu1 %v13653_v51  ;;  %7652 = vmatmul.mubr.bf16.gmra.mrb[96].mxu0 %v12883_v19  ;;  %v11173_v51 = vld [vmem:[#allocation14 + $0x780] ss:$16 sps:$4 sm:$0xff]  }
 0x78b   :  { %6849 = vmatprep.mubr.bf16.mxu1 %v12827_v18  ;;  %7661 = vmatprep.mubr.bf16.mxu0 %v12907_v21  ;;  %v11164_v18 = vld [vmem:[#allocation14 + $0x760] ss:$16 sps:$4 sm:$0xff]  }
 0x78c   :  { %6977 = vmatpush1.bf16.msra.mxu1 %v11137_v10  ;;  %v11195_v10 = vld [vmem:[#allocation16 + $0xe8] sm:$0xff]  }
 0x78d   :  { %6978 = vmatprep.subr.bf16.mxu1 %v11148_v28  ;;  %v11243_v28 = vld [vmem:[#allocation14 + $0x108] ss:$16 sps:$4 sm:$0xff]  }
 0x790   :  { %6979 = vmatpush1.bf16.msra.mxu1 %v11146_v34  ;;  %v11244_v34 = vld [vmem:[#allocation14 + $0x12c] ss:$16 sps:$4 sm:$0xff]  }
 0x791   :  { %6980 = vmatprep.subr.bf16.mxu1 %v11157_v0  ;;  %v11245_v0 = vld [vmem:[#allocation14 + $0x128] ss:$16 sps:$4 sm:$0xff]  }
 0x792   :  { %6850 = vmatmul.mubr.bf16.gmra.mrb[20].mxu1 %v12822_v12  ;;  %7662 = vmatmul.mubr.bf16.gmra.mrb[100].mxu0 %v12903_v50  ;;  %v11176_v12 = vld [vmem:[#allocation14 + $0x7a0] ss:$16 sps:$4 sm:$0xff]  }
 0x793   :  { %6859 = vmatprep.mubr.bf16.mxu1 %v12847_v44  ;;  %7671 = vmatprep.mubr.bf16.mxu0 %v12927_v8  ;;  %v11181_v44 = vld [vmem:[#allocation14 + $0x7c4] ss:$16 sps:$4 sm:$0xff]  }
 0x794   :  { %6981 = vmatpush1.bf16.msra.mxu1 %v11155_v49  ;;  %v11246_v49 = vld [vmem:[#allocation14 + $0x14c] ss:$16 sps:$4 sm:$0xff]  }
 0x795   :  { %6982 = vmatprep.subr.bf16.mxu1 %v11166_v36  ;;  %v13671_v36 = vld [vmem:[#allocation60_spill] sm:$0xff] }
 0x798   :  { %6983 = vmatpush1.bf16.msra.mxu1 %v11164_v18  ;;  %v13672_v18 = vld [vmem:[#allocation62_spill] sm:$0xff] }
 0x799   :  { %6984 = vmatprep.subr.bf16.mxu1 %v11175_v47  ;;  %v11247_v47 = vld [vmem:[#allocation14 + $0x148] ss:$16 sps:$4 sm:$0xff]  }
 0x79a   :  { %6860 = vmatmul.mubr.bf16.gmra.mrb[24].mxu1 %v13654_v11  ;;  %7672 = vmatmul.mubr.bf16.gmra.mrb[104].mxu0 %v12923_v42  ;;  %v11237_v11 = vld [vmem:[#allocation14 + $0xa8] ss:$16 sps:$4 sm:$0xff]  }
 0x79b   :  { %6869 = vmatprep.mubr.bf16.mxu1 %v12867_v4  ;;  %7681 = vmatprep.mubr.bf16.mxu0 %v12947_v43  ;;  %v11182_v4 = vld [vmem:[#allocation14 + $0x7e0] ss:$16 sps:$4 sm:$0xff]  }
 0x79c   :  { %6985 = vmatpush1.bf16.msra.mxu1 %v11173_v51  ;;  %v11248_v51 = vld [vmem:[#allocation14 + $0x16c] ss:$16 sps:$4 sm:$0xff]  }
 0x79d   :  { %6986 = vmatprep.subr.bf16.mxu1 %v11178_v41  ;;  %v11249_v41 = vld [vmem:[#allocation14 + $0x168] ss:$16 sps:$4 sm:$0xff]  }
 0x7a0   :  { %6987 = vmatpush1.bf16.msra.mxu1 %v11176_v12  ;;  %v11250_v12 = vld [vmem:[#allocation14 + $0x18c] ss:$16 sps:$4 sm:$0xff]  }
 0x7a1   :  { %6988 = vmatprep.subr.bf16.mxu1 %v11181_v44  ;;  %v13673_v44 = vld [vmem:[#allocation61_spill] sm:$0xff] }
 0x7a2   :  { %6870 = vmatmul.mubr.bf16.gmra.mrb[28].mxu1 %v12863_v27  ;;  %7682 = vmatmul.mubr.bf16.gmra.mrb[108].mxu0 %v12943_v20  ;;  %v13655_v27 = vld [vmem:[#allocation41_spill] sm:$0xff] }
 0x7a3   :  { %6879 = vmatprep.mubr.bf16.mxu1 %v12887_v62  ;;  %7691 = vmatprep.mubr.bf16.mxu0 %v12967_v46  ;;  %v13657_v62 = vld [vmem:[#allocation44_spill] sm:$0xff] }
 0x7a4   :  { %6989 = vmatpush1.bf16.msra.mxu1 %v11179_v60  ;;  %v13674_v60 = vld [vmem:[#allocation64_spill] sm:$0xff] }
 0x7a5   :  { %6990 = vmatprep.subr.bf16.mxu1 %v11184_v29  ;;  %v11251_v29 = vld [vmem:[#allocation14 + $0x188] ss:$16 sps:$4 sm:$0xff]  }
 0x7a8   :  { %6991 = vmatpush1.bf16.msra.mxu1 %v11182_v4  ;;  %v11196_v4 = vld [vmem:[#allocation16 + $0xa8] sm:$0xff]  }
 0x7a9   :  { %9950 = vmatprep.subr.bf16.mxu1 %v11226_v57  ;;  %v11252_v57 = vld [vmem:[#allocation14 + $0x1ac] ss:$16 sps:$4 sm:$0xff]  }
 0x7aa   :  { %6880 = vmatmul.mubr.bf16.gmra.mrb[32].mxu1 %v12883_v19  ;;  %7692 = vmatmul.mubr.bf16.gmra.mrb[112].mxu0 %v12963_v26  ;;  %v13656_v19 = vld [vmem:[#allocation40_spill] sm:$0xff] }
 0x7ab   :  { %6889 = vmatprep.mubr.bf16.mxu1 %v12907_v21  ;;  %7701 = vmatprep.mubr.bf16.mxu0 %v12987_v63  ;;  %v13659_v21 = vld [vmem:[#allocation46_spill] sm:$0xff] }
 0x7b2   :  { %6890 = vmatmul.mubr.bf16.gmra.mrb[36].mxu1 %v12903_v50  ;;  %7702 = vmatmul.mubr.bf16.gmra.mrb[116].mxu0 %v12983_v58  ;;  %v13658_v50 = vld [vmem:[#allocation43_spill] sm:$0xff] }
 0x7b3   :  { %6899 = vmatprep.mubr.bf16.mxu1 %v12927_v8  ;;  %7711 = vmatprep.mubr.bf16.mxu0 %v13007_v7  ;;  %v13661_v8 = vld [vmem:[#allocation48_spill] sm:$0xff] }
 0x7ba   :  { %6900 = vmatmul.mubr.bf16.gmra.mrb[40].mxu1 %v12923_v42  ;;  %7712 = vmatmul.mubr.bf16.gmra.mrb[120].mxu0 %v13003_v3  ;;  %v13660_v42 = vld [vmem:[#allocation45_spill] sm:$0xff] }
 0x7bb   :  { %6909 = vmatprep.mubr.bf16.mxu1 %v12947_v43  ;;  %7721 = vmatprep.mubr.bf16.mxu0 %v13027_v37  ;;  %v13663_v43 = vld [vmem:[#allocation52_spill] sm:$0xff] }
 0x7c2   :  { %6910 = vmatmul.mubr.bf16.gmra.mrb[44].mxu1 %v12943_v20  ;;  %7722 = vmatmul.mubr.bf16.gmra.mrb[124].mxu0 %v13023_v32  ;;  %v13662_v20 = vld [vmem:[#allocation47_spill] sm:$0xff] }
 0x7c3   :  { %6919 = vmatprep.mubr.bf16.mxu1 %v12967_v46  ;;  %7764 = vmatprep.mubr.bf16.mxu0 %v13655_v27  ;;  %v13664_v46 = vld [vmem:[#allocation50_spill] sm:$0xff] }
 0x7ca   :  { %6920 = vmatmul.mubr.bf16.gmra.mrb[48].mxu1 %v12963_v26  ;;  %7765 = vmatmul.mubr.bf16.vlgmr.msra.gmra.mrb[64].mxu0 %v13656_v19  ;;  %v11185_v26 = vld [vmem:[#allocation16 + $0xc0] sm:$0xff]  }
 0x7cb   :  { %6929 = vmatprep.mubr.bf16.mxu1 %v12987_v63  ;;  %7774 = vmatprep.mubr.bf16.mxu0 %v13657_v62  ;;  %v11227_v63 = vld [vmem:[#allocation14 + $0x8] ss:$16 sps:$4 sm:$0xff]  }
 0x7cc   :  { %9766 = vmatprep.subr.bf16.mxu0 %v11185_v26  ;;  %v11201_v26 = vld [vmem:[#allocation16 + $0x40] sm:$0xff]  }
 0x7d2   :  { %6930 = vmatmul.mubr.bf16.gmra.mrb[52].mxu1 %v12983_v58  ;;  %7775 = vmatmul.mubr.bf16.gmra.mrb[68].mxu0 %v13658_v50  ;;  %v11186_v58 = vld [vmem:[#allocation16 + $0x80] sm:$0xff]  }
 0x7d3   :  { %6939 = vmatprep.mubr.bf16.mxu1 %v13007_v7  ;;  %7784 = vmatprep.mubr.bf16.mxu0 %v13659_v21  ;;  %v11228_v7 = vld [vmem:[#allocation14 + $0x2c] ss:$16 sps:$4 sm:$0xff]  }
 0x7d4   :  { %9767 = vmatpush3.bf16.msra.mxu0 %v11186_v58  ;;  %v13676_v58 = vld [vmem:[#allocation65_spill] sm:$0xff] }
 0x7d5   :  { %9768 = vmatprep.subr.bf16.mxu0 %v11187_v15  ;;  %v11206_v15 = vld [vmem:[#allocation16 + $0x10] sm:$0xff]  }
 0x7d8   :  { %9769 = vmatpush3.bf16.msra.mxu0 %v11188_v33  ;;  %v13686_v33 = vld [vmem:[#allocation34_spill] sm:$0xff] }
 0x7d9   :  { %9770 = vmatprep.subr.bf16.mxu0 %v11189_v53  ;;  %v11216_v53 = vld [vmem:[#allocation16 + $0x38] sm:$0xff]  }
 0x7da   :  { %6940 = vmatmul.mubr.bf16.gmra.mrb[56].mxu1 %v13003_v3  ;;  %7785 = vmatmul.mubr.bf16.gmra.mrb[72].mxu0 %v13660_v42  ;;  %v13665_v3 = vld [vmem:[#allocation54_spill] sm:$0xff] }
 0x7db   :  { %6949 = vmatprep.mubr.bf16.mxu1 %v13027_v37  ;;  %7794 = vmatprep.mubr.bf16.mxu0 %v13661_v8  ;;  %v11230_v37 = vld [vmem:[#allocation14 + $0x4c] ss:$16 sps:$4 sm:$0xff]  }
 0x7dc   :  { %9771 = vmatpush3.bf16.msra.mxu0 %v11190_v13  ;;  %v13180_v13 = vld [vmem:[%s13538_s16] sm:$0xf] }
 0x7dd   :  { %9772 = vmatprep.subr.bf16.mxu0 %v11191_v48  ;;  %v13689_v48 = vld [vmem:[#allocation27_spill] sm:$0xff] }
 0x7e0   :  { %9773 = vmatpush3.bf16.msra.mxu0 %v11192_v30  ;;  %v13691_v30 = vsub.s32 3, %v13689_v48 }
 0x7e1   :  { %9774 = vmatprep.subr.bf16.mxu0 %v11193_v2 }
 0x7e2   :  { %6950 = vmatmul.mubr.bf16.gmra.mrb[60].mxu1 %v13023_v32  ;;  %7795 = vmatmul.mubr.bf16.gmra.mrb[76].mxu0 %v13662_v20  ;;  %v11229_v32 = vld [vmem:[#allocation14 + $0x28] ss:$16 sps:$4 sm:$0xff]  }
 0x7e3   :  { %6992 = vmatprep.mubr.bf16.mxu1 %v13655_v27  ;;  %7804 = vmatprep.mubr.bf16.mxu0 %v13663_v43  ;;  %v11197_v27 = vld [vmem:[#allocation16 + $0xf0] sm:$0xff]  }
 0x7e4   :  { %9775 = vmatpush3.bf16.msra.mxu0 %v11194_v6 }
 0x7e5   :  { %9776 = vmatprep.subr.bf16.mxu0 %v11195_v10 }
 0x7e8   :  { %9777 = vmatpush3.bf16.msra.mxu0 %v11196_v4 }
 0x7e9   :  { %9778 = vmatprep.subr.bf16.mxu0 %v11197_v27 }
 0x7ea   :  { %6993 = vmatmul.mubr.bf16.vlgmr.msra.gmra.mrb[0].mxu1 %v13656_v19  ;;  %7805 = vmatmul.mubr.bf16.gmra.mrb[80].mxu0 %v13664_v46  ;;  %v11253_v19 = vld [vmem:[#allocation14 + $0x1a8] ss:$16 sps:$4 sm:$0xff]  }
 0x7eb   :  { %9966 = vmatpush1.bf16.msra.mxu1 %v11227_v63  ;;  %7002 = vmatprep.mubr.bf16.mxu1 %v13657_v62  ;;  %v11198_v62 = vld [vmem:[#allocation16 + $0xb0] sm:$0xff]   ;;  %v13678_v63 = vld [vmem:[#allocation66_spill] sm:$0xff] }
 0x7ec   :  { %7814 = vmatprep.mubr.bf16.mxu0 %v13665_v3  ;;  %9951 = vmatprep.subr.bf16.mxu1 %v11228_v7  ;;  %v13680_v7 = vld [vmem:[#allocation37_spill] sm:$0xff] }
 0x7ed   :  { %9779 = vmatpush3.bf16.msra.mxu0 %v11198_v62 }
 0x7ef   :  { %9967 = vmatpush1.bf16.msra.mxu1 %v11229_v32  ;;  %v11203_v32 = vld [vmem:[#allocation16 + $0x48] sm:$0xff]  }
 0x7f0   :  { %9952 = vmatprep.subr.bf16.mxu1 %v11230_v37  ;;  %v13682_v37 = vld [vmem:[#allocation30_spill] sm:$0xff] }
 0x7f2   :  { %7003 = vmatmul.mubr.bf16.gmra.mrb[4].mxu1 %v13658_v50  ;;  %7815 = vmatmul.mubr.bf16.gmra.mrb[84].mxu0 %v13666_v14  ;;  %v11254_v50 = vld [vmem:[#allocation14 + $0x1cc] ss:$16 sps:$4 sm:$0xff]  }
 0x7f3   :  { %7012 = vmatprep.mubr.bf16.mxu1 %v13659_v21  ;;  %7824 = vmatprep.mubr.bf16.mxu0 %v13667_v56  ;;  %v13675_v21 = vld [vmem:[#allocation63_spill] sm:$0xff] }
 0x7f4   :  { %9968 = vmatpush1.bf16.msra.mxu1 %v11231_v25  ;;  %v11207_v25 = vld [vmem:[#allocation16 + $0x58] sm:$0xff]  }
 0x7f5   :  { %9953 = vmatprep.subr.bf16.mxu1 %v11232_v1  ;;  %v13684_v1 = vld [vmem:[#allocation32_spill] sm:$0xff] }
 0x7f8   :  { %9969 = vmatpush1.bf16.msra.mxu1 %v11233_v52  ;;  %v11209_v52 = vld [vmem:[#allocation16 + $0x60] sm:$0xff]  }
 0x7f9   :  { %9954 = vmatprep.subr.bf16.mxu1 %v11234_v55  ;;  %v11210_v55 = vld [vmem:[#allocation16 + $0x20] sm:$0xff]  }
 0x7fa   :  { %7013 = vmatmul.mubr.bf16.gmra.mrb[8].mxu1 %v13660_v42  ;;  %7825 = vmatmul.mubr.bf16.gmra.mrb[88].mxu0 %v13668_v61  ;;  %v11199_v42 = vld [vmem:[#allocation16 + $0xf8] sm:$0xff]  }
 0x7fb   :  { %7022 = vmatprep.mubr.bf16.mxu1 %v13661_v8  ;;  %7834 = vmatprep.mubr.bf16.mxu0 %v13669_v59  ;;  %v11255_v8 = vld [vmem:[#allocation14 + $0x1c8] ss:$16 sps:$4 sm:$0xff]  }
 0x7fc   :  { %9970 = vmatpush1.bf16.msra.mxu1 %v11235_v16  ;;  %9780 = vmatprep.subr.bf16.mxu0 %v11199_v42  ;;  %v11212_v16 = vld [vmem:[#allocation16 + $0x28] sm:$0xff]  }
 0x7fd   :  { %9955 = vmatprep.subr.bf16.mxu1 %v11236_v24  ;;  %v11213_v24 = vld [vmem:[#allocation16 + $0x70] sm:$0xff]  }
 0x800   :  { %9971 = vmatpush1.bf16.msra.mxu1 %v11237_v11  ;;  %v11214_v11 = vld [vmem:[#allocation16 + $0x30] sm:$0xff]  }
 0x801   :  { %9956 = vmatprep.subr.bf16.mxu1 %v11238_v17  ;;  %v11215_v17 = vld [vmem:[#allocation16 + $0x78] sm:$0xff]  }
 0x802   :  { %7023 = vmatmul.mubr.bf16.gmra.mrb[12].mxu1 %v13662_v20  ;;  %7835 = vmatmul.mubr.bf16.gmra.mrb[92].mxu0 %v13670_v5  ;;  %v11200_v20 = vld [vmem:[#allocation16 + $0xb8] sm:$0xff]  }
 0x803   :  { %7032 = vmatprep.mubr.bf16.mxu1 %v13663_v43  ;;  %7844 = vmatprep.mubr.bf16.mxu0 %v12889_v35  ;;  %v11256_v43 = vld [vmem:[#allocation14 + $0x1ec] ss:$16 sps:$4 sm:$0xff]  }
 0x804   :  { %9972 = vmatpush1.bf16.msra.mxu1 %v11239_v39  ;;  %9781 = vmatpush3.bf16.msra.mxu0 %v11200_v20  ;;  %v13690_v39 = vsub.s32 2, %v13689_v48 }
 0x805   :  { %9957 = vmatprep.subr.bf16.mxu1 %v11240_v54 }
 0x806   :  { %v13185_v54 = vrot.slane %v13180_v13, %v13690_v39 }
 0x808   :  { %9973 = vmatpush1.bf16.msra.mxu1 %v11241_v9  ;;  %v13190_v9 = vrot.slane %v13180_v13, %v13691_v30 }
 0x809   :  { %9958 = vmatprep.subr.bf16.mxu1 %v11242_v40 }
 0x80a   :  { %7033 = vmatmul.mubr.bf16.gmra.mrb[16].mxu1 %v13664_v46  ;;  %7845 = vmatmul.mubr.bf16.gmra.mrb[96].mxu0 %v12885_v45  ;;  %v11257_v46 = vld [vmem:[#allocation14 + $0x1e8] ss:$16 sps:$4 sm:$0xff]  }
 0x80b   :  { %7042 = vmatprep.mubr.bf16.mxu1 %v13665_v3  ;;  %7854 = vmatprep.mubr.bf16.mxu0 %v12909_v31  ;;  %v13679_v3 = vld [vmem:[#allocation68_spill] sm:$0xff] }
 0x80c   :  { %9974 = vmatpush1.bf16.msra.mxu1 %v11243_v28 }
 0x80d   :  { %9959 = vmatprep.subr.bf16.mxu1 %v11244_v34 }
 0x810   :  { %9975 = vmatpush1.bf16.msra.mxu1 %v11245_v0 }
 0x811   :  { %9960 = vmatprep.subr.bf16.mxu1 %v11246_v49 }
 0x812   :  { %7043 = vmatmul.mubr.bf16.gmra.mrb[20].mxu1 %v13666_v14  ;;  %7855 = vmatmul.mubr.bf16.gmra.mrb[100].mxu0 %v13671_v36  ;;  %v11204_v14 = vld [vmem:[#allocation16 + $0x8] sm:$0xff]  }
 0x813   :  { %7052 = vmatprep.mubr.bf16.mxu1 %v13667_v56  ;;  %7864 = vmatprep.mubr.bf16.mxu0 %v13672_v18  ;;  %v11205_v56 = vld [vmem:[#allocation16 + $0x50] sm:$0xff]  }
 0x814   :  { %9976 = vmatpush1.bf16.msra.mxu1 %v11247_v47 }
 0x815   :  { %9961 = vmatprep.subr.bf16.mxu1 %v11248_v51 }
 0x818   :  { %9977 = vmatpush1.bf16.msra.mxu1 %v11249_v41 }
 0x819   :  { %9962 = vmatprep.subr.bf16.mxu1 %v11250_v12 }
 0x81a   :  { %7053 = vmatmul.mubr.bf16.gmra.mrb[24].mxu1 %v13668_v61  ;;  %7865 = vmatmul.mubr.bf16.gmra.mrb[104].mxu0 %v13673_v44  ;;  %v11211_v61 = vld [vmem:[#allocation16 + $0x68] sm:$0xff]  }
 0x81b   :  { %7062 = vmatprep.mubr.bf16.mxu1 %v13669_v59  ;;  %7874 = vmatprep.mubr.bf16.mxu0 %v13674_v60  ;;  %v13687_v59 = vld [vmem:[#allocation39_spill] sm:$0xff] }
 0x81c   :  { %9978 = vmatpush1.bf16.msra.mxu1 %v11251_v29 }
 0x81d   :  { %9963 = vmatprep.subr.bf16.mxu1 %v11252_v57 }
 0x820   :  { %9979 = vmatpush1.bf16.msra.mxu1 %v11253_v19 }
 0x821   :  { %9964 = vmatprep.subr.bf16.mxu1 %v11254_v50 }
 0x822   :  { %7063 = vmatmul.mubr.bf16.gmra.mrb[28].mxu1 %v13670_v5  ;;  %7875 = vmatmul.mubr.bf16.gmra.mrb[108].mxu0 %v13675_v21  ;;  %v13688_v5 = vld [vmem:[#allocation38_spill] sm:$0xff] }
 0x823   :  { %7072 = vmatprep.mubr.bf16.mxu1 %v12889_v35  ;;  %7884 = vmatprep.mubr.bf16.mxu0 %v12969_v23  ;;  %v13677_v35 = vld [vmem:[#allocation67_spill] sm:$0xff] }
 0x824   :  { %9980 = vmatpush1.bf16.msra.mxu1 %v11255_v8 }
 0x825   :  { %9965 = vmatprep.subr.bf16.mxu1 %v11256_v43 }
 0x828   :  { %9981 = vmatpush1.bf16.msra.mxu1 %v11257_v46 }
 0x829   :  { %9654 = vmatprep.subr.bf16.mxu1 %v11201_v26 }
 0x82a   :  { %7073 = vmatmul.mubr.bf16.gmra.mrb[32].mxu1 %v12885_v45  ;;  %7885 = vmatmul.mubr.bf16.gmra.mrb[112].mxu0 %v13676_v58  ;;  %v13681_v45 = vld [vmem:[#allocation31_spill] sm:$0xff] }
 0x82b   :  { %7082 = vmatprep.mubr.bf16.mxu1 %v12909_v31  ;;  %7894 = vmatprep.mubr.bf16.mxu0 %v13677_v35  ;;  %v11202_v31 = vld [vmem:[#allocation16] sm:$0xff]  }
 0x832   :  { %7083 = vmatmul.mubr.bf16.gmra.mrb[36].mxu1 %v13671_v36  ;;  %7895 = vmatmul.mubr.bf16.gmra.mrb[116].mxu0 %v13678_v63 }
 0x833   :  { %7092 = vmatprep.mubr.bf16.mxu1 %v13672_v18  ;;  %7904 = vmatprep.mubr.bf16.mxu0 %v13679_v3 }
 0x83a   :  { %7093 = vmatmul.mubr.bf16.gmra.mrb[40].mxu1 %v13673_v44  ;;  %7905 = vmatmul.mubr.bf16.gmra.mrb[120].mxu0 %v13680_v7 }
 0x83b   :  { %7102 = vmatprep.mubr.bf16.mxu1 %v13674_v60  ;;  %7914 = vmatprep.mubr.bf16.mxu0 %v13029_v22 }
 0x842   :  { %7103 = vmatmul.mubr.bf16.gmra.mrb[44].mxu1 %v13675_v21  ;;  %7915 = vmatmul.mubr.bf16.gmra.mrb[124].mxu0 %v13025_v38 }
 0x843   :  { %7112 = vmatprep.mubr.bf16.mxu1 %v12969_v23  ;;  %v13683_v23 = vld [vmem:[#allocation33_spill] sm:$0xff] }
 0x84a   :  { %7113 = vmatmul.mubr.bf16.gmra.mrb[48].mxu1 %v13676_v58 }
 0x84b   :  { %7122 = vmatprep.mubr.bf16.mxu1 %v13677_v35 }
 0x852   :  { %7123 = vmatmul.mubr.bf16.gmra.mrb[52].mxu1 %v13678_v63 }
 0x853   :  { %7132 = vmatprep.mubr.bf16.mxu1 %v13679_v3 }
 0x85a   :  { %7133 = vmatmul.mubr.bf16.gmra.mrb[56].mxu1 %v13680_v7 }
 0x85b   :  { %7142 = vmatprep.mubr.bf16.mxu1 %v13029_v22  ;;  %v13685_v22 = vld [vmem:[#allocation36_spill] sm:$0xff] }
 0x862   :  { %7143 = vmatmul.mubr.bf16.gmra.mrb[60].mxu1 %v13025_v38  ;;  %v11208_v38 = vld [vmem:[#allocation16 + $0x18] sm:$0xff]  }
 0x863   :  { %7305 = vmatprep.mubr.bf16.mxu1 %v13681_v45 }
 0x86a   :  { %7306 = vmatmul.mubr.bf16.vlgmr.msra.gmra.mrb[64].mxu1 %v13682_v37 }
 0x86b   :  { %7315 = vmatprep.mubr.bf16.mxu1 %v13683_v23  ;;  %9655 = vmatpush3.bf16.msra.mxu1 %v11202_v31 }
 0x86c   :  { %9656 = vmatprep.subr.bf16.mxu1 %v11203_v32 }
 0x86f   :  { %9657 = vmatpush3.bf16.msra.mxu1 %v11204_v14 }
 0x870   :  { %9658 = vmatprep.subr.bf16.mxu1 %v11205_v56 }
 0x872   :  { %7316 = vmatmul.mubr.bf16.gmra.mrb[68].mxu1 %v13684_v1 }
 0x873   :  { %7325 = vmatprep.mubr.bf16.mxu1 %v13685_v22  ;;  %9659 = vmatpush3.bf16.msra.mxu1 %v11206_v15 }
 0x874   :  { %9660 = vmatprep.subr.bf16.mxu1 %v11207_v25 }
 0x877   :  { %9661 = vmatpush3.bf16.msra.mxu1 %v11208_v38 }
 0x878   :  { %9662 = vmatprep.subr.bf16.mxu1 %v11209_v52 }
 0x87a   :  { %7326 = vmatmul.mubr.bf16.gmra.mrb[72].mxu1 %v13686_v33 }
 0x87b   :  { %7335 = vmatprep.mubr.bf16.mxu1 %v13687_v59  ;;  %9663 = vmatpush3.bf16.msra.mxu1 %v11210_v55 }
 0x87c   :  { %9664 = vmatprep.subr.bf16.mxu1 %v11211_v61 }
 0x87f   :  { %9665 = vmatpush3.bf16.msra.mxu1 %v11212_v16  ;;  %v13692_v16 = vld [vmem:[#allocation28_spill] sm:$0xff] }
 0x880   :  { %9666 = vmatprep.subr.bf16.mxu1 %v11213_v24  ;;  %v13210_v24 = vrot.slane %v13180_v13, %v13692_v16 }
 0x882   :  { %7336 = vmatmul.mubr.bf16.gmra.mrb[76].mxu1 %v13688_v5  ;;  %v13693_v5 = vld [vmem:[#allocation29_spill] sm:$0xff] }
 0x883   :  { %9667 = vmatpush3.bf16.msra.mxu1 %v11214_v11 }
 0x884   :  { %9668 = vmatprep.subr.bf16.mxu1 %v11215_v17 }
 0x887   :  { %9669 = vmatpush3.bf16.msra.mxu1 %v11216_v53  ;;  %v13214_v53 = vrot.slane %v13180_v13, %v13693_v5 }
 0x89d   :  { %v7766_v2 = vpop.f32.mrb[64].mxu0 }
 0x89e   :  { %v10046_v40 = vadd.f32 %v7766_v2, %v13185_v54  ;;  %v7768_v6 = vpop.f32.mrb[65].mxu0 }
 0x89f   :  { %v10047_v10 = vadd.f32 %v7768_v6, %v13190_v9  ;;  %v7770_v28 = vpop.f32.mrb[66].mxu0 }
 0x8a0   :  { %v10048_v34 = vadd.f32 %v7770_v28, %v13185_v54  ;;  %v7772_v0 = vpop.f32.mrb[67].mxu0  ;;  %v7927_v36 = vmax.f32 %v10046_v40, 0.0 }
 0x8a1   :  { %v10049_v49 = vadd.f32 %v7772_v0, %v13190_v9  ;;  %v7928_v47 = vmax.f32 %v10047_v10, 0.0 }
 0x8a2   :  { %v7931_v18 = vmax.f32 %v10048_v34, 0.0 }
 0x8a3   :  { %v7932_v51 = vmax.f32 %v10049_v49, 0.0 }
 0x8a4   :  { %v8055_v41 = vpack.c.bf16 %v7931_v18, %v7927_v36 }
 0x8a5   :  { %v8056_v12 = vpack.c.bf16 %v7932_v51, %v7928_v47  ;;  %v7776_v44 = vpop.f32.mrb[68].mxu0 }
 0x8a6   :  { %v10050_v60 = vadd.f32 %v7776_v44, %v13185_v54  ;;  %v7778_v29 = vpop.f32.mrb[69].mxu0 }
 0x8a7   :  { %v10051_v4 = vadd.f32 %v7778_v29, %v13190_v9  ;;  %v7780_v57 = vpop.f32.mrb[70].mxu0  ;;  %8573 = vmatprep.mubr.bf16.mxu0 %v8056_v12 }
 0x8a8   :  { %v10052_v27 = vadd.f32 %v7780_v57, %v13185_v54  ;;  %v7782_v19 = vpop.f32.mrb[71].mxu0  ;;  %8574 = vmatmul.mubr.bf16.vlgmr.msra.gmra.mrb[128].mxu0 %v8055_v41  ;;  %v7935_v50 = vmax.f32 %v10050_v60, 0.0 }
 0x8a9   :  { %v10053_v62 = vadd.f32 %v7782_v19, %v13190_v9  ;;  %v7936_v42 = vmax.f32 %v10051_v4, 0.0 }
 0x8aa   :  { %v7939_v21 = vmax.f32 %v10052_v27, 0.0 }
 0x8ab   :  { %v7940_v8 = vmax.f32 %v10053_v62, 0.0 }
 0x8ac   :  { %v8059_v20 = vpack.c.bf16 %v7939_v21, %v7935_v50 }
 0x8ad   :  { %v8060_v43 = vpack.c.bf16 %v7940_v8, %v7936_v42  ;;  %v7786_v26 = vpop.f32.mrb[72].mxu0 }
 0x8ae   :  { %v10054_v46 = vadd.f32 %v7786_v26, %v13185_v54  ;;  %v7788_v58 = vpop.f32.mrb[73].mxu0 }
 0x8af   :  { %v10055_v35 = vadd.f32 %v7788_v58, %v13190_v9  ;;  %v7790_v63 = vpop.f32.mrb[74].mxu0  ;;  %8581 = vmatprep.mubr.bf16.mxu0 %v8060_v43 }
 0x8b0   :  { %v10056_v3 = vadd.f32 %v7790_v63, %v13185_v54  ;;  %v7792_v7 = vpop.f32.mrb[75].mxu0  ;;  %8582 = vmatmul.mubr.bf16.gmra.mrb[132].mxu0 %v8059_v20  ;;  %v7943_v31 = vmax.f32 %v10054_v46, 0.0 }
 0x8b1   :  { %v10057_v45 = vadd.f32 %v7792_v7, %v13190_v9  ;;  %v7944_v37 = vmax.f32 %v10055_v35, 0.0 }
 0x8b2   :  { %v7947_v32 = vmax.f32 %v10056_v3, 0.0 }
 0x8b3   :  { %v7948_v23 = vmax.f32 %v10057_v45, 0.0 }
 0x8b4   :  { %v8063_v14 = vpack.c.bf16 %v7947_v32, %v7943_v31 }
 0x8b5   :  { %v8064_v56 = vpack.c.bf16 %v7948_v23, %v7944_v37  ;;  %v7796_v15 = vpop.f32.mrb[76].mxu0 }
 0x8b6   :  { %v10058_v25 = vadd.f32 %v7796_v15, %v13185_v54  ;;  %v7798_v1 = vpop.f32.mrb[77].mxu0 }
 0x8b7   :  { %v10059_v22 = vadd.f32 %v7798_v1, %v13190_v9  ;;  %v7800_v38 = vpop.f32.mrb[78].mxu0  ;;  %8589 = vmatprep.mubr.bf16.mxu0 %v8064_v56 }
 0x8b8   :  { %v10060_v52 = vadd.f32 %v7800_v38, %v13185_v54  ;;  %v7802_v55 = vpop.f32.mrb[79].mxu0  ;;  %8590 = vmatmul.mubr.bf16.gmra.mrb[136].mxu0 %v8063_v14  ;;  %v7951_v33 = vmax.f32 %v10058_v25, 0.0 }
 0x8b9   :  { %v10061_v61 = vadd.f32 %v7802_v55, %v13190_v9  ;;  %v7952_v11 = vmax.f32 %v10059_v22, 0.0 }
 0x8ba   :  { %v7955_v59 = vmax.f32 %v10060_v52, 0.0 }
 0x8bb   :  { %v7956_v17 = vmax.f32 %v10061_v61, 0.0 }
 0x8bc   :  { %v8067_v48 = vpack.c.bf16 %v7955_v59, %v7951_v33 }
 0x8bd   :  { %v8068_v39 = vpack.c.bf16 %v7956_v17, %v7952_v11  ;;  %v6994_v30 = vpop.f32.mrb[0].mxu1  ;;  %v7806_v2 = vpop.f32.mrb[80].mxu0 }
 0x8be   :  { %v9982_v40 = vadd.f32 %v6994_v30, %v13210_v24  ;;  %v10062_v6 = vadd.f32 %v7806_v2, %v13185_v54  ;;  %v6996_v10 = vpop.f32.mrb[1].mxu1  ;;  %v7808_v28 = vpop.f32.mrb[81].mxu0 }
 0x8bf   :  { %v9983_v34 = vadd.f32 %v6996_v10, %v13214_v53  ;;  %v10063_v0 = vadd.f32 %v7808_v28, %v13190_v9  ;;  %v6998_v49 = vpop.f32.mrb[2].mxu1  ;;  %v7810_v36 = vpop.f32.mrb[82].mxu0  ;;  %8597 = vmatprep.mubr.bf16.mxu0 %v8068_v39 }
 0x8c0   :  { %v9984_v13 = vadd.f32 %v6998_v49, %v13210_v24  ;;  %v10064_v18 = vadd.f32 %v7810_v36, %v13185_v54  ;;  %v7000_v47 = vpop.f32.mrb[3].mxu1  ;;  %v7812_v51 = vpop.f32.mrb[83].mxu0  ;;  %8598 = vmatmul.mubr.bf16.gmra.mrb[140].mxu0 %v8067_v48  ;;  %v7925_v44 = vmax.f32 %v9982_v40, 0.0  ;;  %v7959_v60 = vmax.f32 %v10062_v6, 0.0 }
 0x8c1   :  { %v9985_v41 = vadd.f32 %v7000_v47, %v13214_v53  ;;  %v10065_v12 = vadd.f32 %v7812_v51, %v13190_v9  ;;  %v7926_v57 = vmax.f32 %v9983_v34, 0.0  ;;  %v7960_v27 = vmax.f32 %v10063_v0, 0.0 }
 0x8c2   :  { %v7929_v29 = vmax.f32 %v9984_v13, 0.0  ;;  %v7963_v4 = vmax.f32 %v10064_v18, 0.0 }
 0x8c3   :  { %v7930_v19 = vmax.f32 %v9985_v41, 0.0  ;;  %v7964_v62 = vmax.f32 %v10065_v12, 0.0 }
 0x8c4   :  { %v8053_v50 = vpack.c.bf16 %v7929_v29, %v7925_v44  ;;  %v8071_v21 = vpack.c.bf16 %v7963_v4, %v7959_v60 }
 0x8c5   :  { %v8054_v42 = vpack.c.bf16 %v7930_v19, %v7926_v57  ;;  %v8072_v8 = vpack.c.bf16 %v7964_v62, %v7960_v27  ;;  %v7004_v20 = vpop.f32.mrb[4].mxu1  ;;  %v7816_v43 = vpop.f32.mrb[84].mxu0 }
 0x8c6   :  { %v9986_v26 = vadd.f32 %v7004_v20, %v13210_v24  ;;  %v10066_v46 = vadd.f32 %v7816_v43, %v13185_v54  ;;  %v7006_v58 = vpop.f32.mrb[5].mxu1  ;;  %v7818_v35 = vpop.f32.mrb[85].mxu0 }
 0x8c7   :  { %v9987_v63 = vadd.f32 %v7006_v58, %v13214_v53  ;;  %v10067_v3 = vadd.f32 %v7818_v35, %v13190_v9  ;;  %v7008_v7 = vpop.f32.mrb[6].mxu1  ;;  %v7820_v45 = vpop.f32.mrb[86].mxu0  ;;  %8412 = vmatprep.mubr.bf16.mxu1 %v8054_v42  ;;  %8605 = vmatprep.mubr.bf16.mxu0 %v8072_v8 }
 0x8c8   :  { %v9988_v31 = vadd.f32 %v7008_v7, %v13210_v24  ;;  %v10068_v32 = vadd.f32 %v7820_v45, %v13185_v54  ;;  %v7010_v37 = vpop.f32.mrb[7].mxu1  ;;  %v7822_v23 = vpop.f32.mrb[87].mxu0  ;;  %8413 = vmatmul.mubr.bf16.vlgmr.msra.gmra.mrb[80].mxu1 %v8053_v50  ;;  %8606 = vmatmul.mubr.bf16.gmra.mrb[144].mxu0 %v8071_v21  ;;  %v7933_v15 = vmax.f32 %v9986_v26, 0.0  ;;  %v7967_v25 = vmax.f32 %v10066_v46, 0.0 }
 0x8c9   :  { %v9989_v14 = vadd.f32 %v7010_v37, %v13214_v53  ;;  %v10069_v56 = vadd.f32 %v7822_v23, %v13190_v9  ;;  %v7934_v38 = vmax.f32 %v9987_v63, 0.0  ;;  %v7968_v52 = vmax.f32 %v10067_v3, 0.0 }
 0x8ca   :  { %v7937_v1 = vmax.f32 %v9988_v31, 0.0  ;;  %v7971_v22 = vmax.f32 %v10068_v32, 0.0 }
 0x8cb   :  { %v7938_v55 = vmax.f32 %v9989_v14, 0.0  ;;  %v7972_v61 = vmax.f32 %v10069_v56, 0.0 }
 0x8cc   :  { %v8057_v33 = vpack.c.bf16 %v7937_v1, %v7933_v15  ;;  %v8075_v59 = vpack.c.bf16 %v7971_v22, %v7967_v25 }
 0x8cd   :  { %v8058_v16 = vpack.c.bf16 %v7938_v55, %v7934_v38  ;;  %v8076_v11 = vpack.c.bf16 %v7972_v61, %v7968_v52  ;;  %v7014_v17 = vpop.f32.mrb[8].mxu1  ;;  %v7826_v5 = vpop.f32.mrb[88].mxu0 }
 0x8ce   :  { %v9990_v48 = vadd.f32 %v7014_v17, %v13210_v24  ;;  %v10070_v39 = vadd.f32 %v7826_v5, %v13185_v54  ;;  %v7016_v30 = vpop.f32.mrb[9].mxu1  ;;  %v7828_v2 = vpop.f32.mrb[89].mxu0 }
 0x8cf   :  { %v9991_v40 = vadd.f32 %v7016_v30, %v13214_v53  ;;  %v10071_v6 = vadd.f32 %v7828_v2, %v13190_v9  ;;  %v7018_v10 = vpop.f32.mrb[10].mxu1  ;;  %v7830_v28 = vpop.f32.mrb[90].mxu0  ;;  %8420 = vmatprep.mubr.bf16.mxu1 %v8058_v16  ;;  %8613 = vmatprep.mubr.bf16.mxu0 %v8076_v11 }
 0x8d0   :  { %v9992_v34 = vadd.f32 %v7018_v10, %v13210_v24  ;;  %v10072_v0 = vadd.f32 %v7830_v28, %v13185_v54  ;;  %v7020_v49 = vpop.f32.mrb[11].mxu1  ;;  %v7832_v36 = vpop.f32.mrb[91].mxu0  ;;  %8421 = vmatmul.mubr.bf16.gmra.mrb[84].mxu1 %v8057_v33  ;;  %8614 = vmatmul.mubr.bf16.gmra.mrb[148].mxu0 %v8075_v59  ;;  %v7941_v47 = vmax.f32 %v9990_v48, 0.0  ;;  %v7975_v51 = vmax.f32 %v10070_v39, 0.0 }
 0x8d1   :  { %v9993_v13 = vadd.f32 %v7020_v49, %v13214_v53  ;;  %v10073_v18 = vadd.f32 %v7832_v36, %v13190_v9  ;;  %v7942_v44 = vmax.f32 %v9991_v40, 0.0  ;;  %v7976_v60 = vmax.f32 %v10071_v6, 0.0 }
 0x8d2   :  { %v7945_v41 = vmax.f32 %v9992_v34, 0.0  ;;  %v7979_v12 = vmax.f32 %v10072_v0, 0.0 }
 0x8d3   :  { %v7946_v29 = vmax.f32 %v9993_v13, 0.0  ;;  %v7980_v4 = vmax.f32 %v10073_v18, 0.0 }
 0x8d4   :  { %v8061_v57 = vpack.c.bf16 %v7945_v41, %v7941_v47  ;;  %v8079_v27 = vpack.c.bf16 %v7979_v12, %v7975_v51 }
 0x8d5   :  { %v8062_v19 = vpack.c.bf16 %v7946_v29, %v7942_v44  ;;  %v8080_v62 = vpack.c.bf16 %v7980_v4, %v7976_v60  ;;  %v7024_v50 = vpop.f32.mrb[12].mxu1  ;;  %v7836_v21 = vpop.f32.mrb[92].mxu0 }
 0x8d6   :  { %v9994_v42 = vadd.f32 %v7024_v50, %v13210_v24  ;;  %v10074_v8 = vadd.f32 %v7836_v21, %v13185_v54  ;;  %v7026_v20 = vpop.f32.mrb[13].mxu1  ;;  %v7838_v43 = vpop.f32.mrb[93].mxu0 }
 0x8d7   :  { %v9995_v26 = vadd.f32 %v7026_v20, %v13214_v53  ;;  %v10075_v46 = vadd.f32 %v7838_v43, %v13190_v9  ;;  %v7028_v58 = vpop.f32.mrb[14].mxu1  ;;  %v7840_v35 = vpop.f32.mrb[94].mxu0  ;;  %8428 = vmatprep.mubr.bf16.mxu1 %v8062_v19  ;;  %8621 = vmatprep.mubr.bf16.mxu0 %v8080_v62 }
 0x8d8   :  { %v9996_v63 = vadd.f32 %v7028_v58, %v13210_v24  ;;  %v10076_v3 = vadd.f32 %v7840_v35, %v13185_v54  ;;  %v7030_v7 = vpop.f32.mrb[15].mxu1  ;;  %v7842_v45 = vpop.f32.mrb[95].mxu0  ;;  %8429 = vmatmul.mubr.bf16.gmra.mrb[88].mxu1 %v8061_v57  ;;  %8622 = vmatmul.mubr.bf16.gmra.mrb[152].mxu0 %v8079_v27  ;;  %v7949_v37 = vmax.f32 %v9994_v42, 0.0  ;;  %v7983_v23 = vmax.f32 %v10074_v8, 0.0 }
 0x8d9   :  { %v9997_v31 = vadd.f32 %v7030_v7, %v13214_v53  ;;  %v10077_v32 = vadd.f32 %v7842_v45, %v13190_v9  ;;  %v7950_v15 = vmax.f32 %v9995_v26, 0.0  ;;  %v7984_v25 = vmax.f32 %v10075_v46, 0.0 }
 0x8da   :  { %v7953_v14 = vmax.f32 %v9996_v63, 0.0  ;;  %v7987_v56 = vmax.f32 %v10076_v3, 0.0 }
 0x8db   :  { %v7954_v1 = vmax.f32 %v9997_v31, 0.0  ;;  %v7988_v22 = vmax.f32 %v10077_v32, 0.0 }
 0x8dc   :  { %v8065_v38 = vpack.c.bf16 %v7953_v14, %v7949_v37  ;;  %v8083_v52 = vpack.c.bf16 %v7987_v56, %v7983_v23 }
 0x8dd   :  { %v8066_v55 = vpack.c.bf16 %v7954_v1, %v7950_v15  ;;  %v8084_v61 = vpack.c.bf16 %v7988_v22, %v7984_v25  ;;  %v7034_v33 = vpop.f32.mrb[16].mxu1  ;;  %v7846_v59 = vpop.f32.mrb[96].mxu0 }
 0x8de   :  { %v9998_v16 = vadd.f32 %v7034_v33, %v13210_v24  ;;  %v10078_v11 = vadd.f32 %v7846_v59, %v13185_v54  ;;  %v7036_v17 = vpop.f32.mrb[17].mxu1  ;;  %v7848_v5 = vpop.f32.mrb[97].mxu0 }
 0x8df   :  { %v9999_v48 = vadd.f32 %v7036_v17, %v13214_v53  ;;  %v10079_v39 = vadd.f32 %v7848_v5, %v13190_v9  ;;  %v7038_v30 = vpop.f32.mrb[18].mxu1  ;;  %v7850_v2 = vpop.f32.mrb[98].mxu0  ;;  %8436 = vmatprep.mubr.bf16.mxu1 %v8066_v55  ;;  %8629 = vmatprep.mubr.bf16.mxu0 %v8084_v61 }
 0x8e0   :  { %v10000_v40 = vadd.f32 %v7038_v30, %v13210_v24  ;;  %v10080_v6 = vadd.f32 %v7850_v2, %v13185_v54  ;;  %v7040_v10 = vpop.f32.mrb[19].mxu1  ;;  %v7852_v28 = vpop.f32.mrb[99].mxu0  ;;  %8437 = vmatmul.mubr.bf16.gmra.mrb[92].mxu1 %v8065_v38  ;;  %8630 = vmatmul.mubr.bf16.gmra.mrb[156].mxu0 %v8083_v52  ;;  %v7957_v49 = vmax.f32 %v9998_v16, 0.0  ;;  %v7991_v36 = vmax.f32 %v10078_v11, 0.0 }
 0x8e1   :  { %v10001_v34 = vadd.f32 %v7040_v10, %v13214_v53  ;;  %v10081_v0 = vadd.f32 %v7852_v28, %v13190_v9  ;;  %v7958_v47 = vmax.f32 %v9999_v48, 0.0  ;;  %v7992_v51 = vmax.f32 %v10079_v39, 0.0 }
 0x8e2   :  { %v7961_v13 = vmax.f32 %v10000_v40, 0.0  ;;  %v7995_v18 = vmax.f32 %v10080_v6, 0.0 }
 0x8e3   :  { %v7962_v41 = vmax.f32 %v10001_v34, 0.0  ;;  %v7996_v12 = vmax.f32 %v10081_v0, 0.0 }
 0x8e4   :  { %v8069_v44 = vpack.c.bf16 %v7961_v13, %v7957_v49  ;;  %v8087_v60 = vpack.c.bf16 %v7995_v18, %v7991_v36 }
 0x8e5   :  { %v8070_v29 = vpack.c.bf16 %v7962_v41, %v7958_v47  ;;  %v8088_v4 = vpack.c.bf16 %v7996_v12, %v7992_v51  ;;  %v7044_v57 = vpop.f32.mrb[20].mxu1  ;;  %v7856_v27 = vpop.f32.mrb[100].mxu0 }
 0x8e6   :  { %v10002_v19 = vadd.f32 %v7044_v57, %v13210_v24  ;;  %v10082_v62 = vadd.f32 %v7856_v27, %v13185_v54  ;;  %v7046_v50 = vpop.f32.mrb[21].mxu1  ;;  %v7858_v21 = vpop.f32.mrb[101].mxu0 }
 0x8e7   :  { %v10003_v42 = vadd.f32 %v7046_v50, %v13214_v53  ;;  %v10083_v8 = vadd.f32 %v7858_v21, %v13190_v9  ;;  %v7048_v20 = vpop.f32.mrb[22].mxu1  ;;  %v7860_v43 = vpop.f32.mrb[102].mxu0  ;;  %8444 = vmatprep.mubr.bf16.mxu1 %v8070_v29  ;;  %8637 = vmatprep.mubr.bf16.mxu0 %v8088_v4 }
 0x8e8   :  { %v10004_v26 = vadd.f32 %v7048_v20, %v13210_v24  ;;  %v10084_v46 = vadd.f32 %v7860_v43, %v13185_v54  ;;  %v7050_v58 = vpop.f32.mrb[23].mxu1  ;;  %v7862_v35 = vpop.f32.mrb[103].mxu0  ;;  %8445 = vmatmul.mubr.bf16.gmra.mrb[96].mxu1 %v8069_v44  ;;  %8638 = vmatmul.mubr.bf16.gmra.mrb[160].mxu0 %v8087_v60  ;;  %v7965_v7 = vmax.f32 %v10002_v19, 0.0  ;;  %v7999_v45 = vmax.f32 %v10082_v62, 0.0 }
 0x8e9   :  { %v10005_v63 = vadd.f32 %v7050_v58, %v13214_v53  ;;  %v10085_v3 = vadd.f32 %v7862_v35, %v13190_v9  ;;  %v7966_v37 = vmax.f32 %v10003_v42, 0.0  ;;  %v8000_v23 = vmax.f32 %v10083_v8, 0.0 }
 0x8ea   :  { %v7969_v31 = vmax.f32 %v10004_v26, 0.0  ;;  %v8003_v32 = vmax.f32 %v10084_v46, 0.0 }
 0x8eb   :  { %v7970_v14 = vmax.f32 %v10005_v63, 0.0  ;;  %v8004_v56 = vmax.f32 %v10085_v3, 0.0 }
 0x8ec   :  { %v8073_v15 = vpack.c.bf16 %v7969_v31, %v7965_v7  ;;  %v8091_v25 = vpack.c.bf16 %v8003_v32, %v7999_v45 }
 0x8ed   :  { %v8074_v1 = vpack.c.bf16 %v7970_v14, %v7966_v37  ;;  %v8092_v22 = vpack.c.bf16 %v8004_v56, %v8000_v23  ;;  %v7054_v38 = vpop.f32.mrb[24].mxu1  ;;  %v7866_v52 = vpop.f32.mrb[104].mxu0 }
 0x8ee   :  { %v10006_v55 = vadd.f32 %v7054_v38, %v13210_v24  ;;  %v10086_v61 = vadd.f32 %v7866_v52, %v13185_v54  ;;  %v7056_v33 = vpop.f32.mrb[25].mxu1  ;;  %v7868_v59 = vpop.f32.mrb[105].mxu0 }
 0x8ef   :  { %v10007_v16 = vadd.f32 %v7056_v33, %v13214_v53  ;;  %v10087_v11 = vadd.f32 %v7868_v59, %v13190_v9  ;;  %v7058_v17 = vpop.f32.mrb[26].mxu1  ;;  %v7870_v5 = vpop.f32.mrb[106].mxu0  ;;  %8452 = vmatprep.mubr.bf16.mxu1 %v8074_v1  ;;  %8645 = vmatprep.mubr.bf16.mxu0 %v8092_v22 }
 0x8f0   :  { %v10008_v48 = vadd.f32 %v7058_v17, %v13210_v24  ;;  %v10088_v39 = vadd.f32 %v7870_v5, %v13185_v54  ;;  %v7060_v30 = vpop.f32.mrb[27].mxu1  ;;  %v7872_v2 = vpop.f32.mrb[107].mxu0  ;;  %8453 = vmatmul.mubr.bf16.gmra.mrb[100].mxu1 %v8073_v15  ;;  %8646 = vmatmul.mubr.bf16.gmra.mrb[164].mxu0 %v8091_v25  ;;  %v7973_v10 = vmax.f32 %v10006_v55, 0.0  ;;  %v8007_v28 = vmax.f32 %v10086_v61, 0.0 }
 0x8f1   :  { %v10009_v40 = vadd.f32 %v7060_v30, %v13214_v53  ;;  %v10089_v6 = vadd.f32 %v7872_v2, %v13190_v9  ;;  %v7974_v49 = vmax.f32 %v10007_v16, 0.0  ;;  %v8008_v36 = vmax.f32 %v10087_v11, 0.0 }
 0x8f2   :  { %v7977_v34 = vmax.f32 %v10008_v48, 0.0  ;;  %v8011_v0 = vmax.f32 %v10088_v39, 0.0 }
 0x8f3   :  { %v7978_v13 = vmax.f32 %v10009_v40, 0.0  ;;  %v8012_v18 = vmax.f32 %v10089_v6, 0.0 }
 0x8f4   :  { %v8077_v47 = vpack.c.bf16 %v7977_v34, %v7973_v10  ;;  %v8095_v51 = vpack.c.bf16 %v8011_v0, %v8007_v28 }
 0x8f5   :  { %v8078_v41 = vpack.c.bf16 %v7978_v13, %v7974_v49  ;;  %v8096_v12 = vpack.c.bf16 %v8012_v18, %v8008_v36  ;;  %v7064_v44 = vpop.f32.mrb[28].mxu1  ;;  %v7876_v60 = vpop.f32.mrb[108].mxu0  ;;  %v11217_v13 = vld [vmem:[#allocation17] sm:$0xff]  }
 0x8f6   :  { %v10010_v29 = vadd.f32 %v7064_v44, %v13210_v24  ;;  %v10090_v4 = vadd.f32 %v7876_v60, %v13185_v54  ;;  %v7066_v57 = vpop.f32.mrb[29].mxu1  ;;  %v7878_v27 = vpop.f32.mrb[109].mxu0  ;;  %9902 = vmatprep.subr.bf16.mxu1 %v11217_v13 }
 0x8f7   :  { %v10011_v19 = vadd.f32 %v7066_v57, %v13214_v53  ;;  %v10091_v62 = vadd.f32 %v7878_v27, %v13190_v9  ;;  %v7068_v50 = vpop.f32.mrb[30].mxu1  ;;  %v7880_v21 = vpop.f32.mrb[110].mxu0  ;;  %8460 = vmatprep.mubr.bf16.mxu1 %v8078_v41  ;;  %8653 = vmatprep.mubr.bf16.mxu0 %v8096_v12 }
 0x8f8   :  { %v10012_v42 = vadd.f32 %v7068_v50, %v13210_v24  ;;  %v10092_v8 = vadd.f32 %v7880_v21, %v13185_v54  ;;  %v7070_v20 = vpop.f32.mrb[31].mxu1  ;;  %v7882_v43 = vpop.f32.mrb[111].mxu0  ;;  %8461 = vmatmul.mubr.bf16.gmra.mrb[104].mxu1 %v8077_v47  ;;  %8654 = vmatmul.mubr.bf16.gmra.mrb[168].mxu0 %v8095_v51  ;;  %v7981_v58 = vmax.f32 %v10010_v29, 0.0  ;;  %v8015_v35 = vmax.f32 %v10090_v4, 0.0 }
 0x8f9   :  { %v10013_v26 = vadd.f32 %v7070_v20, %v13214_v53  ;;  %v10093_v46 = vadd.f32 %v7882_v43, %v13190_v9  ;;  %v7982_v7 = vmax.f32 %v10011_v19, 0.0  ;;  %v8016_v45 = vmax.f32 %v10091_v62, 0.0  ;;  %9903 = vmatpush3.bf16.msra.mxu1 %v11217_v13 }
 0x8fa   :  { %v7985_v63 = vmax.f32 %v10012_v42, 0.0  ;;  %v8019_v3 = vmax.f32 %v10092_v8, 0.0 }
 0x8fb   :  { %v7986_v31 = vmax.f32 %v10013_v26, 0.0  ;;  %v8020_v32 = vmax.f32 %v10093_v46, 0.0 }
 0x8fc   :  { %v8081_v37 = vpack.c.bf16 %v7985_v63, %v7981_v58  ;;  %v8099_v23 = vpack.c.bf16 %v8019_v3, %v8015_v35 }
 0x8fd   :  { %v8082_v14 = vpack.c.bf16 %v7986_v31, %v7982_v7  ;;  %v8100_v56 = vpack.c.bf16 %v8020_v32, %v8016_v45  ;;  %v7074_v15 = vpop.f32.mrb[32].mxu1  ;;  %v13280_v25 = vpop.f32.mrb[112].mxu0  ;;  %v11218_v31 = vld [vmem:[#allocation17 + $0x8] sm:$0xff]  }
 0x8fe   :  { %v10014_v1 = vadd.f32 %v7074_v15, %v13210_v24  ;;  %v7076_v22 = vpop.f32.mrb[33].mxu1  ;;  %v13283_v38 = vpop.f32.mrb[113].mxu0  ;;  %9904 = vmatprep.subr.bf16.mxu1 %v11218_v31 }
 0x8ff   :  { %v10015_v52 = vadd.f32 %v7076_v22, %v13214_v53  ;;  %v7078_v55 = vpop.f32.mrb[34].mxu1  ;;  %v13286_v61 = vpop.f32.mrb[114].mxu0  ;;  %8468 = vmatprep.mubr.bf16.mxu1 %v8082_v14  ;;  %8661 = vmatprep.mubr.bf16.mxu0 %v8100_v56 }
 0x900   :  { %v10016_v33 = vadd.f32 %v7078_v55, %v13210_v24  ;;  %v7080_v59 = vpop.f32.mrb[35].mxu1  ;;  %v13289_v16 = vpop.f32.mrb[115].mxu0  ;;  %8469 = vmatmul.mubr.bf16.gmra.mrb[108].mxu1 %v8081_v37  ;;  %8662 = vmatmul.mubr.bf16.gmra.mrb[172].mxu0 %v8099_v23  ;;  %v7989_v17 = vmax.f32 %v10014_v1, 0.0  ;;  %v11219_v55 = vld [vmem:[#allocation17 + $0x10] sm:$0xff]  }
 0x901   :  { %v10017_v11 = vadd.f32 %v7080_v59, %v13214_v53  ;;  %v7990_v48 = vmax.f32 %v10015_v52, 0.0  ;;  %9905 = vmatpush3.bf16.msra.mxu1 %v11218_v31 }
 0x902   :  { %v7993_v5 = vmax.f32 %v10016_v33, 0.0  ;;  %9906 = vmatprep.subr.bf16.mxu1 %v11219_v55 }
 0x903   :  { %v7994_v39 = vmax.f32 %v10017_v11, 0.0 }
 0x904   :  { %v8085_v30 = vpack.c.bf16 %v7993_v5, %v7989_v17 }
 0x905   :  { %v8086_v2 = vpack.c.bf16 %v7994_v39, %v7990_v48  ;;  %v7084_v40 = vpop.f32.mrb[36].mxu1  ;;  %v13292_v6 = vpop.f32.mrb[116].mxu0  ;;  %9907 = vmatpush3.bf16.msra.mxu1 %v11219_v55 }
 0x906   :  { %v10018_v10 = vadd.f32 %v7084_v40, %v13210_v24  ;;  %v7086_v28 = vpop.f32.mrb[37].mxu1  ;;  %v13295_v34 = vpop.f32.mrb[117].mxu0  ;;  %v11220_v40 = vld [vmem:[#allocation17 + $0x18] sm:$0xff]  }
 0x907   :  { %v10019_v0 = vadd.f32 %v7086_v28, %v13214_v53  ;;  %v7088_v49 = vpop.f32.mrb[38].mxu1  ;;  %v13298_v36 = vpop.f32.mrb[118].mxu0  ;;  %8476 = vmatprep.mubr.bf16.mxu1 %v8086_v2  ;;  %9908 = vmatprep.subr.bf16.mxu1 %v11220_v40 }
 0x908   :  { %v10020_v18 = vadd.f32 %v7088_v49, %v13210_v24  ;;  %v7090_v47 = vpop.f32.mrb[39].mxu1  ;;  %v13301_v51 = vpop.f32.mrb[119].mxu0  ;;  %8477 = vmatmul.mubr.bf16.gmra.mrb[112].mxu1 %v8085_v30  ;;  %v7997_v12 = vmax.f32 %v10018_v10, 0.0 }
 0x909   :  { %v10021_v41 = vadd.f32 %v7090_v47, %v13214_v53  ;;  %v7998_v60 = vmax.f32 %v10019_v0, 0.0  ;;  %9909 = vmatpush3.bf16.msra.mxu1 %v11220_v40 }
 0x90a   :  { %v8001_v44 = vmax.f32 %v10020_v18, 0.0 }
 0x90b   :  { %v8002_v29 = vmax.f32 %v10021_v41, 0.0 }
 0x90c   :  { %v8089_v4 = vpack.c.bf16 %v8001_v44, %v7997_v12  ;;  %v11221_v12 = vld [vmem:[#allocation17 + $0x20] sm:$0xff]  }
 0x90d   :  { %v8090_v57 = vpack.c.bf16 %v8002_v29, %v7998_v60  ;;  %v7094_v27 = vpop.f32.mrb[40].mxu1  ;;  %v13304_v19 = vpop.f32.mrb[120].mxu0  ;;  %9910 = vmatprep.subr.bf16.mxu1 %v11221_v12 }
 0x90e   :  { %v10022_v62 = vadd.f32 %v7094_v27, %v13210_v24  ;;  %v7096_v50 = vpop.f32.mrb[41].mxu1  ;;  %v13307_v21 = vpop.f32.mrb[121].mxu0  ;;  %9911 = vmatpush3.bf16.msra.mxu1 %v11221_v12 }
 0x90f   :  { %v10023_v42 = vadd.f32 %v7096_v50, %v13214_v53  ;;  %v7098_v8 = vpop.f32.mrb[42].mxu1  ;;  %v13310_v20 = vpop.f32.mrb[122].mxu0  ;;  %8484 = vmatprep.mubr.bf16.mxu1 %v8090_v57 }
 0x910   :  { %v10024_v43 = vadd.f32 %v7098_v8, %v13210_v24  ;;  %v7100_v26 = vpop.f32.mrb[43].mxu1  ;;  %v13313_v46 = vpop.f32.mrb[123].mxu0  ;;  %8485 = vmatmul.mubr.bf16.gmra.mrb[116].mxu1 %v8089_v4  ;;  %v8005_v35 = vmax.f32 %v10022_v62, 0.0  ;;  %v11222_v62 = vld [vmem:[#allocation17 + $0x28] sm:$0xff]  }
 0x911   :  { %v10025_v58 = vadd.f32 %v7100_v26, %v13214_v53  ;;  %v8006_v3 = vmax.f32 %v10023_v42, 0.0  ;;  %9912 = vmatprep.subr.bf16.mxu1 %v11222_v62 }
 0x912   :  { %v8009_v63 = vmax.f32 %v10024_v43, 0.0  ;;  %9913 = vmatpush3.bf16.msra.mxu1 %v11222_v62 }
 0x913   :  { %v8010_v7 = vmax.f32 %v10025_v58, 0.0 }
 0x914   :  { %v8093_v45 = vpack.c.bf16 %v8009_v63, %v8005_v35 }
 0x915   :  { %v8094_v32 = vpack.c.bf16 %v8010_v7, %v8006_v3  ;;  %v7104_v37 = vpop.f32.mrb[44].mxu1  ;;  %v13316_v23 = vpop.f32.mrb[124].mxu0  ;;  %v11223_v3 = vld [vmem:[#allocation17 + $0x30] sm:$0xff]  }
 0x916   :  { %v10026_v14 = vadd.f32 %v7104_v37, %v13210_v24  ;;  %v7106_v56 = vpop.f32.mrb[45].mxu1  ;;  %v13319_v15 = vpop.f32.mrb[125].mxu0  ;;  %9914 = vmatprep.subr.bf16.mxu1 %v11223_v3 }
 0x917   :  { %v10027_v1 = vadd.f32 %v7106_v56, %v13214_v53  ;;  %v7108_v22 = vpop.f32.mrb[46].mxu1  ;;  %v13322_v52 = vpop.f32.mrb[126].mxu0  ;;  %8492 = vmatprep.mubr.bf16.mxu1 %v8094_v32  ;;  %9915 = vmatpush3.bf16.msra.mxu1 %v11223_v3  ;;  %v11224_v56 = vld [vmem:[#allocation17 + $0x38] sm:$0xff]  }
 0x918   :  { %v10028_v33 = vadd.f32 %v7108_v22, %v13210_v24  ;;  %v7110_v59 = vpop.f32.mrb[47].mxu1  ;;  %v13325_v11 = vpop.f32.mrb[127].mxu0  ;;  %8493 = vmatmul.mubr.bf16.gmra.mrb[120].mxu1 %v8093_v45  ;;  %v8013_v5 = vmax.f32 %v10026_v14, 0.0  ;;  %9916 = vmatprep.subr.bf16.mxu1 %v11224_v56 }
 0x919   :  { %v10029_v17 = vadd.f32 %v7110_v59, %v13214_v53  ;;  %v8014_v39 = vmax.f32 %v10027_v1, 0.0 }
 0x91a   :  { %v8017_v48 = vmax.f32 %v10028_v33, 0.0 }
 0x91b   :  { %v8018_v30 = vmax.f32 %v10029_v17, 0.0  ;;  %9917 = vmatpush3.bf16.msra.mxu1 %v11224_v56 }
 0x91c   :  { %v8097_v2 = vpack.c.bf16 %v8017_v48, %v8013_v5 }
 0x91d   :  { %v8098_v10 = vpack.c.bf16 %v8018_v30, %v8014_v39  ;;  %v7114_v28 = vpop.f32.mrb[48].mxu1 }
 0x91e   :  { %v10030_v0 = vadd.f32 %v7114_v28, %v13210_v24  ;;  %v7116_v49 = vpop.f32.mrb[49].mxu1 }
 0x91f   :  { %v10031_v13 = vadd.f32 %v7116_v49, %v13214_v53  ;;  %v7118_v18 = vpop.f32.mrb[50].mxu1  ;;  %8500 = vmatprep.mubr.bf16.mxu1 %v8098_v10 }
 0x920   :  { %v10032_v47 = vadd.f32 %v7118_v18, %v13210_v24  ;;  %v7120_v41 = vpop.f32.mrb[51].mxu1  ;;  %8501 = vmatmul.mubr.bf16.gmra.mrb[124].mxu1 %v8097_v2  ;;  %v8021_v60 = vmax.f32 %v10030_v0, 0.0 }
 0x921   :  { %v10033_v44 = vadd.f32 %v7120_v41, %v13214_v53  ;;  %v8022_v4 = vmax.f32 %v10031_v13, 0.0 }
 0x922   :  { %v8025_v29 = vmax.f32 %v10032_v47, 0.0 }
 0x923   :  { %v8026_v57 = vmax.f32 %v10033_v44, 0.0 }
 0x924   :  { %v8101_v27 = vpack.c.bf16 %v8025_v29, %v8021_v60 }
 0x925   :  { %v8102_v50 = vpack.c.bf16 %v8026_v57, %v8022_v4  ;;  %v7124_v42 = vpop.f32.mrb[52].mxu1 }
 0x926   :  { %v10034_v8 = vadd.f32 %v7124_v42, %v13210_v24  ;;  %v7126_v43 = vpop.f32.mrb[53].mxu1 }
 0x927   :  { %v10035_v26 = vadd.f32 %v7126_v43, %v13214_v53  ;;  %v7128_v58 = vpop.f32.mrb[54].mxu1  ;;  %8508 = vmatprep.mubr.bf16.mxu1 %v8102_v50 }
 0x928   :  { %v10036_v35 = vadd.f32 %v7128_v58, %v13210_v24  ;;  %v7130_v63 = vpop.f32.mrb[55].mxu1  ;;  %8509 = vmatmul.mubr.bf16.gmra.mrb[128].mxu1 %v8101_v27  ;;  %v8029_v45 = vmax.f32 %v10034_v8, 0.0 }
 0x929   :  { %v10037_v7 = vadd.f32 %v7130_v63, %v13214_v53  ;;  %v8030_v32 = vmax.f32 %v10035_v26, 0.0 }
 0x92a   :  { %v8033_v31 = vmax.f32 %v10036_v35, 0.0 }
 0x92b   :  { %v8034_v37 = vmax.f32 %v10037_v7, 0.0 }
 0x92c   :  { %v8105_v14 = vpack.c.bf16 %v8033_v31, %v8029_v45 }
 0x92d   :  { %v8106_v1 = vpack.c.bf16 %v8034_v37, %v8030_v32  ;;  %v7134_v22 = vpop.f32.mrb[56].mxu1 }
 0x92e   :  { %v10038_v55 = vadd.f32 %v7134_v22, %v13210_v24  ;;  %v7136_v33 = vpop.f32.mrb[57].mxu1 }
 0x92f   :  { %v10039_v59 = vadd.f32 %v7136_v33, %v13214_v53  ;;  %v7138_v17 = vpop.f32.mrb[58].mxu1  ;;  %8516 = vmatprep.mubr.bf16.mxu1 %v8106_v1 }
 0x930   :  { %v10040_v5 = vadd.f32 %v7138_v17, %v13210_v24  ;;  %v7140_v48 = vpop.f32.mrb[59].mxu1  ;;  %8517 = vmatmul.mubr.bf16.gmra.mrb[132].mxu1 %v8105_v14  ;;  %v8037_v30 = vmax.f32 %v10038_v55, 0.0 }
 0x931   :  { %v10041_v39 = vadd.f32 %v7140_v48, %v13214_v53  ;;  %v8038_v40 = vmax.f32 %v10039_v59, 0.0 }
 0x932   :  { %v8041_v2 = vmax.f32 %v10040_v5, 0.0 }
 0x933   :  { %v8042_v10 = vmax.f32 %v10041_v39, 0.0 }
 0x934   :  { %v8109_v28 = vpack.c.bf16 %v8041_v2, %v8037_v30 }
 0x935   :  { %v8110_v0 = vpack.c.bf16 %v8042_v10, %v8038_v40  ;;  %v7144_v49 = vpop.f32.mrb[60].mxu1 }
 0x936   :  { %v10042_v13 = vadd.f32 %v7144_v49, %v13210_v24  ;;  %v7146_v18 = vpop.f32.mrb[61].mxu1 }
 0x937   :  { %v10043_v47 = vadd.f32 %v7146_v18, %v13214_v53  ;;  %v7148_v41 = vpop.f32.mrb[62].mxu1  ;;  %8524 = vmatprep.mubr.bf16.mxu1 %v8110_v0 }
 0x938   :  { %v10044_v12 = vadd.f32 %v7148_v41, %v13210_v24  ;;  %v7150_v44 = vpop.f32.mrb[63].mxu1  ;;  %8525 = vmatmul.mubr.bf16.gmra.mrb[136].mxu1 %v8109_v28  ;;  %v8045_v29 = vmax.f32 %v10042_v13, 0.0 }
 0x939   :  { %v10045_v60 = vadd.f32 %v7150_v44, %v13214_v53  ;;  %v8046_v57 = vmax.f32 %v10043_v47, 0.0 }
 0x93a   :  { %v8049_v4 = vmax.f32 %v10044_v12, 0.0 }
 0x93b   :  { %v8050_v27 = vmax.f32 %v10045_v60, 0.0 }
 0x93c   :  { %v8113_v62 = vpack.c.bf16 %v8049_v4, %v8045_v29 }
 0x93d   :  { %v8114_v50 = vpack.c.bf16 %v8050_v27, %v8046_v57  ;;  %v7307_v42 = vpop.f32.mrb[64].mxu1 }
 0x93e   :  { %v7308_v8 = vadd.f32 %v7307_v42, %v13185_v54  ;;  %v7309_v43 = vpop.f32.mrb[65].mxu1 }
 0x93f   :  { %v7310_v26 = vadd.f32 %v7309_v43, %v13190_v9  ;;  %v7311_v58 = vpop.f32.mrb[66].mxu1  ;;  %8532 = vmatprep.mubr.bf16.mxu1 %v8114_v50 }
 0x940   :  { %v10095_v24 = vadd.f32 %v13280_v25, %v7308_v8  ;;  %v7312_v35 = vadd.f32 %v7311_v58, %v13185_v54  ;;  %v7313_v63 = vpop.f32.mrb[67].mxu1  ;;  %8533 = vmatmul.mubr.bf16.gmra.mrb[140].mxu1 %v8113_v62 }
 0x941   :  { %v10097_v53 = vadd.f32 %v13283_v38, %v7310_v26  ;;  %v7314_v3 = vadd.f32 %v7313_v63, %v13190_v9 }
 0x942   :  { %v10099_v7 = vadd.f32 %v13286_v61, %v7312_v35  ;;  %v8023_v31 = vmax.f32 %v10095_v24, 0.0 }
 0x943   :  { %v10101_v45 = vadd.f32 %v13289_v16, %v7314_v3  ;;  %v8024_v37 = vmax.f32 %v10097_v53, 0.0 }
 0x944   :  { %v8027_v32 = vmax.f32 %v10099_v7, 0.0 }
 0x945   :  { %v8028_v14 = vmax.f32 %v10101_v45, 0.0  ;;  %v7317_v56 = vpop.f32.mrb[68].mxu1 }
 0x946   :  { %v8103_v1 = vpack.c.bf16 %v8027_v32, %v8023_v31  ;;  %v7318_v25 = vadd.f32 %v7317_v56, %v13185_v54  ;;  %v7319_v22 = vpop.f32.mrb[69].mxu1 }
 0x947   :  { %v7320_v55 = vadd.f32 %v7319_v22, %v13190_v9  ;;  %v7321_v33 = vpop.f32.mrb[70].mxu1  ;;  %v8104_v59 = vpack.c.bf16 %v8028_v14, %v8024_v37 }
 0x948   :  { %v10103_v38 = vadd.f32 %v13292_v6, %v7318_v25  ;;  %v7322_v17 = vadd.f32 %v7321_v33, %v13185_v54  ;;  %v7323_v61 = vpop.f32.mrb[71].mxu1 }
 0x949   :  { %v10105_v16 = vadd.f32 %v13295_v34, %v7320_v55  ;;  %v7324_v5 = vadd.f32 %v7323_v61, %v13190_v9  ;;  %8669 = vmatprep.mubr.bf16.mxu0 %v8104_v59 }
 0x94a   :  { %v10107_v48 = vadd.f32 %v13298_v36, %v7322_v17  ;;  %8670 = vmatmul.mubr.bf16.gmra.mrb[176].mxu0 %v8103_v1  ;;  %v8031_v30 = vmax.f32 %v10103_v38, 0.0 }
 0x94b   :  { %v10109_v39 = vadd.f32 %v13301_v51, %v7324_v5  ;;  %v8032_v40 = vmax.f32 %v10105_v16, 0.0 }
 0x94c   :  { %v8035_v2 = vmax.f32 %v10107_v48, 0.0 }
 0x94d   :  { %v8036_v10 = vmax.f32 %v10109_v39, 0.0  ;;  %v7327_v28 = vpop.f32.mrb[72].mxu1 }
 0x94e   :  { %v8107_v0 = vpack.c.bf16 %v8035_v2, %v8031_v30  ;;  %v7328_v6 = vadd.f32 %v7327_v28, %v13185_v54  ;;  %v7329_v49 = vpop.f32.mrb[73].mxu1  ;;  %v13387_v28 = vld [vmem:[%s13539_s17] ss:$0 sm:$0xff] }
 0x94f   :  { %v7330_v13 = vadd.f32 %v7329_v49, %v13190_v9  ;;  %v7331_v34 = vpop.f32.mrb[74].mxu1  ;;  %v8108_v18 = vpack.c.bf16 %v8036_v10, %v8032_v40 }
 0x950   :  { %v10111_v47 = vadd.f32 %v13304_v19, %v7328_v6  ;;  %v7332_v36 = vadd.f32 %v7331_v34, %v13185_v54  ;;  %v7333_v41 = vpop.f32.mrb[75].mxu1 }
 0x951   :  { %v10113_v51 = vadd.f32 %v13307_v21, %v7330_v13  ;;  %v7334_v12 = vadd.f32 %v7333_v41, %v13190_v9  ;;  %8677 = vmatprep.mubr.bf16.mxu0 %v8108_v18 }
 0x952   :  { %v10115_v44 = vadd.f32 %v13310_v20, %v7332_v36  ;;  %8678 = vmatmul.mubr.bf16.gmra.mrb[180].mxu0 %v8107_v0  ;;  %v8039_v29 = vmax.f32 %v10111_v47, 0.0 }
 0x953   :  { %v10117_v60 = vadd.f32 %v13313_v46, %v7334_v12  ;;  %v8040_v57 = vmax.f32 %v10113_v51, 0.0 }
 0x954   :  { %v8043_v4 = vmax.f32 %v10115_v44, 0.0 }
 0x955   :  { %v8044_v27 = vmax.f32 %v10117_v60, 0.0  ;;  %v7337_v62 = vpop.f32.mrb[76].mxu1 }
 0x956   :  { %v8111_v50 = vpack.c.bf16 %v8043_v4, %v8039_v29  ;;  %v7338_v19 = vadd.f32 %v7337_v62, %v13185_v54  ;;  %v7339_v42 = vpop.f32.mrb[77].mxu1 }
 0x957   :  { %v7340_v8 = vadd.f32 %v7339_v42, %v13190_v9  ;;  %v7341_v21 = vpop.f32.mrb[78].mxu1  ;;  %v8112_v43 = vpack.c.bf16 %v8044_v27, %v8040_v57 }
 0x958   :  { %v10119_v26 = vadd.f32 %v13316_v23, %v7338_v19  ;;  %v7342_v20 = vadd.f32 %v7341_v21, %v13185_v54  ;;  %v7343_v58 = vpop.f32.mrb[79].mxu1 }
 0x959   :  { %v10121_v46 = vadd.f32 %v13319_v15, %v7340_v8  ;;  %v7344_v24 = vadd.f32 %v7343_v58, %v13190_v9  ;;  %8685 = vmatprep.mubr.bf16.mxu0 %v8112_v43 }
 0x95a   :  { %v10123_v35 = vadd.f32 %v13322_v52, %v7342_v20  ;;  %8686 = vmatmul.mubr.bf16.gmra.mrb[184].mxu0 %v8111_v50  ;;  %v8047_v53 = vmax.f32 %v10119_v26, 0.0 }
 0x95b   :  { %v10125_v63 = vadd.f32 %v13325_v11, %v7344_v24  ;;  %v8048_v7 = vmax.f32 %v10121_v46, 0.0 }
 0x95c   :  { %v8051_v3 = vmax.f32 %v10123_v35, 0.0 }
 0x95d   :  { %v8052_v45 = vmax.f32 %v10125_v63, 0.0 }
 0x95e   :  { %v8115_v31 = vpack.c.bf16 %v8051_v3, %v8047_v53 }
 0x95f   :  { %v8116_v32 = vpack.c.bf16 %v8052_v45, %v8048_v7 }
 0x961   :  { %8693 = vmatprep.mubr.bf16.mxu0 %v8116_v32 }
 0x962   :  { %8694 = vmatmul.mubr.bf16.gmra.mrb[188].mxu0 %v8115_v31 }
 0x97b   :  { %v9782_v54 = vpop.f32.mrb[128].mxu0 }
 0x97c   :  { %v9783_v23 = vpop.f32.mrb[129].mxu0 }
 0x97d   :  { %v9784_v37 = vadd.f32 %v9783_v23, %v9782_v54  ;;  %v9785_v15 = vpop.f32.mrb[130].mxu0 }
 0x97e   :  { %v9786_v14 = vpop.f32.mrb[131].mxu0 }
 0x97f   :  { %v9787_v9 = vadd.f32 %v9786_v14, %v9785_v15 }
 0x983   :  { %v9788_v56 = vpop.f32.mrb[132].mxu0 }
 0x984   :  { %v9789_v1 = vpop.f32.mrb[133].mxu0 }
 0x985   :  { %v9790_v52 = vadd.f32 %v9789_v1, %v9788_v56  ;;  %v9791_v25 = vpop.f32.mrb[134].mxu0 }
 0x986   :  { %v9792_v22 = vpop.f32.mrb[135].mxu0 }
 0x987   :  { %v9793_v11 = vadd.f32 %v9792_v22, %v9791_v25 }
 0x98b   :  { %v9794_v55 = vpop.f32.mrb[136].mxu0 }
 0x98c   :  { %v9795_v33 = vpop.f32.mrb[137].mxu0 }
 0x98d   :  { %v13376_v59 = vadd.f32 %v9795_v33, %v9794_v55  ;;  %v9797_v38 = vpop.f32.mrb[138].mxu0 }
 0x98e   :  { %v9798_v17 = vpop.f32.mrb[139].mxu0 }
 0x98f   :  { %v13378_v61 = vadd.f32 %v9798_v17, %v9797_v38 }
 0x993   :  { %v9800_v16 = vpop.f32.mrb[140].mxu0 }
 0x994   :  { %v9801_v5 = vpop.f32.mrb[141].mxu0 }
 0x995   :  { %v13380_v48 = vadd.f32 %v9801_v5, %v9800_v16  ;;  %v9803_v39 = vpop.f32.mrb[142].mxu0 }
 0x996   :  { %v9804_v30 = vpop.f32.mrb[143].mxu0 }
 0x997   :  { %v13382_v2 = vadd.f32 %v9804_v30, %v9803_v39 }
 0x99b   :  { %v9670_v40 = vpop.f32.mrb[80].mxu1  ;;  %v9806_v10 = vpop.f32.mrb[144].mxu0 }
 0x99c   :  { %v9671_v0 = vpop.f32.mrb[81].mxu1  ;;  %v9807_v6 = vpop.f32.mrb[145].mxu0 }
 0x99d   :  { %v9672_v49 = vadd.f32 %v9671_v0, %v9670_v40  ;;  %v13389_v13 = vadd.f32 %v9807_v6, %v9806_v10  ;;  %v9673_v34 = vpop.f32.mrb[82].mxu1  ;;  %v9809_v18 = vpop.f32.mrb[146].mxu0 }
 0x99e   :  { %v9674_v47 = vpop.f32.mrb[83].mxu1  ;;  %v9810_v36 = vpop.f32.mrb[147].mxu0 }
 0x99f   :  { %v8415_v41 = vadd.f32 %v9672_v49, %v13387_v28  ;;  %v9675_v51 = vadd.f32 %v9674_v47, %v9673_v34  ;;  %v13392_v12 = vadd.f32 %v9810_v36, %v9809_v18 }
 0x9a1   :  { %v8576_v44 = vadd.f32 %v9784_v37, %v8415_v41  ;;  %v8418_v60 = vadd.f32 %v9675_v51, %v13387_v28 }
 0x9a3   :  { %v8579_v29 = vadd.f32 %v9787_v9, %v8418_v60  ;;  %v9676_v4 = vpop.f32.mrb[84].mxu1  ;;  %v9812_v57 = vpop.f32.mrb[148].mxu0  ;;  %v8702_v50 = vmax.f32 %v8576_v44, 0.0 }
 0x9a4   :  { %v9677_v27 = vpop.f32.mrb[85].mxu1  ;;  %v9813_v62 = vpop.f32.mrb[149].mxu0 }
 0x9a5   :  { %v8703_v19 = vmax.f32 %v8579_v29, 0.0  ;;  %v9678_v42 = vadd.f32 %v9677_v27, %v9676_v4  ;;  %v13395_v8 = vadd.f32 %v9813_v62, %v9812_v57  ;;  %v9679_v21 = vpop.f32.mrb[86].mxu1  ;;  %v9815_v43 = vpop.f32.mrb[150].mxu0 }
 0x9a6   :  { %v9680_v26 = vpop.f32.mrb[87].mxu1  ;;  %v9816_v20 = vpop.f32.mrb[151].mxu0 }
 0x9a7   :  { %v8423_v58 = vadd.f32 %v9678_v42, %v13387_v28  ;;  %v9681_v46 = vadd.f32 %v9680_v26, %v9679_v21  ;;  %v13398_v24 = vadd.f32 %v9816_v20, %v9815_v43  ;;  %v8734_v35 = vpack.c.bf16 %v8703_v19, %v8702_v50 }
 0x9a9   :  { %v8584_v63 = vadd.f32 %v9790_v52, %v8423_v58  ;;  %v8426_v53 = vadd.f32 %v9681_v46, %v13387_v28  ;;  %9918 = vmatprep.mubr.bf16.mxu1 %v8734_v35 }
 0x9ab   :  { %v8587_v3 = vadd.f32 %v9793_v11, %v8426_v53  ;;  %v9682_v7 = vpop.f32.mrb[88].mxu1  ;;  %v9818_v45 = vpop.f32.mrb[152].mxu0  ;;  %v8704_v54 = vmax.f32 %v8584_v63, 0.0 }
 0x9ac   :  { %v9683_v31 = vpop.f32.mrb[89].mxu1  ;;  %v9819_v32 = vpop.f32.mrb[153].mxu0 }
 0x9ad   :  { %v8705_v23 = vmax.f32 %v8587_v3, 0.0  ;;  %v9684_v37 = vadd.f32 %v9683_v31, %v9682_v7  ;;  %v13401_v15 = vadd.f32 %v9819_v32, %v9818_v45  ;;  %v9685_v14 = vpop.f32.mrb[90].mxu1  ;;  %v9821_v9 = vpop.f32.mrb[154].mxu0 }
 0x9ae   :  { %v9686_v56 = vpop.f32.mrb[91].mxu1  ;;  %v9822_v1 = vpop.f32.mrb[155].mxu0 }
 0x9af   :  { %v8735_v25 = vpack.c.bf16 %v8705_v23, %v8704_v54  ;;  %v8431_v52 = vadd.f32 %v9684_v37, %v13387_v28  ;;  %v9687_v22 = vadd.f32 %v9686_v56, %v9685_v14  ;;  %v13404_v55 = vadd.f32 %v9822_v1, %v9821_v9 }
 0x9b1   :  { %v8592_v11 = vadd.f32 %v13376_v59, %v8431_v52  ;;  %v8434_v33 = vadd.f32 %v9687_v22, %v13387_v28  ;;  %9919 = vmatmul.mubr.bf16.vlgmr.msra.gmra.mrb[144].mxu1 %v8735_v25 }
 0x9b3   :  { %v8595_v38 = vadd.f32 %v13378_v61, %v8434_v33  ;;  %v9688_v17 = vpop.f32.mrb[92].mxu1  ;;  %v9824_v16 = vpop.f32.mrb[156].mxu0  ;;  %v8706_v30 = vmax.f32 %v8592_v11, 0.0 }
 0x9b4   :  { %v9689_v5 = vpop.f32.mrb[93].mxu1  ;;  %v9825_v39 = vpop.f32.mrb[157].mxu0 }
 0x9b5   :  { %v8707_v40 = vmax.f32 %v8595_v38, 0.0  ;;  %v9690_v10 = vadd.f32 %v9689_v5, %v9688_v17  ;;  %v13409_v0 = vadd.f32 %v9825_v39, %v9824_v16  ;;  %v9691_v6 = vpop.f32.mrb[94].mxu1  ;;  %v9827_v49 = vpop.f32.mrb[158].mxu0 }
 0x9b6   :  { %v9692_v34 = vpop.f32.mrb[95].mxu1  ;;  %v9828_v18 = vpop.f32.mrb[159].mxu0 }
 0x9b7   :  { %v8439_v59 = vadd.f32 %v9690_v10, %v13387_v28  ;;  %v9693_v47 = vadd.f32 %v9692_v34, %v9691_v6  ;;  %v13412_v36 = vadd.f32 %v9828_v18, %v9827_v49  ;;  %v8736_v41 = vpack.c.bf16 %v8707_v40, %v8706_v30 }
 0x9b9   :  { %v8600_v61 = vadd.f32 %v13380_v48, %v8439_v59  ;;  %v8442_v51 = vadd.f32 %v9693_v47, %v13387_v28  ;;  %9922 = vmatprep.mubr.bf16.mxu1 %v8736_v41 }
 0x9bb   :  { %v8603_v44 = vadd.f32 %v13382_v2, %v8442_v51  ;;  %v9694_v60 = vpop.f32.mrb[96].mxu1  ;;  %v9830_v29 = vpop.f32.mrb[160].mxu0  ;;  %v8708_v27 = vmax.f32 %v8600_v61, 0.0 }
 0x9bc   :  { %v9695_v4 = vpop.f32.mrb[97].mxu1  ;;  %v9831_v57 = vpop.f32.mrb[161].mxu0 }
 0x9bd   :  { %v8709_v62 = vmax.f32 %v8603_v44, 0.0  ;;  %v9696_v50 = vadd.f32 %v9695_v4, %v9694_v60  ;;  %v13417_v19 = vadd.f32 %v9831_v57, %v9830_v29  ;;  %v9697_v42 = vpop.f32.mrb[98].mxu1  ;;  %v9833_v21 = vpop.f32.mrb[162].mxu0 }
 0x9be   :  { %v9698_v43 = vpop.f32.mrb[99].mxu1  ;;  %v9834_v26 = vpop.f32.mrb[163].mxu0 }
 0x9bf   :  { %v8737_v20 = vpack.c.bf16 %v8709_v62, %v8708_v27  ;;  %v8447_v48 = vadd.f32 %v9696_v50, %v13387_v28  ;;  %v9699_v58 = vadd.f32 %v9698_v43, %v9697_v42  ;;  %v13420_v46 = vadd.f32 %v9834_v26, %v9833_v21 }
 0x9c1   :  { %v8608_v2 = vadd.f32 %v13389_v13, %v8447_v48  ;;  %v8450_v35 = vadd.f32 %v9699_v58, %v13387_v28  ;;  %9923 = vmatmul.mubr.bf16.gmra.mrb[148].mxu1 %v8737_v20 }
 0x9c3   :  { %v8611_v63 = vadd.f32 %v13392_v12, %v8450_v35  ;;  %v9700_v53 = vpop.f32.mrb[100].mxu1  ;;  %v9836_v3 = vpop.f32.mrb[164].mxu0  ;;  %v8710_v31 = vmax.f32 %v8608_v2, 0.0 }
 0x9c4   :  { %v9701_v7 = vpop.f32.mrb[101].mxu1  ;;  %v9837_v45 = vpop.f32.mrb[165].mxu0 }
 0x9c5   :  { %v8711_v32 = vmax.f32 %v8611_v63, 0.0  ;;  %v9702_v54 = vadd.f32 %v9701_v7, %v9700_v53  ;;  %v13425_v23 = vadd.f32 %v9837_v45, %v9836_v3  ;;  %v9703_v37 = vpop.f32.mrb[102].mxu1  ;;  %v9839_v14 = vpop.f32.mrb[166].mxu0 }
 0x9c6   :  { %v9704_v9 = vpop.f32.mrb[103].mxu1  ;;  %v9840_v56 = vpop.f32.mrb[167].mxu0 }
 0x9c7   :  { %v8455_v13 = vadd.f32 %v9702_v54, %v13387_v28  ;;  %v9705_v1 = vadd.f32 %v9704_v9, %v9703_v37  ;;  %v13428_v25 = vadd.f32 %v9840_v56, %v9839_v14  ;;  %v8738_v52 = vpack.c.bf16 %v8711_v32, %v8710_v31 }
 0x9c9   :  { %v8616_v12 = vadd.f32 %v13395_v8, %v8455_v13  ;;  %v8458_v22 = vadd.f32 %v9705_v1, %v13387_v28  ;;  %9926 = vmatprep.mubr.bf16.mxu1 %v8738_v52 }
 0x9cb   :  { %v8619_v11 = vadd.f32 %v13398_v24, %v8458_v22  ;;  %v9706_v33 = vpop.f32.mrb[104].mxu1  ;;  %v9842_v38 = vpop.f32.mrb[168].mxu0  ;;  %v8712_v5 = vmax.f32 %v8616_v12, 0.0 }
 0x9cc   :  { %v9707_v17 = vpop.f32.mrb[105].mxu1  ;;  %v9843_v16 = vpop.f32.mrb[169].mxu0 }
 0x9cd   :  { %v8713_v39 = vmax.f32 %v8619_v11, 0.0  ;;  %v9708_v30 = vadd.f32 %v9707_v17, %v9706_v33  ;;  %v13433_v40 = vadd.f32 %v9843_v16, %v9842_v38  ;;  %v9709_v10 = vpop.f32.mrb[106].mxu1  ;;  %v9845_v6 = vpop.f32.mrb[170].mxu0 }
 0x9ce   :  { %v9710_v49 = vpop.f32.mrb[107].mxu1  ;;  %v9846_v34 = vpop.f32.mrb[171].mxu0 }
 0x9cf   :  { %v8739_v18 = vpack.c.bf16 %v8713_v39, %v8712_v5  ;;  %v8463_v8 = vadd.f32 %v9708_v30, %v13387_v28  ;;  %v9711_v59 = vadd.f32 %v9710_v49, %v9709_v10  ;;  %v13436_v47 = vadd.f32 %v9846_v34, %v9845_v6 }
 0x9d1   :  { %v8624_v24 = vadd.f32 %v13401_v15, %v8463_v8  ;;  %v8466_v41 = vadd.f32 %v9711_v59, %v13387_v28  ;;  %9927 = vmatmul.mubr.bf16.gmra.mrb[152].mxu1 %v8739_v18 }
 0x9d3   :  { %v8627_v61 = vadd.f32 %v13404_v55, %v8466_v41  ;;  %v9712_v51 = vpop.f32.mrb[108].mxu1  ;;  %v9848_v44 = vpop.f32.mrb[172].mxu0  ;;  %v8714_v4 = vmax.f32 %v8624_v24, 0.0 }
 0x9d4   :  { %v9713_v60 = vpop.f32.mrb[109].mxu1  ;;  %v9849_v29 = vpop.f32.mrb[173].mxu0 }
 0x9d5   :  { %v8715_v57 = vmax.f32 %v8627_v61, 0.0  ;;  %v9714_v27 = vadd.f32 %v9713_v60, %v9712_v51  ;;  %v13441_v62 = vadd.f32 %v9849_v29, %v9848_v44  ;;  %v9715_v50 = vpop.f32.mrb[110].mxu1  ;;  %v9851_v42 = vpop.f32.mrb[174].mxu0 }
 0x9d6   :  { %v9716_v21 = vpop.f32.mrb[111].mxu1  ;;  %v9852_v43 = vpop.f32.mrb[175].mxu0 }
 0x9d7   :  { %v8471_v15 = vadd.f32 %v9714_v27, %v13387_v28  ;;  %v9717_v26 = vadd.f32 %v9716_v21, %v9715_v50  ;;  %v9853_v20 = vadd.f32 %v9852_v43, %v9851_v42  ;;  %v8740_v48 = vpack.c.bf16 %v8715_v57, %v8714_v4 }
 0x9d9   :  { %v8632_v55 = vadd.f32 %v13409_v0, %v8471_v15  ;;  %v8474_v58 = vadd.f32 %v9717_v26, %v13387_v28  ;;  %9930 = vmatprep.mubr.bf16.mxu1 %v8740_v48 }
 0x9db   :  { %v8635_v2 = vadd.f32 %v13412_v36, %v8474_v58  ;;  %v9718_v35 = vpop.f32.mrb[112].mxu1  ;;  %v8716_v53 = vmax.f32 %v8632_v55, 0.0 }
 0x9dc   :  { %v9719_v63 = vpop.f32.mrb[113].mxu1 }
 0x9dd   :  { %v8717_v3 = vmax.f32 %v8635_v2, 0.0  ;;  %v9720_v7 = vadd.f32 %v9719_v63, %v9718_v35  ;;  %v9721_v45 = vpop.f32.mrb[114].mxu1 }
 0x9de   :  { %v9722_v31 = vpop.f32.mrb[115].mxu1 }
 0x9df   :  { %v8741_v32 = vpack.c.bf16 %v8717_v3, %v8716_v53  ;;  %v8479_v54 = vadd.f32 %v9720_v7, %v13387_v28  ;;  %v9723_v37 = vadd.f32 %v9722_v31, %v9721_v45 }
 0x9e1   :  { %v8640_v14 = vadd.f32 %v13417_v19, %v8479_v54  ;;  %v8482_v0 = vadd.f32 %v9723_v37, %v13387_v28  ;;  %9931 = vmatmul.mubr.bf16.gmra.mrb[156].mxu1 %v8741_v32 }
 0x9e3   :  { %v8643_v9 = vadd.f32 %v13420_v46, %v8482_v0  ;;  %v9724_v56 = vpop.f32.mrb[116].mxu1  ;;  %v8718_v13 = vmax.f32 %v8640_v14, 0.0 }
 0x9e4   :  { %v9725_v36 = vpop.f32.mrb[117].mxu1 }
 0x9e5   :  { %v8719_v1 = vmax.f32 %v8643_v9, 0.0  ;;  %v9726_v52 = vadd.f32 %v9725_v36, %v9724_v56  ;;  %v9727_v12 = vpop.f32.mrb[118].mxu1 }
 0x9e6   :  { %v9728_v22 = vpop.f32.mrb[119].mxu1 }
 0x9e7   :  { %v8487_v11 = vadd.f32 %v9726_v52, %v13387_v28  ;;  %v9729_v33 = vadd.f32 %v9728_v22, %v9727_v12  ;;  %v8742_v38 = vpack.c.bf16 %v8719_v1, %v8718_v13 }
 0x9e9   :  { %v8648_v17 = vadd.f32 %v13425_v23, %v8487_v11  ;;  %v8490_v19 = vadd.f32 %v9729_v33, %v13387_v28  ;;  %9934 = vmatprep.mubr.bf16.mxu1 %v8742_v38 }
 0x9eb   :  { %v8651_v16 = vadd.f32 %v13428_v25, %v8490_v19  ;;  %v9730_v5 = vpop.f32.mrb[120].mxu1  ;;  %v8720_v39 = vmax.f32 %v8648_v17, 0.0 }
 0x9ec   :  { %v9731_v46 = vpop.f32.mrb[121].mxu1 }
 0x9ed   :  { %v8721_v30 = vmax.f32 %v8651_v16, 0.0  ;;  %v9732_v10 = vadd.f32 %v9731_v46, %v9730_v5  ;;  %v9733_v6 = vpop.f32.mrb[122].mxu1 }
 0x9ee   :  { %v9734_v49 = vpop.f32.mrb[123].mxu1 }
 0x9ef   :  { %v8743_v34 = vpack.c.bf16 %v8721_v30, %v8720_v39  ;;  %v8495_v18 = vadd.f32 %v9732_v10, %v13387_v28  ;;  %v9735_v8 = vadd.f32 %v9734_v49, %v9733_v6 }
 0x9f1   :  { %v8656_v59 = vadd.f32 %v13433_v40, %v8495_v18  ;;  %v8498_v23 = vadd.f32 %v9735_v8, %v13387_v28  ;;  %9935 = vmatmul.mubr.bf16.gmra.mrb[160].mxu1 %v8743_v34 }
 0x9f3   :  { %v8659_v24 = vadd.f32 %v13436_v47, %v8498_v23  ;;  %v9736_v41 = vpop.f32.mrb[124].mxu1  ;;  %v8722_v61 = vmax.f32 %v8656_v59, 0.0 }
 0x9f4   :  { %v9737_v25 = vpop.f32.mrb[125].mxu1 }
 0x9f5   :  { %v8723_v51 = vmax.f32 %v8659_v24, 0.0  ;;  %v9738_v44 = vadd.f32 %v9737_v25, %v9736_v41  ;;  %v9739_v60 = vpop.f32.mrb[126].mxu1 }
 0x9f6   :  { %v9740_v29 = vpop.f32.mrb[127].mxu1 }
 0x9f7   :  { %v8503_v4 = vadd.f32 %v9738_v44, %v13387_v28  ;;  %v9741_v57 = vadd.f32 %v9740_v29, %v9739_v60  ;;  %v8744_v27 = vpack.c.bf16 %v8723_v51, %v8722_v61 }
 0x9f9   :  { %v8664_v50 = vadd.f32 %v13441_v62, %v8503_v4  ;;  %v8506_v40 = vadd.f32 %v9741_v57, %v13387_v28  ;;  %9938 = vmatprep.mubr.bf16.mxu1 %v8744_v27 }
 0x9fb   :  { %v8667_v42 = vadd.f32 %v9853_v20, %v8506_v40  ;;  %v9742_v21 = vpop.f32.mrb[128].mxu1  ;;  %v8724_v47 = vmax.f32 %v8664_v50, 0.0 }
 0x9fc   :  { %v9743_v43 = vpop.f32.mrb[129].mxu1 }
 0x9fd   :  { %v8725_v15 = vmax.f32 %v8667_v42, 0.0  ;;  %v9744_v26 = vadd.f32 %v9743_v43, %v9742_v21  ;;  %v9745_v48 = vpop.f32.mrb[130].mxu1 }
 0x9fe   :  { %v9746_v55 = vpop.f32.mrb[131].mxu1 }
 0x9ff   :  { %v8745_v58 = vpack.c.bf16 %v8725_v15, %v8724_v47  ;;  %v9747_v2 = vadd.f32 %v9746_v55, %v9745_v48  ;;  %v8511_v12 = vadd.f32 %v9744_v26, %v13387_v28 }
 0xa01   :  { %9939 = vmatmul.mubr.bf16.gmra.mrb[164].mxu1 %v8745_v58  ;;  %v8514_v38 = vadd.f32 %v9747_v2, %v13387_v28 }
 0xa03   :  { %v9748_v35 = vpop.f32.mrb[132].mxu1 }
 0xa04   :  { %v9749_v63 = vpop.f32.mrb[133].mxu1 }
 0xa05   :  { %v9750_v53 = vadd.f32 %v9749_v63, %v9748_v35  ;;  %v9751_v3 = vpop.f32.mrb[134].mxu1 }
 0xa06   :  { %v9752_v7 = vpop.f32.mrb[135].mxu1 }
 0xa07   :  { %v9753_v62 = vadd.f32 %v9752_v7, %v9751_v3  ;;  %v8519_v10 = vadd.f32 %v9750_v53, %v13387_v28 }
 0xa09   :  { %v8522_v8 = vadd.f32 %v9753_v62, %v13387_v28 }
 0xa0b   :  { %v9754_v45 = vpop.f32.mrb[136].mxu1 }
 0xa0c   :  { %v9755_v31 = vpop.f32.mrb[137].mxu1 }
 0xa0d   :  { %v9756_v32 = vadd.f32 %v9755_v31, %v9754_v45  ;;  %v9757_v20 = vpop.f32.mrb[138].mxu1  ;;  %v13473_v31 = vld [vmem:[%s13694_s21] ss:$0 sm:$0xff] }
 0xa0e   :  { %v9758_v54 = vpop.f32.mrb[139].mxu1 }
 0xa0f   :  { %v9759_v37 = vadd.f32 %v9758_v54, %v9757_v20  ;;  %v8527_v44 = vadd.f32 %v9756_v32, %v13387_v28 }
 0xa11   :  { %v8530_v27 = vadd.f32 %v9759_v37, %v13387_v28 }
 0xa13   :  { %v9760_v14 = vpop.f32.mrb[140].mxu1 }
 0xa14   :  { %v9761_v0 = vpop.f32.mrb[141].mxu1 }
 0xa15   :  { %v9762_v9 = vadd.f32 %v9761_v0, %v9760_v14  ;;  %v9763_v56 = vpop.f32.mrb[142].mxu1 }
 0xa16   :  { %v9764_v36 = vpop.f32.mrb[143].mxu1 }
 0xa17   :  { %v9765_v13 = vadd.f32 %v9764_v36, %v9763_v56  ;;  %v8535_v26 = vadd.f32 %v9762_v9, %v13387_v28 }
 0xa19   :  { %v8538_v35 = vadd.f32 %v9765_v13, %v13387_v28 }
 0xa1d   :  { %v9854_v1 = vpop.f32.mrb[176].mxu0 }
 0xa1e   :  { %v9855_v52 = vpop.f32.mrb[177].mxu0 }
 0xa1f   :  { %v9856_v22 = vadd.f32 %v9855_v52, %v9854_v1  ;;  %v9857_v11 = vpop.f32.mrb[178].mxu0 }
 0xa20   :  { %v9858_v33 = vpop.f32.mrb[179].mxu0 }
 0xa21   :  { %v8672_v17 = vadd.f32 %v9856_v22, %v8511_v12  ;;  %v9859_v19 = vadd.f32 %v9858_v33, %v9857_v11 }
 0xa23   :  { %v8675_v16 = vadd.f32 %v9859_v19, %v8514_v38  ;;  %v8726_v5 = vmax.f32 %v8672_v17, 0.0 }
 0xa25   :  { %v8727_v46 = vmax.f32 %v8675_v16, 0.0  ;;  %v9860_v39 = vpop.f32.mrb[180].mxu0 }
 0xa26   :  { %v9861_v30 = vpop.f32.mrb[181].mxu0 }
 0xa27   :  { %v9862_v6 = vadd.f32 %v9861_v30, %v9860_v39  ;;  %v9863_v49 = vpop.f32.mrb[182].mxu0  ;;  %v8746_v34 = vpack.c.bf16 %v8727_v46, %v8726_v5 }
 0xa28   :  { %v9864_v18 = vpop.f32.mrb[183].mxu0 }
 0xa29   :  { %v8680_v59 = vadd.f32 %v9862_v6, %v8519_v10  ;;  %v9865_v23 = vadd.f32 %v9864_v18, %v9863_v49  ;;  %9942 = vmatprep.mubr.bf16.mxu1 %v8746_v34 }
 0xa2b   :  { %v8683_v24 = vadd.f32 %v9865_v23, %v8522_v8  ;;  %v8728_v41 = vmax.f32 %v8680_v59, 0.0 }
 0xa2d   :  { %v8729_v25 = vmax.f32 %v8683_v24, 0.0  ;;  %v9866_v61 = vpop.f32.mrb[184].mxu0 }
 0xa2e   :  { %v9867_v51 = vpop.f32.mrb[185].mxu0 }
 0xa2f   :  { %v8747_v60 = vpack.c.bf16 %v8729_v25, %v8728_v41  ;;  %v9868_v29 = vadd.f32 %v9867_v51, %v9866_v61  ;;  %v9869_v4 = vpop.f32.mrb[186].mxu0 }
 0xa30   :  { %v9870_v57 = vpop.f32.mrb[187].mxu0 }
 0xa31   :  { %v8688_v50 = vadd.f32 %v9868_v29, %v8527_v44  ;;  %v9871_v40 = vadd.f32 %v9870_v57, %v9869_v4  ;;  %9943 = vmatmul.mubr.bf16.gmra.mrb[168].mxu1 %v8747_v60 }
 0xa33   :  { %v8691_v42 = vadd.f32 %v9871_v40, %v8530_v27  ;;  %v8730_v21 = vmax.f32 %v8688_v50, 0.0 }
 0xa35   :  { %v8731_v43 = vmax.f32 %v8691_v42, 0.0  ;;  %v9872_v47 = vpop.f32.mrb[188].mxu0 }
 0xa36   :  { %v9873_v15 = vpop.f32.mrb[189].mxu0 }
 0xa37   :  { %v9874_v48 = vadd.f32 %v9873_v15, %v9872_v47  ;;  %v9875_v55 = vpop.f32.mrb[190].mxu0  ;;  %v8748_v58 = vpack.c.bf16 %v8731_v43, %v8730_v21 }
 0xa38   :  { %v9876_v2 = vpop.f32.mrb[191].mxu0 }
 0xa39   :  { %v8696_v63 = vadd.f32 %v9874_v48, %v8535_v26  ;;  %v9877_v53 = vadd.f32 %v9876_v2, %v9875_v55  ;;  %9946 = vmatprep.mubr.bf16.mxu1 %v8748_v58 }
 0xa3b   :  { %v8699_v3 = vadd.f32 %v9877_v53, %v8538_v35  ;;  %v8732_v7 = vmax.f32 %v8696_v63, 0.0 }
 0xa3d   :  { %v8733_v62 = vmax.f32 %v8699_v3, 0.0 }
 0xa3f   :  { %v8749_v45 = vpack.c.bf16 %v8733_v62, %v8732_v7 }
 0xa41   :  { %9947 = vmatmul.mubr.bf16.gmra.mrb[172].mxu1 %v8749_v45 }
 0xa84   :  { %v9920_v32 = vpop.f32.mrb[144].mxu1 }
 0xa85   :  { %v8864_v20 = vadd.f32 %v9920_v32, %v13473_v31  ;;  %v8855_v54 = vpop.f32.mrb[145].mxu1 }
 0xa86   :  { %v8856_v37 = vadd.f32 %v13473_v31, %v8855_v54  ;;  %v9921_v28 = vpop.f32.mrb[146].mxu1 }
 0xa87   :  { %8984 = vst [vmem:[#allocation19 + $0x10] sm:$0xff] %v8864_v20  ;;  %v8867_v14 = vadd.f32 %v9921_v28, %v13473_v31  ;;  %v8858_v0 = vpop.f32.mrb[147].mxu1 }
 0xa88   :  { %8982 = vst [vmem:[#allocation19] sm:$0xff] %v8856_v37  ;;  %v8859_v9 = vadd.f32 %v13473_v31, %v8858_v0 }
 0xa89   :  { %8985 = vst [vmem:[#allocation19 + $0x18] sm:$0xff] %v8867_v14 }
 0xa8a   :  { %8983 = vst [vmem:[#allocation19 + $0x8] sm:$0xff] %v8859_v9 }
 0xa94   :  { %v9924_v56 = vpop.f32.mrb[148].mxu1 }
 0xa95   :  { %v8880_v36 = vadd.f32 %v9924_v56, %v13473_v31  ;;  %v8871_v13 = vpop.f32.mrb[149].mxu1 }
 0xa96   :  { %v8872_v1 = vadd.f32 %v13473_v31, %v8871_v13  ;;  %v9925_v52 = vpop.f32.mrb[150].mxu1 }
 0xa97   :  { %8988 = vst [vmem:[#allocation19 + $0x30] sm:$0xff] %v8880_v36  ;;  %v8883_v12 = vadd.f32 %v9925_v52, %v13473_v31  ;;  %v8874_v22 = vpop.f32.mrb[151].mxu1 }
 0xa98   :  { %8986 = vst [vmem:[#allocation19 + $0x20] sm:$0xff] %v8872_v1  ;;  %v8875_v11 = vadd.f32 %v13473_v31, %v8874_v22 }
 0xa99   :  { %8989 = vst [vmem:[#allocation19 + $0x38] sm:$0xff] %v8883_v12 }
 0xa9a   :  { %8987 = vst [vmem:[#allocation19 + $0x28] sm:$0xff] %v8875_v11 }
 0xaa4   :  { %v9928_v33 = vpop.f32.mrb[152].mxu1 }
 0xaa5   :  { %v8896_v38 = vadd.f32 %v9928_v33, %v13473_v31  ;;  %v8887_v17 = vpop.f32.mrb[153].mxu1 }
 0xaa6   :  { %v8888_v19 = vadd.f32 %v13473_v31, %v8887_v17  ;;  %v9929_v16 = vpop.f32.mrb[154].mxu1 }
 0xaa7   :  { %8992 = vst [vmem:[#allocation19 + $0x50] sm:$0xff] %v8896_v38  ;;  %v8899_v5 = vadd.f32 %v9929_v16, %v13473_v31  ;;  %v8890_v46 = vpop.f32.mrb[155].mxu1 }
 0xaa8   :  { %8990 = vst [vmem:[#allocation19 + $0x40] sm:$0xff] %v8888_v19  ;;  %v8891_v39 = vadd.f32 %v13473_v31, %v8890_v46 }
 0xaa9   :  { %8993 = vst [vmem:[#allocation19 + $0x58] sm:$0xff] %v8899_v5 }
 0xaaa   :  { %8991 = vst [vmem:[#allocation19 + $0x48] sm:$0xff] %v8891_v39 }
 0xab4   :  { %v9932_v30 = vpop.f32.mrb[156].mxu1 }
 0xab5   :  { %v8912_v10 = vadd.f32 %v9932_v30, %v13473_v31  ;;  %v8903_v6 = vpop.f32.mrb[157].mxu1 }
 0xab6   :  { %v8904_v49 = vadd.f32 %v13473_v31, %v8903_v6  ;;  %v9933_v34 = vpop.f32.mrb[158].mxu1 }
 0xab7   :  { %8996 = vst [vmem:[#allocation19 + $0x70] sm:$0xff] %v8912_v10  ;;  %v8915_v18 = vadd.f32 %v9933_v34, %v13473_v31  ;;  %v8906_v8 = vpop.f32.mrb[159].mxu1 }
 0xab8   :  { %8994 = vst [vmem:[#allocation19 + $0x60] sm:$0xff] %v8904_v49  ;;  %v8907_v59 = vadd.f32 %v13473_v31, %v8906_v8 }
 0xab9   :  { %8997 = vst [vmem:[#allocation19 + $0x78] sm:$0xff] %v8915_v18 }
 0xaba   :  { %8995 = vst [vmem:[#allocation19 + $0x68] sm:$0xff] %v8907_v59 }
 0xac4   :  { %v9936_v23 = vpop.f32.mrb[160].mxu1 }
 0xac5   :  { %v8928_v24 = vadd.f32 %v9936_v23, %v13473_v31  ;;  %v8919_v41 = vpop.f32.mrb[161].mxu1 }
 0xac6   :  { %v8920_v25 = vadd.f32 %v13473_v31, %v8919_v41  ;;  %v9937_v61 = vpop.f32.mrb[162].mxu1 }
 0xac7   :  { %9000 = vst [vmem:[#allocation19 + $0x90] sm:$0xff] %v8928_v24  ;;  %v8931_v51 = vadd.f32 %v9937_v61, %v13473_v31  ;;  %v8922_v44 = vpop.f32.mrb[163].mxu1 }
 0xac8   :  { %8998 = vst [vmem:[#allocation19 + $0x80] sm:$0xff] %v8920_v25  ;;  %v8923_v60 = vadd.f32 %v13473_v31, %v8922_v44 }
 0xac9   :  { %9001 = vst [vmem:[#allocation19 + $0x98] sm:$0xff] %v8931_v51 }
 0xaca   :  { %8999 = vst [vmem:[#allocation19 + $0x88] sm:$0xff] %v8923_v60 }
 0xad4   :  { %v9940_v29 = vpop.f32.mrb[164].mxu1 }
 0xad5   :  { %v8944_v4 = vadd.f32 %v9940_v29, %v13473_v31  ;;  %v8935_v57 = vpop.f32.mrb[165].mxu1 }
 0xad6   :  { %v8936_v27 = vadd.f32 %v13473_v31, %v8935_v57  ;;  %v9941_v50 = vpop.f32.mrb[166].mxu1 }
 0xad7   :  { %9004 = vst [vmem:[#allocation19 + $0xb0] sm:$0xff] %v8944_v4  ;;  %v8947_v40 = vadd.f32 %v9941_v50, %v13473_v31  ;;  %v8938_v42 = vpop.f32.mrb[167].mxu1 }
 0xad8   :  { %9002 = vst [vmem:[#allocation19 + $0xa0] sm:$0xff] %v8936_v27  ;;  %v8939_v21 = vadd.f32 %v13473_v31, %v8938_v42 }
 0xad9   :  { %9005 = vst [vmem:[#allocation19 + $0xb8] sm:$0xff] %v8947_v40 }
 0xada   :  { %9003 = vst [vmem:[#allocation19 + $0xa8] sm:$0xff] %v8939_v21 }
 0xb04   :  { %v9944_v43 = vpop.f32.mrb[168].mxu1 }
 0xb05   :  { %v8960_v47 = vadd.f32 %v9944_v43, %v13473_v31  ;;  %v8951_v15 = vpop.f32.mrb[169].mxu1 }
 0xb06   :  { %v8952_v26 = vadd.f32 %v13473_v31, %v8951_v15  ;;  %v9945_v48 = vpop.f32.mrb[170].mxu1 }
 0xb07   :  { %9008 = vst [vmem:[#allocation19 + $0xd0] sm:$0xff] %v8960_v47  ;;  %v8963_v55 = vadd.f32 %v9945_v48, %v13473_v31  ;;  %v8954_v58 = vpop.f32.mrb[171].mxu1 }
 0xb08   :  { %9006 = vst [vmem:[#allocation19 + $0xc0] sm:$0xff] %v8952_v26  ;;  %v8955_v2 = vadd.f32 %v13473_v31, %v8954_v58 }
 0xb09   :  { %9009 = vst [vmem:[#allocation19 + $0xd8] sm:$0xff] %v8963_v55 }
 0xb0a   :  { %9007 = vst [vmem:[#allocation19 + $0xc8] sm:$0xff] %v8955_v2 }
 0xb14   :  { %v9948_v35 = vpop.f32.mrb[172].mxu1 }
 0xb15   :  { %v8976_v63 = vadd.f32 %v9948_v35, %v13473_v31  ;;  %v8967_v53 = vpop.f32.mrb[173].mxu1 }
 0xb16   :  { %v8968_v3 = vadd.f32 %v13473_v31, %v8967_v53  ;;  %v9949_v7 = vpop.f32.mrb[174].mxu1 }
 0xb17   :  { %9012 = vst [vmem:[#allocation19 + $0xf0] sm:$0xff] %v8976_v63  ;;  %v8979_v62 = vadd.f32 %v9949_v7, %v13473_v31  ;;  %v8970_v45 = vpop.f32.mrb[175].mxu1 }
 0xb18   :  { %9010 = vst [vmem:[#allocation19 + $0xe0] sm:$0xff] %v8968_v3  ;;  %v8971_v32 = vadd.f32 %v13473_v31, %v8970_v45 }
 0xb19   :  { %9013 = vst [vmem:[#allocation19 + $0xf8] sm:$0xff] %v8979_v62 }
 0xb1a   :  { %9011 = vst [vmem:[#allocation19 + $0xe8] sm:$0xff] %v8971_v32 }
 0xb1b   :  { %11489 = shalt.err (!%p11486_p0)
}
 0xb1c   :  { %s13695_s19 = sld [smem:[#allocation74_spill]] }
 0xb22   :  { %s11490_s8 = scalar_lea.hbm %s13695_s19, 4096 }
 0xb23   :  { %p11491_p1 = scmp.ne.s32.totalorder %s13695_s19, %s11490_s8  ;;  %p11494_p2 = scmp.lt.u32.totalorder %s11490_s8, %s13695_s19 }
 0xb25   :  { %p11496_p3 = pnand %p11494_p2, %p11491_p1 }
 0xb27   :  { %11499 = shalt.err (!%p11496_p3)
}
 0xb28   :  { %9025 = dma.vmem_to_hbm [thread:$0]  %s9020_s0, 4096, %s13695_s19, [#allocation4], %s13604_s22, %s13604_s22, %s11517_s29  }
 0xb29   :  { %11512 = dma.done.wait [#allocation4], 4096  }
 0xb2a   :  { %11513 = vsyncadd [#allocation4], 4294963200 }
 0xb2b   :  { %9029 = vsyncpa [#allocation3], 1 }
 0xb2c   :  { %9030 = vsyncpa [#allocation6], 1 }
 0xb2d   :  { %9031 = vsyncpa [#allocation9], 1 }
 0xb2e   :  { %9032 = vsyncpa [#allocation12], 1 }
 0xb2f   :  { %9033 = vsyncpa [#allocation15], 1 }
 0xb30   :  { %9034 = vsyncpa [#allocation18], 1 }
 0xb31   :  { %9035 = vsyncpa [#allocation4], 1 }

</bundles_post_ra>
